<compile_context>
chip_gen: v5e
topology: v5e:2x2
jax: 0.10.0
libtpu: 0.0.40
codegen_flags: <defaults>
</compile_context>

<pallas_src>
import functools

import jax
import jax.numpy as jnp
from jax.experimental import pallas as pl
from jax.experimental.pallas import tpu as pltpu

_VMEM_LIMIT = 32 * 1024 * 1024        # actual per-step need is a few MiB; headroom on v7x
_SQRT_2_OVER_PI = 0.7978845608028654
_BN_EPS = 1e-5
_LN_EPS = 1e-5


def _round_up(a, b):
    return (a + b - 1) // b * b


def _gelu(y):
    # TODO(synk): PyTorch nn.GELU() defaults to exact erf; Mosaic erf lowering is not
    # guaranteed, so the tanh approximation is used (~1e-3 level deviation).
    return 0.5 * y * (1.0 + jnp.tanh(_SQRT_2_OVER_PI * (y + 0.044715 * y * y * y)))


def _pick_images_per_step(n, rows_per_image, target_rows=256):
    """Batch images per grid step until M ~ target_rows (must divide n)."""
    nb = max(1, min(n, target_rows // max(rows_per_image, 1)))
    while n % nb:
        nb -= 1
    return max(nb, 1)


# ----------------------------------------------------------------------------
# Fused Conv + bias + BatchNorm partial statistics.
#   LHS is tap-folded: K = kfold (= kw*cin or kh*kw*cin), only `taps` kh-taps are
#   looped in-kernel, accumulated in vregs, stored once as a dense padded bf16 slab.
#   Per-step BN sum/sumsq (valid columns only) come out as extra outputs.
# ----------------------------------------------------------------------------
def _conv_bn_kernel(xw_ref, w_ref, b_ref, o_ref, s_ref, ss_ref, *,
                    taps, nb, ho, wo, wo_pad):
    # xw_ref : (nb, hq, wo_pad, kfold) bf16   tap-folded input
    # w_ref  : (taps, kfold, cout)     bf16
    # b_ref  : (1, cout)               f32
    # o_ref  : (nb, ho, wo_pad, cout)  bf16   (dense, unmasked store)
    # s_ref  : (1, 1, cout) f32 partial BN sum    (valid columns only)
    # ss_ref : (1, 1, cout) f32 partial BN sumsq
    kfold = xw_ref.shape[-1]
    cout = w_ref.shape[-1]
    m = nb * ho * wo_pad
    acc = jnp.zeros((m, cout), jnp.float32)            # lives in vregs, written once
    for dy in range(taps):
        slab = xw_ref[:, dy:dy + ho, :, :].reshape(m, kfold)
        acc = acc + jnp.dot(slab, w_ref[dy], preferred_element_type=jnp.float32)
    y = acc + b_ref[...]

    # BN partial statistics over the valid output columns only (padded cols masked).
    if wo_pad != wo:
        col = jax.lax.broadcasted_iota(jnp.int32, (m, 1), 0) % wo_pad
        ym = jnp.where(col < wo, y, 0.0)
    else:
        ym = y
    s_ref[...] = jnp.sum(ym, axis=0, keepdims=True).reshape(1, 1, cout)
    ss_ref[...] = jnp.sum(ym * ym, axis=0, keepdims=True).reshape(1, 1, cout)

    o_ref[...] = y.reshape(nb, ho, wo_pad, cout).astype(o_ref.dtype)


def _conv_bn_call(xw, wmat, bias, *, taps, ho, wo, wo_pad):
    n, hq = xw.shape[0], xw.shape[1]
    kfold = xw.shape[-1]
    cout = wmat.shape[-1]
    nb = _pick_images_per_step(n, ho * wo_pad)
    steps = n // nb
    kern = functools.partial(_conv_bn_kernel, taps=taps, nb=nb, ho=ho, wo=wo,
                             wo_pad=wo_pad)
    act, s, ss = pl.pallas_call(
        kern,
        out_shape=(jax.ShapeDtypeStruct((n, ho, wo_pad, cout), jnp.bfloat16),
                   jax.ShapeDtypeStruct((steps, 1, cout), jnp.float32),
                   jax.ShapeDtypeStruct((steps, 1, cout), jnp.float32)),
        grid=(steps,),
        in_specs=[pl.BlockSpec((nb, hq, wo_pad, kfold), lambda b: (b, 0, 0, 0)),
                  pl.BlockSpec((taps, kfold, cout), lambda b: (0, 0, 0)),
                  pl.BlockSpec((1, cout), lambda b: (0, 0))],
        out_specs=(pl.BlockSpec((nb, ho, wo_pad, cout), lambda b: (b, 0, 0, 0)),
                   pl.BlockSpec((1, 1, cout), lambda b: (b, 0, 0)),
                   pl.BlockSpec((1, 1, cout), lambda b: (b, 0, 0))),
        compiler_params=pltpu.CompilerParams(
            dimension_semantics=("parallel",),
            vmem_limit_bytes=_VMEM_LIMIT),
    )(xw, wmat, bias.reshape(1, cout).astype(jnp.float32))
    # Strip padded columns outside the kernel (cheap XLA slice; kernel stores stay dense).
    return act[:, :, :wo, :], s, ss


def coordconv_7x7_s2(x_nhwc, w_oihw, bias):
    """Block-1 CoordConv 7x7 stride-2 pad-3 via full im2col (cin padded to 8, K=392)."""
    n, h, wd, cin = x_nhwc.shape
    cout, cin_w, kh, kw = w_oihw.shape
    assert cin_w == cin
    stride, pad = 2, 3
    ho = (h + 2 * pad - kh) // stride + 1
    wo = (wd + 2 * pad - kw) // stride + 1
    wo_pad = _round_up(wo, 8)
    cinp = _round_up(cin, 8)
    xp = jnp.pad(x_nhwc.astype(jnp.bfloat16),
                 ((0, 0), (pad, pad), (pad, pad), (0, cinp - cin)))
    cols = [xp[:, dy:dy + stride * (ho - 1) + 1:stride,
               dx:dx + stride * (wo - 1) + 1:stride, :]
            for dy in range(kh) for dx in range(kw)]
    xw = jnp.concatenate(cols, axis=-1)                 # (n, ho, wo, kh*kw*cinp)
    if wo_pad != wo:
        xw = jnp.pad(xw, ((0, 0), (0, 0), (0, wo_pad - wo), (0, 0)))
    wp = jnp.pad(w_oihw, ((0, 0), (0, cinp - cin), (0, 0), (0, 0)))
    wmat = jnp.transpose(wp, (2, 3, 1, 0)).reshape(1, kh * kw * cinp, cout)
    return _conv_bn_call(xw, wmat.astype(jnp.bfloat16), bias,
                         taps=1, ho=ho, wo=wo, wo_pad=wo_pad)


def conv3x3_s1p1(x_nhwc, w_oihw, bias):
    """3x3 stride-1 pad-1 conv: kw taps folded into K (=3*cin), kh taps looped in-kernel."""
    n, h, wd, cin = x_nhwc.shape
    cout, cin_w, kh, kw = w_oihw.shape
    assert cin_w == cin and kh == 3 and kw == 3
    pad = 1
    ho, wo = h, wd
    wo_pad = _round_up(wo, 8)
    right = wo_pad + kw - 1 - (wd + pad)                # extra zero cols so fold is static
    xp = jnp.pad(x_nhwc.astype(jnp.bfloat16),
                 ((0, 0), (pad, pad), (pad, right), (0, 0)))
    xw = jnp.concatenate([xp[:, :, dx:dx + wo_pad, :] for dx in range(kw)],
                         axis=-1)                       # (n, h+2, wo_pad, kw*cin)
    wmat = jnp.transpose(w_oihw, (2, 3, 1, 0)).reshape(kh, kw * cin, cout)
    return _conv_bn_call(xw, wmat.astype(jnp.bfloat16), bias,
                         taps=kh, ho=ho, wo=wo, wo_pad=wo_pad)


# ----------------------------------------------------------------------------
# BatchNorm scale/shift from fused conv partial stats (tiny (c,) math, plain JAX glue).
# ----------------------------------------------------------------------------
def _bn_scale_shift(psum, psumsq, count, gamma, beta):
    # TODO(synk): single-pass E[x^2]-E[x]^2 can cancel badly if |mean| >> std;
    #             switch to a shifted two-pass formulation if that regime appears.
    s = jnp.sum(psum, axis=(0, 1))
    ss = jnp.sum(psumsq, axis=(0, 1))
    mean = s / count
    var = jnp.maximum(ss / count - mean * mean, 0.0)
    scale = gamma * jax.lax.rsqrt(var + _BN_EPS)
    shift = beta - mean * scale
    return (scale.reshape(1, -1).astype(jnp.float32),
            shift.reshape(1, -1).astype(jnp.float32))


# ----------------------------------------------------------------------------
# Parity-plane split (plain JAX): makes every stride-2 pool tap a contiguous slice.
# plane[(dy%s)*s + (dx%s)][hq, wq] == x_pad[s*hq + dy%s, s*wq + dx%s]
# ----------------------------------------------------------------------------
def _plane_split(x, stride, hq, wq):
    n, h, w, c = x.shape
    hp, wp = stride * hq, stride * wq
    if hp != h or wp != w:
        x = jnp.pad(x, ((0, 0), (0, hp - h), (0, wp - w), (0, 0)))
    x = x.reshape(n, hq, stride, wq, stride, c)
    x = jnp.transpose(x, (0, 2, 4, 1, 3, 5))            # (n, s, s, hq, wq, c)
    return x.reshape(n * stride * stride, hq, wq, c)


# ----------------------------------------------------------------------------
# Fused BatchNorm-apply + GELU + MaxPool(3, stride=2)
# ----------------------------------------------------------------------------
def _bn_gelu_maxpool_kernel(x_ref, sc_ref, sh_ref, o_ref, *, stride, k, ho, wo):
    # x_ref : (s*s, hq, wq, c) bf16 parity planes of one image
    # sc/sh : (1, c) f32 ; o_ref: (1, ho, wo, c) bf16
    scale = sc_ref[...]
    shift = sh_ref[...]
    r = None
    for dy in range(k):
        for dx in range(k):
            p = (dy % stride) * stride + (dx % stride)
            slab = x_ref[p,
                         dy // stride: dy // stride + ho,
                         dx // stride: dx // stride + wo, :].astype(jnp.float32)
            y = _gelu(slab * scale + shift)     # per-tap GELU: EUP slots are idle filler
            r = y if r is None else jnp.maximum(r, y)
    o_ref[...] = r[None].astype(o_ref.dtype)


def bn_gelu_maxpool(x_nhwc, scale, shift, k=3, stride=2):
    n, h, wd, c = x_nhwc.shape
    ho = (h - k) // stride + 1
    wo = (wd - k) // stride + 1
    hq = (k - 1) // stride + ho
    wq = (k - 1) // stride + wo
    planes = _plane_split(x_nhwc, stride, hq, wq)       # (n*s*s, hq, wq, c) bf16
    s2 = stride * stride
    kern = functools.partial(_bn_gelu_maxpool_kernel, stride=stride, k=k, ho=ho, wo=wo)
    return pl.pallas_call(
        kern,
        out_shape=jax.ShapeDtypeStruct((n, ho, wo, c), jnp.bfloat16),
        grid=(n,),
        in_specs=[pl.BlockSpec((s2, hq, wq, c), lambda b: (b, 0, 0, 0)),
                  pl.BlockSpec((1, c), lambda b: (0, 0)),
                  pl.BlockSpec((1, c), lambda b: (0, 0))],
        out_specs=pl.BlockSpec((1, ho, wo, c), lambda b: (b, 0, 0, 0)),
        compiler_params=pltpu.CompilerParams(
            dimension_semantics=("parallel",),
            vmem_limit_bytes=_VMEM_LIMIT),
    )(planes, scale, shift)


# ----------------------------------------------------------------------------
# Tail: BN-apply + GELU + AdaptiveAvgPool((1,1)) + Linear + LayerNorm, one kernel.
# ----------------------------------------------------------------------------
def _tail_kernel(x_ref, sc_ref, sh_ref, w_ref, b_ref, g_ref, bb_ref, o_ref, *, inv_hw):
    # x_ref: (n, hw, c) bf16 ; sc/sh: (1,c) f32 ; w: (c,e) bf16 ; b/g/bb: (1,e) f32
    x = x_ref[...].astype(jnp.float32)
    g = _gelu(x * sc_ref[...] + sh_ref[...])
    feat = jnp.sum(g, axis=1) * inv_hw                  # adaptive avg pool -> (n, c)
    y = jnp.dot(feat.astype(jnp.bfloat16), w_ref[...],
                preferred_element_type=jnp.float32) + b_ref[...]
    mean = jnp.mean(y, axis=-1, keepdims=True)
    var = jnp.mean(jnp.square(y - mean), axis=-1, keepdims=True)
    o_ref[...] = (y - mean) * jax.lax.rsqrt(var + _LN_EPS) * g_ref[...] + bb_ref[...]


def gelu_avgpool_fc_layernorm(x_nhwc, scale, shift, fc_w, fc_b, ln_g, ln_b):
    n, h, wd, c = x_nhwc.shape
    hw = h * wd
    e = fc_w.shape[1]
    x3 = x_nhwc.reshape(n, hw, c).astype(jnp.bfloat16)
    kern = functools.partial(_tail_kernel, inv_hw=1.0 / hw)
    # TODO(synk): e < 128 means a masked lane store on the final output; negligible here.
    return pl.pallas_call(
        kern,
        out_shape=jax.ShapeDtypeStruct((n, e), jnp.float32),
        grid=(1,),
        in_specs=[pl.BlockSpec((n, hw, c), lambda i: (0, 0, 0)),
                  pl.BlockSpec((1, c), lambda i: (0, 0)),
                  pl.BlockSpec((1, c), lambda i: (0, 0)),
                  pl.BlockSpec((c, e), lambda i: (0, 0)),
                  pl.BlockSpec((1, e), lambda i: (0, 0)),
                  pl.BlockSpec((1, e), lambda i: (0, 0)),
                  pl.BlockSpec((1, e), lambda i: (0, 0))],
        out_specs=pl.BlockSpec((n, e), lambda i: (0, 0)),
        compiler_params=pltpu.CompilerParams(
            dimension_semantics=("arbitrary",),
            vmem_limit_bytes=_VMEM_LIMIT),
    )(x3, scale, shift, fc_w.astype(jnp.bfloat16),
      fc_b.reshape(1, e).astype(jnp.float32),
      ln_g.reshape(1, e).astype(jnp.float32),
      ln_b.reshape(1, e).astype(jnp.float32))


# ----------------------------------------------------------------------------
# Full forward pass
# ----------------------------------------------------------------------------
def clinical_image_encoder(x_nchw, params):
    """Input: NCHW float32 (like PyTorch). Output: (N, embedding_dim) float32."""
    x = jnp.transpose(x_nchw, (0, 2, 3, 1)).astype(jnp.float32)      # NHWC
    n, h, wd, _ = x.shape

    # CoordConv coordinate channels: xx varies along W, yy varies along H (PyTorch order).
    xx = jnp.broadcast_to(jnp.linspace(-1.0, 1.0, wd, dtype=jnp.float32)[None, :], (h, wd))
    yy = jnp.broadcast_to(jnp.linspace(-1.0, 1.0, h, dtype=jnp.float32)[:, None], (h, wd))
    coords = jnp.broadcast_to(jnp.stack([xx, yy], axis=-1)[None], (n, h, wd, 2))
    x = jnp.concatenate([x, coords], axis=-1)                        # (N,H,W,5)

    # Block 1: CoordConv(5->64, k7, s2, p3) [+ fused BN stats] -> BN+GELU+MaxPool(3,s2)
    y1, s1, ss1 = coordconv_7x7_s2(x, params["w1"], params["b1"])
    cnt1 = y1.shape[0] * y1.shape[1] * y1.shape[2]
    sc1, sh1 = _bn_scale_shift(s1, ss1, cnt1, params["bn1_g"], params["bn1_b"])
    x = bn_gelu_maxpool(y1, sc1, sh1)

    # Block 2: Conv(64->128, k3, p1) [+ fused BN stats] -> BN+GELU+MaxPool(3,s2)
    y2, s2, ss2 = conv3x3_s1p1(x, params["w2"], params["b2"])
    cnt2 = y2.shape[0] * y2.shape[1] * y2.shape[2]
    sc2, sh2 = _bn_scale_shift(s2, ss2, cnt2, params["bn2_g"], params["bn2_b"])
    x = bn_gelu_maxpool(y2, sc2, sh2)

    # Block 3 + head: Conv(128->256) [+ stats] -> BN+GELU+AvgPool+Linear+LayerNorm fused
    y3, s3, ss3 = conv3x3_s1p1(x, params["w3"], params["b3"])
    cnt3 = y3.shape[0] * y3.shape[1] * y3.shape[2]
    sc3, sh3 = _bn_scale_shift(s3, ss3, cnt3, params["bn3_g"], params["bn3_b"])
    return gelu_avgpool_fc_layernorm(y3, sc3, sh3, params["fc_w"], params["fc_b"],
                                     params["ln_g"], params["ln_b"])


# ----------------------------------------------------------------------------
# Deterministic synthetic parameters (no checkpoint)
# ----------------------------------------------------------------------------
def init_params(key, embedding_dim):
    ks = jax.random.split(key, 4)
    f32 = jnp.float32
    return {
        "w1": 0.05 * jax.random.normal(ks[0], (64, 5, 7, 7), f32),     # CoordConv: 3+2 in
        "b1": jnp.zeros((64,), f32),
        "bn1_g": jnp.ones((64,), f32), "bn1_b": jnp.zeros((64,), f32),
        "w2": 0.05 * jax.random.normal(ks[1], (128, 64, 3, 3), f32),
        "b2": jnp.zeros((128,), f32),
        "bn2_g": jnp.ones((128,), f32), "bn2_b": jnp.zeros((128,), f32),
        "w3": 0.05 * jax.random.normal(ks[2], (256, 128, 3, 3), f32),
        "b3": jnp.zeros((256,), f32),
        "bn3_g": jnp.ones((256,), f32), "bn3_b": jnp.zeros((256,), f32),
        "fc_w": 0.05 * jax.random.normal(ks[3], (256, embedding_dim), f32),
        "fc_b": jnp.zeros((embedding_dim,), f32),
        "ln_g": jnp.ones((embedding_dim,), f32),
        "ln_b": jnp.zeros((embedding_dim,), f32),
    }


if __name__ == "__main__":
    key = jax.random.PRNGKey(0)
    kx, kp = jax.random.split(key)

    embedding_dim = 32
    x = jax.random.normal(kx, (2, 3, 32, 32), jnp.float32)   # NCHW, like PyTorch
    params = init_params(kp, embedding_dim)

    out = jax.jit(clinical_image_encoder)(x, params)
    out = jax.block_until_ready(out)

    assert out.shape == (2, embedding_dim), out.shape
    assert bool(jnp.all(jnp.isfinite(out)))
    print("KERNEL_OK")
</pallas_src>

<mosaic_0001>
module attributes {stable_mosaic.version = 11 : i64} {
  func.func @_conv_bn_kernel(%arg0: i32, %arg1: memref<1x16x16x392xbf16, #tpu.memory_space<vmem>>, %arg2: memref<1x392x64xbf16, #tpu.memory_space<vmem>>, %arg3: memref<1x64xf32, #tpu.memory_space<vmem>>, %arg4: memref<1x16x16x64xbf16, #tpu.memory_space<vmem>>, %arg5: memref<1x1x64xf32, #tpu.memory_space<vmem>>, %arg6: memref<1x1x64xf32, #tpu.memory_space<vmem>>) attributes {dimension_semantics = [#tpu.dimension_semantics<parallel>], iteration_bounds = array<i64: 2>, scalar_prefetch = 0 : i64, scratch_operands = 0 : i64, tpu.core_type = #tpu.core_type<tc>, window_params = [{transform_indices = @transform_0, window_bounds = array<i64: 1, 16, 16, 392>}, {pipeline_mode = #tpu.pipeline_mode<synchronous>, transform_indices = @transform_1, window_bounds = array<i64: 1, 392, 64>}, {pipeline_mode = #tpu.pipeline_mode<synchronous>, transform_indices = @transform_2, window_bounds = array<i64: 1, 64>}, {transform_indices = @transform_3, window_bounds = array<i64: 1, 16, 16, 64>}, {transform_indices = @transform_4, window_bounds = array<i64: 1, 1, 64>}, {transform_indices = @transform_5, window_bounds = array<i64: 1, 1, 64>}]} {
    %cst = arith.constant 0.000000e+00 : f32
    %0 = vector.broadcast %cst : f32 to vector<256x64xf32>
    %c0 = arith.constant 0 : index
    %c0_0 = arith.constant 0 : index
    %c0_1 = arith.constant 0 : index
    %c0_2 = arith.constant 0 : index
    %1 = vector.load %arg1[%c0, %c0_0, %c0_1, %c0_2] : memref<1x16x16x392xbf16, #tpu.memory_space<vmem>>, vector<1x16x16x392xbf16>
    %2 = vector.shape_cast %1 : vector<1x16x16x392xbf16> to vector<256x392xbf16>
    %c0_3 = arith.constant 0 : index
    %c0_4 = arith.constant 0 : index
    %c0_5 = arith.constant 0 : index
    %3 = vector.load %arg2[%c0_3, %c0_4, %c0_5] : memref<1x392x64xbf16, #tpu.memory_space<vmem>>, vector<1x392x64xbf16>
    %4 = vector.shape_cast %3 : vector<1x392x64xbf16> to vector<392x64xbf16>
    %cst_6 = arith.constant dense<0.000000e+00> : vector<256x64xf32>
    %5 = tpu.matmul %2, %4, %cst_6 {dimension_numbers = #tpu.dot_dimension_numbers<[1], [0], [0], [1], [0, 0, 1, 1], [], []>} : vector<256x392xbf16>, vector<392x64xbf16>, vector<256x64xf32> -> vector<256x64xf32>
    %6 = arith.addf %0, %5 : vector<256x64xf32>
    %c0_7 = arith.constant 0 : index
    %c0_8 = arith.constant 0 : index
    %7 = vector.load %arg3[%c0_7, %c0_8] : memref<1x64xf32, #tpu.memory_space<vmem>>, vector<1x64xf32>
    %8 = vector.broadcast %7 : vector<1x64xf32> to vector<256x64xf32>
    %9 = arith.addf %6, %8 : vector<256x64xf32>
    %cst_9 = arith.constant dense<0.000000e+00> : vector<64xf32>
    %10 = vector.multi_reduction <add>, %9, %cst_9 [0] : vector<256x64xf32> to vector<64xf32>
    %11 = vector.shape_cast %10 : vector<64xf32> to vector<1x64xf32>
    %12 = vector.shape_cast %11 : vector<1x64xf32> to vector<1x1x64xf32>
    %c0_10 = arith.constant 0 : index
    %c0_11 = arith.constant 0 : index
    %c0_12 = arith.constant 0 : index
    %13 = vector.load %arg5[%c0_10, %c0_11, %c0_12] : memref<1x1x64xf32, #tpu.memory_space<vmem>>, vector<1x1x64xf32>
    tpu.vector_store %arg5[%c0_10, %c0_11, %c0_12], %12 {strides = array<i32>} : memref<1x1x64xf32, #tpu.memory_space<vmem>>, vector<1x1x64xf32>,
    %14 = arith.mulf %9, %9 : vector<256x64xf32>
    %cst_13 = arith.constant dense<0.000000e+00> : vector<64xf32>
    %15 = vector.multi_reduction <add>, %14, %cst_13 [0] : vector<256x64xf32> to vector<64xf32>
    %16 = vector.shape_cast %15 : vector<64xf32> to vector<1x64xf32>
    %17 = vector.shape_cast %16 : vector<1x64xf32> to vector<1x1x64xf32>
    %c0_14 = arith.constant 0 : index
    %c0_15 = arith.constant 0 : index
    %c0_16 = arith.constant 0 : index
    %18 = vector.load %arg6[%c0_14, %c0_15, %c0_16] : memref<1x1x64xf32, #tpu.memory_space<vmem>>, vector<1x1x64xf32>
    tpu.vector_store %arg6[%c0_14, %c0_15, %c0_16], %17 {strides = array<i32>} : memref<1x1x64xf32, #tpu.memory_space<vmem>>, vector<1x1x64xf32>,
    %19 = vector.shape_cast %9 : vector<256x64xf32> to vector<1x16x16x64xf32>
    %20 = arith.truncf %19 : vector<1x16x16x64xf32> to vector<1x16x16x64xbf16>
    %c0_17 = arith.constant 0 : index
    %c0_18 = arith.constant 0 : index
    %c0_19 = arith.constant 0 : index
    %c0_20 = arith.constant 0 : index
    %21 = vector.load %arg4[%c0_17, %c0_18, %c0_19, %c0_20] : memref<1x16x16x64xbf16, #tpu.memory_space<vmem>>, vector<1x16x16x64xbf16>
    tpu.vector_store %arg4[%c0_17, %c0_18, %c0_19, %c0_20], %20 {strides = array<i32>} : memref<1x16x16x64xbf16, #tpu.memory_space<vmem>>, vector<1x16x16x64xbf16>,
    return
  }
  func.func @transform_0(%arg0: i32) -> (i32, i32, i32, i32) {
    %c0_i32 = arith.constant 0 : i32
    %c0_i32_0 = arith.constant 0 : i32
    %c0_i32_1 = arith.constant 0 : i32
    %c0_i32_2 = arith.constant 0 : i32
    return %arg0, %c0_i32, %c0_i32_0, %c0_i32_1 : i32, i32, i32, i32
  }
  func.func @transform_1(%arg0: i32) -> (i32, i32, i32) {
    %c0_i32 = arith.constant 0 : i32
    %c0_i32_0 = arith.constant 0 : i32
    %c0_i32_1 = arith.constant 0 : i32
    %c0_i32_2 = arith.constant 0 : i32
    return %c0_i32, %c0_i32_0, %c0_i32_1 : i32, i32, i32
  }
  func.func @transform_2(%arg0: i32) -> (i32, i32) {
    %c0_i32 = arith.constant 0 : i32
    %c0_i32_0 = arith.constant 0 : i32
    %c0_i32_1 = arith.constant 0 : i32
    return %c0_i32, %c0_i32_0 : i32, i32
  }
  func.func @transform_3(%arg0: i32) -> (i32, i32, i32, i32) {
    %c0_i32 = arith.constant 0 : i32
    %c0_i32_0 = arith.constant 0 : i32
    %c0_i32_1 = arith.constant 0 : i32
    %c0_i32_2 = arith.constant 0 : i32
    return %arg0, %c0_i32, %c0_i32_0, %c0_i32_1 : i32, i32, i32, i32
  }
  func.func @transform_4(%arg0: i32) -> (i32, i32, i32) {
    %c0_i32 = arith.constant 0 : i32
    %c0_i32_0 = arith.constant 0 : i32
    %c0_i32_1 = arith.constant 0 : i32
    return %arg0, %c0_i32, %c0_i32_0 : i32, i32, i32
  }
  func.func @transform_5(%arg0: i32) -> (i32, i32, i32) {
    %c0_i32 = arith.constant 0 : i32
    %c0_i32_0 = arith.constant 0 : i32
    %c0_i32_1 = arith.constant 0 : i32
    return %arg0, %c0_i32, %c0_i32_0 : i32, i32, i32
  }
}

module attributes {stable_mosaic.version = 11 : i64} {
  func.func @_bn_gelu_maxpool_kernel(%arg0: i32, %arg1: memref<4x8x8x64xbf16, #tpu.memory_space<vmem>>, %arg2: memref<1x64xf32, #tpu.memory_space<vmem>>, %arg3: memref<1x64xf32, #tpu.memory_space<vmem>>, %arg4: memref<1x7x7x64xbf16, #tpu.memory_space<vmem>>) attributes {dimension_semantics = [#tpu.dimension_semantics<parallel>], iteration_bounds = array<i64: 2>, scalar_prefetch = 0 : i64, scratch_operands = 0 : i64, tpu.core_type = #tpu.core_type<tc>, window_params = [{transform_indices = @transform_0, window_bounds = array<i64: 4, 8, 8, 64>}, {pipeline_mode = #tpu.pipeline_mode<synchronous>, transform_indices = @transform_1, window_bounds = array<i64: 1, 64>}, {pipeline_mode = #tpu.pipeline_mode<synchronous>, transform_indices = @transform_2, window_bounds = array<i64: 1, 64>}, {transform_indices = @transform_3, window_bounds = array<i64: 1, 7, 7, 64>}]} {
    %c0 = arith.constant 0 : index
    %c0_0 = arith.constant 0 : index
    %0 = vector.load %arg2[%c0, %c0_0] : memref<1x64xf32, #tpu.memory_space<vmem>>, vector<1x64xf32>
    %c0_1 = arith.constant 0 : index
    %c0_2 = arith.constant 0 : index
    %1 = vector.load %arg3[%c0_1, %c0_2] : memref<1x64xf32, #tpu.memory_space<vmem>>, vector<1x64xf32>
    %c0_3 = arith.constant 0 : index
    %c0_4 = arith.constant 0 : index
    %c0_5 = arith.constant 0 : index
    %c0_6 = arith.constant 0 : index
    %2 = vector.load %arg1[%c0_3, %c0_4, %c0_5, %c0_6] : memref<4x8x8x64xbf16, #tpu.memory_space<vmem>>, vector<1x7x7x64xbf16>
    %3 = vector.shape_cast %2 : vector<1x7x7x64xbf16> to vector<7x7x64xbf16>
    %4 = arith.extf %3 : vector<7x7x64xbf16> to vector<7x7x64xf32>
    %5 = vector.shape_cast %0 : vector<1x64xf32> to vector<1x1x64xf32>
    %6 = vector.broadcast %5 : vector<1x1x64xf32> to vector<7x7x64xf32>
    %7 = arith.mulf %4, %6 : vector<7x7x64xf32>
    %8 = vector.shape_cast %1 : vector<1x64xf32> to vector<1x1x64xf32>
    %9 = vector.broadcast %8 : vector<1x1x64xf32> to vector<7x7x64xf32>
    %10 = arith.addf %7, %9 : vector<7x7x64xf32>
    %cst = arith.constant 5.000000e-01 : f32
    %11 = vector.broadcast %cst : f32 to vector<7x7x64xf32>
    %12 = arith.mulf %11, %10 : vector<7x7x64xf32>
    %cst_7 = arith.constant 4.471500e-02 : f32
    %13 = vector.broadcast %cst_7 : f32 to vector<7x7x64xf32>
    %14 = arith.mulf %13, %10 : vector<7x7x64xf32>
    %15 = arith.mulf %14, %10 : vector<7x7x64xf32>
    %16 = arith.mulf %15, %10 : vector<7x7x64xf32>
    %17 = arith.addf %10, %16 : vector<7x7x64xf32>
    %cst_8 = arith.constant 0.797884583 : f32
    %18 = vector.broadcast %cst_8 : f32 to vector<7x7x64xf32>
    %19 = arith.mulf %18, %17 : vector<7x7x64xf32>
    %20 = math.tanh %19 : vector<7x7x64xf32>
    %cst_9 = arith.constant 1.000000e+00 : f32
    %21 = vector.broadcast %cst_9 : f32 to vector<7x7x64xf32>
    %22 = arith.addf %21, %20 : vector<7x7x64xf32>
    %23 = arith.mulf %12, %22 : vector<7x7x64xf32>
    %c1 = arith.constant 1 : index
    %c0_10 = arith.constant 0 : index
    %c0_11 = arith.constant 0 : index
    %c0_12 = arith.constant 0 : index
    %24 = vector.load %arg1[%c1, %c0_10, %c0_11, %c0_12] : memref<4x8x8x64xbf16, #tpu.memory_space<vmem>>, vector<1x7x7x64xbf16>
    %25 = vector.shape_cast %24 : vector<1x7x7x64xbf16> to vector<7x7x64xbf16>
    %26 = arith.extf %25 : vector<7x7x64xbf16> to vector<7x7x64xf32>
    %27 = vector.shape_cast %0 : vector<1x64xf32> to vector<1x1x64xf32>
    %28 = vector.broadcast %27 : vector<1x1x64xf32> to vector<7x7x64xf32>
    %29 = arith.mulf %26, %28 : vector<7x7x64xf32>
    %30 = vector.shape_cast %1 : vector<1x64xf32> to vector<1x1x64xf32>
    %31 = vector.broadcast %30 : vector<1x1x64xf32> to vector<7x7x64xf32>
    %32 = arith.addf %29, %31 : vector<7x7x64xf32>
    %cst_13 = arith.constant 5.000000e-01 : f32
    %33 = vector.broadcast %cst_13 : f32 to vector<7x7x64xf32>
    %34 = arith.mulf %33, %32 : vector<7x7x64xf32>
    %cst_14 = arith.constant 4.471500e-02 : f32
    %35 = vector.broadcast %cst_14 : f32 to vector<7x7x64xf32>
    %36 = arith.mulf %35, %32 : vector<7x7x64xf32>
    %37 = arith.mulf %36, %32 : vector<7x7x64xf32>
    %38 = arith.mulf %37, %32 : vector<7x7x64xf32>
    %39 = arith.addf %32, %38 : vector<7x7x64xf32>
    %cst_15 = arith.constant 0.797884583 : f32
    %40 = vector.broadcast %cst_15 : f32 to vector<7x7x64xf32>
    %41 = arith.mulf %40, %39 : vector<7x7x64xf32>
    %42 = math.tanh %41 : vector<7x7x64xf32>
    %cst_16 = arith.constant 1.000000e+00 : f32
    %43 = vector.broadcast %cst_16 : f32 to vector<7x7x64xf32>
    %44 = arith.addf %43, %42 : vector<7x7x64xf32>
    %45 = arith.mulf %34, %44 : vector<7x7x64xf32>
    %46 = arith.maximumf %23, %45 : vector<7x7x64xf32>
    %c0_17 = arith.constant 0 : index
    %c0_18 = arith.constant 0 : index
    %c1_19 = arith.constant 1 : index
    %c0_20 = arith.constant 0 : index
    %47 = vector.load %arg1[%c0_17, %c0_18, %c1_19, %c0_20] : memref<4x8x8x64xbf16, #tpu.memory_space<vmem>>, vector<1x7x7x64xbf16>
    %48 = vector.shape_cast %47 : vector<1x7x7x64xbf16> to vector<7x7x64xbf16>
    %49 = arith.extf %48 : vector<7x7x64xbf16> to vector<7x7x64xf32>
    %50 = vector.shape_cast %0 : vector<1x64xf32> to vector<1x1x64xf32>
    %51 = vector.broadcast %50 : vector<1x1x64xf32> to vector<7x7x64xf32>
    %52 = arith.mulf %49, %51 : vector<7x7x64xf32>
    %53 = vector.shape_cast %1 : vector<1x64xf32> to vector<1x1x64xf32>
    %54 = vector.broadcast %53 : vector<1x1x64xf32> to vector<7x7x64xf32>
    %55 = arith.addf %52, %54 : vector<7x7x64xf32>
    %cst_21 = arith.constant 5.000000e-01 : f32
    %56 = vector.broadcast %cst_21 : f32 to vector<7x7x64xf32>
    %57 = arith.mulf %56, %55 : vector<7x7x64xf32>
    %cst_22 = arith.constant 4.471500e-02 : f32
    %58 = vector.broadcast %cst_22 : f32 to vector<7x7x64xf32>
    %59 = arith.mulf %58, %55 : vector<7x7x64xf32>
    %60 = arith.mulf %59, %55 : vector<7x7x64xf32>
    %61 = arith.mulf %60, %55 : vector<7x7x64xf32>
    %62 = arith.addf %55, %61 : vector<7x7x64xf32>
    %cst_23 = arith.constant 0.797884583 : f32
    %63 = vector.broadcast %cst_23 : f32 to vector<7x7x64xf32>
    %64 = arith.mulf %63, %62 : vector<7x7x64xf32>
    %65 = math.tanh %64 : vector<7x7x64xf32>
    %cst_24 = arith.constant 1.000000e+00 : f32
    %66 = vector.broadcast %cst_24 : f32 to vector<7x7x64xf32>
    %67 = arith.addf %66, %65 : vector<7x7x64xf32>
    %68 = arith.mulf %57, %67 : vector<7x7x64xf32>
    %69 = arith.maximumf %46, %68 : vector<7x7x64xf32>
    %c2 = arith.constant 2 : index
    %c0_25 = arith.constant 0 : index
    %c0_26 = arith.constant 0 : index
    %c0_27 = arith.constant 0 : index
    %70 = vector.load %arg1[%c2, %c0_25, %c0_26, %c0_27] : memref<4x8x8x64xbf16, #tpu.memory_space<vmem>>, vector<1x7x7x64xbf16>
    %71 = vector.shape_cast %70 : vector<1x7x7x64xbf16> to vector<7x7x64xbf16>
    %72 = arith.extf %71 : vector<7x7x64xbf16> to vector<7x7x64xf32>
    %73 = vector.shape_cast %0 : vector<1x64xf32> to vector<1x1x64xf32>
    %74 = vector.broadcast %73 : vector<1x1x64xf32> to vector<7x7x64xf32>
    %75 = arith.mulf %72, %74 : vector<7x7x64xf32>
    %76 = vector.shape_cast %1 : vector<1x64xf32> to vector<1x1x64xf32>
    %77 = vector.broadcast %76 : vector<1x1x64xf32> to vector<7x7x64xf32>
    %78 = arith.addf %75, %77 : vector<7x7x64xf32>
    %cst_28 = arith.constant 5.000000e-01 : f32
    %79 = vector.broadcast %cst_28 : f32 to vector<7x7x64xf32>
    %80 = arith.mulf %79, %78 : vector<7x7x64xf32>
    %cst_29 = arith.constant 4.471500e-02 : f32
    %81 = vector.broadcast %cst_29 : f32 to vector<7x7x64xf32>
    %82 = arith.mulf %81, %78 : vector<7x7x64xf32>
    %83 = arith.mulf %82, %78 : vector<7x7x64xf32>
    %84 = arith.mulf %83, %78 : vector<7x7x64xf32>
    %85 = arith.addf %78, %84 : vector<7x7x64xf32>
    %cst_30 = arith.constant 0.797884583 : f32
    %86 = vector.broadcast %cst_30 : f32 to vector<7x7x64xf32>
    %87 = arith.mulf %86, %85 : vector<7x7x64xf32>
    %88 = math.tanh %87 : vector<7x7x64xf32>
    %cst_31 = arith.constant 1.000000e+00 : f32
    %89 = vector.broadcast %cst_31 : f32 to vector<7x7x64xf32>
    %90 = arith.addf %89, %88 : vector<7x7x64xf32>
    %91 = arith.mulf %80, %90 : vector<7x7x64xf32>
    %92 = arith.maximumf %69, %91 : vector<7x7x64xf32>
    %c3 = arith.constant 3 : index
    %c0_32 = arith.constant 0 : index
    %c0_33 = arith.constant 0 : index
    %c0_34 = arith.constant 0 : index
    %93 = vector.load %arg1[%c3, %c0_32, %c0_33, %c0_34] : memref<4x8x8x64xbf16, #tpu.memory_space<vmem>>, vector<1x7x7x64xbf16>
    %94 = vector.shape_cast %93 : vector<1x7x7x64xbf16> to vector<7x7x64xbf16>
    %95 = arith.extf %94 : vector<7x7x64xbf16> to vector<7x7x64xf32>
    %96 = vector.shape_cast %0 : vector<1x64xf32> to vector<1x1x64xf32>
    %97 = vector.broadcast %96 : vector<1x1x64xf32> to vector<7x7x64xf32>
    %98 = arith.mulf %95, %97 : vector<7x7x64xf32>
    %99 = vector.shape_cast %1 : vector<1x64xf32> to vector<1x1x64xf32>
    %100 = vector.broadcast %99 : vector<1x1x64xf32> to vector<7x7x64xf32>
    %101 = arith.addf %98, %100 : vector<7x7x64xf32>
    %cst_35 = arith.constant 5.000000e-01 : f32
    %102 = vector.broadcast %cst_35 : f32 to vector<7x7x64xf32>
    %103 = arith.mulf %102, %101 : vector<7x7x64xf32>
    %cst_36 = arith.constant 4.471500e-02 : f32
    %104 = vector.broadcast %cst_36 : f32 to vector<7x7x64xf32>
    %105 = arith.mulf %104, %101 : vector<7x7x64xf32>
    %106 = arith.mulf %105, %101 : vector<7x7x64xf32>
    %107 = arith.mulf %106, %101 : vector<7x7x64xf32>
    %108 = arith.addf %101, %107 : vector<7x7x64xf32>
    %cst_37 = arith.constant 0.797884583 : f32
    %109 = vector.broadcast %cst_37 : f32 to vector<7x7x64xf32>
    %110 = arith.mulf %109, %108 : vector<7x7x64xf32>
    %111 = math.tanh %110 : vector<7x7x64xf32>
    %cst_38 = arith.constant 1.000000e+00 : f32
    %112 = vector.broadcast %cst_38 : f32 to vector<7x7x64xf32>
    %113 = arith.addf %112, %111 : vector<7x7x64xf32>
    %114 = arith.mulf %103, %113 : vector<7x7x64xf32>
    %115 = arith.maximumf %92, %114 : vector<7x7x64xf32>
    %c2_39 = arith.constant 2 : index
    %c0_40 = arith.constant 0 : index
    %c1_41 = arith.constant 1 : index
    %c0_42 = arith.constant 0 : index
    %116 = vector.load %arg1[%c2_39, %c0_40, %c1_41, %c0_42] : memref<4x8x8x64xbf16, #tpu.memory_space<vmem>>, vector<1x7x7x64xbf16>
    %117 = vector.shape_cast %116 : vector<1x7x7x64xbf16> to vector<7x7x64xbf16>
    %118 = arith.extf %117 : vector<7x7x64xbf16> to vector<7x7x64xf32>
    %119 = vector.shape_cast %0 : vector<1x64xf32> to vector<1x1x64xf32>
    %120 = vector.broadcast %119 : vector<1x1x64xf32> to vector<7x7x64xf32>
    %121 = arith.mulf %118, %120 : vector<7x7x64xf32>
    %122 = vector.shape_cast %1 : vector<1x64xf32> to vector<1x1x64xf32>
    %123 = vector.broadcast %122 : vector<1x1x64xf32> to vector<7x7x64xf32>
    %124 = arith.addf %121, %123 : vector<7x7x64xf32>
    %cst_43 = arith.constant 5.000000e-01 : f32
    %125 = vector.broadcast %cst_43 : f32 to vector<7x7x64xf32>
    %126 = arith.mulf %125, %124 : vector<7x7x64xf32>
    %cst_44 = arith.constant 4.471500e-02 : f32
    %127 = vector.broadcast %cst_44 : f32 to vector<7x7x64xf32>
    %128 = arith.mulf %127, %124 : vector<7x7x64xf32>
    %129 = arith.mulf %128, %124 : vector<7x7x64xf32>
    %130 = arith.mulf %129, %124 : vector<7x7x64xf32>
    %131 = arith.addf %124, %130 : vector<7x7x64xf32>
    %cst_45 = arith.constant 0.797884583 : f32
    %132 = vector.broadcast %cst_45 : f32 to vector<7x7x64xf32>
    %133 = arith.mulf %132, %131 : vector<7x7x64xf32>
    %134 = math.tanh %133 : vector<7x7x64xf32>
    %cst_46 = arith.constant 1.000000e+00 : f32
    %135 = vector.broadcast %cst_46 : f32 to vector<7x7x64xf32>
    %136 = arith.addf %135, %134 : vector<7x7x64xf32>
    %137 = arith.mulf %126, %136 : vector<7x7x64xf32>
    %138 = arith.maximumf %115, %137 : vector<7x7x64xf32>
    %c0_47 = arith.constant 0 : index
    %c1_48 = arith.constant 1 : index
    %c0_49 = arith.constant 0 : index
    %c0_50 = arith.constant 0 : index
    %139 = vector.load %arg1[%c0_47, %c1_48, %c0_49, %c0_50] : memref<4x8x8x64xbf16, #tpu.memory_space<vmem>>, vector<1x7x7x64xbf16>
    %140 = vector.shape_cast %139 : vector<1x7x7x64xbf16> to vector<7x7x64xbf16>
    %141 = arith.extf %140 : vector<7x7x64xbf16> to vector<7x7x64xf32>
    %142 = vector.shape_cast %0 : vector<1x64xf32> to vector<1x1x64xf32>
    %143 = vector.broadcast %142 : vector<1x1x64xf32> to vector<7x7x64xf32>
    %144 = arith.mulf %141, %143 : vector<7x7x64xf32>
    %145 = vector.shape_cast %1 : vector<1x64xf32> to vector<1x1x64xf32>
    %146 = vector.broadcast %145 : vector<1x1x64xf32> to vector<7x7x64xf32>
    %147 = arith.addf %144, %146 : vector<7x7x64xf32>
    %cst_51 = arith.constant 5.000000e-01 : f32
    %148 = vector.broadcast %cst_51 : f32 to vector<7x7x64xf32>
    %149 = arith.mulf %148, %147 : vector<7x7x64xf32>
    %cst_52 = arith.constant 4.471500e-02 : f32
    %150 = vector.broadcast %cst_52 : f32 to vector<7x7x64xf32>
    %151 = arith.mulf %150, %147 : vector<7x7x64xf32>
    %152 = arith.mulf %151, %147 : vector<7x7x64xf32>
    %153 = arith.mulf %152, %147 : vector<7x7x64xf32>
    %154 = arith.addf %147, %153 : vector<7x7x64xf32>
    %cst_53 = arith.constant 0.797884583 : f32
    %155 = vector.broadcast %cst_53 : f32 to vector<7x7x64xf32>
    %156 = arith.mulf %155, %154 : vector<7x7x64xf32>
    %157 = math.tanh %156 : vector<7x7x64xf32>
    %cst_54 = arith.constant 1.000000e+00 : f32
    %158 = vector.broadcast %cst_54 : f32 to vector<7x7x64xf32>
    %159 = arith.addf %158, %157 : vector<7x7x64xf32>
    %160 = arith.mulf %149, %159 : vector<7x7x64xf32>
    %161 = arith.maximumf %138, %160 : vector<7x7x64xf32>
    %c1_55 = arith.constant 1 : index
    %c1_56 = arith.constant 1 : index
    %c0_57 = arith.constant 0 : index
    %c0_58 = arith.constant 0 : index
    %162 = vector.load %arg1[%c1_55, %c1_56, %c0_57, %c0_58] : memref<4x8x8x64xbf16, #tpu.memory_space<vmem>>, vector<1x7x7x64xbf16>
    %163 = vector.shape_cast %162 : vector<1x7x7x64xbf16> to vector<7x7x64xbf16>
    %164 = arith.extf %163 : vector<7x7x64xbf16> to vector<7x7x64xf32>
    %165 = vector.shape_cast %0 : vector<1x64xf32> to vector<1x1x64xf32>
    %166 = vector.broadcast %165 : vector<1x1x64xf32> to vector<7x7x64xf32>
    %167 = arith.mulf %164, %166 : vector<7x7x64xf32>
    %168 = vector.shape_cast %1 : vector<1x64xf32> to vector<1x1x64xf32>
    %169 = vector.broadcast %168 : vector<1x1x64xf32> to vector<7x7x64xf32>
    %170 = arith.addf %167, %169 : vector<7x7x64xf32>
    %cst_59 = arith.constant 5.000000e-01 : f32
    %171 = vector.broadcast %cst_59 : f32 to vector<7x7x64xf32>
    %172 = arith.mulf %171, %170 : vector<7x7x64xf32>
    %cst_60 = arith.constant 4.471500e-02 : f32
    %173 = vector.broadcast %cst_60 : f32 to vector<7x7x64xf32>
    %174 = arith.mulf %173, %170 : vector<7x7x64xf32>
    %175 = arith.mulf %174, %170 : vector<7x7x64xf32>
    %176 = arith.mulf %175, %170 : vector<7x7x64xf32>
    %177 = arith.addf %170, %176 : vector<7x7x64xf32>
    %cst_61 = arith.constant 0.797884583 : f32
    %178 = vector.broadcast %cst_61 : f32 to vector<7x7x64xf32>
    %179 = arith.mulf %178, %177 : vector<7x7x64xf32>
    %180 = math.tanh %179 : vector<7x7x64xf32>
    %cst_62 = arith.constant 1.000000e+00 : f32
    %181 = vector.broadcast %cst_62 : f32 to vector<7x7x64xf32>
    %182 = arith.addf %181, %180 : vector<7x7x64xf32>
    %183 = arith.mulf %172, %182 : vector<7x7x64xf32>
    %184 = arith.maximumf %161, %183 : vector<7x7x64xf32>
    %c0_63 = arith.constant 0 : index
    %c1_64 = arith.constant 1 : index
    %c1_65 = arith.constant 1 : index
    %c0_66 = arith.constant 0 : index
    %185 = vector.load %arg1[%c0_63, %c1_64, %c1_65, %c0_66] : memref<4x8x8x64xbf16, #tpu.memory_space<vmem>>, vector<1x7x7x64xbf16>
    %186 = vector.shape_cast %185 : vector<1x7x7x64xbf16> to vector<7x7x64xbf16>
    %187 = arith.extf %186 : vector<7x7x64xbf16> to vector<7x7x64xf32>
    %188 = vector.shape_cast %0 : vector<1x64xf32> to vector<1x1x64xf32>
    %189 = vector.broadcast %188 : vector<1x1x64xf32> to vector<7x7x64xf32>
    %190 = arith.mulf %187, %189 : vector<7x7x64xf32>
    %191 = vector.shape_cast %1 : vector<1x64xf32> to vector<1x1x64xf32>
    %192 = vector.broadcast %191 : vector<1x1x64xf32> to vector<7x7x64xf32>
    %193 = arith.addf %190, %192 : vector<7x7x64xf32>
    %cst_67 = arith.constant 5.000000e-01 : f32
    %194 = vector.broadcast %cst_67 : f32 to vector<7x7x64xf32>
    %195 = arith.mulf %194, %193 : vector<7x7x64xf32>
    %cst_68 = arith.constant 4.471500e-02 : f32
    %196 = vector.broadcast %cst_68 : f32 to vector<7x7x64xf32>
    %197 = arith.mulf %196, %193 : vector<7x7x64xf32>
    %198 = arith.mulf %197, %193 : vector<7x7x64xf32>
    %199 = arith.mulf %198, %193 : vector<7x7x64xf32>
    %200 = arith.addf %193, %199 : vector<7x7x64xf32>
    %cst_69 = arith.constant 0.797884583 : f32
    %201 = vector.broadcast %cst_69 : f32 to vector<7x7x64xf32>
    %202 = arith.mulf %201, %200 : vector<7x7x64xf32>
    %203 = math.tanh %202 : vector<7x7x64xf32>
    %cst_70 = arith.constant 1.000000e+00 : f32
    %204 = vector.broadcast %cst_70 : f32 to vector<7x7x64xf32>
    %205 = arith.addf %204, %203 : vector<7x7x64xf32>
    %206 = arith.mulf %195, %205 : vector<7x7x64xf32>
    %207 = arith.maximumf %184, %206 : vector<7x7x64xf32>
    %208 = vector.shape_cast %207 : vector<7x7x64xf32> to vector<1x7x7x64xf32>
    %209 = arith.truncf %208 : vector<1x7x7x64xf32> to vector<1x7x7x64xbf16>
    %c0_71 = arith.constant 0 : index
    %c0_72 = arith.constant 0 : index
    %c0_73 = arith.constant 0 : index
    %c0_74 = arith.constant 0 : index
    %210 = vector.load %arg4[%c0_71, %c0_72, %c0_73, %c0_74] : memref<1x7x7x64xbf16, #tpu.memory_space<vmem>>, vector<1x7x7x64xbf16>
    tpu.vector_store %arg4[%c0_71, %c0_72, %c0_73, %c0_74], %209 {strides = array<i32>} : memref<1x7x7x64xbf16, #tpu.memory_space<vmem>>, vector<1x7x7x64xbf16>,
    return
  }
  func.func @transform_0(%arg0: i32) -> (i32, i32, i32, i32) {
    %c0_i32 = arith.constant 0 : i32
    %c0_i32_0 = arith.constant 0 : i32
    %c0_i32_1 = arith.constant 0 : i32
    %c0_i32_2 = arith.constant 0 : i32
    return %arg0, %c0_i32, %c0_i32_0, %c0_i32_1 : i32, i32, i32, i32
  }
  func.func @transform_1(%arg0: i32) -> (i32, i32) {
    %c0_i32 = arith.constant 0 : i32
    %c0_i32_0 = arith.constant 0 : i32
    %c0_i32_1 = arith.constant 0 : i32
    return %c0_i32, %c0_i32_0 : i32, i32
  }
  func.func @transform_2(%arg0: i32) -> (i32, i32) {
    %c0_i32 = arith.constant 0 : i32
    %c0_i32_0 = arith.constant 0 : i32
    %c0_i32_1 = arith.constant 0 : i32
    return %c0_i32, %c0_i32_0 : i32, i32
  }
  func.func @transform_3(%arg0: i32) -> (i32, i32, i32, i32) {
    %c0_i32 = arith.constant 0 : i32
    %c0_i32_0 = arith.constant 0 : i32
    %c0_i32_1 = arith.constant 0 : i32
    %c0_i32_2 = arith.constant 0 : i32
    return %arg0, %c0_i32, %c0_i32_0, %c0_i32_1 : i32, i32, i32, i32
  }
}

module attributes {stable_mosaic.version = 11 : i64} {
  func.func @_conv_bn_kernel(%arg0: i32, %arg1: memref<2x9x8x192xbf16, #tpu.memory_space<vmem>>, %arg2: memref<3x192x128xbf16, #tpu.memory_space<vmem>>, %arg3: memref<1x128xf32, #tpu.memory_space<vmem>>, %arg4: memref<2x7x8x128xbf16, #tpu.memory_space<vmem>>, %arg5: memref<1x1x128xf32, #tpu.memory_space<vmem>>, %arg6: memref<1x1x128xf32, #tpu.memory_space<vmem>>) attributes {dimension_semantics = [#tpu.dimension_semantics<parallel>], iteration_bounds = array<i64: 1>, scalar_prefetch = 0 : i64, scratch_operands = 0 : i64, tpu.core_type = #tpu.core_type<tc>, window_params = [{transform_indices = @transform_0, window_bounds = array<i64: 2, 9, 8, 192>}, {pipeline_mode = #tpu.pipeline_mode<synchronous>, transform_indices = @transform_1, window_bounds = array<i64: 3, 192, 128>}, {pipeline_mode = #tpu.pipeline_mode<synchronous>, transform_indices = @transform_2, window_bounds = array<i64: 1, 128>}, {transform_indices = @transform_3, window_bounds = array<i64: 2, 7, 8, 128>}, {transform_indices = @transform_4, window_bounds = array<i64: 1, 1, 128>}, {transform_indices = @transform_5, window_bounds = array<i64: 1, 1, 128>}]} {
    %cst = arith.constant 0.000000e+00 : f32
    %0 = vector.broadcast %cst : f32 to vector<112x128xf32>
    %c0 = arith.constant 0 : index
    %c0_0 = arith.constant 0 : index
    %c0_1 = arith.constant 0 : index
    %c0_2 = arith.constant 0 : index
    %1 = vector.load %arg1[%c0, %c0_0, %c0_1, %c0_2] : memref<2x9x8x192xbf16, #tpu.memory_space<vmem>>, vector<2x7x8x192xbf16>
    %2 = vector.shape_cast %1 : vector<2x7x8x192xbf16> to vector<112x192xbf16>
    %c0_3 = arith.constant 0 : index
    %c0_4 = arith.constant 0 : index
    %c0_5 = arith.constant 0 : index
    %3 = vector.load %arg2[%c0_3, %c0_4, %c0_5] : memref<3x192x128xbf16, #tpu.memory_space<vmem>>, vector<1x192x128xbf16>
    %4 = vector.shape_cast %3 : vector<1x192x128xbf16> to vector<192x128xbf16>
    %cst_6 = arith.constant dense<0.000000e+00> : vector<112x128xf32>
    %5 = tpu.matmul %2, %4, %cst_6 {dimension_numbers = #tpu.dot_dimension_numbers<[1], [0], [0], [1], [0, 0, 1, 1], [], []>} : vector<112x192xbf16>, vector<192x128xbf16>, vector<112x128xf32> -> vector<112x128xf32>
    %6 = arith.addf %0, %5 : vector<112x128xf32>
    %c0_7 = arith.constant 0 : index
    %c1 = arith.constant 1 : index
    %c0_8 = arith.constant 0 : index
    %c0_9 = arith.constant 0 : index
    %7 = vector.load %arg1[%c0_7, %c1, %c0_8, %c0_9] : memref<2x9x8x192xbf16, #tpu.memory_space<vmem>>, vector<2x7x8x192xbf16>
    %8 = vector.shape_cast %7 : vector<2x7x8x192xbf16> to vector<112x192xbf16>
    %c1_10 = arith.constant 1 : index
    %c0_11 = arith.constant 0 : index
    %c0_12 = arith.constant 0 : index
    %9 = vector.load %arg2[%c1_10, %c0_11, %c0_12] : memref<3x192x128xbf16, #tpu.memory_space<vmem>>, vector<1x192x128xbf16>
    %10 = vector.shape_cast %9 : vector<1x192x128xbf16> to vector<192x128xbf16>
    %cst_13 = arith.constant dense<0.000000e+00> : vector<112x128xf32>
    %11 = tpu.matmul %8, %10, %cst_13 {dimension_numbers = #tpu.dot_dimension_numbers<[1], [0], [0], [1], [0, 0, 1, 1], [], []>} : vector<112x192xbf16>, vector<192x128xbf16>, vector<112x128xf32> -> vector<112x128xf32>
    %12 = arith.addf %6, %11 : vector<112x128xf32>
    %c0_14 = arith.constant 0 : index
    %c2 = arith.constant 2 : index
    %c0_15 = arith.constant 0 : index
    %c0_16 = arith.constant 0 : index
    %13 = vector.load %arg1[%c0_14, %c2, %c0_15, %c0_16] : memref<2x9x8x192xbf16, #tpu.memory_space<vmem>>, vector<2x7x8x192xbf16>
    %14 = vector.shape_cast %13 : vector<2x7x8x192xbf16> to vector<112x192xbf16>
    %c2_17 = arith.constant 2 : index
    %c0_18 = arith.constant 0 : index
    %c0_19 = arith.constant 0 : index
    %15 = vector.load %arg2[%c2_17, %c0_18, %c0_19] : memref<3x192x128xbf16, #tpu.memory_space<vmem>>, vector<1x192x128xbf16>
    %16 = vector.shape_cast %15 : vector<1x192x128xbf16> to vector<192x128xbf16>
    %cst_20 = arith.constant dense<0.000000e+00> : vector<112x128xf32>
    %17 = tpu.matmul %14, %16, %cst_20 {dimension_numbers = #tpu.dot_dimension_numbers<[1], [0], [0], [1], [0, 0, 1, 1], [], []>} : vector<112x192xbf16>, vector<192x128xbf16>, vector<112x128xf32> -> vector<112x128xf32>
    %18 = arith.addf %12, %17 : vector<112x128xf32>
    %c0_21 = arith.constant 0 : index
    %c0_22 = arith.constant 0 : index
    %19 = vector.load %arg3[%c0_21, %c0_22] : memref<1x128xf32, #tpu.memory_space<vmem>>, vector<1x128xf32>
    %20 = vector.broadcast %19 : vector<1x128xf32> to vector<112x128xf32>
    %21 = arith.addf %18, %20 : vector<112x128xf32>
    %22 = tpu.iota {dimensions = array<i32: 0>} : vector<112x1xi32>
    %c8_i32 = arith.constant 8 : i32
    %c0_i32 = arith.constant 0 : i32
    %23 = arith.cmpi eq, %c8_i32, %c0_i32 : i32
    %c1_i32 = arith.constant 1 : i32
    %24 = arith.select %23, %c1_i32, %c8_i32 : i32
    %25 = vector.broadcast %24 : i32 to vector<112x1xi32>
    %26 = arith.remsi %22, %25 : vector<112x1xi32>
    %c0_i32_23 = arith.constant 0 : i32
    %27 = vector.broadcast %c0_i32_23 : i32 to vector<112x1xi32>
    %28 = arith.cmpi ne, %26, %27 : vector<112x1xi32>
    %c0_i32_24 = arith.constant 0 : i32
    %29 = vector.broadcast %c0_i32_24 : i32 to vector<112x1xi32>
    %30 = arith.cmpi slt, %26, %29 : vector<112x1xi32>
    %c0_i32_25 = arith.constant 0 : i32
    %31 = arith.cmpi slt, %24, %c0_i32_25 : i32
    %32 = vector.broadcast %31 : i1 to vector<112x1xi1>
    %33 = vector.broadcast %32 : vector<112x1xi1> to vector<112x1xi1>
    %34 = arith.xori %30, %33 : vector<112x1xi1>
    %35 = arith.andi %34, %28 : vector<112x1xi1>
    %36 = vector.broadcast %24 : i32 to vector<112x1xi32>
    %37 = arith.addi %26, %36 : vector<112x1xi32>
    %38 = arith.select %35, %37, %26 : vector<112x1xi1>, vector<112x1xi32>
    %c7_i32 = arith.constant 7 : i32
    %39 = vector.broadcast %c7_i32 : i32 to vector<112x1xi32>
    %40 = arith.cmpi slt, %38, %39 : vector<112x1xi32>
    %cst_26 = arith.constant 0.000000e+00 : f32
    %41 = vector.shape_cast %40 : vector<112x1xi1> to vector<112x1xi1>
    %42 = vector.broadcast %41 : vector<112x1xi1> to vector<112x128xi1>
    %43 = vector.broadcast %cst_26 : f32 to vector<112x128xf32>
    %44 = arith.select %42, %21, %43 : vector<112x128xi1>, vector<112x128xf32>
    %cst_27 = arith.constant dense<0.000000e+00> : vector<128xf32>
    %45 = vector.multi_reduction <add>, %44, %cst_27 [0] : vector<112x128xf32> to vector<128xf32>
    %46 = vector.shape_cast %45 : vector<128xf32> to vector<1x128xf32>
    %47 = vector.shape_cast %46 : vector<1x128xf32> to vector<1x1x128xf32>
    %c0_28 = arith.constant 0 : index
    %c0_29 = arith.constant 0 : index
    %c0_30 = arith.constant 0 : index
    %48 = vector.load %arg5[%c0_28, %c0_29, %c0_30] : memref<1x1x128xf32, #tpu.memory_space<vmem>>, vector<1x1x128xf32>
    tpu.vector_store %arg5[%c0_28, %c0_29, %c0_30], %47 {strides = array<i32>} : memref<1x1x128xf32, #tpu.memory_space<vmem>>, vector<1x1x128xf32>,
    %49 = arith.mulf %44, %44 : vector<112x128xf32>
    %cst_31 = arith.constant dense<0.000000e+00> : vector<128xf32>
    %50 = vector.multi_reduction <add>, %49, %cst_31 [0] : vector<112x128xf32> to vector<128xf32>
    %51 = vector.shape_cast %50 : vector<128xf32> to vector<1x128xf32>
    %52 = vector.shape_cast %51 : vector<1x128xf32> to vector<1x1x128xf32>
    %c0_32 = arith.constant 0 : index
    %c0_33 = arith.constant 0 : index
    %c0_34 = arith.constant 0 : index
    %53 = vector.load %arg6[%c0_32, %c0_33, %c0_34] : memref<1x1x128xf32, #tpu.memory_space<vmem>>, vector<1x1x128xf32>
    tpu.vector_store %arg6[%c0_32, %c0_33, %c0_34], %52 {strides = array<i32>} : memref<1x1x128xf32, #tpu.memory_space<vmem>>, vector<1x1x128xf32>,
    %54 = vector.shape_cast %21 : vector<112x128xf32> to vector<2x7x8x128xf32>
    %55 = arith.truncf %54 : vector<2x7x8x128xf32> to vector<2x7x8x128xbf16>
    %c0_35 = arith.constant 0 : index
    %c0_36 = arith.constant 0 : index
    %c0_37 = arith.constant 0 : index
    %c0_38 = arith.constant 0 : index
    %56 = vector.load %arg4[%c0_35, %c0_36, %c0_37, %c0_38] : memref<2x7x8x128xbf16, #tpu.memory_space<vmem>>, vector<2x7x8x128xbf16>
    tpu.vector_store %arg4[%c0_35, %c0_36, %c0_37, %c0_38], %55 {strides = array<i32>} : memref<2x7x8x128xbf16, #tpu.memory_space<vmem>>, vector<2x7x8x128xbf16>,
    return
  }
  func.func @transform_0(%arg0: i32) -> (i32, i32, i32, i32) {
    %c0_i32 = arith.constant 0 : i32
    %c0_i32_0 = arith.constant 0 : i32
    %c0_i32_1 = arith.constant 0 : i32
    %c0_i32_2 = arith.constant 0 : i32
    return %arg0, %c0_i32, %c0_i32_0, %c0_i32_1 : i32, i32, i32, i32
  }
  func.func @transform_1(%arg0: i32) -> (i32, i32, i32) {
    %c0_i32 = arith.constant 0 : i32
    %c0_i32_0 = arith.constant 0 : i32
    %c0_i32_1 = arith.constant 0 : i32
    %c0_i32_2 = arith.constant 0 : i32
    return %c0_i32, %c0_i32_0, %c0_i32_1 : i32, i32, i32
  }
  func.func @transform_2(%arg0: i32) -> (i32, i32) {
    %c0_i32 = arith.constant 0 : i32
    %c0_i32_0 = arith.constant 0 : i32
    %c0_i32_1 = arith.constant 0 : i32
    return %c0_i32, %c0_i32_0 : i32, i32
  }
  func.func @transform_3(%arg0: i32) -> (i32, i32, i32, i32) {
    %c0_i32 = arith.constant 0 : i32
    %c0_i32_0 = arith.constant 0 : i32
    %c0_i32_1 = arith.constant 0 : i32
    %c0_i32_2 = arith.constant 0 : i32
    return %arg0, %c0_i32, %c0_i32_0, %c0_i32_1 : i32, i32, i32, i32
  }
  func.func @transform_4(%arg0: i32) -> (i32, i32, i32) {
    %c0_i32 = arith.constant 0 : i32
    %c0_i32_0 = arith.constant 0 : i32
    %c0_i32_1 = arith.constant 0 : i32
    return %arg0, %c0_i32, %c0_i32_0 : i32, i32, i32
  }
  func.func @transform_5(%arg0: i32) -> (i32, i32, i32) {
    %c0_i32 = arith.constant 0 : i32
    %c0_i32_0 = arith.constant 0 : i32
    %c0_i32_1 = arith.constant 0 : i32
    return %arg0, %c0_i32, %c0_i32_0 : i32, i32, i32
  }
}

module attributes {stable_mosaic.version = 11 : i64} {
  func.func @_bn_gelu_maxpool_kernel(%arg0: i32, %arg1: memref<4x4x4x128xbf16, #tpu.memory_space<vmem>>, %arg2: memref<1x128xf32, #tpu.memory_space<vmem>>, %arg3: memref<1x128xf32, #tpu.memory_space<vmem>>, %arg4: memref<1x3x3x128xbf16, #tpu.memory_space<vmem>>) attributes {dimension_semantics = [#tpu.dimension_semantics<parallel>], iteration_bounds = array<i64: 2>, scalar_prefetch = 0 : i64, scratch_operands = 0 : i64, tpu.core_type = #tpu.core_type<tc>, window_params = [{transform_indices = @transform_0, window_bounds = array<i64: 4, 4, 4, 128>}, {pipeline_mode = #tpu.pipeline_mode<synchronous>, transform_indices = @transform_1, window_bounds = array<i64: 1, 128>}, {pipeline_mode = #tpu.pipeline_mode<synchronous>, transform_indices = @transform_2, window_bounds = array<i64: 1, 128>}, {transform_indices = @transform_3, window_bounds = array<i64: 1, 3, 3, 128>}]} {
    %c0 = arith.constant 0 : index
    %c0_0 = arith.constant 0 : index
    %0 = vector.load %arg2[%c0, %c0_0] : memref<1x128xf32, #tpu.memory_space<vmem>>, vector<1x128xf32>
    %c0_1 = arith.constant 0 : index
    %c0_2 = arith.constant 0 : index
    %1 = vector.load %arg3[%c0_1, %c0_2] : memref<1x128xf32, #tpu.memory_space<vmem>>, vector<1x128xf32>
    %c0_3 = arith.constant 0 : index
    %c0_4 = arith.constant 0 : index
    %c0_5 = arith.constant 0 : index
    %c0_6 = arith.constant 0 : index
    %2 = vector.load %arg1[%c0_3, %c0_4, %c0_5, %c0_6] : memref<4x4x4x128xbf16, #tpu.memory_space<vmem>>, vector<1x3x3x128xbf16>
    %3 = vector.shape_cast %2 : vector<1x3x3x128xbf16> to vector<3x3x128xbf16>
    %4 = arith.extf %3 : vector<3x3x128xbf16> to vector<3x3x128xf32>
    %5 = vector.shape_cast %0 : vector<1x128xf32> to vector<1x1x128xf32>
    %6 = vector.broadcast %5 : vector<1x1x128xf32> to vector<3x3x128xf32>
    %7 = arith.mulf %4, %6 : vector<3x3x128xf32>
    %8 = vector.shape_cast %1 : vector<1x128xf32> to vector<1x1x128xf32>
    %9 = vector.broadcast %8 : vector<1x1x128xf32> to vector<3x3x128xf32>
    %10 = arith.addf %7, %9 : vector<3x3x128xf32>
    %cst = arith.constant 5.000000e-01 : f32
    %11 = vector.broadcast %cst : f32 to vector<3x3x128xf32>
    %12 = arith.mulf %11, %10 : vector<3x3x128xf32>
    %cst_7 = arith.constant 4.471500e-02 : f32
    %13 = vector.broadcast %cst_7 : f32 to vector<3x3x128xf32>
    %14 = arith.mulf %13, %10 : vector<3x3x128xf32>
    %15 = arith.mulf %14, %10 : vector<3x3x128xf32>
    %16 = arith.mulf %15, %10 : vector<3x3x128xf32>
    %17 = arith.addf %10, %16 : vector<3x3x128xf32>
    %cst_8 = arith.constant 0.797884583 : f32
    %18 = vector.broadcast %cst_8 : f32 to vector<3x3x128xf32>
    %19 = arith.mulf %18, %17 : vector<3x3x128xf32>
    %20 = math.tanh %19 : vector<3x3x128xf32>
    %cst_9 = arith.constant 1.000000e+00 : f32
    %21 = vector.broadcast %cst_9 : f32 to vector<3x3x128xf32>
    %22 = arith.addf %21, %20 : vector<3x3x128xf32>
    %23 = arith.mulf %12, %22 : vector<3x3x128xf32>
    %c1 = arith.constant 1 : index
    %c0_10 = arith.constant 0 : index
    %c0_11 = arith.constant 0 : index
    %c0_12 = arith.constant 0 : index
    %24 = vector.load %arg1[%c1, %c0_10, %c0_11, %c0_12] : memref<4x4x4x128xbf16, #tpu.memory_space<vmem>>, vector<1x3x3x128xbf16>
    %25 = vector.shape_cast %24 : vector<1x3x3x128xbf16> to vector<3x3x128xbf16>
    %26 = arith.extf %25 : vector<3x3x128xbf16> to vector<3x3x128xf32>
    %27 = vector.shape_cast %0 : vector<1x128xf32> to vector<1x1x128xf32>
    %28 = vector.broadcast %27 : vector<1x1x128xf32> to vector<3x3x128xf32>
    %29 = arith.mulf %26, %28 : vector<3x3x128xf32>
    %30 = vector.shape_cast %1 : vector<1x128xf32> to vector<1x1x128xf32>
    %31 = vector.broadcast %30 : vector<1x1x128xf32> to vector<3x3x128xf32>
    %32 = arith.addf %29, %31 : vector<3x3x128xf32>
    %cst_13 = arith.constant 5.000000e-01 : f32
    %33 = vector.broadcast %cst_13 : f32 to vector<3x3x128xf32>
    %34 = arith.mulf %33, %32 : vector<3x3x128xf32>
    %cst_14 = arith.constant 4.471500e-02 : f32
    %35 = vector.broadcast %cst_14 : f32 to vector<3x3x128xf32>
    %36 = arith.mulf %35, %32 : vector<3x3x128xf32>
    %37 = arith.mulf %36, %32 : vector<3x3x128xf32>
    %38 = arith.mulf %37, %32 : vector<3x3x128xf32>
    %39 = arith.addf %32, %38 : vector<3x3x128xf32>
    %cst_15 = arith.constant 0.797884583 : f32
    %40 = vector.broadcast %cst_15 : f32 to vector<3x3x128xf32>
    %41 = arith.mulf %40, %39 : vector<3x3x128xf32>
    %42 = math.tanh %41 : vector<3x3x128xf32>
    %cst_16 = arith.constant 1.000000e+00 : f32
    %43 = vector.broadcast %cst_16 : f32 to vector<3x3x128xf32>
    %44 = arith.addf %43, %42 : vector<3x3x128xf32>
    %45 = arith.mulf %34, %44 : vector<3x3x128xf32>
    %46 = arith.maximumf %23, %45 : vector<3x3x128xf32>
    %c0_17 = arith.constant 0 : index
    %c0_18 = arith.constant 0 : index
    %c1_19 = arith.constant 1 : index
    %c0_20 = arith.constant 0 : index
    %47 = vector.load %arg1[%c0_17, %c0_18, %c1_19, %c0_20] : memref<4x4x4x128xbf16, #tpu.memory_space<vmem>>, vector<1x3x3x128xbf16>
    %48 = vector.shape_cast %47 : vector<1x3x3x128xbf16> to vector<3x3x128xbf16>
    %49 = arith.extf %48 : vector<3x3x128xbf16> to vector<3x3x128xf32>
    %50 = vector.shape_cast %0 : vector<1x128xf32> to vector<1x1x128xf32>
    %51 = vector.broadcast %50 : vector<1x1x128xf32> to vector<3x3x128xf32>
    %52 = arith.mulf %49, %51 : vector<3x3x128xf32>
    %53 = vector.shape_cast %1 : vector<1x128xf32> to vector<1x1x128xf32>
    %54 = vector.broadcast %53 : vector<1x1x128xf32> to vector<3x3x128xf32>
    %55 = arith.addf %52, %54 : vector<3x3x128xf32>
    %cst_21 = arith.constant 5.000000e-01 : f32
    %56 = vector.broadcast %cst_21 : f32 to vector<3x3x128xf32>
    %57 = arith.mulf %56, %55 : vector<3x3x128xf32>
    %cst_22 = arith.constant 4.471500e-02 : f32
    %58 = vector.broadcast %cst_22 : f32 to vector<3x3x128xf32>
    %59 = arith.mulf %58, %55 : vector<3x3x128xf32>
    %60 = arith.mulf %59, %55 : vector<3x3x128xf32>
    %61 = arith.mulf %60, %55 : vector<3x3x128xf32>
    %62 = arith.addf %55, %61 : vector<3x3x128xf32>
    %cst_23 = arith.constant 0.797884583 : f32
    %63 = vector.broadcast %cst_23 : f32 to vector<3x3x128xf32>
    %64 = arith.mulf %63, %62 : vector<3x3x128xf32>
    %65 = math.tanh %64 : vector<3x3x128xf32>
    %cst_24 = arith.constant 1.000000e+00 : f32
    %66 = vector.broadcast %cst_24 : f32 to vector<3x3x128xf32>
    %67 = arith.addf %66, %65 : vector<3x3x128xf32>
    %68 = arith.mulf %57, %67 : vector<3x3x128xf32>
    %69 = arith.maximumf %46, %68 : vector<3x3x128xf32>
    %c2 = arith.constant 2 : index
    %c0_25 = arith.constant 0 : index
    %c0_26 = arith.constant 0 : index
    %c0_27 = arith.constant 0 : index
    %70 = vector.load %arg1[%c2, %c0_25, %c0_26, %c0_27] : memref<4x4x4x128xbf16, #tpu.memory_space<vmem>>, vector<1x3x3x128xbf16>
    %71 = vector.shape_cast %70 : vector<1x3x3x128xbf16> to vector<3x3x128xbf16>
    %72 = arith.extf %71 : vector<3x3x128xbf16> to vector<3x3x128xf32>
    %73 = vector.shape_cast %0 : vector<1x128xf32> to vector<1x1x128xf32>
    %74 = vector.broadcast %73 : vector<1x1x128xf32> to vector<3x3x128xf32>
    %75 = arith.mulf %72, %74 : vector<3x3x128xf32>
    %76 = vector.shape_cast %1 : vector<1x128xf32> to vector<1x1x128xf32>
    %77 = vector.broadcast %76 : vector<1x1x128xf32> to vector<3x3x128xf32>
    %78 = arith.addf %75, %77 : vector<3x3x128xf32>
    %cst_28 = arith.constant 5.000000e-01 : f32
    %79 = vector.broadcast %cst_28 : f32 to vector<3x3x128xf32>
    %80 = arith.mulf %79, %78 : vector<3x3x128xf32>
    %cst_29 = arith.constant 4.471500e-02 : f32
    %81 = vector.broadcast %cst_29 : f32 to vector<3x3x128xf32>
    %82 = arith.mulf %81, %78 : vector<3x3x128xf32>
    %83 = arith.mulf %82, %78 : vector<3x3x128xf32>
    %84 = arith.mulf %83, %78 : vector<3x3x128xf32>
    %85 = arith.addf %78, %84 : vector<3x3x128xf32>
    %cst_30 = arith.constant 0.797884583 : f32
    %86 = vector.broadcast %cst_30 : f32 to vector<3x3x128xf32>
    %87 = arith.mulf %86, %85 : vector<3x3x128xf32>
    %88 = math.tanh %87 : vector<3x3x128xf32>
    %cst_31 = arith.constant 1.000000e+00 : f32
    %89 = vector.broadcast %cst_31 : f32 to vector<3x3x128xf32>
    %90 = arith.addf %89, %88 : vector<3x3x128xf32>
    %91 = arith.mulf %80, %90 : vector<3x3x128xf32>
    %92 = arith.maximumf %69, %91 : vector<3x3x128xf32>
    %c3 = arith.constant 3 : index
    %c0_32 = arith.constant 0 : index
    %c0_33 = arith.constant 0 : index
    %c0_34 = arith.constant 0 : index
    %93 = vector.load %arg1[%c3, %c0_32, %c0_33, %c0_34] : memref<4x4x4x128xbf16, #tpu.memory_space<vmem>>, vector<1x3x3x128xbf16>
    %94 = vector.shape_cast %93 : vector<1x3x3x128xbf16> to vector<3x3x128xbf16>
    %95 = arith.extf %94 : vector<3x3x128xbf16> to vector<3x3x128xf32>
    %96 = vector.shape_cast %0 : vector<1x128xf32> to vector<1x1x128xf32>
    %97 = vector.broadcast %96 : vector<1x1x128xf32> to vector<3x3x128xf32>
    %98 = arith.mulf %95, %97 : vector<3x3x128xf32>
    %99 = vector.shape_cast %1 : vector<1x128xf32> to vector<1x1x128xf32>
    %100 = vector.broadcast %99 : vector<1x1x128xf32> to vector<3x3x128xf32>
    %101 = arith.addf %98, %100 : vector<3x3x128xf32>
    %cst_35 = arith.constant 5.000000e-01 : f32
    %102 = vector.broadcast %cst_35 : f32 to vector<3x3x128xf32>
    %103 = arith.mulf %102, %101 : vector<3x3x128xf32>
    %cst_36 = arith.constant 4.471500e-02 : f32
    %104 = vector.broadcast %cst_36 : f32 to vector<3x3x128xf32>
    %105 = arith.mulf %104, %101 : vector<3x3x128xf32>
    %106 = arith.mulf %105, %101 : vector<3x3x128xf32>
    %107 = arith.mulf %106, %101 : vector<3x3x128xf32>
    %108 = arith.addf %101, %107 : vector<3x3x128xf32>
    %cst_37 = arith.constant 0.797884583 : f32
    %109 = vector.broadcast %cst_37 : f32 to vector<3x3x128xf32>
    %110 = arith.mulf %109, %108 : vector<3x3x128xf32>
    %111 = math.tanh %110 : vector<3x3x128xf32>
    %cst_38 = arith.constant 1.000000e+00 : f32
    %112 = vector.broadcast %cst_38 : f32 to vector<3x3x128xf32>
    %113 = arith.addf %112, %111 : vector<3x3x128xf32>
    %114 = arith.mulf %103, %113 : vector<3x3x128xf32>
    %115 = arith.maximumf %92, %114 : vector<3x3x128xf32>
    %c2_39 = arith.constant 2 : index
    %c0_40 = arith.constant 0 : index
    %c1_41 = arith.constant 1 : index
    %c0_42 = arith.constant 0 : index
    %116 = vector.load %arg1[%c2_39, %c0_40, %c1_41, %c0_42] : memref<4x4x4x128xbf16, #tpu.memory_space<vmem>>, vector<1x3x3x128xbf16>
    %117 = vector.shape_cast %116 : vector<1x3x3x128xbf16> to vector<3x3x128xbf16>
    %118 = arith.extf %117 : vector<3x3x128xbf16> to vector<3x3x128xf32>
    %119 = vector.shape_cast %0 : vector<1x128xf32> to vector<1x1x128xf32>
    %120 = vector.broadcast %119 : vector<1x1x128xf32> to vector<3x3x128xf32>
    %121 = arith.mulf %118, %120 : vector<3x3x128xf32>
    %122 = vector.shape_cast %1 : vector<1x128xf32> to vector<1x1x128xf32>
    %123 = vector.broadcast %122 : vector<1x1x128xf32> to vector<3x3x128xf32>
    %124 = arith.addf %121, %123 : vector<3x3x128xf32>
    %cst_43 = arith.constant 5.000000e-01 : f32
    %125 = vector.broadcast %cst_43 : f32 to vector<3x3x128xf32>
    %126 = arith.mulf %125, %124 : vector<3x3x128xf32>
    %cst_44 = arith.constant 4.471500e-02 : f32
    %127 = vector.broadcast %cst_44 : f32 to vector<3x3x128xf32>
    %128 = arith.mulf %127, %124 : vector<3x3x128xf32>
    %129 = arith.mulf %128, %124 : vector<3x3x128xf32>
    %130 = arith.mulf %129, %124 : vector<3x3x128xf32>
    %131 = arith.addf %124, %130 : vector<3x3x128xf32>
    %cst_45 = arith.constant 0.797884583 : f32
    %132 = vector.broadcast %cst_45 : f32 to vector<3x3x128xf32>
    %133 = arith.mulf %132, %131 : vector<3x3x128xf32>
    %134 = math.tanh %133 : vector<3x3x128xf32>
    %cst_46 = arith.constant 1.000000e+00 : f32
    %135 = vector.broadcast %cst_46 : f32 to vector<3x3x128xf32>
    %136 = arith.addf %135, %134 : vector<3x3x128xf32>
    %137 = arith.mulf %126, %136 : vector<3x3x128xf32>
    %138 = arith.maximumf %115, %137 : vector<3x3x128xf32>
    %c0_47 = arith.constant 0 : index
    %c1_48 = arith.constant 1 : index
    %c0_49 = arith.constant 0 : index
    %c0_50 = arith.constant 0 : index
    %139 = vector.load %arg1[%c0_47, %c1_48, %c0_49, %c0_50] : memref<4x4x4x128xbf16, #tpu.memory_space<vmem>>, vector<1x3x3x128xbf16>
    %140 = vector.shape_cast %139 : vector<1x3x3x128xbf16> to vector<3x3x128xbf16>
    %141 = arith.extf %140 : vector<3x3x128xbf16> to vector<3x3x128xf32>
    %142 = vector.shape_cast %0 : vector<1x128xf32> to vector<1x1x128xf32>
    %143 = vector.broadcast %142 : vector<1x1x128xf32> to vector<3x3x128xf32>
    %144 = arith.mulf %141, %143 : vector<3x3x128xf32>
    %145 = vector.shape_cast %1 : vector<1x128xf32> to vector<1x1x128xf32>
    %146 = vector.broadcast %145 : vector<1x1x128xf32> to vector<3x3x128xf32>
    %147 = arith.addf %144, %146 : vector<3x3x128xf32>
    %cst_51 = arith.constant 5.000000e-01 : f32
    %148 = vector.broadcast %cst_51 : f32 to vector<3x3x128xf32>
    %149 = arith.mulf %148, %147 : vector<3x3x128xf32>
    %cst_52 = arith.constant 4.471500e-02 : f32
    %150 = vector.broadcast %cst_52 : f32 to vector<3x3x128xf32>
    %151 = arith.mulf %150, %147 : vector<3x3x128xf32>
    %152 = arith.mulf %151, %147 : vector<3x3x128xf32>
    %153 = arith.mulf %152, %147 : vector<3x3x128xf32>
    %154 = arith.addf %147, %153 : vector<3x3x128xf32>
    %cst_53 = arith.constant 0.797884583 : f32
    %155 = vector.broadcast %cst_53 : f32 to vector<3x3x128xf32>
    %156 = arith.mulf %155, %154 : vector<3x3x128xf32>
    %157 = math.tanh %156 : vector<3x3x128xf32>
    %cst_54 = arith.constant 1.000000e+00 : f32
    %158 = vector.broadcast %cst_54 : f32 to vector<3x3x128xf32>
    %159 = arith.addf %158, %157 : vector<3x3x128xf32>
    %160 = arith.mulf %149, %159 : vector<3x3x128xf32>
    %161 = arith.maximumf %138, %160 : vector<3x3x128xf32>
    %c1_55 = arith.constant 1 : index
    %c1_56 = arith.constant 1 : index
    %c0_57 = arith.constant 0 : index
    %c0_58 = arith.constant 0 : index
    %162 = vector.load %arg1[%c1_55, %c1_56, %c0_57, %c0_58] : memref<4x4x4x128xbf16, #tpu.memory_space<vmem>>, vector<1x3x3x128xbf16>
    %163 = vector.shape_cast %162 : vector<1x3x3x128xbf16> to vector<3x3x128xbf16>
    %164 = arith.extf %163 : vector<3x3x128xbf16> to vector<3x3x128xf32>
    %165 = vector.shape_cast %0 : vector<1x128xf32> to vector<1x1x128xf32>
    %166 = vector.broadcast %165 : vector<1x1x128xf32> to vector<3x3x128xf32>
    %167 = arith.mulf %164, %166 : vector<3x3x128xf32>
    %168 = vector.shape_cast %1 : vector<1x128xf32> to vector<1x1x128xf32>
    %169 = vector.broadcast %168 : vector<1x1x128xf32> to vector<3x3x128xf32>
    %170 = arith.addf %167, %169 : vector<3x3x128xf32>
    %cst_59 = arith.constant 5.000000e-01 : f32
    %171 = vector.broadcast %cst_59 : f32 to vector<3x3x128xf32>
    %172 = arith.mulf %171, %170 : vector<3x3x128xf32>
    %cst_60 = arith.constant 4.471500e-02 : f32
    %173 = vector.broadcast %cst_60 : f32 to vector<3x3x128xf32>
    %174 = arith.mulf %173, %170 : vector<3x3x128xf32>
    %175 = arith.mulf %174, %170 : vector<3x3x128xf32>
    %176 = arith.mulf %175, %170 : vector<3x3x128xf32>
    %177 = arith.addf %170, %176 : vector<3x3x128xf32>
    %cst_61 = arith.constant 0.797884583 : f32
    %178 = vector.broadcast %cst_61 : f32 to vector<3x3x128xf32>
    %179 = arith.mulf %178, %177 : vector<3x3x128xf32>
    %180 = math.tanh %179 : vector<3x3x128xf32>
    %cst_62 = arith.constant 1.000000e+00 : f32
    %181 = vector.broadcast %cst_62 : f32 to vector<3x3x128xf32>
    %182 = arith.addf %181, %180 : vector<3x3x128xf32>
    %183 = arith.mulf %172, %182 : vector<3x3x128xf32>
    %184 = arith.maximumf %161, %183 : vector<3x3x128xf32>
    %c0_63 = arith.constant 0 : index
    %c1_64 = arith.constant 1 : index
    %c1_65 = arith.constant 1 : index
    %c0_66 = arith.constant 0 : index
    %185 = vector.load %arg1[%c0_63, %c1_64, %c1_65, %c0_66] : memref<4x4x4x128xbf16, #tpu.memory_space<vmem>>, vector<1x3x3x128xbf16>
    %186 = vector.shape_cast %185 : vector<1x3x3x128xbf16> to vector<3x3x128xbf16>
    %187 = arith.extf %186 : vector<3x3x128xbf16> to vector<3x3x128xf32>
    %188 = vector.shape_cast %0 : vector<1x128xf32> to vector<1x1x128xf32>
    %189 = vector.broadcast %188 : vector<1x1x128xf32> to vector<3x3x128xf32>
    %190 = arith.mulf %187, %189 : vector<3x3x128xf32>
    %191 = vector.shape_cast %1 : vector<1x128xf32> to vector<1x1x128xf32>
    %192 = vector.broadcast %191 : vector<1x1x128xf32> to vector<3x3x128xf32>
    %193 = arith.addf %190, %192 : vector<3x3x128xf32>
    %cst_67 = arith.constant 5.000000e-01 : f32
    %194 = vector.broadcast %cst_67 : f32 to vector<3x3x128xf32>
    %195 = arith.mulf %194, %193 : vector<3x3x128xf32>
    %cst_68 = arith.constant 4.471500e-02 : f32
    %196 = vector.broadcast %cst_68 : f32 to vector<3x3x128xf32>
    %197 = arith.mulf %196, %193 : vector<3x3x128xf32>
    %198 = arith.mulf %197, %193 : vector<3x3x128xf32>
    %199 = arith.mulf %198, %193 : vector<3x3x128xf32>
    %200 = arith.addf %193, %199 : vector<3x3x128xf32>
    %cst_69 = arith.constant 0.797884583 : f32
    %201 = vector.broadcast %cst_69 : f32 to vector<3x3x128xf32>
    %202 = arith.mulf %201, %200 : vector<3x3x128xf32>
    %203 = math.tanh %202 : vector<3x3x128xf32>
    %cst_70 = arith.constant 1.000000e+00 : f32
    %204 = vector.broadcast %cst_70 : f32 to vector<3x3x128xf32>
    %205 = arith.addf %204, %203 : vector<3x3x128xf32>
    %206 = arith.mulf %195, %205 : vector<3x3x128xf32>
    %207 = arith.maximumf %184, %206 : vector<3x3x128xf32>
    %208 = vector.shape_cast %207 : vector<3x3x128xf32> to vector<1x3x3x128xf32>
    %209 = arith.truncf %208 : vector<1x3x3x128xf32> to vector<1x3x3x128xbf16>
    %c0_71 = arith.constant 0 : index
    %c0_72 = arith.constant 0 : index
    %c0_73 = arith.constant 0 : index
    %c0_74 = arith.constant 0 : index
    %210 = vector.load %arg4[%c0_71, %c0_72, %c0_73, %c0_74] : memref<1x3x3x128xbf16, #tpu.memory_space<vmem>>, vector<1x3x3x128xbf16>
    tpu.vector_store %arg4[%c0_71, %c0_72, %c0_73, %c0_74], %209 {strides = array<i32>} : memref<1x3x3x128xbf16, #tpu.memory_space<vmem>>, vector<1x3x3x128xbf16>,
    return
  }
  func.func @transform_0(%arg0: i32) -> (i32, i32, i32, i32) {
    %c0_i32 = arith.constant 0 : i32
    %c0_i32_0 = arith.constant 0 : i32
    %c0_i32_1 = arith.constant 0 : i32
    %c0_i32_2 = arith.constant 0 : i32
    return %arg0, %c0_i32, %c0_i32_0, %c0_i32_1 : i32, i32, i32, i32
  }
  func.func @transform_1(%arg0: i32) -> (i32, i32) {
    %c0_i32 = arith.constant 0 : i32
    %c0_i32_0 = arith.constant 0 : i32
    %c0_i32_1 = arith.constant 0 : i32
    return %c0_i32, %c0_i32_0 : i32, i32
  }
  func.func @transform_2(%arg0: i32) -> (i32, i32) {
    %c0_i32 = arith.constant 0 : i32
    %c0_i32_0 = arith.constant 0 : i32
    %c0_i32_1 = arith.constant 0 : i32
    return %c0_i32, %c0_i32_0 : i32, i32
  }
  func.func @transform_3(%arg0: i32) -> (i32, i32, i32, i32) {
    %c0_i32 = arith.constant 0 : i32
    %c0_i32_0 = arith.constant 0 : i32
    %c0_i32_1 = arith.constant 0 : i32
    %c0_i32_2 = arith.constant 0 : i32
    return %arg0, %c0_i32, %c0_i32_0, %c0_i32_1 : i32, i32, i32, i32
  }
}

module attributes {stable_mosaic.version = 11 : i64} {
  func.func @_conv_bn_kernel(%arg0: i32, %arg1: memref<2x5x8x384xbf16, #tpu.memory_space<vmem>>, %arg2: memref<3x384x256xbf16, #tpu.memory_space<vmem>>, %arg3: memref<1x256xf32, #tpu.memory_space<vmem>>, %arg4: memref<2x3x8x256xbf16, #tpu.memory_space<vmem>>, %arg5: memref<1x1x256xf32, #tpu.memory_space<vmem>>, %arg6: memref<1x1x256xf32, #tpu.memory_space<vmem>>) attributes {dimension_semantics = [#tpu.dimension_semantics<parallel>], iteration_bounds = array<i64: 1>, scalar_prefetch = 0 : i64, scratch_operands = 0 : i64, tpu.core_type = #tpu.core_type<tc>, window_params = [{transform_indices = @transform_0, window_bounds = array<i64: 2, 5, 8, 384>}, {pipeline_mode = #tpu.pipeline_mode<synchronous>, transform_indices = @transform_1, window_bounds = array<i64: 3, 384, 256>}, {pipeline_mode = #tpu.pipeline_mode<synchronous>, transform_indices = @transform_2, window_bounds = array<i64: 1, 256>}, {transform_indices = @transform_3, window_bounds = array<i64: 2, 3, 8, 256>}, {transform_indices = @transform_4, window_bounds = array<i64: 1, 1, 256>}, {transform_indices = @transform_5, window_bounds = array<i64: 1, 1, 256>}]} {
    %cst = arith.constant 0.000000e+00 : f32
    %0 = vector.broadcast %cst : f32 to vector<48x256xf32>
    %c0 = arith.constant 0 : index
    %c0_0 = arith.constant 0 : index
    %c0_1 = arith.constant 0 : index
    %c0_2 = arith.constant 0 : index
    %1 = vector.load %arg1[%c0, %c0_0, %c0_1, %c0_2] : memref<2x5x8x384xbf16, #tpu.memory_space<vmem>>, vector<2x3x8x384xbf16>
    %2 = vector.shape_cast %1 : vector<2x3x8x384xbf16> to vector<48x384xbf16>
    %c0_3 = arith.constant 0 : index
    %c0_4 = arith.constant 0 : index
    %c0_5 = arith.constant 0 : index
    %3 = vector.load %arg2[%c0_3, %c0_4, %c0_5] : memref<3x384x256xbf16, #tpu.memory_space<vmem>>, vector<1x384x256xbf16>
    %4 = vector.shape_cast %3 : vector<1x384x256xbf16> to vector<384x256xbf16>
    %cst_6 = arith.constant dense<0.000000e+00> : vector<48x256xf32>
    %5 = tpu.matmul %2, %4, %cst_6 {dimension_numbers = #tpu.dot_dimension_numbers<[1], [0], [0], [1], [0, 0, 1, 1], [], []>} : vector<48x384xbf16>, vector<384x256xbf16>, vector<48x256xf32> -> vector<48x256xf32>
    %6 = arith.addf %0, %5 : vector<48x256xf32>
    %c0_7 = arith.constant 0 : index
    %c1 = arith.constant 1 : index
    %c0_8 = arith.constant 0 : index
    %c0_9 = arith.constant 0 : index
    %7 = vector.load %arg1[%c0_7, %c1, %c0_8, %c0_9] : memref<2x5x8x384xbf16, #tpu.memory_space<vmem>>, vector<2x3x8x384xbf16>
    %8 = vector.shape_cast %7 : vector<2x3x8x384xbf16> to vector<48x384xbf16>
    %c1_10 = arith.constant 1 : index
    %c0_11 = arith.constant 0 : index
    %c0_12 = arith.constant 0 : index
    %9 = vector.load %arg2[%c1_10, %c0_11, %c0_12] : memref<3x384x256xbf16, #tpu.memory_space<vmem>>, vector<1x384x256xbf16>
    %10 = vector.shape_cast %9 : vector<1x384x256xbf16> to vector<384x256xbf16>
    %cst_13 = arith.constant dense<0.000000e+00> : vector<48x256xf32>
    %11 = tpu.matmul %8, %10, %cst_13 {dimension_numbers = #tpu.dot_dimension_numbers<[1], [0], [0], [1], [0, 0, 1, 1], [], []>} : vector<48x384xbf16>, vector<384x256xbf16>, vector<48x256xf32> -> vector<48x256xf32>
    %12 = arith.addf %6, %11 : vector<48x256xf32>
    %c0_14 = arith.constant 0 : index
    %c2 = arith.constant 2 : index
    %c0_15 = arith.constant 0 : index
    %c0_16 = arith.constant 0 : index
    %13 = vector.load %arg1[%c0_14, %c2, %c0_15, %c0_16] : memref<2x5x8x384xbf16, #tpu.memory_space<vmem>>, vector<2x3x8x384xbf16>
    %14 = vector.shape_cast %13 : vector<2x3x8x384xbf16> to vector<48x384xbf16>
    %c2_17 = arith.constant 2 : index
    %c0_18 = arith.constant 0 : index
    %c0_19 = arith.constant 0 : index
    %15 = vector.load %arg2[%c2_17, %c0_18, %c0_19] : memref<3x384x256xbf16, #tpu.memory_space<vmem>>, vector<1x384x256xbf16>
    %16 = vector.shape_cast %15 : vector<1x384x256xbf16> to vector<384x256xbf16>
    %cst_20 = arith.constant dense<0.000000e+00> : vector<48x256xf32>
    %17 = tpu.matmul %14, %16, %cst_20 {dimension_numbers = #tpu.dot_dimension_numbers<[1], [0], [0], [1], [0, 0, 1, 1], [], []>} : vector<48x384xbf16>, vector<384x256xbf16>, vector<48x256xf32> -> vector<48x256xf32>
    %18 = arith.addf %12, %17 : vector<48x256xf32>
    %c0_21 = arith.constant 0 : index
    %c0_22 = arith.constant 0 : index
    %19 = vector.load %arg3[%c0_21, %c0_22] : memref<1x256xf32, #tpu.memory_space<vmem>>, vector<1x256xf32>
    %20 = vector.broadcast %19 : vector<1x256xf32> to vector<48x256xf32>
    %21 = arith.addf %18, %20 : vector<48x256xf32>
    %22 = tpu.iota {dimensions = array<i32: 0>} : vector<48x1xi32>
    %c8_i32 = arith.constant 8 : i32
    %c0_i32 = arith.constant 0 : i32
    %23 = arith.cmpi eq, %c8_i32, %c0_i32 : i32
    %c1_i32 = arith.constant 1 : i32
    %24 = arith.select %23, %c1_i32, %c8_i32 : i32
    %25 = vector.broadcast %24 : i32 to vector<48x1xi32>
    %26 = arith.remsi %22, %25 : vector<48x1xi32>
    %c0_i32_23 = arith.constant 0 : i32
    %27 = vector.broadcast %c0_i32_23 : i32 to vector<48x1xi32>
    %28 = arith.cmpi ne, %26, %27 : vector<48x1xi32>
    %c0_i32_24 = arith.constant 0 : i32
    %29 = vector.broadcast %c0_i32_24 : i32 to vector<48x1xi32>
    %30 = arith.cmpi slt, %26, %29 : vector<48x1xi32>
    %c0_i32_25 = arith.constant 0 : i32
    %31 = arith.cmpi slt, %24, %c0_i32_25 : i32
    %32 = vector.broadcast %31 : i1 to vector<48x1xi1>
    %33 = vector.broadcast %32 : vector<48x1xi1> to vector<48x1xi1>
    %34 = arith.xori %30, %33 : vector<48x1xi1>
    %35 = arith.andi %34, %28 : vector<48x1xi1>
    %36 = vector.broadcast %24 : i32 to vector<48x1xi32>
    %37 = arith.addi %26, %36 : vector<48x1xi32>
    %38 = arith.select %35, %37, %26 : vector<48x1xi1>, vector<48x1xi32>
    %c3_i32 = arith.constant 3 : i32
    %39 = vector.broadcast %c3_i32 : i32 to vector<48x1xi32>
    %40 = arith.cmpi slt, %38, %39 : vector<48x1xi32>
    %cst_26 = arith.constant 0.000000e+00 : f32
    %41 = vector.shape_cast %40 : vector<48x1xi1> to vector<48x1xi1>
    %42 = vector.broadcast %41 : vector<48x1xi1> to vector<48x256xi1>
    %43 = vector.broadcast %cst_26 : f32 to vector<48x256xf32>
    %44 = arith.select %42, %21, %43 : vector<48x256xi1>, vector<48x256xf32>
    %cst_27 = arith.constant dense<0.000000e+00> : vector<256xf32>
    %45 = vector.multi_reduction <add>, %44, %cst_27 [0] : vector<48x256xf32> to vector<256xf32>
    %46 = vector.shape_cast %45 : vector<256xf32> to vector<1x256xf32>
    %47 = vector.shape_cast %46 : vector<1x256xf32> to vector<1x1x256xf32>
    %c0_28 = arith.constant 0 : index
    %c0_29 = arith.constant 0 : index
    %c0_30 = arith.constant 0 : index
    %48 = vector.load %arg5[%c0_28, %c0_29, %c0_30] : memref<1x1x256xf32, #tpu.memory_space<vmem>>, vector<1x1x256xf32>
    tpu.vector_store %arg5[%c0_28, %c0_29, %c0_30], %47 {strides = array<i32>} : memref<1x1x256xf32, #tpu.memory_space<vmem>>, vector<1x1x256xf32>,
    %49 = arith.mulf %44, %44 : vector<48x256xf32>
    %cst_31 = arith.constant dense<0.000000e+00> : vector<256xf32>
    %50 = vector.multi_reduction <add>, %49, %cst_31 [0] : vector<48x256xf32> to vector<256xf32>
    %51 = vector.shape_cast %50 : vector<256xf32> to vector<1x256xf32>
    %52 = vector.shape_cast %51 : vector<1x256xf32> to vector<1x1x256xf32>
    %c0_32 = arith.constant 0 : index
    %c0_33 = arith.constant 0 : index
    %c0_34 = arith.constant 0 : index
    %53 = vector.load %arg6[%c0_32, %c0_33, %c0_34] : memref<1x1x256xf32, #tpu.memory_space<vmem>>, vector<1x1x256xf32>
    tpu.vector_store %arg6[%c0_32, %c0_33, %c0_34], %52 {strides = array<i32>} : memref<1x1x256xf32, #tpu.memory_space<vmem>>, vector<1x1x256xf32>,
    %54 = vector.shape_cast %21 : vector<48x256xf32> to vector<2x3x8x256xf32>
    %55 = arith.truncf %54 : vector<2x3x8x256xf32> to vector<2x3x8x256xbf16>
    %c0_35 = arith.constant 0 : index
    %c0_36 = arith.constant 0 : index
    %c0_37 = arith.constant 0 : index
    %c0_38 = arith.constant 0 : index
    %56 = vector.load %arg4[%c0_35, %c0_36, %c0_37, %c0_38] : memref<2x3x8x256xbf16, #tpu.memory_space<vmem>>, vector<2x3x8x256xbf16>
    tpu.vector_store %arg4[%c0_35, %c0_36, %c0_37, %c0_38], %55 {strides = array<i32>} : memref<2x3x8x256xbf16, #tpu.memory_space<vmem>>, vector<2x3x8x256xbf16>,
    return
  }
  func.func @transform_0(%arg0: i32) -> (i32, i32, i32, i32) {
    %c0_i32 = arith.constant 0 : i32
    %c0_i32_0 = arith.constant 0 : i32
    %c0_i32_1 = arith.constant 0 : i32
    %c0_i32_2 = arith.constant 0 : i32
    return %arg0, %c0_i32, %c0_i32_0, %c0_i32_1 : i32, i32, i32, i32
  }
  func.func @transform_1(%arg0: i32) -> (i32, i32, i32) {
    %c0_i32 = arith.constant 0 : i32
    %c0_i32_0 = arith.constant 0 : i32
    %c0_i32_1 = arith.constant 0 : i32
    %c0_i32_2 = arith.constant 0 : i32
    return %c0_i32, %c0_i32_0, %c0_i32_1 : i32, i32, i32
  }
  func.func @transform_2(%arg0: i32) -> (i32, i32) {
    %c0_i32 = arith.constant 0 : i32
    %c0_i32_0 = arith.constant 0 : i32
    %c0_i32_1 = arith.constant 0 : i32
    return %c0_i32, %c0_i32_0 : i32, i32
  }
  func.func @transform_3(%arg0: i32) -> (i32, i32, i32, i32) {
    %c0_i32 = arith.constant 0 : i32
    %c0_i32_0 = arith.constant 0 : i32
    %c0_i32_1 = arith.constant 0 : i32
    %c0_i32_2 = arith.constant 0 : i32
    return %arg0, %c0_i32, %c0_i32_0, %c0_i32_1 : i32, i32, i32, i32
  }
  func.func @transform_4(%arg0: i32) -> (i32, i32, i32) {
    %c0_i32 = arith.constant 0 : i32
    %c0_i32_0 = arith.constant 0 : i32
    %c0_i32_1 = arith.constant 0 : i32
    return %arg0, %c0_i32, %c0_i32_0 : i32, i32, i32
  }
  func.func @transform_5(%arg0: i32) -> (i32, i32, i32) {
    %c0_i32 = arith.constant 0 : i32
    %c0_i32_0 = arith.constant 0 : i32
    %c0_i32_1 = arith.constant 0 : i32
    return %arg0, %c0_i32, %c0_i32_0 : i32, i32, i32
  }
}

module attributes {stable_mosaic.version = 11 : i64} {
  func.func @_tail_kernel(%arg0: i32, %arg1: memref<2x9x256xbf16, #tpu.memory_space<vmem>>, %arg2: memref<1x256xf32, #tpu.memory_space<vmem>>, %arg3: memref<1x256xf32, #tpu.memory_space<vmem>>, %arg4: memref<256x32xbf16, #tpu.memory_space<vmem>>, %arg5: memref<1x32xf32, #tpu.memory_space<vmem>>, %arg6: memref<1x32xf32, #tpu.memory_space<vmem>>, %arg7: memref<1x32xf32, #tpu.memory_space<vmem>>, %arg8: memref<2x32xf32, #tpu.memory_space<vmem>>) attributes {dimension_semantics = [#tpu.dimension_semantics<arbitrary>], iteration_bounds = array<i64: 1>, scalar_prefetch = 0 : i64, scratch_operands = 0 : i64, tpu.core_type = #tpu.core_type<tc>, window_params = [{pipeline_mode = #tpu.pipeline_mode<synchronous>, transform_indices = @transform_0, window_bounds = array<i64: 2, 9, 256>}, {pipeline_mode = #tpu.pipeline_mode<synchronous>, transform_indices = @transform_1, window_bounds = array<i64: 1, 256>}, {pipeline_mode = #tpu.pipeline_mode<synchronous>, transform_indices = @transform_2, window_bounds = array<i64: 1, 256>}, {pipeline_mode = #tpu.pipeline_mode<synchronous>, transform_indices = @transform_3, window_bounds = array<i64: 256, 32>}, {pipeline_mode = #tpu.pipeline_mode<synchronous>, transform_indices = @transform_4, window_bounds = array<i64: 1, 32>}, {pipeline_mode = #tpu.pipeline_mode<synchronous>, transform_indices = @transform_5, window_bounds = array<i64: 1, 32>}, {pipeline_mode = #tpu.pipeline_mode<synchronous>, transform_indices = @transform_6, window_bounds = array<i64: 1, 32>}, {pipeline_mode = #tpu.pipeline_mode<synchronous>, transform_indices = @transform_7, window_bounds = array<i64: 2, 32>}]} {
    %c0 = arith.constant 0 : index
    %c0_0 = arith.constant 0 : index
    %c0_1 = arith.constant 0 : index
    %0 = vector.load %arg1[%c0, %c0_0, %c0_1] : memref<2x9x256xbf16, #tpu.memory_space<vmem>>, vector<2x9x256xbf16>
    %1 = arith.extf %0 : vector<2x9x256xbf16> to vector<2x9x256xf32>
    %c0_2 = arith.constant 0 : index
    %c0_3 = arith.constant 0 : index
    %2 = vector.load %arg2[%c0_2, %c0_3] : memref<1x256xf32, #tpu.memory_space<vmem>>, vector<1x256xf32>
    %3 = vector.shape_cast %2 : vector<1x256xf32> to vector<1x1x256xf32>
    %4 = vector.broadcast %3 : vector<1x1x256xf32> to vector<2x9x256xf32>
    %5 = arith.mulf %1, %4 : vector<2x9x256xf32>
    %c0_4 = arith.constant 0 : index
    %c0_5 = arith.constant 0 : index
    %6 = vector.load %arg3[%c0_4, %c0_5] : memref<1x256xf32, #tpu.memory_space<vmem>>, vector<1x256xf32>
    %7 = vector.shape_cast %6 : vector<1x256xf32> to vector<1x1x256xf32>
    %8 = vector.broadcast %7 : vector<1x1x256xf32> to vector<2x9x256xf32>
    %9 = arith.addf %5, %8 : vector<2x9x256xf32>
    %cst = arith.constant 5.000000e-01 : f32
    %10 = vector.broadcast %cst : f32 to vector<2x9x256xf32>
    %11 = arith.mulf %10, %9 : vector<2x9x256xf32>
    %cst_6 = arith.constant 4.471500e-02 : f32
    %12 = vector.broadcast %cst_6 : f32 to vector<2x9x256xf32>
    %13 = arith.mulf %12, %9 : vector<2x9x256xf32>
    %14 = arith.mulf %13, %9 : vector<2x9x256xf32>
    %15 = arith.mulf %14, %9 : vector<2x9x256xf32>
    %16 = arith.addf %9, %15 : vector<2x9x256xf32>
    %cst_7 = arith.constant 0.797884583 : f32
    %17 = vector.broadcast %cst_7 : f32 to vector<2x9x256xf32>
    %18 = arith.mulf %17, %16 : vector<2x9x256xf32>
    %19 = math.tanh %18 : vector<2x9x256xf32>
    %cst_8 = arith.constant 1.000000e+00 : f32
    %20 = vector.broadcast %cst_8 : f32 to vector<2x9x256xf32>
    %21 = arith.addf %20, %19 : vector<2x9x256xf32>
    %22 = arith.mulf %11, %21 : vector<2x9x256xf32>
    %cst_9 = arith.constant dense<0.000000e+00> : vector<2x256xf32>
    %23 = vector.multi_reduction <add>, %22, %cst_9 [1] : vector<2x9x256xf32> to vector<2x256xf32>
    %cst_10 = arith.constant 0.111111112 : f32
    %24 = vector.broadcast %cst_10 : f32 to vector<2x256xf32>
    %25 = arith.mulf %23, %24 : vector<2x256xf32>
    %26 = arith.truncf %25 : vector<2x256xf32> to vector<2x256xbf16>
    %c0_11 = arith.constant 0 : index
    %c0_12 = arith.constant 0 : index
    %27 = vector.load %arg4[%c0_11, %c0_12] : memref<256x32xbf16, #tpu.memory_space<vmem>>, vector<256x32xbf16>
    %cst_13 = arith.constant dense<0.000000e+00> : vector<2x32xf32>
    %28 = tpu.matmul %26, %27, %cst_13 {dimension_numbers = #tpu.dot_dimension_numbers<[1], [0], [0], [1], [0, 0, 1, 1], [], []>} : vector<2x256xbf16>, vector<256x32xbf16>, vector<2x32xf32> -> vector<2x32xf32>
    %c0_14 = arith.constant 0 : index
    %c0_15 = arith.constant 0 : index
    %29 = vector.load %arg5[%c0_14, %c0_15] : memref<1x32xf32, #tpu.memory_space<vmem>>, vector<1x32xf32>
    %30 = vector.broadcast %29 : vector<1x32xf32> to vector<2x32xf32>
    %31 = arith.addf %28, %30 : vector<2x32xf32>
    %cst_16 = arith.constant dense<0.000000e+00> : vector<2xf32>
    %32 = vector.multi_reduction <add>, %31, %cst_16 [1] : vector<2x32xf32> to vector<2xf32>
    %33 = vector.shape_cast %32 : vector<2xf32> to vector<2x1xf32>
    %cst_17 = arith.constant 3.200000e+01 : f32
    %34 = vector.broadcast %cst_17 : f32 to vector<2x1xf32>
    %35 = arith.divf %33, %34 : vector<2x1xf32>
    %36 = vector.broadcast %35 : vector<2x1xf32> to vector<2x32xf32>
    %37 = arith.subf %31, %36 : vector<2x32xf32>
    %38 = arith.mulf %37, %37 : vector<2x32xf32>
    %cst_18 = arith.constant dense<0.000000e+00> : vector<2xf32>
    %39 = vector.multi_reduction <add>, %38, %cst_18 [1] : vector<2x32xf32> to vector<2xf32>
    %40 = vector.shape_cast %39 : vector<2xf32> to vector<2x1xf32>
    %cst_19 = arith.constant 3.200000e+01 : f32
    %41 = vector.broadcast %cst_19 : f32 to vector<2x1xf32>
    %42 = arith.divf %40, %41 : vector<2x1xf32>
    %43 = vector.broadcast %35 : vector<2x1xf32> to vector<2x32xf32>
    %44 = arith.subf %31, %43 : vector<2x32xf32>
    %cst_20 = arith.constant 9.99999974E-6 : f32
    %45 = vector.broadcast %cst_20 : f32 to vector<2x1xf32>
    %46 = arith.addf %42, %45 : vector<2x1xf32>
    %47 = math.rsqrt %46 : vector<2x1xf32>
    %48 = vector.broadcast %47 : vector<2x1xf32> to vector<2x32xf32>
    %49 = arith.mulf %44, %48 : vector<2x32xf32>
    %c0_21 = arith.constant 0 : index
    %c0_22 = arith.constant 0 : index
    %50 = vector.load %arg6[%c0_21, %c0_22] : memref<1x32xf32, #tpu.memory_space<vmem>>, vector<1x32xf32>
    %51 = vector.broadcast %50 : vector<1x32xf32> to vector<2x32xf32>
    %52 = arith.mulf %49, %51 : vector<2x32xf32>
    %c0_23 = arith.constant 0 : index
    %c0_24 = arith.constant 0 : index
    %53 = vector.load %arg7[%c0_23, %c0_24] : memref<1x32xf32, #tpu.memory_space<vmem>>, vector<1x32xf32>
    %54 = vector.broadcast %53 : vector<1x32xf32> to vector<2x32xf32>
    %55 = arith.addf %52, %54 : vector<2x32xf32>
    %c0_25 = arith.constant 0 : index
    %c0_26 = arith.constant 0 : index
    %56 = vector.load %arg8[%c0_25, %c0_26] : memref<2x32xf32, #tpu.memory_space<vmem>>, vector<2x32xf32>
    tpu.vector_store %arg8[%c0_25, %c0_26], %55 {strides = array<i32>} : memref<2x32xf32, #tpu.memory_space<vmem>>, vector<2x32xf32>,
    return
  }
  func.func @transform_0(%arg0: i32) -> (i32, i32, i32) {
    %c0_i32 = arith.constant 0 : i32
    %c0_i32_0 = arith.constant 0 : i32
    %c0_i32_1 = arith.constant 0 : i32
    %c0_i32_2 = arith.constant 0 : i32
    return %c0_i32, %c0_i32_0, %c0_i32_1 : i32, i32, i32
  }
  func.func @transform_1(%arg0: i32) -> (i32, i32) {
    %c0_i32 = arith.constant 0 : i32
    %c0_i32_0 = arith.constant 0 : i32
    %c0_i32_1 = arith.constant 0 : i32
    return %c0_i32, %c0_i32_0 : i32, i32
  }
  func.func @transform_2(%arg0: i32) -> (i32, i32) {
    %c0_i32 = arith.constant 0 : i32
    %c0_i32_0 = arith.constant 0 : i32
    %c0_i32_1 = arith.constant 0 : i32
    return %c0_i32, %c0_i32_0 : i32, i32
  }
  func.func @transform_3(%arg0: i32) -> (i32, i32) {
    %c0_i32 = arith.constant 0 : i32
    %c0_i32_0 = arith.constant 0 : i32
    %c0_i32_1 = arith.constant 0 : i32
    return %c0_i32, %c0_i32_0 : i32, i32
  }
  func.func @transform_4(%arg0: i32) -> (i32, i32) {
    %c0_i32 = arith.constant 0 : i32
    %c0_i32_0 = arith.constant 0 : i32
    %c0_i32_1 = arith.constant 0 : i32
    return %c0_i32, %c0_i32_0 : i32, i32
  }
  func.func @transform_5(%arg0: i32) -> (i32, i32) {
    %c0_i32 = arith.constant 0 : i32
    %c0_i32_0 = arith.constant 0 : i32
    %c0_i32_1 = arith.constant 0 : i32
    return %c0_i32, %c0_i32_0 : i32, i32
  }
  func.func @transform_6(%arg0: i32) -> (i32, i32) {
    %c0_i32 = arith.constant 0 : i32
    %c0_i32_0 = arith.constant 0 : i32
    %c0_i32_1 = arith.constant 0 : i32
    return %c0_i32, %c0_i32_0 : i32, i32
  }
  func.func @transform_7(%arg0: i32) -> (i32, i32) {
    %c0_i32 = arith.constant 0 : i32
    %c0_i32_0 = arith.constant 0 : i32
    %c0_i32_1 = arith.constant 0 : i32
    return %c0_i32, %c0_i32_0 : i32, i32
  }
}

</mosaic_0001>

<bundles_post_ra>
// kernel: clinical_image_encoder.7
= control target key start
LH: loop header
LB: loop body
LE: loop exit
PB: predicated region body
PF: predicated region fallthrough
CT: control target
= control target key end

     0   :  { %s1191_s12 = smov 0   ;;  %s1692_s0 = inlined_call_operand.vmem [shape: bf16[8,8,8,64], index: 0, kind: input, shape index: {}]   ;;  %s1693_s1 = inlined_call_operand.vmem [shape: f32[1,64], index: 1, kind: input, shape index: {}]   ;;  %s1694_s2 = inlined_call_operand.vmem [shape: f32[1,64], index: 2, kind: input, shape index: {}]   ;;  %s1695_s3 = inlined_call_operand.vmem [shape: bf16[2,7,7,64], index: 3, kind: output, shape index: {}]  }
   0x1 LB: > { %s1197_s13 = sadd.s32 4294967295, %s1169_s12   ;;  %p944_p0 = scmp.ge.s32.totalorder %s1169_s12, 1  ;;  %s1169_s12 = sphi %s1191_s12, %s13_s12  }
   0x2   : > { %p139_p1 = scmp.lt.s32.totalorder %s1169_s12, 3 }
   0x4   : > { %p140_p2 = pnand %p944_p0, %p139_p1 }
   0x6   : > { %143 = sbr.rel (%p140_p2) target bundleno = 154 (0x9a), region = 32 }
   0xb   : > { %s945_s14 = sshll.u32 %s1197_s13, 2  ;;  %v1210_v0 = vld [vmem:[%s1693_s1] ss:$0 sm:$0xff]  ;;  %p171_p4 = scmp.lt.s32.totalorder %s1197_s13, 1  ;;  %vm861_vm0 = vcmask 519168  }
   0xc   : > { %p165_p3 = scmp.lt.s32.totalorder %s945_s14, 7  ;;  %v1219_v9 = vld [vmem:[%s1694_s2] ss:$0 sm:$0xff]  ;;  %vm862_vm1 = vsmask.f32 3328 }
   0xd   : > { %s1729_s13 = smov (!%p171_p4, %s1197_s13), 1  ;;  %vm1657_vm2 = vmand %vm861_vm0, %vm862_vm1 }
   0xe   : > { %s1727_s14 = smov (!%p165_p3, %s945_s14), 7  ;;  %s1076_s23 = smul.u32 28, %s1729_s13 }
   0xf   : > { %s986_s15 = sshll.u32 %s1727_s14, 5 }
  0x10   : > { %s1205_s18 = scalar_lea.vmem %s1692_s0, %s986_s15  ;;  %s1642_s26 = scalar_lea.vmem %s1695_s3, %s1076_s23 }
  0x11   : > { %v988_v1 = vld [vmem:[%s1205_s18] sm:$0xff]   ;;  %v1059_v2 = vld [vmem:[%s1205_s18 + $0x8] sm:$0xff]   ;;  %v1060_v3 = vld [vmem:[%s1205_s18 + $0x10] sm:$0xff]  }
  0x12   : > { %v989_v4 = vunpack.c.l.bf16 %v988_v1  ;;  %v990_v5 = vunpack.c.h.bf16 %v988_v1  ;;  %v993_v6 = vunpack.c.l.bf16 %v1059_v2  ;;  %v994_v7 = vunpack.c.h.bf16 %v1059_v2  ;;  %v184_v8 = vld [vmem:[%s1205_s18 + $0x18] sm:$0xf]  ;;  %v1061_v28 = vld [vmem:[%s1205_s18 + $0x20] sm:$0xff]   ;;  %v1062_v39 = vld [vmem:[%s1205_s18 + $0x28] sm:$0xff]  }
  0x13   : > { %v997_v10 = vunpack.c.l.bf16 %v1060_v3  ;;  %v998_v11 = vunpack.c.h.bf16 %v1060_v3  ;;  %v191_v12 = vunpack.c.l.bf16 %v184_v8  ;;  %v1001_v42 = vunpack.c.l.bf16 %v1061_v28  ;;  %v1063_v43 = vld [vmem:[%s1205_s18 + $0x30] sm:$0xff]   ;;  %v955_v47 = vld [vmem:[%s1205_s18 + $0x38] sm:$0xf] }
  0x14   : > { %v195_v13 = vmul.f32 %v1210_v0, %v989_v4  ;;  %v196_v14 = vmul.f32 %v1210_v0, %v990_v5  ;;  %v197_v15 = vmul.f32 %v1210_v0, %v993_v6  ;;  %v198_v16 = vmul.f32 %v1210_v0, %v994_v7 }
  0x15   : > { %v199_v17 = vmul.f32 %v1210_v0, %v997_v10  ;;  %v200_v18 = vmul.f32 %v1210_v0, %v998_v11  ;;  %v201_v19 = vmul.f32 %v1210_v0, %v191_v12  ;;  %v1002_v49 = vunpack.c.h.bf16 %v1061_v28 }
  0x16   : > { %v205_v20 = vadd.f32 %v1219_v9, %v195_v13  ;;  %v206_v21 = vadd.f32 %v1219_v9, %v196_v14  ;;  %v207_v22 = vadd.f32 %v1219_v9, %v197_v15  ;;  %v208_v23 = vadd.f32 %v1219_v9, %v198_v16 }
  0x17   : > { %v209_v24 = vadd.f32 %v1219_v9, %v199_v17  ;;  %v1234_v25 = vadd.f32 %v1219_v9, %v200_v18  ;;  %v1237_v26 = vadd.f32 %v1219_v9, %v201_v19  ;;  %v1005_v50 = vunpack.c.l.bf16 %v1062_v39 }
  0x18   : > { %v219_v27 = vmul.f32 0.044715, %v205_v20  ;;  %v220_v29 = vmul.f32 0.044715, %v206_v21  ;;  %v221_v30 = vmul.f32 0.044715, %v207_v22  ;;  %v1006_v51 = vunpack.c.h.bf16 %v1062_v39 }
  0x19   : > { %v222_v31 = vmul.f32 0.044715, %v208_v23  ;;  %v223_v32 = vmul.f32 0.044715, %v209_v24  ;;  %v224_v33 = vmul.f32 0.044715, %v1234_v25  ;;  %v1009_v54 = vunpack.c.l.bf16 %v1063_v43 }
  0x1a   : > { %v225_v34 = vmul.f32 0.044715, %v1237_v26  ;;  %v226_v35 = vmul.f32 %v219_v27, %v205_v20  ;;  %v227_v36 = vmul.f32 %v220_v29, %v206_v21  ;;  %v228_v37 = vmul.f32 %v221_v30, %v207_v22 }
  0x1b   : > { %v229_v38 = vmul.f32 %v222_v31, %v208_v23  ;;  %v230_v40 = vmul.f32 %v223_v32, %v209_v24  ;;  %v231_v44 = vmul.f32 %v224_v33, %v1234_v25  ;;  %v1247_v52 = vmul.f32 0.5, %v205_v20 }
  0x1c   : > { %v233_v41 = vmul.f32 %v226_v35, %v205_v20  ;;  %v232_v45 = vmul.f32 %v225_v34, %v1237_v26  ;;  %v234_v46 = vmul.f32 %v227_v36, %v206_v21  ;;  %v235_v48 = vmul.f32 %v228_v37, %v207_v22 }
  0x1d   : > { %v236_v53 = vmul.f32 %v229_v38, %v208_v23  ;;  %v1010_v55 = vunpack.c.h.bf16 %v1063_v43  ;;  %v237_v56 = vmul.f32 %v230_v40, %v209_v24  ;;  %v289_v58 = vunpack.c.l.bf16 %v955_v47 }
  0x1e   : > { %v240_v57 = vadd.f32 %v233_v41, %v205_v20  ;;  %v290_v59 = vmul.f32 %v1210_v0, %v1001_v42  ;;  %v1250_v60 = vmul.f32 0.5, %v206_v21  ;;  %v238_v61 = vmul.f32 %v231_v44, %v1234_v25 }
  0x1f   : > { %v239_v62 = vmul.f32 %v232_v45, %v1237_v26  ;;  %v241_v63 = vadd.f32 %v234_v46, %v206_v21  ;;  %v242_v1 = vadd.f32 %v235_v48, %v207_v22  ;;  %v291_v2 = vmul.f32 %v1210_v0, %v1002_v49 }
  0x20   : > { %v292_v3 = vmul.f32 %v1210_v0, %v1005_v50  ;;  %v293_v4 = vmul.f32 %v1210_v0, %v1006_v51  ;;  %v1257_v5 = vmul.f32 0.5, %v207_v22  ;;  %v243_v6 = vadd.f32 %v236_v53, %v208_v23 }
  0x21   : > { %v294_v7 = vmul.f32 %v1210_v0, %v1009_v54  ;;  %v295_v8 = vmul.f32 %v1210_v0, %v1010_v55  ;;  %v244_v10 = vadd.f32 %v237_v56, %v209_v24  ;;  %v247_v11 = vmul.f32 0.7978846, %v240_v57 }
  0x22   : > { %v296_v12 = vmul.f32 %v1210_v0, %v289_v58  ;;  %v297_v13 = vadd.f32 %v1219_v9, %v290_v59  ;;  %v245_v14 = vadd.f32 %v238_v61, %v1234_v25  ;;  %v248_v15 = vmul.f32 0.7978846, %v241_v63 }
  0x23   : > { %v298_v16 = vadd.f32 %v1219_v9, %v291_v2  ;;  %v299_v17 = vadd.f32 %v1219_v9, %v292_v3  ;;  %v246_v18 = vadd.f32 %v239_v62, %v1237_v26  ;;  %v1267_v19 = vmul.f32 0.7978846, %v242_v1 }
  0x24   : > { %v300_v20 = vadd.f32 %v1219_v9, %v293_v4  ;;  %v301_v21 = vadd.f32 %v1219_v9, %v294_v7  ;;  %v1271_v22 = vmul.f32 0.5, %v208_v23  ;;  %v1273_v27 = vmul.f32 0.5, %v209_v24 }
  0x25   : > { %v1275_v28 = vmul.f32 0.7978846, %v243_v6  ;;  %v302_v29 = vadd.f32 %v1219_v9, %v295_v8  ;;  %v1278_v30 = vmul.f32 0.7978846, %v244_v10  ;;  %1087 = vtanh.f32 %v247_v11 }
  0x26   : > { %v1281_v31 = vadd.f32 %v1219_v9, %v296_v12  ;;  %v311_v32 = vmul.f32 0.044715, %v297_v13  ;;  %v1283_v33 = vmul.f32 0.7978846, %v245_v14  ;;  %1089 = vtanh.f32 %v248_v15  ;;  %v1064_v15 = vld [vmem:[%s1205_s18 + $0x40] sm:$0xff]  }
  0x27   : > { %v312_v34 = vmul.f32 0.044715, %v298_v16  ;;  %v313_v35 = vmul.f32 0.044715, %v299_v17  ;;  %v253_v23 = vmul.f32 0.7978846, %v246_v18  ;;  %1091 = vtanh.f32 %v1267_v19 }
  0x28   : > { %v314_v24 = vmul.f32 0.044715, %v300_v20  ;;  %v315_v36 = vmul.f32 0.044715, %v301_v21  ;;  %v1287_v37 = vmul.f32 0.5, %v1234_v25  ;;  %v1290_v38 = vmul.f32 0.5, %v1237_v26 }
  0x29   : > { %1093 = vtanh.f32 %v1275_v28  ;;  %v316_v39 = vmul.f32 0.044715, %v302_v29  ;;  %v317_v40 = vmul.f32 0.044715, %v1281_v31  ;;  %v318_v41 = vmul.f32 %v311_v32, %v297_v13 }
  0x2a   : > { %1701 = vst [vmem:[#allocation2_spill] sm:$0xff] %v1287_v37  ;;  %1095 = vtanh.f32 %v1278_v30  ;;  %v319_v42 = vmul.f32 %v312_v34, %v298_v16  ;;  %v1296_v43 = vmul.f32 0.5, %v297_v13  ;;  %v320_v44 = vmul.f32 %v313_v35, %v299_v17 }
  0x2b   : > { %1097 = vtanh.f32 %v1283_v33  ;;  %v321_v45 = vmul.f32 %v314_v24, %v300_v20  ;;  %v1088_v25 = vpop.eup %1087  ;;  %v1298_v46 = vmul.f32 0.5, %v298_v16  ;;  %v322_v26 = vmul.f32 %v315_v36, %v301_v21  ;;  %v1065_v36 = vld [vmem:[%s1205_s18 + $0x48] sm:$0xff]  }
  0x2c   : > { %1099 = vtanh.f32 %v253_v23  ;;  %v323_v47 = vmul.f32 %v316_v39, %v302_v29  ;;  %v1090_v48 = vpop.eup %1089  ;;  %v1300_v49 = vmul.f32 0.5, %v299_v17  ;;  %v1302_v50 = vmul.f32 0.5, %v300_v20  ;;  %v962_v39 = vld [vmem:[%s1205_s18 + $0x58] sm:$0xf] }
  0x2d   : > { %v325_v51 = vmul.f32 %v318_v41, %v297_v13  ;;  %v326_v53 = vmul.f32 %v319_v42, %v298_v16  ;;  %v1092_v54 = vpop.eup %1091  ;;  %v324_v55 = vmul.f32 %v317_v40, %v1281_v31  ;;  %v327_v56 = vmul.f32 %v320_v44, %v299_v17 }
  0x2e   : > { %v328_v57 = vmul.f32 %v321_v45, %v300_v20  ;;  %v329_v58 = vmul.f32 %v322_v26, %v301_v21  ;;  %v1305_v61 = vmul.f32 0.5, %v301_v21  ;;  %v330_v62 = vmul.f32 %v323_v47, %v302_v29  ;;  %v1066_v45 = vld [vmem:[%s1205_s18 + $0x50] sm:$0xff]  }
  0x2f   : > { %v1094_v59 = vpop.eup %1093  ;;  %v332_v63 = vadd.f32 %v325_v51, %v297_v13  ;;  %v333_v1 = vadd.f32 %v326_v53, %v298_v16  ;;  %v261_v3 = vadd.f32 1.0, %v1088_v25  ;;  %v262_v4 = vadd.f32 1.0, %v1090_v48 }
  0x30   : > { %v1096_v2 = vpop.eup %1095  ;;  %v334_v6 = vadd.f32 %v327_v56, %v299_v17  ;;  %v335_v7 = vadd.f32 %v328_v57, %v300_v20  ;;  %v1307_v10 = vmul.f32 0.5, %v302_v29  ;;  %v336_v11 = vadd.f32 %v329_v58, %v301_v21 }
  0x31   : > { %v1098_v8 = vpop.eup %1097  ;;  %v339_v12 = vmul.f32 0.7978846, %v332_v63  ;;  %v340_v14 = vmul.f32 0.7978846, %v333_v1  ;;  %v263_v32 = vadd.f32 1.0, %v1092_v54  ;;  %v264_v34 = vadd.f32 1.0, %v1094_v59 }
  0x32   : > { %v1100_v18 = vpop.eup %1099  ;;  %v331_v13 = vmul.f32 %v324_v55, %v1281_v31  ;;  %v341_v16 = vmul.f32 0.7978846, %v334_v6  ;;  %v1312_v35 = vmul.f32 0.5, %v1281_v31  ;;  %v337_v17 = vadd.f32 %v330_v62, %v302_v29 }
  0x33   : > { %v342_v20 = vmul.f32 0.7978846, %v335_v7  ;;  %1101 = vtanh.f32 %v339_v12  ;;  %v1315_v21 = vmul.f32 %v261_v3, %v1247_v52  ;;  %v1318_v23 = vmul.f32 %v262_v4, %v1250_v60 }
  0x34   : > { %1103 = vtanh.f32 %v340_v14  ;;  %v1013_v24 = vunpack.c.l.bf16 %v1064_v15  ;;  %v265_v40 = vadd.f32 1.0, %v1096_v2  ;;  %v266_v41 = vadd.f32 1.0, %v1098_v8 }
  0x35   : > { %v267_v42 = vadd.f32 1.0, %v1100_v18  ;;  %v343_v44 = vmul.f32 0.7978846, %v336_v11  ;;  %v1324_v25 = vmul.f32 %v263_v32, %v1257_v5  ;;  %v1327_v29 = vmul.f32 %v264_v34, %v1271_v22 }
  0x36   : > { %v338_v52 = vadd.f32 %v331_v13, %v1281_v31  ;;  %1105 = vtanh.f32 %v341_v16  ;;  %v344_v60 = vmul.f32 0.7978846, %v337_v17  ;;  %v1014_v26 = vunpack.c.h.bf16 %v1064_v15 }
  0x37   : > { %1107 = vtanh.f32 %v342_v20  ;;  %v1017_v47 = vunpack.c.l.bf16 %v1065_v36  ;;  %v1018_v48 = vunpack.c.h.bf16 %v1065_v36  ;;  %v1021_v51 = vunpack.c.l.bf16 %v1066_v45 }
  0x38   : > { %v1022_v53 = vunpack.c.h.bf16 %v1066_v45  ;;  %v416_v54 = vunpack.c.l.bf16 %v962_v39  ;;  %v1331_v56 = vmul.f32 %v265_v40, %v1273_v27  ;;  %v1334_v57 = vmul.f32 %v266_v41, %v1287_v37 }
  0x39   : > { %v1102_v55 = vpop.eup %1101  ;;  %v1337_v58 = vmul.f32 %v267_v42, %v1290_v38  ;;  %1109 = vtanh.f32 %v343_v44  ;;  %v345_v59 = vmul.f32 0.7978846, %v338_v52  ;;  %v381_v62 = vrot.slane %v1315_v21, 1 }
  0x3a   : > { %v1104_v31 = vpop.eup %1103  ;;  %v382_v63 = vrot.slane %v1318_v23, 1  ;;  %v417_v1 = vmul.f32 %v1210_v0, %v1013_v24  ;;  %1111 = vtanh.f32 %v344_v60  ;;  %v353_v2 = vadd.f32 1.0, %v1102_v55 }
  0x3b   : > { %v418_v3 = vmul.f32 %v1210_v0, %v1014_v26  ;;  %v419_v4 = vmul.f32 %v1210_v0, %v1017_v47  ;;  %v420_v7 = vmul.f32 %v1210_v0, %v1018_v48  ;;  %v421_v38 = vmul.f32 %v1210_v0, %v1021_v51 }
  0x3c   : > { %v1106_v6 = vpop.eup %1105  ;;  %v422_v8 = vmul.f32 %v1210_v0, %v1022_v53  ;;  %v423_v11 = vmul.f32 %v1210_v0, %v416_v54  ;;  %v354_v14 = vadd.f32 1.0, %v1104_v31  ;;  %v383_v15 = vrot.slane %v1324_v25, 1 }
  0x3d   : > { %v1108_v12 = vpop.eup %1107  ;;  %1113 = vtanh.f32 %v345_v59  ;;  %v424_v16 = vadd.f32 %v1219_v9, %v417_v1  ;;  %v355_v20 = vadd.f32 1.0, %v1106_v6  ;;  %v360_v24 = vmul.f32 %v353_v2, %v1296_v43 }
  0x3e   : > { %v425_v36 = vadd.f32 %v1219_v9, %v418_v3  ;;  %v426_v39 = vadd.f32 %v1219_v9, %v419_v4  ;;  %v427_v40 = vadd.f32 %v1219_v9, %v420_v7  ;;  %v428_v41 = vadd.f32 %v1219_v9, %v421_v38 }
  0x3f   : > { %v1110_v17 = vpop.eup %1109  ;;  %v1360_v42 = vadd.f32 %v1219_v9, %v422_v8  ;;  %v1363_v44 = vadd.f32 %v1219_v9, %v423_v11  ;;  %v356_v52 = vadd.f32 1.0, %v1108_v12  ;;  %v361_v60 = vmul.f32 %v354_v14, %v1298_v46 }
  0x40   : > { %v1112_v45 = vpop.eup %1111  ;;  %v1366_v26 = vmul.f32 0.5, %v424_v16  ;;  %v1368_v43 = vmul.f32 0.5, %v425_v36  ;;  %v357_v47 = vadd.f32 1.0, %v1110_v17  ;;  %v1370_v48 = vmul.f32 0.5, %v426_v39 }
  0x41   : > { %v1372_v51 = vmul.f32 0.5, %v427_v40  ;;  %v438_v53 = vmul.f32 0.044715, %v424_v16  ;;  %v1375_v54 = vmul.f32 %v355_v20, %v1300_v49  ;;  %v367_v55 = vmax.f32 %v1315_v21, %v360_v24 }
  0x42   : > { %v439_v31 = vmul.f32 0.044715, %v425_v36  ;;  %v440_v59 = vmul.f32 0.044715, %v426_v39  ;;  %v358_v2 = vadd.f32 1.0, %v1112_v45  ;;  %v1378_v46 = vmul.f32 0.5, %v428_v41 }
  0x43   : > { %1702 = vst [vmem:[#allocation3_spill] sm:$0xff] %v1375_v54  ;;  %v1114_v1 = vpop.eup %1113  ;;  %v441_v3 = vmul.f32 0.044715, %v427_v40  ;;  %v442_v4 = vmul.f32 0.044715, %v428_v41  ;;  %v1381_v6 = vmul.f32 %v356_v52, %v1302_v50  ;;  %v445_v49 = vmul.f32 %v438_v53, %v424_v16  ;;  %v1067_v53 = vld [vmem:[%s1205_s18 + $0x60] sm:$0xff]  }
  0x44   : > { %v443_v7 = vmul.f32 0.044715, %v1360_v42  ;;  %v444_v38 = vmul.f32 0.044715, %v1363_v44  ;;  %v368_v8 = vmax.f32 %v1318_v23, %v361_v60  ;;  %v446_v11 = vmul.f32 %v439_v31, %v425_v36 }
  0x45   : > { %1703 = vst [vmem:[#allocation4_spill] sm:$0xff] %v1381_v6  ;;  %v447_v12 = vmul.f32 %v440_v59, %v426_v39  ;;  %v448_v14 = vmul.f32 %v441_v3, %v427_v40  ;;  %v449_v17 = vmul.f32 %v442_v4, %v428_v41  ;;  %v452_v45 = vmul.f32 %v445_v49, %v424_v16  ;;  %v1068_v4 = vld [vmem:[%s1205_s18 + $0x68] sm:$0xff]  }
  0x46   : > { %v450_v20 = vmul.f32 %v443_v7, %v1360_v42  ;;  %v451_v24 = vmul.f32 %v444_v38, %v1363_v44  ;;  %v359_v50 = vadd.f32 1.0, %v1114_v1  ;;  %v1389_v52 = vmul.f32 0.5, %v1360_v42 }
  0x47   : > { %v453_v13 = vmul.f32 %v446_v11, %v425_v36  ;;  %v454_v34 = vmul.f32 %v447_v12, %v426_v39  ;;  %v1393_v60 = vmul.f32 %v357_v47, %v1305_v61  ;;  %v455_v31 = vmul.f32 %v448_v14, %v427_v40  ;;  %v1069_v12 = vld [vmem:[%s1205_s18 + $0x70] sm:$0xff]  }
  0x48   : > { %v456_v59 = vmul.f32 %v449_v17, %v428_v41  ;;  %v459_v3 = vadd.f32 %v452_v45, %v424_v16  ;;  %v1397_v7 = vmul.f32 %v358_v2, %v1307_v10  ;;  %v369_v1 = vmax.f32 %v1324_v25, %v1375_v54  ;;  %v969_v45 = vld [vmem:[%s1205_s18 + $0x78] sm:$0xf] }
  0x49   : > { %1704 = vst [vmem:[#allocation5_spill] sm:$0xff] %v1393_v60  ;;  %v1403_v38 = vmax.f32 %v367_v55, %v381_v62  ;;  %v460_v49 = vadd.f32 %v453_v13, %v425_v36  ;;  %v370_v61 = vmax.f32 %v1327_v29, %v1381_v6  ;;  %v457_v47 = vmul.f32 %v450_v20, %v1360_v42 }
  0x4a   : > { %1705 = vst [vmem:[#allocation6_spill] sm:$0xff] %v1397_v7  ;;  %v458_v11 = vmul.f32 %v451_v24, %v1363_v44  ;;  %v1025_v16 = vunpack.c.l.bf16 %v1067_v53  ;;  %v461_v14 = vadd.f32 %v454_v34, %v426_v39  ;;  %v466_v10 = vmul.f32 0.7978846, %v459_v3 }
  0x4b   : > { %v1026_v2 = vunpack.c.h.bf16 %v1067_v53  ;;  %v1029_v17 = vunpack.c.l.bf16 %v1068_v4  ;;  %v1413_v21 = vmax.f32 %v368_v8, %v382_v63  ;;  %v1416_v62 = vmul.f32 0.5, %v1363_v44 }
  0x4c   : > { %v462_v13 = vadd.f32 %v455_v31, %v427_v40  ;;  %v463_v36 = vadd.f32 %v456_v59, %v428_v41  ;;  %v467_v55 = vmul.f32 0.7978846, %v460_v49  ;;  %v1030_v20 = vunpack.c.h.bf16 %v1068_v4 }
  0x4d   : > { %v1033_v32 = vunpack.c.l.bf16 %v1069_v12  ;;  %v1034_v24 = vunpack.c.h.bf16 %v1069_v12  ;;  %v464_v18 = vadd.f32 %v457_v47, %v1360_v42  ;;  %v465_v34 = vadd.f32 %v458_v11, %v1363_v44 }
  0x4e   : > { %v515_v39 = vunpack.c.l.bf16 %v969_v45  ;;  %v516_v53 = vmul.f32 %v1210_v0, %v1025_v16  ;;  %v468_v3 = vmul.f32 0.7978846, %v461_v14  ;;  %1115 = vtanh.f32 %v466_v10 }
  0x4f   : > { %v517_v23 = vmul.f32 %v1210_v0, %v1026_v2  ;;  %v518_v63 = vmul.f32 %v1210_v0, %v1029_v17  ;;  %v366_v40 = vmul.f32 %v359_v50, %v1312_v35  ;;  %v469_v41 = vmul.f32 0.7978846, %v462_v13 }
  0x50   : > { %v519_v8 = vmul.f32 %v1210_v0, %v1030_v20  ;;  %v520_v31 = vmul.f32 %v1210_v0, %v1033_v32  ;;  %v371_v42 = vmax.f32 %v1331_v56, %v1393_v60  ;;  %v470_v44 = vmul.f32 0.7978846, %v463_v36 }
  0x51   : > { %1117 = vtanh.f32 %v467_v55  ;;  %v521_v59 = vmul.f32 %v1210_v0, %v1034_v24  ;;  %v372_v4 = vmax.f32 %v1334_v57, %v1397_v7  ;;  %v471_v49 = vmul.f32 0.7978846, %v464_v18 }
  0x52   : > { %v522_v47 = vmul.f32 %v1210_v0, %v515_v39  ;;  %v523_v35 = vadd.f32 %v1219_v9, %v516_v53  ;;  %v472_v50 = vmul.f32 0.7978846, %v465_v34  ;;  %1119 = vtanh.f32 %v468_v3 }
  0x53   : > { %v524_v11 = vadd.f32 %v1219_v9, %v517_v23  ;;  %v525_v32 = vadd.f32 %v1219_v9, %v518_v63  ;;  %v373_v16 = vmax.f32 %v1337_v58, %v366_v40  ;;  %1121 = vtanh.f32 %v469_v41 }
  0x54   : > { %v526_v12 = vadd.f32 %v1219_v9, %v519_v8  ;;  %v1438_v14 = vadd.f32 %v1219_v9, %v520_v31  ;;  %v1116_v10 = vpop.eup %1115  ;;  %v1442_v18 = vmax.f32 %v369_v1, %v383_v15  ;;  %v1706_v2 = vrot.slane %v1327_v29, 1 }
  0x55   : > { %1123 = vtanh.f32 %v470_v44  ;;  %v1449_v45 = vadd.f32 %v1219_v9, %v521_v59  ;;  %v1707_v13 = vrot.slane %v1331_v56, 1  ;;  %v1456_v55 = vadd.f32 %v1219_v9, %v522_v47 }
  0x56   : > { %v1446_v17 = vmax.f32 %v370_v61, %v1706_v2  ;;  %1125 = vtanh.f32 %v471_v49  ;;  %v537_v20 = vmul.f32 0.044715, %v523_v35  ;;  %v1708_v15 = vrot.slane %v1334_v57, 1 }
  0x57   : > { %v1453_v36 = vmax.f32 %v371_v42, %v1707_v13  ;;  %v1118_v25 = vpop.eup %1117  ;;  %1127 = vtanh.f32 %v472_v50  ;;  %v538_v29 = vmul.f32 0.044715, %v524_v11  ;;  %v539_v61 = vmul.f32 0.044715, %v525_v32 }
  0x58   : > { %v1460_v1 = vmax.f32 %v372_v4, %v1708_v15  ;;  %v1709_v24 = vrot.slane %v1337_v58, 1  ;;  %v480_v56 = vadd.f32 1.0, %v1116_v10  ;;  %v540_v39 = vmul.f32 0.044715, %v526_v12  ;;  %v1120_v3 = vpop.eup %1119 }
  0x59   : > { %v541_v53 = vmul.f32 0.044715, %v1438_v14  ;;  %v1467_v23 = vmul.f32 0.5, %v523_v35  ;;  %v1469_v63 = vmul.f32 0.5, %v524_v11  ;;  %v1471_v40 = vmul.f32 0.5, %v525_v32  ;;  %v1122_v41 = vpop.eup %1121 }
  0x5a   : > { %v1464_v34 = vmax.f32 %v373_v16, %v1709_v24  ;;  %v542_v57 = vmul.f32 0.044715, %v1449_v45  ;;  %v481_v8 = vadd.f32 1.0, %v1118_v25  ;;  %v1474_v31 = vmul.f32 0.5, %v526_v12 }
  0x5b   : > { %v543_v58 = vmul.f32 0.044715, %v1456_v55  ;;  %v544_v42 = vmul.f32 %v537_v20, %v523_v35  ;;  %v1124_v44 = vpop.eup %1123  ;;  %v1478_v59 = vmul.f32 0.5, %v1438_v14  ;;  %v1481_v4 = vmul.f32 0.5, %v1449_v45 }
  0x5c   : > { %v545_v49 = vmul.f32 %v538_v29, %v524_v11  ;;  %v546_v47 = vmul.f32 %v539_v61, %v525_v32  ;;  %v1126_v50 = vpop.eup %1125  ;;  %v482_v16 = vadd.f32 1.0, %v1120_v3  ;;  %v547_v10 = vmul.f32 %v540_v39, %v526_v12 }
  0x5d   : > { %v548_v2 = vmul.f32 %v541_v53, %v1438_v14  ;;  %v549_v13 = vmul.f32 %v542_v57, %v1449_v45  ;;  %v1128_v25 = vpop.eup %1127  ;;  %v1486_v15 = vmul.f32 %v480_v56, %v1366_v26  ;;  %v1489_v20 = vmul.f32 0.5, %v1456_v55 }
  0x5e   : > { %v551_v24 = vmul.f32 %v544_v42, %v523_v35  ;;  %v552_v7 = vmul.f32 %v545_v49, %v524_v11  ;;  %v550_v60 = vmul.f32 %v543_v58, %v1456_v55  ;;  %v553_v29 = vmul.f32 %v546_v47, %v525_v32 }
  0x5f   : > { %v554_v61 = vmul.f32 %v547_v10, %v526_v12  ;;  %v555_v39 = vmul.f32 %v548_v2, %v1438_v14  ;;  %v483_v3 = vadd.f32 1.0, %v1122_v41  ;;  %v484_v53 = vadd.f32 1.0, %v1124_v44  ;;  %v1072_v10 = vld [vmem:[%s1205_s18 + $0x18] sm:$0xff]   ;;  %v970_v44 = vld [vmem:[%s1205_s18 + $0x4] sm:$0xf] }
  0x60   : > { %v558_v57 = vadd.f32 %v551_v24, %v523_v35  ;;  %v559_v6 = vadd.f32 %v552_v7, %v524_v11  ;;  %v485_v54 = vadd.f32 1.0, %v1126_v50  ;;  %v486_v26 = vadd.f32 1.0, %v1128_v25 }
  0x61   : > { %v556_v56 = vmul.f32 %v549_v13, %v1449_v45  ;;  %v560_v37 = vadd.f32 %v553_v29, %v525_v32  ;;  %v1495_v42 = vmul.f32 %v481_v8, %v1368_v43  ;;  %v1498_v58 = vmul.f32 %v482_v16, %v1370_v48 }
  0x62   : > { %v561_v49 = vadd.f32 %v554_v61, %v526_v12  ;;  %v565_v47 = vmul.f32 0.7978846, %v558_v57  ;;  %v494_v41 = vmax.f32 %v1403_v38, %v1486_v15  ;;  %v557_v35 = vmul.f32 %v550_v60, %v1456_v55 }
  0x63   : > { %v562_v7 = vadd.f32 %v555_v39, %v1438_v14  ;;  %v566_v11 = vmul.f32 0.7978846, %v559_v6  ;;  %v1507_v32 = vmul.f32 %v483_v3, %v1372_v51  ;;  %v1510_v43 = vmul.f32 %v484_v53, %v1378_v46 }
  0x64   : > { %v567_v48 = vmul.f32 0.7978846, %v560_v37  ;;  %1129 = vtanh.f32 %v565_v47  ;;  %v1513_v12 = vmul.f32 %v485_v54, %v1389_v52  ;;  %v1516_v8 = vmul.f32 %v486_v26, %v1416_v62 }
  0x65   : > { %v563_v60 = vadd.f32 %v556_v56, %v1449_v45  ;;  %v1045_v50 = vunpack.c.l.bf16 %v1072_v10  ;;  %v495_v6 = vmax.f32 %v1413_v21, %v1495_v42  ;;  %v568_v14 = vmul.f32 0.7978846, %v561_v49 }
  0x66   : > { %v1046_v51 = vunpack.c.h.bf16 %v1072_v10  ;;  %v636_v16 = vunpack.c.l.bf16 %v970_v44  ;;  %v496_v46 = vmax.f32 %v1442_v18, %v1498_v58  ;;  %v564_v37 = vadd.f32 %v557_v35, %v1456_v55 }
  0x67   : > { %v569_v2 = vmul.f32 0.7978846, %v562_v7  ;;  %1131 = vtanh.f32 %v566_v11  ;;  %v497_v54 = vmax.f32 %v1446_v17, %v1507_v32  ;;  %v570_v25 = vmul.f32 0.7978846, %v563_v60 }
  0x68   : > { %1133 = vtanh.f32 %v567_v48  ;;  %v643_v62 = vmul.f32 %v1210_v0, %v636_v16  ;;  %v648_v55 = vmul.f32 %v1210_v0, %v1045_v50  ;;  %v607_v29 = vrot.slane %v1486_v15, 1 }
  0x69   : > { %1135 = vtanh.f32 %v568_v14  ;;  %v649_v61 = vmul.f32 %v1210_v0, %v1046_v51  ;;  %v571_v3 = vmul.f32 0.7978846, %v564_v37  ;;  %v1710_v17 = vmax.f32 %v1453_v36, %v1510_v43 }
  0x6a   : > { %v1130_v24 = vpop.eup %1129  ;;  %v650_v39 = vadd.f32 %v1219_v9, %v643_v62  ;;  %1137 = vtanh.f32 %v569_v2  ;;  %v655_v47 = vadd.f32 %v1219_v9, %v648_v55 }
  0x6b   : > { %1139 = vtanh.f32 %v570_v25  ;;  %v579_v49 = vadd.f32 1.0, %v1130_v24  ;;  %v656_v11 = vadd.f32 %v1219_v9, %v649_v61 }
  0x6c   : > { %v664_v44 = vmul.f32 0.044715, %v650_v39  ;;  %1141 = vtanh.f32 %v571_v3  ;;  %v669_v37 = vmul.f32 0.044715, %v655_v47  ;;  %v1546_v24 = vmul.f32 0.5, %v650_v39 }
  0x6d   : > { %v1132_v56 = vpop.eup %1131  ;;  %v586_v16 = vmul.f32 %v579_v49, %v1467_v23  ;;  %v670_v2 = vmul.f32 0.044715, %v656_v11  ;;  %v1548_v61 = vmul.f32 0.5, %v655_v47 }
  0x6e   : > { %v1134_v10 = vpop.eup %1133  ;;  %v580_v50 = vadd.f32 1.0, %v1132_v56  ;;  %v671_v62 = vmul.f32 %v664_v44, %v650_v39  ;;  %v676_v49 = vmul.f32 %v669_v37, %v655_v47 }
  0x6f   : > { %v1136_v60 = vpop.eup %1135  ;;  %v581_v51 = vadd.f32 1.0, %v1134_v10  ;;  %v593_v23 = vmax.f32 %v494_v41, %v586_v16  ;;  %v677_v44 = vmul.f32 %v670_v2, %v656_v11 }
  0x70   : > { %v1138_v14 = vpop.eup %1137  ;;  %v582_v55 = vadd.f32 1.0, %v1136_v60  ;;  %v587_v48 = vmul.f32 %v580_v50, %v1469_v63  ;;  %v678_v35 = vmul.f32 %v671_v62, %v650_v39  ;;  %v1075_v60 = vld [vmem:[%s1205_s18 + $0x38] sm:$0xff]   ;;  %v683_v13 = vmul.f32 %v676_v49, %v655_v47 }
  0x71   : > { %v1140_v25 = vpop.eup %1139  ;;  %v583_v3 = vadd.f32 1.0, %v1138_v14  ;;  %v588_v56 = vmul.f32 %v581_v51, %v1471_v40  ;;  %v684_v45 = vmul.f32 %v677_v44, %v656_v11  ;;  %v977_v14 = vld [vmem:[%s1205_s18 + $0x24] sm:$0xf]  ;;  %v1057_v53 = vunpack.c.l.bf16 %v1075_v60 }
  0x72   : > { %v1142_v7 = vpop.eup %1141  ;;  %v584_v10 = vadd.f32 1.0, %v1140_v25  ;;  %v589_v26 = vmul.f32 %v582_v55, %v1474_v31  ;;  %v685_v57 = vadd.f32 %v678_v35, %v650_v39  ;;  %v690_v63 = vadd.f32 %v683_v13, %v655_v47 }
  0x73   : > { %v691_v50 = vadd.f32 %v684_v45, %v656_v11  ;;  %v594_v38 = vmax.f32 %v495_v6, %v587_v48  ;;  %v1058_v40 = vunpack.c.h.bf16 %v1075_v60  ;;  %v585_v41 = vadd.f32 1.0, %v1142_v7 }
  0x74   : > { %v692_v52 = vmul.f32 0.7978846, %v685_v57  ;;  %v735_v51 = vunpack.c.l.bf16 %v977_v14  ;;  %v697_v16 = vmul.f32 0.7978846, %v690_v63  ;;  %v747_v31 = vmul.f32 %v1210_v0, %v1057_v53 }
  0x75   : > { %v748_v39 = vmul.f32 %v1210_v0, %v1058_v40  ;;  %v590_v13 = vmul.f32 %v583_v3, %v1478_v59  ;;  %v698_v45 = vmul.f32 0.7978846, %v691_v50  ;;  %v595_v6 = vmax.f32 %v496_v46, %v588_v56 }
  0x76   : > { %1143 = vtanh.f32 %v692_v52  ;;  %v742_v21 = vmul.f32 %v1210_v0, %v735_v51  ;;  %v1572_v52 = vadd.f32 %v1219_v9, %v747_v31  ;;  %v591_v53 = vmul.f32 %v584_v10, %v1481_v4  ;;  %v1718_v31 = vld [vmem:[#allocation2_spill] sm:$0xff] }
  0x77   : > { %1145 = vtanh.f32 %v1267_v19  ;;  %v1575_v19 = vadd.f32 %v1219_v9, %v748_v39  ;;  %v1578_v59 = vmul.f32 0.5, %v656_v11  ;;  %v1592_v4 = vmax.f32 %v593_v23, %v607_v29 }
  0x78   : > { %1147 = vtanh.f32 %v1275_v28  ;;  %v1582_v0 = vadd.f32 %v1219_v9, %v742_v21  ;;  %v592_v28 = vmul.f32 %v585_v41, %v1489_v20  ;;  %v768_v18 = vmul.f32 0.044715, %v1572_v52 }
  0x79   : > { %1149 = vtanh.f32 %v1278_v30  ;;  %v596_v30 = vmax.f32 %v497_v54, %v589_v26  ;;  %v597_v54 = vmax.f32 %v1710_v17, %v590_v13  ;;  %v1711_v57 = vrot.slane %v1495_v42, 1  ;;  %v1722_v17 = vld [vmem:[#allocation6_spill] sm:$0xff] }
  0x7a   : > { %1151 = vtanh.f32 %v1283_v33  ;;  %v763_v9 = vmul.f32 0.044715, %v1582_v0  ;;  %v769_v33 = vmul.f32 0.044715, %v1575_v19  ;;  %v1712_v47 = vrot.slane %v1498_v58, 1 }
  0x7b   : > { %1153 = vtanh.f32 %v697_v16  ;;  %v622_v26 = vmax.f32 %v594_v38, %v1711_v57  ;;  %v775_v35 = vmul.f32 %v768_v18, %v1572_v52  ;;  %v1713_v7 = vmax.f32 %v1460_v1, %v1513_v12  ;;  %v1720_v18 = vld [vmem:[#allocation4_spill] sm:$0xff] }
  0x7c   : > { %v1144_v46 = vpop.eup %1143  ;;  %1155 = vtanh.f32 %v698_v45  ;;  %v623_v15 = vmax.f32 %v595_v6, %v1712_v47  ;;  %v770_v37 = vmul.f32 %v763_v9, %v1582_v0  ;;  %v776_v2 = vmul.f32 %v769_v33, %v1575_v19  ;;  %v1721_v33 = vld [vmem:[#allocation5_spill] sm:$0xff] }
  0x7d   : > { %v1146_v20 = vpop.eup %1145  ;;  %v598_v11 = vmax.f32 %v1713_v7, %v591_v53  ;;  %v1714_v42 = vmax.f32 %v1464_v34, %v1516_v8  ;;  %v1715_v62 = vrot.slane %v1507_v32, 1  ;;  %v782_v1 = vmul.f32 %v775_v35, %v1572_v52 }
  0x7e   : > { %v1148_v29 = vpop.eup %1147  ;;  %v707_v48 = vadd.f32 1.0, %v1146_v20  ;;  %v777_v49 = vmul.f32 %v770_v37, %v1582_v0  ;;  %v783_v10 = vmul.f32 %v776_v2, %v1575_v19  ;;  %v1716_v60 = vrot.slane %v1510_v43, 1  ;;  %v867_v2 = vld [vmem:[%s1642_s26 + $0x4] sm:$0xf] }
  0x7f   : > { %v1150_v36 = vpop.eup %1149  ;;  %v599_v58 = vmax.f32 %v1714_v42, %v592_v28  ;;  %v624_v25 = vmax.f32 %v596_v30, %v1715_v62  ;;  %v708_v55 = vadd.f32 1.0, %v1148_v29  ;;  %v789_v63 = vadd.f32 %v782_v1, %v1572_v52 }
  0x80   : > { %v1152_v3 = vpop.eup %1151  ;;  %v709_v56 = vadd.f32 1.0, %v1150_v36  ;;  %v714_v23 = vmul.f32 %v707_v48, %v1257_v5  ;;  %v625_v34 = vmax.f32 %v597_v54, %v1716_v60  ;;  %v1717_v38 = vrot.slane %v1513_v12, 1  ;;  %v870_v36 = vld [vmem:[%s1642_s26 + $0x8] sm:$0xf] }
  0x81   : > { %v1154_v44 = vpop.eup %1153  ;;  %v710_v14 = vadd.f32 1.0, %v1152_v3  ;;  %v715_v32 = vmul.f32 %v708_v55, %v1271_v22  ;;  %v784_v51 = vadd.f32 %v777_v49, %v1582_v0  ;;  %v706_v16 = vadd.f32 1.0, %v1144_v46 }
  0x82   : > { %v1156_v50 = vpop.eup %1155  ;;  %v1629_v40 = vmax.f32 %v598_v11, %v1717_v38  ;;  %v716_v5 = vmul.f32 %v709_v56, %v1273_v27  ;;  %v721_v41 = vmax.f32 %v622_v26, %v714_v23  ;;  %v790_v13 = vadd.f32 %v783_v10, %v1575_v19  ;;  %v1719_v27 = vld [vmem:[#allocation3_spill] sm:$0xff] }
  0x83   : > { %v717_v43 = vmul.f32 %v710_v14, %v1718_v31  ;;  %v722_v39 = vmax.f32 %v623_v15, %v715_v32  ;;  %v791_v45 = vmul.f32 0.7978846, %v784_v51  ;;  %v796_v21 = vmul.f32 0.7978846, %v789_v63 }
  0x84   : > { %v723_v22 = vmax.f32 %v624_v25, %v716_v5  ;;  %v711_v6 = vadd.f32 1.0, %v1154_v44  ;;  %v712_v12 = vadd.f32 1.0, %v1156_v50  ;;  %v797_v28 = vmul.f32 0.7978846, %v790_v13 }
  0x85   : > { %v724_v53 = vmax.f32 %v625_v34, %v717_v43  ;;  %1157 = vtanh.f32 %v791_v45  ;;  %v820_v30 = vmax.f32 %v721_v41, %v1719_v27  ;;  %v821_v9 = vmax.f32 %v722_v39, %v1720_v18 }
  0x86   : > { %v822_v46 = vmax.f32 %v723_v22, %v1721_v33  ;;  %v713_v20 = vmul.f32 %v706_v16, %v1546_v24  ;;  %1159 = vtanh.f32 %v796_v21  ;;  %v834_v57 = vrot.slane %v714_v23, 1  ;;  %v864_v22 = vld [vmem:[%s1642_s26] sm:$0xf] }
  0x87   : > { %v823_v54 = vmax.f32 %v724_v53, %v1722_v17  ;;  %1161 = vtanh.f32 %v797_v28  ;;  %v835_v26 = vrot.slane %v715_v32, 1  ;;  %v836_v47 = vrot.slane %v716_v5, 1  ;;  %v882_v53 = vld [vmem:[%s1642_s26 + $0x18] sm:$0xf] }
  0x88   : > { %v1723_v15 = vrot.slane %v1516_v8, 1  ;;  %v718_v29 = vmul.f32 %v711_v6, %v1548_v61  ;;  %v719_v7 = vmul.f32 %v712_v12, %v1578_v59  ;;  %v837_v11 = vrot.slane %v717_v43, 1  ;;  %v873_v61 = vld [vmem:[%s1642_s26 + $0xc] sm:$0xf]  ;;  %v879_v6 = vld [vmem:[%s1642_s26 + $0x14] sm:$0xf] }
  0x89   : > { %v848_v48 = vmax.f32 %v820_v30, %v834_v57  ;;  %v849_v24 = vmax.f32 %v821_v9, %v835_v26  ;;  %v850_v37 = vmax.f32 %v822_v46, %v836_v47  ;;  %v756_v42 = vmul.f32 0.5, %v1582_v0  ;;  %v876_v0 = vld [vmem:[%s1642_s26 + $0x10] sm:$0xf] }
  0x8a   : > { %v627_v35 = vmax.f32 %v599_v58, %v1723_v15  ;;  %v761_v62 = vmul.f32 0.5, %v1572_v52  ;;  %v762_v25 = vmul.f32 0.5, %v1575_v19  ;;  %v851_v55 = vmax.f32 %v823_v54, %v837_v11 }
  0x8b   : > { %v1158_v59 = vpop.eup %1157  ;;  %v720_v58 = vmax.f32 %v1592_v4, %v713_v20  ;;  %v855_v1 = vpack.c.bf16 %v848_v48, %v848_v48  ;;  %v856_v3 = vpack.c.bf16 %v849_v24, %v849_v24  ;;  %v857_v56 = vpack.c.bf16 %v850_v37, %v850_v37 }
  0x8c   : > { %v1160_v23 = vpop.eup %1159  ;;  %v725_v52 = vmax.f32 %v1629_v40, %v718_v29  ;;  %v726_v19 = vmax.f32 %v627_v35, %v719_v7  ;;  %v805_v49 = vadd.f32 1.0, %v1158_v59  ;;  %v858_v10 = vpack.c.bf16 %v851_v55, %v851_v55 }
  0x8d   : > { %v1162_v44 = vpop.eup %1161  ;;  %v810_v60 = vadd.f32 1.0, %v1160_v23  ;;  %v868_v34 = vsel %vm1657_vm2, %v855_v1, %v867_v2  ;;  %v871_v4 = vsel %vm1657_vm2, %v856_v3, %v870_v36  ;;  %v874_v14 = vsel %vm1657_vm2, %v857_v56, %v873_v61 }
  0x8e   : > { %v811_v32 = vadd.f32 1.0, %v1162_v44  ;;  %v812_v63 = vmul.f32 %v805_v49, %v756_v42  ;;  %v833_v50 = vrot.slane %v713_v20, 1  ;;  %869 = vst [vmem:[%s1642_s26 + $0x4] sm:$0xf] %v868_v34  ;;  %v877_v38 = vsel %vm1657_vm2, %v858_v10, %v876_v0 }
  0x8f   : > { %v817_v40 = vmul.f32 %v810_v60, %v761_v62  ;;  %v838_v5 = vrot.slane %v718_v29, 1  ;;  %872 = vst [vmem:[%s1642_s26 + $0x8] sm:$0xf] %v871_v4  ;;  %v839_v16 = vrot.slane %v719_v7, 1 }
  0x90   : > { %v818_v41 = vmul.f32 %v811_v32, %v762_v25  ;;  %v819_v51 = vmax.f32 %v720_v58, %v812_v63  ;;  %875 = vst [vmem:[%s1642_s26 + $0xc] sm:$0xf] %v874_v14 }
  0x91   : > { %v824_v31 = vmax.f32 %v725_v52, %v817_v40  ;;  %878 = vst [vmem:[%s1642_s26 + $0x10] sm:$0xf] %v877_v38 }
  0x92   : > { %v825_v43 = vmax.f32 %v726_v19, %v818_v41  ;;  %v847_v39 = vmax.f32 %v819_v51, %v833_v50 }
  0x93   : > { %v852_v13 = vmax.f32 %v824_v31, %v838_v5 }
  0x94   : > { %v853_v45 = vmax.f32 %v825_v43, %v839_v16  ;;  %v854_v21 = vpack.c.bf16 %v847_v39, %v847_v39 }
  0x95   : > { %v859_v12 = vpack.c.bf16 %v852_v13, %v852_v13 }
  0x96   : > { %v860_v28 = vpack.c.bf16 %v853_v45, %v853_v45  ;;  %v865_v27 = vsel %vm1657_vm2, %v854_v21, %v864_v22 }
  0x97   : > { %866 = vst [vmem:[%s1642_s26] sm:$0xf] %v865_v27  ;;  %v880_v30 = vsel %vm1657_vm2, %v859_v12, %v879_v6 }
  0x98   : > { %881 = vst [vmem:[%s1642_s26 + $0x14] sm:$0xf] %v880_v30  ;;  %v883_v18 = vsel %vm1657_vm2, %v860_v28, %v882_v53 }
  0x99   : > { %884 = vst [vmem:[%s1642_s26 + $0x18] sm:$0xf] %v883_v18 }
  0x9a PF: > { %s13_s12 = sadd.s32 1, %s1169_s12  }
  0x9b   : > { %p10_p5 = scmp.ge.s32.totalorder %s13_s12, 4  }
  0x9d   :  { %12 = sbr.rel (!%p10_p5) target bundleno = 1 (0x1), region = 67 }

// kernel: clinical_image_encoder.6
= control target key start
LH: loop header
LB: loop body
LE: loop exit
PB: predicated region body
PF: predicated region fallthrough
CT: control target
= control target key end

     0   :  { %s2081_s18 = smov 0   ;;  %s2547_s0 = inlined_call_operand.vmem [shape: bf16[2,16,16,392], index: 0, kind: input, shape index: {}]   ;;  %s2548_s1 = inlined_call_operand.vmem [shape: bf16[1,392,64], index: 1, kind: input, shape index: {}]   ;;  %s2549_s2 = inlined_call_operand.vmem [shape: f32[1,64], index: 2, kind: input, shape index: {}]   ;;  %s2550_s3 = inlined_call_operand.vmem [shape: bf16[2,16,16,64], index: 3, kind: output, shape index: {0}]   ;;  %s2551_s4 = inlined_call_operand.vmem [shape: f32[2,1,64], index: 4, kind: output, shape index: {1}]   ;;  %s2552_s5 = inlined_call_operand.vmem [shape: f32[2,1,64], index: 5, kind: output, shape index: {2}]  }
   0x1 LB: > { %s1564_s19 = sadd.s32 4294967295, %s2049_s18   ;;  %p1568_p0 = scmp.ge.s32.totalorder %s2049_s18, 1  ;;  %s2049_s18 = sphi %s2081_s18, %s16_s18  }
   0x2   : > { %p192_p1 = scmp.lt.s32.totalorder %s2049_s18, 3 }
   0x4   : > { %p193_p2 = pnand %p1568_p0, %p192_p1 }
   0x5   : > { %p226_p3 = scmp.lt.s32.totalorder (!%p193_p2), %s1564_s19, 1 }
   0x6   : > { %196 = sbr.rel (%p193_p2) target bundleno = 447 (0x1bf), region = 32 }
   0xb   : > { %v2016_v0 = vld [vmem:[%s2548_s1 + $0x38] sm:$0xff]  ;;  %v2015_v3 = vld [vmem:[%s2548_s1 + $0x30] sm:$0xff]  ;;  %s2554_s19 = smov (!%p226_p3, %s1564_s19), 1  ;;  %v2014_v6 = vld [vmem:[%s2548_s1 + $0x28] sm:$0xff]  ;;  %vm860_vm0 = vcmask 1043456   ;;  %vm811_vm1 = vcmask 64512  }
   0xc   : > { %v2024_v1 = vld [vmem:[%s2548_s1 + $0x78] sm:$0xff]  ;;  %864 = vmatpush.bf16.msra.mxu0 %v2016_v0  ;;  %v2023_v4 = vld [vmem:[%s2548_s1 + $0x70] sm:$0xff]  ;;  %s1943_s7 = sshll.u32 %s2554_s19, 9  ;;  %v2022_v7 = vld [vmem:[%s2548_s1 + $0x68] sm:$0xff]  ;;  %s1944_s6 = sshll.u32 %s2554_s19, 7  ;;  %vm1426_vm2 = vcmask 519168  }
   0xd   : > { %v2032_v2 = vld [vmem:[%s2548_s1 + $0xb8] sm:$0xff]  ;;  %953 = vmatpush.bf16.msra.mxu1 %v2024_v1  ;;  %v2031_v5 = vld [vmem:[%s2548_s1 + $0xb0] sm:$0xff]  ;;  %s2113_s10 = scalar_lea.vmem %s2547_s0, %s1943_s7  ;;  %v355_v8 = vld [vmem:[%s2548_s1 + $0xc0] sm:$0xf]  ;;  %s2269_s9 = scalar_lea.vmem %s2550_s3, %s1944_s6  ;;  %vm1220_vm3 = vcmask 523264   ;;  %vm1290_vm4 = vcmask 516096  }
   0xe   : > { %1042 = vmatpush.bf16.msra.mxu2 %v2032_v2  ;;  %v2030_v9 = vld [vmem:[%s2548_s1 + $0xa8] sm:$0xff]  ;;  %v761_v10 = vunpack.c.l.b16 %v355_v8  ;;  %v1585_v12 = vld [vmem:[%s2113_s10 + $0x18] sm:$0xf0]  ;;  %v2013_v14 = vld [vmem:[%s2548_s1 + $0x20] sm:$0xff]  ;;  %s238_s14 = scalar_lea.vmem %s2551_s4, %s2554_s19  ;;  %s241_s17 = scalar_lea.vmem %s2552_s5, %s2554_s19 }
   0xf   : > { %v1946_v11 = vld [vmem:[%s2113_s10 + $0xc] sm:$0xf]  ;;  %v2021_v15 = vld [vmem:[%s2548_s1 + $0x60] sm:$0xff]  ;;  %v2012_v19 = vld [vmem:[%s2548_s1 + $0x18] sm:$0xff] }
  0x10   : > { %865 = vmatpush.bf16.msra.mxu0 %v2015_v3  ;;  %v786_v13 = vpack.c.b16 %v761_v10, %v761_v10  ;;  %v2029_v16 = vld [vmem:[%s2548_s1 + $0xa0] sm:$0xff]  ;;  %v1588_v18 = vor.u32 %v1946_v11, %v1585_v12  ;;  %v2020_v20 = vld [vmem:[%s2548_s1 + $0x58] sm:$0xff]  ;;  %v2011_v22 = vld [vmem:[%s2548_s1 + $0x10] sm:$0xff] }
  0x11   : > { %954 = vmatpush.bf16.msra.mxu1 %v2023_v4  ;;  %v2028_v21 = vld [vmem:[%s2548_s1 + $0x98] sm:$0xff]  ;;  %v2019_v23 = vld [vmem:[%s2548_s1 + $0x50] sm:$0xff]  ;;  %v2010_v25 = vld [vmem:[%s2548_s1 + $0x8] sm:$0xff] }
  0x12   : > { %1043 = vmatpush.bf16.msra.mxu2 %v2031_v5  ;;  %v862_v17 = vsel %vm860_vm0, %v786_v13, 0  ;;  %v2027_v24 = vld [vmem:[%s2548_s1 + $0x90] sm:$0xff]  ;;  %v2018_v26 = vld [vmem:[%s2548_s1 + $0x48] sm:$0xff]  ;;  %v1601_v29 = vld [vmem:[%s2113_s10 + $0x38] sm:$0xf0] }
  0x13   : > { %1138 = vmatpush.bf16.msra.mxu3 %v862_v17  ;;  %v2026_v27 = vld [vmem:[%s2548_s1 + $0x88] sm:$0xff]  ;;  %v2009_v30 = vld [vmem:[%s2548_s1] sm:$0xff]  ;;  %v1947_v33 = vld [vmem:[%s2113_s10 + $0xc] sm:$0xf0] }
  0x14   : > { %866 = vmatpush.bf16.msra.mxu0 %v2014_v6  ;;  %v1950_v28 = vld [vmem:[%s2113_s10 + $0x2c] sm:$0xf]  ;;  %v2017_v31 = vld [vmem:[%s2548_s1 + $0x40] sm:$0xff]  ;;  %v1577_v35 = vld [vmem:[%s2113_s10 + $0x10] sm:$0xf0] }
  0x15   : > { %955 = vmatpush.bf16.msra.mxu1 %v2022_v7  ;;  %v1575_v32 = vld [vmem:[%s2113_s10] sm:$0xf]  ;;  %v1945_v34 = vld [vmem:[%s2113_s10 + $0x4] sm:$0xf]  ;;  %v1583_v37 = vld [vmem:[%s2113_s10 + $0x8] sm:$0xf]  ;;  %v1604_v39 = vor.u32 %v1950_v28, %v1601_v29 }
  0x16   : > { %1044 = vmatpush.bf16.msra.mxu2 %v2030_v9  ;;  %1925 = vmatmul.msk.bf16.vlgmr.msra.gmra.mxu3 %vm811_vm1, %v1588_v18  ;;  %v2025_v36 = vld [vmem:[%s2548_s1 + $0x80] sm:$0xff]  ;;  %v1948_v38 = vld [vmem:[%s2113_s10 + $0x14] sm:$0xf0]  ;;  %v1576_v40 = vor.u32 %v1947_v33, %v1575_v32  ;;  %v1580_v41 = vor.u32 %v1945_v34, %v1577_v35  ;;  %v1954_v43 = vld [vmem:[%s2113_s10 + $0x4c] sm:$0xf] }
  0x17   : > { %v1584_v42 = vor.u32 %v1948_v38, %v1583_v37  ;;  %v1617_v44 = vld [vmem:[%s2113_s10 + $0x58] sm:$0xf0]  ;;  %v1591_v45 = vld [vmem:[%s2113_s10 + $0x20] sm:$0xf]  ;;  %v1951_v46 = vld [vmem:[%s2113_s10 + $0x2c] sm:$0xf0] }
  0x18   : > { %867 = vmatpush.bf16.msra.mxu0 %v2013_v14  ;;  %v1949_v47 = vld [vmem:[%s2113_s10 + $0x24] sm:$0xf]  ;;  %v1593_v48 = vld [vmem:[%s2113_s10 + $0x30] sm:$0xf0]  ;;  %v1599_v49 = vld [vmem:[%s2113_s10 + $0x28] sm:$0xf]  ;;  %v1620_v51 = vor.u32 %v1954_v43, %v1617_v44  ;;  %v1592_v52 = vor.u32 %v1951_v46, %v1591_v45 }
  0x19   : > { %956 = vmatpush.bf16.msra.mxu1 %v2021_v15  ;;  %v1952_v50 = vld [vmem:[%s2113_s10 + $0x34] sm:$0xf0]  ;;  %v1596_v53 = vor.u32 %v1949_v47, %v1593_v48  ;;  %v1958_v55 = vld [vmem:[%s2113_s10 + $0x6c] sm:$0xf]  ;;  %v1633_v56 = vld [vmem:[%s2113_s10 + $0x78] sm:$0xf0] }
  0x1a   : > { %1045 = vmatpush.bf16.msra.mxu2 %v2029_v16  ;;  %v1600_v54 = vor.u32 %v1952_v50, %v1599_v49  ;;  %v1607_v57 = vld [vmem:[%s2113_s10 + $0x40] sm:$0xf]  ;;  %v1955_v58 = vld [vmem:[%s2113_s10 + $0x4c] sm:$0xf0]  ;;  %v1953_v59 = vld [vmem:[%s2113_s10 + $0x44] sm:$0xf]  ;;  %v1636_v63 = vor.u32 %v1958_v55, %v1633_v56 }
  0x1b   : > { %v1609_v60 = vld [vmem:[%s2113_s10 + $0x50] sm:$0xf0]  ;;  %v1615_v61 = vld [vmem:[%s2113_s10 + $0x48] sm:$0xf]  ;;  %v1956_v62 = vld [vmem:[%s2113_s10 + $0x54] sm:$0xf0]  ;;  %v1608_v0 = vor.u32 %v1955_v58, %v1607_v57 }
  0x1c   : > { %868 = vmatpush.bf16.msra.mxu0 %v2012_v19  ;;  %v1612_v1 = vor.u32 %v1953_v59, %v1609_v60  ;;  %v1616_v2 = vor.u32 %v1956_v62, %v1615_v61  ;;  %v1962_v3 = vld [vmem:[%s2113_s10 + $0x8c] sm:$0xf]  ;;  %v1649_v4 = vld [vmem:[%s2113_s10 + $0x98] sm:$0xf0]  ;;  %v1623_v5 = vld [vmem:[%s2113_s10 + $0x60] sm:$0xf] }
  0x1d   : > { %957 = vmatpush.bf16.msra.mxu1 %v2020_v20  ;;  %v1959_v6 = vld [vmem:[%s2113_s10 + $0x6c] sm:$0xf0]  ;;  %v1957_v7 = vld [vmem:[%s2113_s10 + $0x64] sm:$0xf]  ;;  %v1625_v8 = vld [vmem:[%s2113_s10 + $0x70] sm:$0xf0]  ;;  %v1652_v11 = vor.u32 %v1962_v3, %v1649_v4 }
  0x1e   : > { %1046 = vmatpush.bf16.msra.mxu2 %v2028_v21  ;;  %v1631_v9 = vld [vmem:[%s2113_s10 + $0x68] sm:$0xf]  ;;  %v1960_v10 = vld [vmem:[%s2113_s10 + $0x74] sm:$0xf0]  ;;  %v1624_v12 = vor.u32 %v1959_v6, %v1623_v5  ;;  %v1628_v13 = vor.u32 %v1957_v7, %v1625_v8  ;;  %v1966_v15 = vld [vmem:[%s2113_s10 + $0xac] sm:$0xf] }
  0x1f   : > { %v1632_v14 = vor.u32 %v1960_v10, %v1631_v9  ;;  %v1665_v16 = vld [vmem:[%s2113_s10 + $0xb8] sm:$0xf0]  ;;  %v1639_v17 = vld [vmem:[%s2113_s10 + $0x80] sm:$0xf]  ;;  %v1963_v18 = vld [vmem:[%s2113_s10 + $0x8c] sm:$0xf0] }
  0x20   : > { %869 = vmatpush.bf16.msra.mxu0 %v2011_v22  ;;  %v1961_v19 = vld [vmem:[%s2113_s10 + $0x84] sm:$0xf]  ;;  %v1641_v20 = vld [vmem:[%s2113_s10 + $0x90] sm:$0xf0]  ;;  %v1647_v21 = vld [vmem:[%s2113_s10 + $0x88] sm:$0xf] }
  0x21   : > { %958 = vmatpush.bf16.msra.mxu1 %v2019_v23  ;;  %v1964_v22 = vld [vmem:[%s2113_s10 + $0x94] sm:$0xf0]  ;;  %v1668_v23 = vor.u32 %v1966_v15, %v1665_v16  ;;  %v1681_v28 = vld [vmem:[%s2113_s10 + $0xd8] sm:$0xf0]  ;;  %v1655_v29 = vld [vmem:[%s2113_s10 + $0xa0] sm:$0xf] }
  0x22   : > { %1047 = vmatpush.bf16.msra.mxu2 %v2027_v24  ;;  %v1640_v24 = vor.u32 %v1963_v18, %v1639_v17  ;;  %v1657_v32 = vld [vmem:[%s2113_s10 + $0xb0] sm:$0xf0]  ;;  %v1663_v33 = vld [vmem:[%s2113_s10 + $0xa8] sm:$0xf]  ;;  %v1968_v34 = vld [vmem:[%s2113_s10 + $0xb4] sm:$0xf0] }
  0x23   : > { %v1664_v38 = vor.u32 %v1968_v34, %v1663_v33  ;;  %v1969_v43 = vld [vmem:[%s2113_s10 + $0xc4] sm:$0xf]  ;;  %v1673_v44 = vld [vmem:[%s2113_s10 + $0xd0] sm:$0xf0]  ;;  %v1679_v45 = vld [vmem:[%s2113_s10 + $0xc8] sm:$0xf] }
  0x24   : > { %870 = vmatpush.bf16.msra.mxu0 %v2010_v25  ;;  %v1644_v25 = vor.u32 %v1961_v19, %v1641_v20  ;;  %v1972_v46 = vld [vmem:[%s2113_s10 + $0xd4] sm:$0xf0]  ;;  %v1676_v49 = vor.u32 %v1969_v43, %v1673_v44  ;;  %v1973_v55 = vld [vmem:[%s2113_s10 + $0xe4] sm:$0xf]  ;;  %v1689_v56 = vld [vmem:[%s2113_s10 + $0xf0] sm:$0xf0] }
  0x25   : > { %959 = vmatpush.bf16.msra.mxu1 %v2018_v26  ;;  %v1648_v26 = vor.u32 %v1964_v22, %v1647_v21  ;;  %v1680_v50 = vor.u32 %v1972_v46, %v1679_v45  ;;  %v1695_v57 = vld [vmem:[%s2113_s10 + $0xe8] sm:$0xf]  ;;  %v1976_v58 = vld [vmem:[%s2113_s10 + $0xf4] sm:$0xf0]  ;;  %v1692_v61 = vor.u32 %v1973_v55, %v1689_v56  ;;  %v1979_v3 = vld [vmem:[%s2113_s10 + $0x10c] sm:$0xf0] }
  0x26   : > { %1048 = vmatpush.bf16.msra.mxu2 %v2026_v27  ;;  %1926 = vmatmul.msk.bf16.gmra.mxu3 %vm811_vm1, %v1604_v39  ;;  %v1970_v27 = vld [vmem:[%s2113_s10 + $0xcc] sm:$0xf]  ;;  %v1696_v62 = vor.u32 %v1976_v58, %v1695_v57  ;;  %v1977_v4 = vld [vmem:[%s2113_s10 + $0x104] sm:$0xf]  ;;  %v1705_v5 = vld [vmem:[%s2113_s10 + $0x110] sm:$0xf0] }
  0x27   : > { %v1684_v35 = vor.u32 %v1970_v27, %v1681_v28  ;;  %v1974_v39 = vld [vmem:[%s2113_s10 + $0xec] sm:$0xf]  ;;  %v2256_v7 = vld [vmem:[%s2549_s2] ss:$0 sm:$0xff]  ;;  %v1711_v8 = vld [vmem:[%s2113_s10 + $0x108] sm:$0xf] }
  0x28   : > { %871 = vmatpush.bf16.msra.mxu0 %v2009_v30  ;;  %v1967_v30 = vld [vmem:[%s2113_s10 + $0xac] sm:$0xf0]  ;;  %v1980_v9 = vld [vmem:[%s2113_s10 + $0x114] sm:$0xf0]  ;;  %v1719_v27 = vld [vmem:[%s2113_s10 + $0x120] sm:$0xf] }
  0x29   : > { %960 = vmatpush.bf16.msra.mxu1 %v2017_v31  ;;  %v1965_v31 = vld [vmem:[%s2113_s10 + $0xa4] sm:$0xf]  ;;  %v1712_v15 = vor.u32 %v1980_v9, %v1711_v8  ;;  %v1727_v33 = vld [vmem:[%s2113_s10 + $0x128] sm:$0xf]  ;;  %v1984_v34 = vld [vmem:[%s2113_s10 + $0x134] sm:$0xf0] }
  0x2a   : > { %1049 = vmatpush.bf16.msra.mxu2 %v2025_v36  ;;  %v1656_v36 = vor.u32 %v1967_v30, %v1655_v29  ;;  %v1660_v37 = vor.u32 %v1965_v31, %v1657_v32  ;;  %v1983_v29 = vld [vmem:[%s2113_s10 + $0x12c] sm:$0xf0]  ;;  %v1981_v30 = vld [vmem:[%s2113_s10 + $0x124] sm:$0xf]  ;;  %v1721_v31 = vld [vmem:[%s2113_s10 + $0x130] sm:$0xf0]  ;;  %v1728_v43 = vor.u32 %v1984_v34, %v1727_v33 }
  0x2b   : > { %872 = vmatmul.bf16.vlgmr.msra.gmra.mxu0 %v1576_v40  ;;  %v1697_v40 = vld [vmem:[%s2113_s10 + $0xf8] sm:$0xf0]  ;;  %v1737_v8 = vld [vmem:[%s2113_s10 + $0x150] sm:$0xf0] }
  0x2c   : > { %961 = vmatmul.bf16.vlgmr.msra.gmra.mxu1 %v1580_v41  ;;  %v1671_v41 = vld [vmem:[%s2113_s10 + $0xc0] sm:$0xf]  ;;  %v1700_v47 = vor.u32 %v1974_v39, %v1697_v40  ;;  %v1724_v39 = vor.u32 %v1981_v30, %v1721_v31 }
  0x2d   : > { %1050 = vmatmul.bf16.vlgmr.msra.gmra.mxu2 %v1584_v42  ;;  %v1971_v42 = vld [vmem:[%s2113_s10 + $0xcc] sm:$0xf0] }
  0x2e   : > { %v1672_v48 = vor.u32 %v1971_v42, %v1671_v41 }
  0x36   : > { %1927 = vmatmul.msk.bf16.gmra.mxu3 %vm811_vm1, %v1620_v51  ;;  %v1978_v51 = vld [vmem:[%s2113_s10 + $0x10c] sm:$0xf] }
  0x3b   : > { %877 = vmatmul.bf16.gmra.mxu0 %v1592_v52  ;;  %v1713_v52 = vld [vmem:[%s2113_s10 + $0x118] sm:$0xf0] }
  0x3c   : > { %966 = vmatmul.bf16.gmra.mxu1 %v1596_v53  ;;  %v1687_v53 = vld [vmem:[%s2113_s10 + $0xe0] sm:$0xf]  ;;  %v1716_v59 = vor.u32 %v1978_v51, %v1713_v52 }
  0x3d   : > { %1055 = vmatmul.bf16.gmra.mxu2 %v1600_v54  ;;  %v1975_v54 = vld [vmem:[%s2113_s10 + $0xec] sm:$0xf0] }
  0x3e   : > { %v1688_v60 = vor.u32 %v1975_v54, %v1687_v53 }
  0x46   : > { %1928 = vmatmul.msk.bf16.gmra.mxu3 %vm811_vm1, %v1636_v63 }
  0x4b   : > { %882 = vmatmul.bf16.gmra.mxu0 %v1608_v0  ;;  %v1982_v0 = vld [vmem:[%s2113_s10 + $0x12c] sm:$0xf] }
  0x4c   : > { %971 = vmatmul.bf16.gmra.mxu1 %v1612_v1  ;;  %v1729_v1 = vld [vmem:[%s2113_s10 + $0x138] sm:$0xf0] }
  0x4d   : > { %1060 = vmatmul.bf16.gmra.mxu2 %v1616_v2  ;;  %v1703_v2 = vld [vmem:[%s2113_s10 + $0x100] sm:$0xf]  ;;  %v1732_v10 = vor.u32 %v1982_v0, %v1729_v1  ;;  %v1761_v0 = vld [vmem:[%s2113_s10 + $0x178] sm:$0xf0] }
  0x4e   : > { %v1735_v1 = vld [vmem:[%s2113_s10 + $0x140] sm:$0xf] }
  0x56   : > { %1929 = vmatmul.msk.bf16.gmra.mxu3 %vm811_vm1, %v1652_v11  ;;  %v1704_v11 = vor.u32 %v1979_v3, %v1703_v2  ;;  %v1987_v2 = vld [vmem:[%s2113_s10 + $0x14c] sm:$0xf0] }
  0x5b   : > { %887 = vmatmul.bf16.gmra.mxu0 %v1624_v12  ;;  %v1708_v12 = vor.u32 %v1977_v4, %v1705_v5 }
  0x5c   : > { %976 = vmatmul.bf16.gmra.mxu1 %v1628_v13 }
  0x5d   : > { %1065 = vmatmul.bf16.gmra.mxu2 %v1632_v14 }
  0x66   : > { %1930 = vmatmul.msk.bf16.gmra.mxu3 %vm811_vm1, %v1668_v23 }
  0x6b   : > { %892 = vmatmul.bf16.gmra.mxu0 %v1640_v24 }
  0x6c   : > { %981 = vmatmul.bf16.gmra.mxu1 %v1644_v25  ;;  %v1986_v25 = vld [vmem:[%s2113_s10 + $0x14c] sm:$0xf] }
  0x6d   : > { %1070 = vmatmul.bf16.gmra.mxu2 %v1648_v26  ;;  %v1745_v26 = vld [vmem:[%s2113_s10 + $0x158] sm:$0xf0] }
  0x76   : > { %1931 = vmatmul.msk.bf16.gmra.mxu3 %vm811_vm1, %v1684_v35  ;;  %v1748_v35 = vor.u32 %v1986_v25, %v1745_v26 }
  0x7b   : > { %897 = vmatmul.bf16.gmra.mxu0 %v1656_v36 }
  0x7c   : > { %986 = vmatmul.bf16.gmra.mxu1 %v1660_v37 }
  0x7d   : > { %1075 = vmatmul.bf16.gmra.mxu2 %v1664_v38  ;;  %v1720_v38 = vor.u32 %v1983_v29, %v1719_v27 }
  0x86   : > { %1932 = vmatmul.msk.bf16.gmra.mxu3 %vm811_vm1, %v1700_v47 }
  0x8b   : > { %902 = vmatmul.bf16.gmra.mxu0 %v1672_v48 }
  0x8c   : > { %991 = vmatmul.bf16.gmra.mxu1 %v1676_v49 }
  0x8d   : > { %1080 = vmatmul.bf16.gmra.mxu2 %v1680_v50 }
  0x96   : > { %1933 = vmatmul.msk.bf16.gmra.mxu3 %vm811_vm1, %v1716_v59 }
  0x99   : > { %v1140_v63 = vpop.f32.mrf.mxu3 }
  0x9b   : > { %907 = vmatmul.bf16.gmra.mxu0 %v1688_v60 }
  0x9c   : > { %996 = vmatmul.bf16.gmra.mxu1 %v1692_v61 }
  0x9d   : > { %1085 = vmatmul.bf16.gmra.mxu2 %v1696_v62 }
  0xa1   : > { %v1142_v6 = vpop.f32.mrf.mxu3 }
  0xa6   : > { %1934 = vmatmul.msk.bf16.gmra.mxu3 %vm811_vm1, %v1732_v10 }
  0xa8   : > { %v873_v13 = vpop.f32.mrf.mxu0 }
  0xa9   : > { %v962_v14 = vpop.f32.mrf.mxu1  ;;  %v874_v16 = vadd.f32 %v2256_v7, %v873_v13  ;;  %v1145_v18 = vpop.f32.mrf.mxu3 }
  0xab   : > { %912 = vmatmul.bf16.gmra.mxu0 %v1704_v11  ;;  %v963_v17 = vadd.f32 %v962_v14, %v874_v16  ;;  %v1743_v11 = vld [vmem:[%s2113_s10 + $0x148] sm:$0xf] }
  0xac   : > { %1001 = vmatmul.bf16.gmra.mxu1 %v1708_v12  ;;  %v1988_v12 = vld [vmem:[%s2113_s10 + $0x154] sm:$0xf0] }
  0xad   : > { %1090 = vmatmul.bf16.gmra.mxu2 %v1712_v15 }
  0xb0   : > { %v1051_v19 = vpop.f32.mrf.mxu2  ;;  %v875_v21 = vpop.f32.mrf.mxu0 }
  0xb1   : > { %v1052_v20 = vadd.f32 %v1051_v19, %v963_v17  ;;  %v964_v22 = vpop.f32.mrf.mxu1  ;;  %v876_v24 = vadd.f32 %v2256_v7, %v875_v21  ;;  %v2275_v32 = vpop.f32.mrf.mxu3 }
  0xb3   : > { %v1141_v23 = vadd.f32 %v1140_v63, %v1052_v20  ;;  %v965_v36 = vadd.f32 %v964_v22, %v876_v24  ;;  %v1990_v63 = vld [vmem:[%s2113_s10 + $0x16c] sm:$0xf] }
  0xb4   : > { %v1764_v13 = vor.u32 %v1990_v63, %v1761_v0 }
  0xb5   : > { %v1394_v28 = vpack.c.bf16 %v1141_v23, %v1141_v23  ;;  %v1292_v45 = vmul.f32 %v1141_v23, %v1141_v23  ;;  %v1221_v47 = vsel %vm1220_vm3, %v1141_v23, 0.0  ;;  %v1744_v23 = vor.u32 %v1988_v12, %v1743_v11 }
  0xb6   : > { %1935 = vmatmul.msk.bf16.gmra.mxu3 %vm811_vm1, %v1748_v35 }
  0xb7   : > { %1427 = vst.msk [vmem:[%s2269_s9] sm:$0xf] %vm1426_vm2, %v1394_v28  ;;  %v1324_v54 = vsel %vm1220_vm3, %v1292_v45, 0.0 }
  0xb8   : > { %v1053_v37 = vpop.f32.mrf.mxu2  ;;  %v878_v41 = vpop.f32.mrf.mxu0 }
  0xb9   : > { %v1054_v40 = vadd.f32 %v1053_v37, %v965_v36  ;;  %v967_v42 = vpop.f32.mrf.mxu1  ;;  %v879_v44 = vadd.f32 %v2256_v7, %v878_v41  ;;  %v1150_v52 = vpop.f32.mrf.mxu3  ;;  %v1777_v41 = vld [vmem:[%s2113_s10 + $0x198] sm:$0xf0] }
  0xbb   : > { %v1143_v46 = vadd.f32 %v1142_v6, %v1054_v40  ;;  %917 = vmatmul.bf16.gmra.mxu0 %v1720_v38  ;;  %v968_v51 = vadd.f32 %v967_v42, %v879_v44  ;;  %v1985_v6 = vld [vmem:[%s2113_s10 + $0x144] sm:$0xf]  ;;  %v1994_v40 = vld [vmem:[%s2113_s10 + $0x18c] sm:$0xf]  ;;  %v1751_v42 = vld [vmem:[%s2113_s10 + $0x160] sm:$0xf] }
  0xbc   : > { %1006 = vmatmul.bf16.gmra.mxu1 %v1724_v39  ;;  %v1740_v19 = vor.u32 %v1985_v6, %v1737_v8 }
  0xbd   : > { %v1222_v48 = vsel %vm1220_vm3, %v1143_v46, 0.0  ;;  %v1293_v49 = vmul.f32 %v1143_v46, %v1143_v46  ;;  %v1395_v50 = vpack.c.bf16 %v1143_v46, %v1143_v46  ;;  %1095 = vmatmul.bf16.gmra.mxu2 %v1728_v43  ;;  %v1991_v43 = vld [vmem:[%s2113_s10 + $0x16c] sm:$0xf0] }
  0xbe   : > { %v1223_v53 = vadd.f32 %v1222_v48, %v1221_v47  ;;  %v1989_v47 = vld [vmem:[%s2113_s10 + $0x164] sm:$0xf]  ;;  %v1753_v48 = vld [vmem:[%s2113_s10 + $0x170] sm:$0xf0] }
  0xbf   : > { %v1325_v55 = vsel %vm1220_vm3, %v1293_v49, 0.0  ;;  %1428 = vst.msk [vmem:[%s2269_s9 + $0x4] sm:$0xf] %vm1426_vm2, %v1395_v50 }
  0xc0   : > { %v1326_v56 = vadd.f32 %v1325_v55, %v1324_v54  ;;  %v1056_v57 = vpop.f32.mrf.mxu2  ;;  %v880_v59 = vpop.f32.mrf.mxu0  ;;  %v1780_v54 = vor.u32 %v1994_v40, %v1777_v41 }
  0xc1   : > { %v1057_v58 = vadd.f32 %v1056_v57, %v968_v51  ;;  %v969_v60 = vpop.f32.mrf.mxu1  ;;  %v881_v62 = vadd.f32 %v2256_v7, %v880_v59  ;;  %v2297_v9 = vpop.f32.mrf.mxu3  ;;  %v1759_v51 = vld [vmem:[%s2113_s10 + $0x168] sm:$0xf]  ;;  %v1756_v59 = vor.u32 %v1989_v47, %v1753_v48 }
  0xc3   : > { %v1146_v61 = vadd.f32 %v1145_v18, %v1057_v58  ;;  %v970_v15 = vadd.f32 %v969_v60, %v881_v62  ;;  %v1736_v18 = vor.u32 %v1987_v2, %v1735_v1  ;;  %v1752_v58 = vor.u32 %v1991_v43, %v1751_v42 }
  0xc5   : > { %v1224_v3 = vsel %vm1220_vm3, %v1146_v61, 0.0  ;;  %v1294_v4 = vmul.f32 %v1146_v61, %v1146_v61  ;;  %v1396_v5 = vpack.c.bf16 %v1146_v61, %v1146_v61 }
  0xc6   : > { %v1225_v10 = vadd.f32 %v1224_v3, %v1223_v53  ;;  %1936 = vmatmul.msk.bf16.gmra.mxu3 %vm811_vm1, %v1764_v13  ;;  %v1992_v53 = vld [vmem:[%s2113_s10 + $0x174] sm:$0xf0] }
  0xc7   : > { %v1327_v14 = vsel %vm1220_vm3, %v1294_v4, 0.0  ;;  %1429 = vst.msk [vmem:[%s2269_s9 + $0x8] sm:$0xf] %vm1426_vm2, %v1396_v5  ;;  %v1760_v63 = vor.u32 %v1992_v53, %v1759_v51 }
  0xc8   : > { %v1328_v16 = vadd.f32 %v1327_v14, %v1326_v56  ;;  %v1058_v17 = vpop.f32.mrf.mxu2  ;;  %v883_v21 = vpop.f32.mrf.mxu0 }
  0xc9   : > { %v1059_v20 = vadd.f32 %v1058_v17, %v970_v15  ;;  %v972_v22 = vpop.f32.mrf.mxu1  ;;  %v884_v24 = vadd.f32 %v2256_v7, %v883_v21  ;;  %v1155_v30 = vpop.f32.mrf.mxu3  ;;  %v1998_v17 = vld [vmem:[%s2113_s10 + $0x1ac] sm:$0xf] }
  0xcb   : > { %v1148_v25 = vadd.f32 %v2275_v32, %v1059_v20  ;;  %922 = vmatmul.bf16.gmra.mxu0 %v1736_v18  ;;  %v973_v29 = vadd.f32 %v972_v22, %v884_v24  ;;  %v1793_v18 = vld [vmem:[%s2113_s10 + $0x1b8] sm:$0xf0]  ;;  %v1995_v20 = vld [vmem:[%s2113_s10 + $0x18c] sm:$0xf0]  ;;  %v1993_v24 = vld [vmem:[%s2113_s10 + $0x184] sm:$0xf] }
  0xcc   : > { %1011 = vmatmul.bf16.gmra.mxu1 %v1740_v19  ;;  %v1767_v19 = vld [vmem:[%s2113_s10 + $0x180] sm:$0xf] }
  0xcd   : > { %v1226_v26 = vsel %vm1220_vm3, %v1148_v25, 0.0  ;;  %v1295_v27 = vmul.f32 %v1148_v25, %v1148_v25  ;;  %v1397_v28 = vpack.c.bf16 %v1148_v25, %v1148_v25  ;;  %1100 = vmatmul.bf16.gmra.mxu2 %v1744_v23  ;;  %v1769_v25 = vld [vmem:[%s2113_s10 + $0x190] sm:$0xf0] }
  0xce   : > { %v1227_v31 = vadd.f32 %v1226_v26, %v1225_v10 }
  0xcf   : > { %v1329_v33 = vsel %vm1220_vm3, %v1295_v27, 0.0  ;;  %1430 = vst.msk [vmem:[%s2269_s9 + $0xc] sm:$0xf] %vm1426_vm2, %v1397_v28  ;;  %v1775_v28 = vld [vmem:[%s2113_s10 + $0x188] sm:$0xf] }
  0xd0   : > { %v1330_v32 = vadd.f32 %v1329_v33, %v1328_v16  ;;  %v1061_v34 = vpop.f32.mrf.mxu2  ;;  %v885_v36 = vpop.f32.mrf.mxu0 }
  0xd1   : > { %v1062_v35 = vadd.f32 %v1061_v34, %v973_v29  ;;  %v974_v37 = vpop.f32.mrf.mxu1  ;;  %v886_v39 = vadd.f32 %v2256_v7, %v885_v36  ;;  %v2319_v49 = vpop.f32.mrf.mxu3  ;;  %v1996_v29 = vld [vmem:[%s2113_s10 + $0x194] sm:$0xf0]  ;;  %v1772_v36 = vor.u32 %v1993_v24, %v1769_v25 }
  0xd2   : > { %v1776_v40 = vor.u32 %v1996_v29, %v1775_v28 }
  0xd3   : > { %v1151_v38 = vadd.f32 %v1150_v52, %v1062_v35  ;;  %v975_v55 = vadd.f32 %v974_v37, %v886_v39  ;;  %v1768_v35 = vor.u32 %v1995_v20, %v1767_v19 }
  0xd5   : > { %v1228_v44 = vsel %vm1220_vm3, %v1151_v38, 0.0  ;;  %v1296_v45 = vmul.f32 %v1151_v38, %v1151_v38  ;;  %v1398_v46 = vpack.c.bf16 %v1151_v38, %v1151_v38 }
  0xd6   : > { %v1229_v50 = vadd.f32 %v1228_v44, %v1227_v31  ;;  %1937 = vmatmul.msk.bf16.gmra.mxu3 %vm811_vm1, %v1780_v54  ;;  %v1796_v31 = vor.u32 %v1998_v17, %v1793_v18 }
  0xd7   : > { %v1331_v52 = vsel %vm1220_vm3, %v1296_v45, 0.0  ;;  %1431 = vst.msk [vmem:[%s2269_s9 + $0x10] sm:$0xf] %vm1426_vm2, %v1398_v46 }
  0xd8   : > { %v1332_v56 = vadd.f32 %v1331_v52, %v1330_v32  ;;  %v1063_v57 = vpop.f32.mrf.mxu2  ;;  %v888_v61 = vpop.f32.mrf.mxu0 }
  0xd9   : > { %v1064_v60 = vadd.f32 %v1063_v57, %v975_v55  ;;  %v977_v62 = vpop.f32.mrf.mxu1  ;;  %v889_v0 = vadd.f32 %v2256_v7, %v888_v61  ;;  %v1160_v6 = vpop.f32.mrf.mxu3  ;;  %v2002_v57 = vld [vmem:[%s2113_s10 + $0x1cc] sm:$0xf] }
  0xdb   : > { %v1153_v1 = vadd.f32 %v2297_v9, %v1064_v60  ;;  %927 = vmatmul.bf16.gmra.mxu0 %v1752_v58  ;;  %v978_v5 = vadd.f32 %v977_v62, %v889_v0  ;;  %v1809_v58 = vld [vmem:[%s2113_s10 + $0x1d8] sm:$0xf0]  ;;  %v1999_v60 = vld [vmem:[%s2113_s10 + $0x1ac] sm:$0xf0]  ;;  %v1997_v0 = vld [vmem:[%s2113_s10 + $0x1a4] sm:$0xf] }
  0xdc   : > { %1016 = vmatmul.bf16.gmra.mxu1 %v1756_v59  ;;  %v1783_v59 = vld [vmem:[%s2113_s10 + $0x1a0] sm:$0xf] }
  0xdd   : > { %v1230_v2 = vsel %vm1220_vm3, %v1153_v1, 0.0  ;;  %v1297_v3 = vmul.f32 %v1153_v1, %v1153_v1  ;;  %v1399_v4 = vpack.c.bf16 %v1153_v1, %v1153_v1  ;;  %1105 = vmatmul.bf16.gmra.mxu2 %v1760_v63  ;;  %v1785_v1 = vld [vmem:[%s2113_s10 + $0x1b0] sm:$0xf0] }
  0xde   : > { %v1231_v8 = vadd.f32 %v1230_v2, %v1229_v50 }
  0xdf   : > { %v1333_v10 = vsel %vm1220_vm3, %v1297_v3, 0.0  ;;  %1432 = vst.msk [vmem:[%s2269_s9 + $0x14] sm:$0xf] %vm1426_vm2, %v1399_v4  ;;  %v1791_v4 = vld [vmem:[%s2113_s10 + $0x1a8] sm:$0xf] }
  0xe0   : > { %v1334_v9 = vadd.f32 %v1333_v10, %v1332_v56  ;;  %v1066_v11 = vpop.f32.mrf.mxu2  ;;  %v890_v13 = vpop.f32.mrf.mxu0 }
  0xe1   : > { %v1067_v12 = vadd.f32 %v1066_v11, %v978_v5  ;;  %v979_v14 = vpop.f32.mrf.mxu1  ;;  %v891_v16 = vadd.f32 %v2256_v7, %v890_v13  ;;  %v2341_v26 = vpop.f32.mrf.mxu3  ;;  %v2000_v5 = vld [vmem:[%s2113_s10 + $0x1b4] sm:$0xf0]  ;;  %v1788_v13 = vor.u32 %v1997_v0, %v1785_v1 }
  0xe2   : > { %v1792_v17 = vor.u32 %v2000_v5, %v1791_v4 }
  0xe3   : > { %v1156_v15 = vadd.f32 %v1155_v30, %v1067_v12  ;;  %v980_v33 = vadd.f32 %v979_v14, %v891_v16  ;;  %v1784_v12 = vor.u32 %v1999_v60, %v1783_v59 }
  0xe5   : > { %v1232_v21 = vsel %vm1220_vm3, %v1156_v15, 0.0  ;;  %v1298_v22 = vmul.f32 %v1156_v15, %v1156_v15  ;;  %v1400_v23 = vpack.c.bf16 %v1156_v15, %v1156_v15 }
  0xe6   : > { %v1233_v27 = vadd.f32 %v1232_v21, %v1231_v8  ;;  %1938 = vmatmul.msk.bf16.gmra.mxu3 %vm811_vm1, %v1796_v31  ;;  %v1812_v8 = vor.u32 %v2002_v57, %v1809_v58 }
  0xe7   : > { %v1335_v30 = vsel %vm1220_vm3, %v1298_v22, 0.0  ;;  %1433 = vst.msk [vmem:[%s2269_s9 + $0x18] sm:$0xf] %vm1426_vm2, %v1400_v23 }
  0xe8   : > { %v1336_v32 = vadd.f32 %v1335_v30, %v1334_v9  ;;  %v1068_v34 = vpop.f32.mrf.mxu2  ;;  %v893_v38 = vpop.f32.mrf.mxu0 }
  0xe9   : > { %v1069_v37 = vadd.f32 %v1068_v34, %v980_v33  ;;  %v982_v39 = vpop.f32.mrf.mxu1  ;;  %v894_v41 = vadd.f32 %v2256_v7, %v893_v38  ;;  %v1165_v47 = vpop.f32.mrf.mxu3  ;;  %v2006_v34 = vld [vmem:[%s2113_s10 + $0x1ec] sm:$0xf] }
  0xeb   : > { %v1158_v42 = vadd.f32 %v2319_v49, %v1069_v37  ;;  %932 = vmatmul.bf16.gmra.mxu0 %v1768_v35  ;;  %v983_v46 = vadd.f32 %v982_v39, %v894_v41  ;;  %v1825_v35 = vld [vmem:[%s2113_s10 + $0x1f8] sm:$0xf0]  ;;  %v2003_v37 = vld [vmem:[%s2113_s10 + $0x1cc] sm:$0xf0]  ;;  %v2001_v41 = vld [vmem:[%s2113_s10 + $0x1c4] sm:$0xf] }
  0xec   : > { %1021 = vmatmul.bf16.gmra.mxu1 %v1772_v36  ;;  %v1799_v36 = vld [vmem:[%s2113_s10 + $0x1c0] sm:$0xf] }
  0xed   : > { %v1234_v43 = vsel %vm1220_vm3, %v1158_v42, 0.0  ;;  %v1299_v44 = vmul.f32 %v1158_v42, %v1158_v42  ;;  %v1401_v45 = vpack.c.bf16 %v1158_v42, %v1158_v42  ;;  %1110 = vmatmul.bf16.gmra.mxu2 %v1776_v40  ;;  %v1801_v42 = vld [vmem:[%s2113_s10 + $0x1d0] sm:$0xf0] }
  0xee   : > { %v1235_v48 = vadd.f32 %v1234_v43, %v1233_v27 }
  0xef   : > { %v1337_v50 = vsel %vm1220_vm3, %v1299_v44, 0.0  ;;  %1434 = vst.msk [vmem:[%s2269_s9 + $0x1c] sm:$0xf] %vm1426_vm2, %v1401_v45  ;;  %v1807_v45 = vld [vmem:[%s2113_s10 + $0x1c8] sm:$0xf] }
  0xf0   : > { %v1338_v49 = vadd.f32 %v1337_v50, %v1336_v32  ;;  %v1071_v51 = vpop.f32.mrf.mxu2  ;;  %v895_v54 = vpop.f32.mrf.mxu0 }
  0xf1   : > { %v1072_v53 = vadd.f32 %v1071_v51, %v983_v46  ;;  %v984_v52 = vpop.f32.mrf.mxu1  ;;  %v896_v56 = vadd.f32 %v2256_v7, %v895_v54  ;;  %v2363_v2 = vpop.f32.mrf.mxu3  ;;  %v2004_v46 = vld [vmem:[%s2113_s10 + $0x1d4] sm:$0xf0]  ;;  %v1804_v54 = vor.u32 %v2001_v41, %v1801_v42 }
  0xf2   : > { %v1808_v57 = vor.u32 %v2004_v46, %v1807_v45 }
  0xf3   : > { %v1161_v55 = vadd.f32 %v1160_v6, %v1072_v53  ;;  %v985_v10 = vadd.f32 %v984_v52, %v896_v56  ;;  %v1800_v53 = vor.u32 %v2003_v37, %v1799_v36 }
  0xf5   : > { %v1236_v61 = vsel %vm1220_vm3, %v1161_v55, 0.0  ;;  %v1300_v62 = vmul.f32 %v1161_v55, %v1161_v55  ;;  %v1402_v63 = vpack.c.bf16 %v1161_v55, %v1161_v55 }
  0xf6   : > { %v1237_v3 = vadd.f32 %v1236_v61, %v1235_v48  ;;  %1939 = vmatmul.msk.bf16.gmra.mxu3 %vm811_vm1, %v1812_v8  ;;  %v1828_v48 = vor.u32 %v2006_v34, %v1825_v35 }
  0xf7   : > { %v1339_v6 = vsel %vm1220_vm3, %v1300_v62, 0.0  ;;  %1435 = vst.msk [vmem:[%s2269_s9 + $0x20] sm:$0xf] %vm1426_vm2, %v1402_v63 }
  0xf8   : > { %v1340_v9 = vadd.f32 %v1339_v6, %v1338_v49  ;;  %v1073_v11 = vpop.f32.mrf.mxu2  ;;  %v898_v15 = vpop.f32.mrf.mxu0 }
  0xf9   : > { %v1074_v14 = vadd.f32 %v1073_v11, %v985_v10  ;;  %v987_v16 = vpop.f32.mrf.mxu1  ;;  %v899_v18 = vadd.f32 %v2256_v7, %v898_v15  ;;  %v1170_v24 = vpop.f32.mrf.mxu3  ;;  %v1815_v11 = vld [vmem:[%s2113_s10 + $0x1e0] sm:$0xf] }
  0xfb   : > { %v1163_v19 = vadd.f32 %v2341_v26, %v1074_v14  ;;  %937 = vmatmul.bf16.gmra.mxu0 %v1784_v12  ;;  %v988_v23 = vadd.f32 %v987_v16, %v899_v18  ;;  %v2007_v12 = vld [vmem:[%s2113_s10 + $0x1ec] sm:$0xf0]  ;;  %v2005_v16 = vld [vmem:[%s2113_s10 + $0x1e4] sm:$0xf] }
  0xfc   : > { %1026 = vmatmul.bf16.gmra.mxu1 %v1788_v13 }
  0xfd   : > { %v1238_v20 = vsel %vm1220_vm3, %v1163_v19, 0.0  ;;  %v1301_v21 = vmul.f32 %v1163_v19, %v1163_v19  ;;  %v1403_v22 = vpack.c.bf16 %v1163_v19, %v1163_v19  ;;  %1115 = vmatmul.bf16.gmra.mxu2 %v1792_v17  ;;  %v1817_v17 = vld [vmem:[%s2113_s10 + $0x1f0] sm:$0xf0] }
  0xfe   : > { %v1239_v25 = vadd.f32 %v1238_v20, %v1237_v3  ;;  %v1823_v20 = vld [vmem:[%s2113_s10 + $0x1e8] sm:$0xf] }
  0xff   : > { %v1341_v27 = vsel %vm1220_vm3, %v1301_v21, 0.0  ;;  %1436 = vst.msk [vmem:[%s2269_s9 + $0x24] sm:$0xf] %vm1426_vm2, %v1403_v22  ;;  %v2008_v21 = vld [vmem:[%s2113_s10 + $0x1f4] sm:$0xf0] }
 0x100   : > { %v1342_v26 = vadd.f32 %v1341_v27, %v1340_v9  ;;  %v1076_v28 = vpop.f32.mrf.mxu2  ;;  %v900_v31 = vpop.f32.mrf.mxu0  ;;  %v1816_v27 = vor.u32 %v2007_v12, %v1815_v11 }
 0x101   : > { %v1077_v29 = vadd.f32 %v1076_v28, %v988_v23  ;;  %v989_v30 = vpop.f32.mrf.mxu1  ;;  %v901_v32 = vadd.f32 %v2256_v7, %v900_v31  ;;  %v1172_v43 = vpop.f32.mrf.mxu3 }
 0x103   : > { %v1166_v33 = vadd.f32 %v1165_v47, %v1077_v29  ;;  %v990_v50 = vadd.f32 %v989_v30, %v901_v32  ;;  %v1824_v30 = vor.u32 %v2008_v21, %v1823_v20 }
 0x105   : > { %v1240_v38 = vsel %vm1220_vm3, %v1166_v33, 0.0  ;;  %v1302_v39 = vmul.f32 %v1166_v33, %v1166_v33  ;;  %v1404_v40 = vpack.c.bf16 %v1166_v33, %v1166_v33 }
 0x106   : > { %v1241_v44 = vadd.f32 %v1240_v38, %v1239_v25  ;;  %1940 = vmatmul.msk.bf16.gmra.mxu3 %vm811_vm1, %v1828_v48 }
 0x107   : > { %v1343_v47 = vsel %vm1220_vm3, %v1302_v39, 0.0  ;;  %1437 = vst.msk [vmem:[%s2269_s9 + $0x28] sm:$0xf] %vm1426_vm2, %v1404_v40 }
 0x108   : > { %v1344_v49 = vadd.f32 %v1343_v47, %v1342_v26  ;;  %v1078_v51 = vpop.f32.mrf.mxu2  ;;  %v903_v55 = vpop.f32.mrf.mxu0  ;;  %v1820_v26 = vor.u32 %v2005_v16, %v1817_v17 }
 0x109   : > { %v1079_v52 = vadd.f32 %v1078_v51, %v990_v50  ;;  %v992_v56 = vpop.f32.mrf.mxu1  ;;  %v904_v58 = vadd.f32 %v2256_v7, %v903_v55  ;;  %v1175_v0 = vpop.f32.mrf.mxu3 }
 0x10b   : > { %v1168_v59 = vadd.f32 %v2363_v2, %v1079_v52  ;;  %942 = vmatmul.bf16.gmra.mxu0 %v1800_v53  ;;  %v993_v63 = vadd.f32 %v992_v56, %v904_v58 }
 0x10c   : > { %1031 = vmatmul.bf16.gmra.mxu1 %v1804_v54 }
 0x10d   : > { %v1242_v60 = vsel %vm1220_vm3, %v1168_v59, 0.0  ;;  %v1303_v61 = vmul.f32 %v1168_v59, %v1168_v59  ;;  %v1405_v62 = vpack.c.bf16 %v1168_v59, %v1168_v59  ;;  %1120 = vmatmul.bf16.gmra.mxu2 %v1808_v57 }
 0x10e   : > { %v1243_v1 = vadd.f32 %v1242_v60, %v1241_v44 }
 0x10f   : > { %v1345_v3 = vsel %vm1220_vm3, %v1303_v61, 0.0  ;;  %1438 = vst.msk [vmem:[%s2269_s9 + $0x2c] sm:$0xf] %vm1426_vm2, %v1405_v62 }
 0x110   : > { %v1346_v4 = vadd.f32 %v1345_v3, %v1344_v49  ;;  %v1081_v2 = vpop.f32.mrf.mxu2  ;;  %v905_v8 = vpop.f32.mrf.mxu0 }
 0x111   : > { %v1082_v5 = vadd.f32 %v1081_v2, %v993_v63  ;;  %v994_v6 = vpop.f32.mrf.mxu1  ;;  %v906_v9 = vadd.f32 %v2256_v7, %v905_v8  ;;  %v1177_v18 = vpop.f32.mrf.mxu3 }
 0x113   : > { %v1171_v10 = vadd.f32 %v1170_v24, %v1082_v5  ;;  %v995_v23 = vadd.f32 %v994_v6, %v906_v9 }
 0x115   : > { %v1244_v13 = vsel %vm1220_vm3, %v1171_v10, 0.0  ;;  %v1304_v14 = vmul.f32 %v1171_v10, %v1171_v10  ;;  %v1406_v15 = vpack.c.bf16 %v1171_v10, %v1171_v10 }
 0x116   : > { %v1245_v19 = vadd.f32 %v1244_v13, %v1243_v1 }
 0x117   : > { %v1347_v22 = vsel %vm1220_vm3, %v1304_v14, 0.0  ;;  %1439 = vst.msk [vmem:[%s2269_s9 + $0x30] sm:$0xf] %vm1426_vm2, %v1406_v15 }
 0x118   : > { %v1348_v24 = vadd.f32 %v1347_v22, %v1346_v4  ;;  %v1083_v25 = vpop.f32.mrf.mxu2  ;;  %v908_v29 = vpop.f32.mrf.mxu0 }
 0x119   : > { %v1084_v28 = vadd.f32 %v1083_v25, %v995_v23  ;;  %v997_v31 = vpop.f32.mrf.mxu1  ;;  %v909_v33 = vadd.f32 %v2256_v7, %v908_v29  ;;  %v1180_v38 = vpop.f32.mrf.mxu3 }
 0x11b   : > { %v1173_v32 = vadd.f32 %v1172_v43, %v1084_v28  ;;  %947 = vmatmul.bf16.gmra.mxu0 %v1816_v27  ;;  %v998_v37 = vadd.f32 %v997_v31, %v909_v33 }
 0x11c   : > { %1036 = vmatmul.bf16.gmra.mxu1 %v1820_v26 }
 0x11d   : > { %v1246_v34 = vsel %vm1220_vm3, %v1173_v32, 0.0  ;;  %v1305_v35 = vmul.f32 %v1173_v32, %v1173_v32  ;;  %v1407_v36 = vpack.c.bf16 %v1173_v32, %v1173_v32  ;;  %1125 = vmatmul.bf16.gmra.mxu2 %v1824_v30 }
 0x11e   : > { %v1247_v39 = vadd.f32 %v1246_v34, %v1245_v19 }
 0x11f   : > { %v1349_v40 = vsel %vm1220_vm3, %v1305_v35, 0.0  ;;  %1440 = vst.msk [vmem:[%s2269_s9 + $0x34] sm:$0xf] %vm1426_vm2, %v1407_v36 }
 0x120   : > { %v1350_v41 = vadd.f32 %v1349_v40, %v1348_v24  ;;  %v1086_v42 = vpop.f32.mrf.mxu2  ;;  %v910_v45 = vpop.f32.mrf.mxu0 }
 0x121   : > { %v1087_v44 = vadd.f32 %v1086_v42, %v998_v37  ;;  %v999_v43 = vpop.f32.mrf.mxu1  ;;  %v911_v48 = vadd.f32 %v2256_v7, %v910_v45  ;;  %v1182_v51 = vpop.f32.mrf.mxu3 }
 0x123   : > { %v1176_v46 = vadd.f32 %v1175_v0, %v1087_v44  ;;  %v1000_v52 = vadd.f32 %v999_v43, %v911_v48 }
 0x125   : > { %v1248_v47 = vsel %vm1220_vm3, %v1176_v46, 0.0  ;;  %v1306_v50 = vmul.f32 %v1176_v46, %v1176_v46  ;;  %v1408_v49 = vpack.c.bf16 %v1176_v46, %v1176_v46 }
 0x126   : > { %v1249_v53 = vadd.f32 %v1248_v47, %v1247_v39 }
 0x127   : > { %v1351_v54 = vsel %vm1220_vm3, %v1306_v50, 0.0  ;;  %1441 = vst.msk [vmem:[%s2269_s9 + $0x38] sm:$0xf] %vm1426_vm2, %v1408_v49 }
 0x128   : > { %v1352_v55 = vadd.f32 %v1351_v54, %v1350_v41  ;;  %v1088_v56 = vpop.f32.mrf.mxu2  ;;  %v913_v58 = vpop.f32.mrf.mxu0 }
 0x129   : > { %v1089_v57 = vadd.f32 %v1088_v56, %v1000_v52  ;;  %v1002_v59 = vpop.f32.mrf.mxu1  ;;  %v914_v60 = vadd.f32 %v2256_v7, %v913_v58  ;;  %v1185_v3 = vpop.f32.mrf.mxu3 }
 0x12b   : > { %v1178_v61 = vadd.f32 %v1177_v18, %v1089_v57  ;;  %v1003_v1 = vadd.f32 %v1002_v59, %v914_v60 }
 0x12d   : > { %v1250_v62 = vsel %vm1220_vm3, %v1178_v61, 0.0  ;;  %v1307_v63 = vmul.f32 %v1178_v61, %v1178_v61  ;;  %v1409_v0 = vpack.c.bf16 %v1178_v61, %v1178_v61 }
 0x12e   : > { %v1251_v4 = vadd.f32 %v1250_v62, %v1249_v53 }
 0x12f   : > { %v1353_v2 = vsel %vm1220_vm3, %v1307_v63, 0.0  ;;  %1442 = vst.msk [vmem:[%s2269_s9 + $0x3c] sm:$0xf] %vm1426_vm2, %v1409_v0 }
 0x130   : > { %v1354_v5 = vadd.f32 %v1353_v2, %v1352_v55  ;;  %v1091_v8 = vpop.f32.mrf.mxu2  ;;  %v915_v10 = vpop.f32.mrf.mxu0 }
 0x131   : > { %v1092_v6 = vadd.f32 %v1091_v8, %v1003_v1  ;;  %v1004_v9 = vpop.f32.mrf.mxu1  ;;  %v916_v12 = vadd.f32 %v2256_v7, %v915_v10  ;;  %v1187_v16 = vpop.f32.mrf.mxu3 }
 0x133   : > { %v1181_v11 = vadd.f32 %v1180_v38, %v1092_v6  ;;  %v1005_v19 = vadd.f32 %v1004_v9, %v916_v12 }
 0x135   : > { %v1252_v13 = vsel %vm1220_vm3, %v1181_v11, 0.0  ;;  %v1308_v14 = vmul.f32 %v1181_v11, %v1181_v11  ;;  %v1410_v15 = vpack.c.bf16 %v1181_v11, %v1181_v11 }
 0x136   : > { %v1253_v17 = vadd.f32 %v1252_v13, %v1251_v4 }
 0x137   : > { %v1355_v18 = vsel %vm1220_vm3, %v1308_v14, 0.0  ;;  %1443 = vst.msk [vmem:[%s2269_s9 + $0x40] sm:$0xf] %vm1426_vm2, %v1410_v15 }
 0x138   : > { %v1356_v20 = vadd.f32 %v1355_v18, %v1354_v5  ;;  %v1093_v21 = vpop.f32.mrf.mxu2  ;;  %v918_v23 = vpop.f32.mrf.mxu0 }
 0x139   : > { %v1094_v22 = vadd.f32 %v1093_v21, %v1005_v19  ;;  %v1007_v24 = vpop.f32.mrf.mxu1  ;;  %v919_v25 = vadd.f32 %v2256_v7, %v918_v23  ;;  %v1190_v30 = vpop.f32.mrf.mxu3 }
 0x13b   : > { %v1183_v27 = vadd.f32 %v1182_v51, %v1094_v22  ;;  %v1008_v31 = vadd.f32 %v1007_v24, %v919_v25 }
 0x13d   : > { %v1254_v26 = vsel %vm1220_vm3, %v1183_v27, 0.0  ;;  %v1309_v28 = vmul.f32 %v1183_v27, %v1183_v27  ;;  %v1411_v29 = vpack.c.bf16 %v1183_v27, %v1183_v27 }
 0x13e   : > { %v1255_v33 = vadd.f32 %v1254_v26, %v1253_v17 }
 0x13f   : > { %v1357_v32 = vsel %vm1220_vm3, %v1309_v28, 0.0  ;;  %1444 = vst.msk [vmem:[%s2269_s9 + $0x44] sm:$0xf] %vm1426_vm2, %v1411_v29 }
 0x140   : > { %v1358_v34 = vadd.f32 %v1357_v32, %v1356_v20  ;;  %v1096_v35 = vpop.f32.mrf.mxu2  ;;  %v920_v37 = vpop.f32.mrf.mxu0 }
 0x141   : > { %v1097_v36 = vadd.f32 %v1096_v35, %v1008_v31  ;;  %v1009_v38 = vpop.f32.mrf.mxu1  ;;  %v921_v40 = vadd.f32 %v2256_v7, %v920_v37  ;;  %v1192_v43 = vpop.f32.mrf.mxu3 }
 0x143   : > { %v1186_v39 = vadd.f32 %v1185_v3, %v1097_v36  ;;  %v1010_v48 = vadd.f32 %v1009_v38, %v921_v40 }
 0x145   : > { %v1256_v41 = vsel %vm1220_vm3, %v1186_v39, 0.0  ;;  %v1310_v42 = vmul.f32 %v1186_v39, %v1186_v39  ;;  %v1412_v44 = vpack.c.bf16 %v1186_v39, %v1186_v39 }
 0x146   : > { %v1257_v45 = vadd.f32 %v1256_v41, %v1255_v33 }
 0x147   : > { %v1359_v46 = vsel %vm1220_vm3, %v1310_v42, 0.0  ;;  %1445 = vst.msk [vmem:[%s2269_s9 + $0x48] sm:$0xf] %vm1426_vm2, %v1412_v44 }
 0x148   : > { %v1360_v47 = vadd.f32 %v1359_v46, %v1358_v34  ;;  %v1098_v50 = vpop.f32.mrf.mxu2  ;;  %v923_v51 = vpop.f32.mrf.mxu0 }
 0x149   : > { %v1099_v49 = vadd.f32 %v1098_v50, %v1010_v48  ;;  %v1012_v53 = vpop.f32.mrf.mxu1  ;;  %v924_v54 = vadd.f32 %v2256_v7, %v923_v51  ;;  %v1195_v63 = vpop.f32.mrf.mxu3 }
 0x14b   : > { %v1188_v52 = vadd.f32 %v1187_v16, %v1099_v49  ;;  %v1013_v58 = vadd.f32 %v1012_v53, %v924_v54 }
 0x14d   : > { %v1258_v55 = vsel %vm1220_vm3, %v1188_v52, 0.0  ;;  %v1311_v56 = vmul.f32 %v1188_v52, %v1188_v52  ;;  %v1413_v57 = vpack.c.bf16 %v1188_v52, %v1188_v52 }
 0x14e   : > { %v1259_v59 = vadd.f32 %v1258_v55, %v1257_v45 }
 0x14f   : > { %v1361_v60 = vsel %vm1220_vm3, %v1311_v56, 0.0  ;;  %1446 = vst.msk [vmem:[%s2269_s9 + $0x4c] sm:$0xf] %vm1426_vm2, %v1413_v57 }
 0x150   : > { %v1362_v61 = vadd.f32 %v1361_v60, %v1360_v47  ;;  %v1101_v62 = vpop.f32.mrf.mxu2  ;;  %v925_v1 = vpop.f32.mrf.mxu0 }
 0x151   : > { %v1102_v0 = vadd.f32 %v1101_v62, %v1013_v58  ;;  %v1014_v3 = vpop.f32.mrf.mxu1  ;;  %v926_v2 = vadd.f32 %v2256_v7, %v925_v1  ;;  %v1197_v18 = vpop.f32.mrf.mxu3 }
 0x153   : > { %v1191_v4 = vadd.f32 %v1190_v30, %v1102_v0  ;;  %v1015_v11 = vadd.f32 %v1014_v3, %v926_v2 }
 0x155   : > { %v1260_v5 = vsel %vm1220_vm3, %v1191_v4, 0.0  ;;  %v1312_v8 = vmul.f32 %v1191_v4, %v1191_v4  ;;  %v1414_v6 = vpack.c.bf16 %v1191_v4, %v1191_v4 }
 0x156   : > { %v2445_v10 = vadd.f32 %v1260_v5, %v1259_v59 }
 0x157   : > { %v1363_v9 = vsel %vm1220_vm3, %v1312_v8, 0.0  ;;  %1447 = vst.msk [vmem:[%s2269_s9 + $0x50] sm:$0xf] %vm1426_vm2, %v1414_v6 }
 0x158   : > { %v2450_v12 = vadd.f32 %v1363_v9, %v1362_v61  ;;  %v1103_v13 = vpop.f32.mrf.mxu2  ;;  %v928_v15 = vpop.f32.mrf.mxu0 }
 0x159   : > { %v1104_v14 = vadd.f32 %v1103_v13, %v1015_v11  ;;  %v1017_v16 = vpop.f32.mrf.mxu1  ;;  %v929_v17 = vadd.f32 %v2256_v7, %v928_v15  ;;  %v1200_v28 = vpop.f32.mrf.mxu3 }
 0x15b   : > { %v2453_v19 = vadd.f32 %v1192_v43, %v1104_v14  ;;  %v1018_v21 = vadd.f32 %v1017_v16, %v929_v17 }
 0x15d   : > { %v1415_v20 = vpack.c.bf16 %v2453_v19, %v2453_v19 }
 0x15f   : > { %1448 = vst.msk [vmem:[%s2269_s9 + $0x54] sm:$0xf] %vm1426_vm2, %v1415_v20  ;;  %v2042_v20 = vld [vmem:[%s2549_s2] ss:$0 sm:$0xff] }
 0x160   : > { %v1106_v22 = vpop.f32.mrf.mxu2  ;;  %v930_v24 = vpop.f32.mrf.mxu0 }
 0x161   : > { %v1107_v23 = vadd.f32 %v1106_v22, %v1018_v21  ;;  %v1019_v25 = vpop.f32.mrf.mxu1  ;;  %v931_v26 = vadd.f32 %v2256_v7, %v930_v24  ;;  %v1202_v39 = vpop.f32.mrf.mxu3  ;;  %v1262_v24 = vsel %vm1220_vm3, %v2453_v19, 0.0 }
 0x163   : > { %v2459_v27 = vadd.f32 %v1195_v63, %v1107_v23  ;;  %v1020_v31 = vadd.f32 %v1019_v25, %v931_v26 }
 0x165   : > { %v1416_v29 = vpack.c.bf16 %v2459_v27, %v2459_v27  ;;  %v1314_v25 = vmul.f32 %v2459_v27, %v2459_v27 }
 0x167   : > { %1449 = vst.msk [vmem:[%s2269_s9 + $0x58] sm:$0xf] %vm1426_vm2, %v1416_v29 }
 0x168   : > { %v1108_v30 = vpop.f32.mrf.mxu2  ;;  %v933_v32 = vpop.f32.mrf.mxu0 }
 0x169   : > { %v1109_v33 = vadd.f32 %v1108_v30, %v1020_v31  ;;  %v1022_v34 = vpop.f32.mrf.mxu1  ;;  %v934_v35 = vadd.f32 %v2256_v7, %v933_v32  ;;  %v1205_v50 = vpop.f32.mrf.mxu3  ;;  %v1264_v30 = vsel %vm1220_vm3, %v2459_v27, 0.0 }
 0x16b   : > { %v2467_v36 = vadd.f32 %v1197_v18, %v1109_v33  ;;  %v1023_v38 = vadd.f32 %v1022_v34, %v934_v35  ;;  %v1263_v34 = vadd.f32 %v1262_v24, %v2445_v10  ;;  %v1367_v35 = vsel %vm1220_vm3, %v1314_v25, 0.0 }
 0x16d   : > { %v1417_v37 = vpack.c.bf16 %v2467_v36, %v2467_v36 }
 0x16f   : > { %1450 = vst.msk [vmem:[%s2269_s9 + $0x5c] sm:$0xf] %vm1426_vm2, %v1417_v37  ;;  %v1266_v37 = vsel %vm1220_vm3, %v2467_v36, 0.0 }
 0x170   : > { %v1111_v40 = vpop.f32.mrf.mxu2  ;;  %v935_v42 = vpop.f32.mrf.mxu0 }
 0x171   : > { %v1112_v41 = vadd.f32 %v1111_v40, %v1023_v38  ;;  %v1024_v44 = vpop.f32.mrf.mxu1  ;;  %v936_v43 = vadd.f32 %v2256_v7, %v935_v42  ;;  %v1207_v61 = vpop.f32.mrf.mxu3 }
 0x173   : > { %v2473_v45 = vadd.f32 %v1200_v28, %v1112_v41  ;;  %v1025_v48 = vadd.f32 %v1024_v44, %v936_v43  ;;  %v1315_v28 = vmul.f32 %v2467_v36, %v2467_v36  ;;  %v1265_v41 = vadd.f32 %v1264_v30, %v1263_v34 }
 0x175   : > { %v1418_v46 = vpack.c.bf16 %v2473_v45, %v2473_v45  ;;  %v1316_v38 = vmul.f32 %v2473_v45, %v2473_v45  ;;  %v1369_v27 = vsel %vm1220_vm3, %v1315_v28, 0.0  ;;  %v1268_v10 = vsel %vm1220_vm3, %v2473_v45, 0.0 }
 0x177   : > { %1451 = vst.msk [vmem:[%s2269_s9 + $0x60] sm:$0xf] %vm1426_vm2, %v1418_v46 }
 0x178   : > { %v1113_v47 = vpop.f32.mrf.mxu2  ;;  %v938_v51 = vpop.f32.mrf.mxu0 }
 0x179   : > { %v1114_v49 = vadd.f32 %v1113_v47, %v1025_v48  ;;  %v1027_v53 = vpop.f32.mrf.mxu1  ;;  %v939_v54 = vadd.f32 %v2256_v7, %v938_v51  ;;  %v1210_v9 = vpop.f32.mrf.mxu3  ;;  %v1267_v47 = vadd.f32 %v1266_v37, %v1265_v41 }
 0x17b   : > { %v1203_v52 = vadd.f32 %v1202_v39, %v1114_v49  ;;  %v1028_v56 = vadd.f32 %v1027_v53, %v939_v54  ;;  %v1269_v51 = vadd.f32 %v1268_v10, %v1267_v47 }
 0x17d   : > { %v1419_v55 = vpack.c.bf16 %v1203_v52, %v1203_v52  ;;  %v1317_v44 = vmul.f32 %v1203_v52, %v1203_v52  ;;  %v1270_v49 = vsel %vm1220_vm3, %v1203_v52, 0.0 }
 0x17f   : > { %1452 = vst.msk [vmem:[%s2269_s9 + $0x64] sm:$0xf] %vm1426_vm2, %v1419_v55  ;;  %v1373_v55 = vsel %vm1220_vm3, %v1317_v44, 0.0 }
 0x180   : > { %v1116_v57 = vpop.f32.mrf.mxu2  ;;  %v940_v59 = vpop.f32.mrf.mxu0 }
 0x181   : > { %v1117_v58 = vadd.f32 %v1116_v57, %v1028_v56  ;;  %v1029_v60 = vpop.f32.mrf.mxu1  ;;  %v941_v63 = vadd.f32 %v2256_v7, %v940_v59  ;;  %v1212_v23 = vpop.f32.mrf.mxu3 }
 0x183   : > { %v1206_v62 = vadd.f32 %v1205_v50, %v1117_v58  ;;  %v1030_v1 = vadd.f32 %v1029_v60, %v941_v63  ;;  %v1371_v50 = vsel %vm1220_vm3, %v1316_v38, 0.0  ;;  %v1271_v60 = vadd.f32 %v1270_v49, %v1269_v51 }
 0x185   : > { %v1420_v0 = vpack.c.bf16 %v1206_v62, %v1206_v62  ;;  %v1318_v36 = vmul.f32 %v1206_v62, %v1206_v62  ;;  %v1272_v45 = vsel %vm1220_vm3, %v1206_v62, 0.0 }
 0x187   : > { %1453 = vst.msk [vmem:[%s2269_s9 + $0x68] sm:$0xf] %vm1426_vm2, %v1420_v0 }
 0x188   : > { %v1118_v3 = vpop.f32.mrf.mxu2  ;;  %v943_v2 = vpop.f32.mrf.mxu0 }
 0x189   : > { %v1119_v4 = vadd.f32 %v1118_v3, %v1030_v1  ;;  %v1032_v5 = vpop.f32.mrf.mxu1  ;;  %v944_v8 = vadd.f32 %v2256_v7, %v943_v2  ;;  %v1313_v7 = vmul.f32 %v2453_v19, %v2453_v19  ;;  %v1215_v53 = vpop.f32.mrf.mxu3 }
 0x18b   : > { %v1208_v6 = vadd.f32 %v1207_v61, %v1119_v4  ;;  %v1033_v13 = vadd.f32 %v1032_v5, %v944_v8  ;;  %v1365_v31 = vsel %vm1220_vm3, %v1313_v7, 0.0  ;;  %v1375_v61 = vsel %vm1220_vm3, %v1318_v36, 0.0 }
 0x18c   : > { %v1366_v40 = vadd.f32 %v1365_v31, %v2450_v12  ;;  %v1273_v4 = vadd.f32 %v1272_v45, %v1271_v60 }
 0x18d   : > { %v1421_v11 = vpack.c.bf16 %v1208_v6, %v1208_v6  ;;  %v1319_v56 = vmul.f32 %v1208_v6, %v1208_v6  ;;  %v1274_v63 = vsel %vm1220_vm3, %v1208_v6, 0.0 }
 0x18e   : > { %v1368_v48 = vadd.f32 %v1367_v35, %v1366_v40 }
 0x18f   : > { %1454 = vst.msk [vmem:[%s2269_s9 + $0x6c] sm:$0xf] %vm1426_vm2, %v1421_v11  ;;  %v1377_v2 = vsel %vm1220_vm3, %v1319_v56, 0.0  ;;  %v1275_v11 = vadd.f32 %v1274_v63, %v1273_v4 }
 0x190   : > { %v1121_v14 = vpop.f32.mrf.mxu2  ;;  %v945_v16 = vpop.f32.mrf.mxu0  ;;  %v1370_v12 = vadd.f32 %v1369_v27, %v1368_v48 }
 0x191   : > { %v1122_v15 = vadd.f32 %v1121_v14, %v1033_v13  ;;  %v1034_v17 = vpop.f32.mrf.mxu1  ;;  %v946_v21 = vadd.f32 %v2042_v20, %v945_v16  ;;  %v1217_v25 = vpop.f32.mrf.mxu3 }
 0x192   : > { %v1372_v59 = vadd.f32 %v1371_v50, %v1370_v12 }
 0x193   : > { %v1211_v18 = vadd.f32 %v1210_v9, %v1122_v15  ;;  %v1035_v26 = vadd.f32 %v1034_v17, %v946_v21 }
 0x194   : > { %v1374_v3 = vadd.f32 %v1373_v55, %v1372_v59 }
 0x195   : > { %v1422_v22 = vpack.c.bf16 %v1211_v18, %v1211_v18  ;;  %v1320_v52 = vmul.f32 %v1211_v18, %v1211_v18  ;;  %v1276_v5 = vsel %vm1220_vm3, %v1211_v18, 0.0 }
 0x196   : > { %v1376_v9 = vadd.f32 %v1375_v61, %v1374_v3 }
 0x197   : > { %1455 = vst.msk [vmem:[%s2269_s9 + $0x70] sm:$0xf] %vm1426_vm2, %v1422_v22  ;;  %v1379_v14 = vsel %vm1220_vm3, %v1320_v52, 0.0 }
 0x198   : > { %v1123_v29 = vpop.f32.mrf.mxu2  ;;  %v948_v32 = vpop.f32.mrf.mxu0  ;;  %v1378_v17 = vadd.f32 %v1377_v2, %v1376_v9 }
 0x199   : > { %v1124_v33 = vadd.f32 %v1123_v29, %v1035_v26  ;;  %v949_v19 = vadd.f32 %v2042_v20, %v948_v32  ;;  %v1037_v42 = vpop.f32.mrf.mxu1 }
 0x19b   : > { %v1213_v39 = vadd.f32 %v1212_v23, %v1124_v33  ;;  %v1038_v46 = vadd.f32 %v1037_v42, %v949_v19  ;;  %v1380_v23 = vadd.f32 %v1379_v14, %v1378_v17 }
 0x19d   : > { %v1423_v43 = vpack.c.bf16 %v1213_v39, %v1213_v39  ;;  %v1321_v62 = vmul.f32 %v1213_v39, %v1213_v39  ;;  %v1278_v15 = vsel %vm1220_vm3, %v1213_v39, 0.0 }
 0x19f   : > { %1456 = vst.msk [vmem:[%s2269_s9 + $0x74] sm:$0xf] %vm1426_vm2, %v1423_v43  ;;  %v1381_v7 = vsel %vm1220_vm3, %v1321_v62, 0.0 }
 0x1a0   : > { %v1126_v54 = vpop.f32.mrf.mxu2  ;;  %v950_v58 = vpop.f32.mrf.mxu0  ;;  %v1382_v29 = vadd.f32 %v1381_v7, %v1380_v23 }
 0x1a1   : > { %v1127_v57 = vadd.f32 %v1126_v54, %v1038_v46  ;;  %v951_v1 = vadd.f32 %v2042_v20, %v950_v58  ;;  %v1039_v13 = vpop.f32.mrf.mxu1  ;;  %v1277_v20 = vadd.f32 %v1276_v5, %v1275_v11 }
 0x1a3   : > { %v1216_v0 = vadd.f32 %v1215_v53, %v1127_v57  ;;  %v1040_v16 = vadd.f32 %v1039_v13, %v951_v1  ;;  %v1279_v24 = vadd.f32 %v1278_v15, %v1277_v20 }
 0x1a5   : > { %v1424_v8 = vpack.c.bf16 %v1216_v0, %v1216_v0  ;;  %v1322_v6 = vmul.f32 %v1216_v0, %v1216_v0  ;;  %v1280_v18 = vsel %vm1220_vm3, %v1216_v0, 0.0 }
 0x1a6   : > { %v1281_v31 = vadd.f32 %v1280_v18, %v1279_v24 }
 0x1a7   : > { %1457 = vst.msk [vmem:[%s2269_s9 + $0x78] sm:$0xf] %vm1426_vm2, %v1424_v8  ;;  %v1383_v26 = vsel %vm1220_vm3, %v1322_v6, 0.0 }
 0x1a8   : > { %v1128_v21 = vpop.f32.mrf.mxu2  ;;  %v1384_v34 = vadd.f32 %v1383_v26, %v1382_v29 }
 0x1a9   : > { %v1129_v22 = vadd.f32 %v1128_v21, %v1040_v16 }
 0x1ab   : > { %v1218_v28 = vadd.f32 %v1217_v25, %v1129_v22 }
 0x1ad   : > { %v1282_v30 = vsel %vm1220_vm3, %v1218_v28, 0.0  ;;  %v1323_v33 = vmul.f32 %v1218_v28, %v1218_v28  ;;  %v1425_v32 = vpack.c.bf16 %v1218_v28, %v1218_v28 }
 0x1ae   : > { %v1283_v19 = vadd.f32 %v1282_v30, %v1281_v31 }
 0x1af   : > { %v1385_v35 = vsel %vm1220_vm3, %v1323_v33, 0.0  ;;  %1458 = vst.msk [vmem:[%s2269_s9 + $0x7c] sm:$0xf] %vm1426_vm2, %v1425_v32 }
 0x1b0   : > { %v1284_v37 = vrot.slane %v1283_v19, 4  ;;  %v1386_v38 = vadd.f32 %v1385_v35, %v1384_v34 }
 0x1b2   : > { %v1285_v39 = vadd.f32 %v1284_v37, %v1283_v19  ;;  %v1387_v40 = vrot.slane %v1386_v38, 4 }
 0x1b4   : > { %v1286_v41 = vrot.slane %v1285_v39, 2  ;;  %v1388_v27 = vadd.f32 %v1387_v40, %v1386_v38 }
 0x1b6   : > { %v1287_v42 = vadd.f32 %v1286_v41, %v1285_v39  ;;  %v1389_v10 = vrot.slane %v1388_v27, 2 }
 0x1b8   : > { %v1288_v44 = vrot.slane %v1287_v42, 1  ;;  %v1390_v43 = vadd.f32 %v1389_v10, %v1388_v27 }
 0x1ba   : > { %v1289_v46 = vadd.f32 %v1288_v44, %v1287_v42  ;;  %v1391_v48 = vrot.slane %v1390_v43, 1 }
 0x1bc   : > { %1291 = vst.msk [vmem:[%s238_s14] sm:$0x1] %vm1290_vm4, %v1289_v46  ;;  %v1392_v47 = vadd.f32 %v1391_v48, %v1390_v43 }
 0x1be   : > { %1393 = vst.msk [vmem:[%s241_s17] sm:$0x1] %vm1290_vm4, %v1392_v47 }
 0x1bf PF: > { %s16_s18 = sadd.s32 1, %s2049_s18  }
 0x1c0   : > { %p13_p4 = scmp.ge.s32.totalorder %s16_s18, 4  }
 0x1c2   :  { %15 = sbr.rel (!%p13_p4) target bundleno = 1 (0x1), region = 86 }

// kernel: clinical_image_encoder.8
= control target key start
LH: loop header
LB: loop body
LE: loop exit
PB: predicated region body
PF: predicated region fallthrough
CT: control target
= control target key end

     0   :  { %vm231_vm0 = vcmask 523264   ;;  %s2387_s1 = inlined_call_operand.vmem [shape: bf16[3,192,128], index: 1, kind: input, shape index: {}]   ;;  %s2388_s0 = inlined_call_operand.vmem [shape: bf16[2,9,8,192], index: 0, kind: input, shape index: {}]   ;;  %s2389_s2 = inlined_call_operand.vmem [shape: f32[1,128], index: 2, kind: input, shape index: {}]   ;;  %s2390_s3 = inlined_call_operand.vmem [shape: bf16[2,7,8,128], index: 3, kind: output, shape index: {0}]   ;;  %s2391_s4 = inlined_call_operand.vmem [shape: f32[1,1,128], index: 4, kind: output, shape index: {1}]   ;;  %s2392_s5 = inlined_call_operand.vmem [shape: f32[1,1,128], index: 5, kind: output, shape index: {2}]  }
   0x1   :  { %v1690_v0 = vld [vmem:[%s2387_s1 + $0x98] sm:$0xff]  ;;  %v1689_v3 = vld [vmem:[%s2387_s1 + $0x90] sm:$0xff]  ;;  %v1688_v8 = vld [vmem:[%s2387_s1 + $0x88] sm:$0xff] }
   0x2   :  { %v1664_v1 = vld [vmem:[%s2387_s1 + $0x38] sm:$0xff]  ;;  %253 = vmatpush.bf16.msra.mxu0 %v1690_v0  ;;  %v1663_v4 = vld [vmem:[%s2387_s1 + $0x30] sm:$0xff]  ;;  %v1662_v9 = vld [vmem:[%s2387_s1 + $0x28] sm:$0xff] }
   0x3   :  { %v1810_v2 = vld [vmem:[%s2387_s1 + $0x58] sm:$0xff]  ;;  %497 = vmatpush.bf16.msra.mxu2 %v1664_v1  ;;  %v1827_v6 = vld [vmem:[%s2387_s1 + $0x50] sm:$0xff]  ;;  %v1845_v10 = vld [vmem:[%s2387_s1 + $0x48] sm:$0xff] }
   0x4   :  { %v1821_v5 = vld [vmem:[%s2387_s1 + $0xb8] sm:$0xff]  ;;  %1766 = vmatpush.bf16.msra.mxu3 %v1810_v2  ;;  %v1833_v7 = vld [vmem:[%s2387_s1 + $0xb0] sm:$0xff]  ;;  %v1851_v11 = vld [vmem:[%s2387_s1 + $0xa8] sm:$0xff] }
   0x5   :  { %1762 = vmatpush.bf16.msra.mxu1 %v1821_v5  ;;  %v1687_v12 = vld [vmem:[%s2387_s1 + $0x80] sm:$0xff]  ;;  %v1649_v15 = vld [vmem:[%s2388_s0 + $0x34] sm:$0xf]  ;;  %v1411_v16 = vld [vmem:[%s2388_s0 + $0x48] sm:$0xf0] }
   0x6   :  { %254 = vmatpush.bf16.msra.mxu0 %v1689_v3  ;;  %v1661_v13 = vld [vmem:[%s2387_s1 + $0x20] sm:$0xff]  ;;  %v1675_v18 = vld [vmem:[%s2388_s0 + $0x3c] sm:$0xf]  ;;  %v1300_v19 = vld [vmem:[%s2388_s0 + $0x50] sm:$0xf0]  ;;  %v1414_v22 = vor.u32 %v1649_v15, %v1411_v16 }
   0x7   :  { %498 = vmatpush.bf16.msra.mxu2 %v1663_v4  ;;  %v1862_v14 = vld [vmem:[%s2387_s1 + $0x40] sm:$0xff]  ;;  %v1720_v20 = vld [vmem:[%s2387_s1 + $0x118] sm:$0xff]  ;;  %v1303_v25 = vor.u32 %v1675_v18, %v1300_v19  ;;  %v1715_v26 = vld [vmem:[%s2387_s1 + $0xf0] sm:$0xff] }
   0x8   :  { %1767 = vmatpush.bf16.msra.mxu3 %v1827_v6  ;;  %v1874_v17 = vld [vmem:[%s2387_s1 + $0xa0] sm:$0xff]  ;;  %v1716_v21 = vld [vmem:[%s2387_s1 + $0xf8] sm:$0xff]  ;;  %v1685_v27 = vld [vmem:[%s2387_s1 + $0x70] sm:$0xff] }
   0x9   :  { %1763 = vmatpush.bf16.msra.mxu1 %v1833_v7  ;;  %v1686_v23 = vld [vmem:[%s2387_s1 + $0x78] sm:$0xff]  ;;  %v1719_v28 = vld [vmem:[%s2387_s1 + $0x110] sm:$0xff]  ;;  %v1714_v30 = vld [vmem:[%s2387_s1 + $0xe8] sm:$0xff] }
   0xa   :  { %255 = vmatpush.bf16.msra.mxu0 %v1688_v8  ;;  %v1660_v24 = vld [vmem:[%s2387_s1 + $0x18] sm:$0xff]  ;;  %v1659_v29 = vld [vmem:[%s2387_s1 + $0x10] sm:$0xff]  ;;  %v1684_v31 = vld [vmem:[%s2387_s1 + $0x68] sm:$0xff] }
   0xb   :  { %499 = vmatpush.bf16.msra.mxu2 %v1662_v9  ;;  %v1658_v32 = vld [vmem:[%s2387_s1 + $0x8] sm:$0xff]  ;;  %v1683_v33 = vld [vmem:[%s2387_s1 + $0x60] sm:$0xff]  ;;  %v1670_v37 = vld [vmem:[%s2388_s0 + $0xc] sm:$0xf0] }
   0xc   :  { %1768 = vmatpush.bf16.msra.mxu3 %v1845_v10  ;;  %v1657_v34 = vld [vmem:[%s2387_s1] sm:$0xff]  ;;  %v1274_v36 = vld [vmem:[%s2388_s0 + $0x8] sm:$0xf]  ;;  %v1651_v40 = vld [vmem:[%s2388_s0 + $0x54] sm:$0xf] }
   0xd   :  { %1764 = vmatpush.bf16.msra.mxu1 %v1851_v11  ;;  %v1713_v35 = vld [vmem:[%s2387_s1 + $0xe0] sm:$0xff]  ;;  %v1644_v39 = vld [vmem:[%s2388_s0 + $0x4] sm:$0xf0]  ;;  %v1419_v41 = vld [vmem:[%s2388_s0 + $0x58] sm:$0xf0]  ;;  %v1275_v44 = vor.u32 %v1670_v37, %v1274_v36 }
   0xe   :  { %256 = vmatpush.bf16.msra.mxu0 %v1687_v12  ;;  %v1385_v38 = vld [vmem:[%s2388_s0] sm:$0xf]  ;;  %v1677_v42 = vld [vmem:[%s2388_s0 + $0x5c] sm:$0xf]  ;;  %v1308_v43 = vld [vmem:[%s2388_s0 + $0x60] sm:$0xf0]  ;;  %v1422_v46 = vor.u32 %v1651_v40, %v1419_v41 }
   0xf   :  { %500 = vmatpush.bf16.msra.mxu2 %v1661_v13  ;;  %v1386_v45 = vor.u32 %v1644_v39, %v1385_v38  ;;  %v1311_v47 = vor.u32 %v1677_v42, %v1308_v43  ;;  %v1718_v48 = vld [vmem:[%s2387_s1 + $0x108] sm:$0xff]  ;;  %v1712_v49 = vld [vmem:[%s2387_s1 + $0xd8] sm:$0xff]  ;;  %v1717_v50 = vld [vmem:[%s2387_s1 + $0x100] sm:$0xff] }
  0x10   :  { %1769 = vmatpush.bf16.msra.mxu3 %v1862_v14  ;;  %v1711_v51 = vld [vmem:[%s2387_s1 + $0xd0] sm:$0xff]  ;;  %v1710_v52 = vld [vmem:[%s2387_s1 + $0xc8] sm:$0xff]  ;;  %v1282_v53 = vld [vmem:[%s2388_s0 + $0x18] sm:$0xf] }
  0x11   :  { %1765 = vmatpush.bf16.msra.mxu1 %v1874_v17  ;;  %v1672_v54 = vld [vmem:[%s2388_s0 + $0x1c] sm:$0xf0]  ;;  %v1393_v55 = vld [vmem:[%s2388_s0 + $0x10] sm:$0xf]  ;;  %v1646_v56 = vld [vmem:[%s2388_s0 + $0x14] sm:$0xf0] }
  0x12   :  { %257 = vmatpush.bf16.msra.mxu0 %v1686_v23  ;;  %v1653_v57 = vld [vmem:[%s2388_s0 + $0x64] sm:$0xf]  ;;  %v1427_v58 = vld [vmem:[%s2388_s0 + $0x68] sm:$0xf0]  ;;  %v1316_v60 = vld [vmem:[%s2388_s0 + $0x70] sm:$0xf0]  ;;  %v1283_v61 = vor.u32 %v1672_v54, %v1282_v53  ;;  %v1394_v62 = vor.u32 %v1646_v56, %v1393_v55 }
  0x13   :  { %1490 = vmatmul.msk.bf16.vlgmr.msra.gmra.mxu3 %vm231_vm0, %v1414_v22  ;;  %501 = vmatpush.bf16.msra.mxu2 %v1660_v24  ;;  %v1679_v59 = vld [vmem:[%s2388_s0 + $0x6c] sm:$0xf]  ;;  %v1430_v63 = vor.u32 %v1653_v57, %v1427_v58  ;;  %v1709_v1 = vld [vmem:[%s2387_s1 + $0xc0] sm:$0xff]  ;;  %v1674_v3 = vld [vmem:[%s2388_s0 + $0x2c] sm:$0xf0] }
  0x14   :  { %829 = vmatpush.bf16.msrb.mxu3 %v1720_v20  ;;  %1379 = vmatmul.msk.bf16.vlgmr.msra.gmra.mxu1 %vm231_vm0, %v1303_v25  ;;  %v1319_v0 = vor.u32 %v1679_v59, %v1316_v60  ;;  %v1401_v4 = vld [vmem:[%s2388_s0 + $0x20] sm:$0xf]  ;;  %v1681_v8 = vld [vmem:[%s2388_s0 + $0x7c] sm:$0xf]  ;;  %v1324_v9 = vld [vmem:[%s2388_s0 + $0x80] sm:$0xf0] }
  0x15   :  { %781 = vmatpush.bf16.msrb.mxu1 %v1716_v21  ;;  %v1327_v13 = vor.u32 %v1681_v8, %v1324_v9  ;;  %v1676_v15 = vld [vmem:[%s2388_s0 + $0x4c] sm:$0xf0]  ;;  %v1695_v18 = vld [vmem:[%s2388_s0 + $0x14] sm:$0xf]  ;;  %v1536_v19 = vld [vmem:[%s2388_s0 + $0x18] sm:$0xf0] }
  0x16   :  { %258 = vmatpush.bf16.msra.mxu0 %v1685_v27  ;;  %v1409_v16 = vld [vmem:[%s2388_s0 + $0x30] sm:$0xf]  ;;  %v1696_v21 = vld [vmem:[%s2388_s0 + $0x14] sm:$0xf0]  ;;  %v1539_v24 = vor.u32 %v1695_v18, %v1536_v19  ;;  %v1678_v27 = vld [vmem:[%s2388_s0 + $0x5c] sm:$0xf0] }
  0x17   :  { %502 = vmatpush.bf16.msra.mxu2 %v1659_v29  ;;  %v1534_v20 = vld [vmem:[%s2388_s0 + $0x10] sm:$0xf]  ;;  %v1652_v29 = vld [vmem:[%s2388_s0 + $0x54] sm:$0xf0]  ;;  %v1314_v38 = vld [vmem:[%s2388_s0 + $0x68] sm:$0xf] }
  0x18   :  { %830 = vmatpush.bf16.msrb.mxu3 %v1719_v28  ;;  %v1535_v25 = vor.u32 %v1696_v21, %v1534_v20  ;;  %v1417_v28 = vld [vmem:[%s2388_s0 + $0x50] sm:$0xf]  ;;  %v1425_v40 = vld [vmem:[%s2388_s0 + $0x60] sm:$0xf]  ;;  %v1654_v41 = vld [vmem:[%s2388_s0 + $0x64] sm:$0xf0] }
  0x19   :  { %782 = vmatpush.bf16.msrb.mxu1 %v1715_v26  ;;  %v1306_v26 = vld [vmem:[%s2388_s0 + $0x58] sm:$0xf]  ;;  %v1680_v39 = vld [vmem:[%s2388_s0 + $0x6c] sm:$0xf0]  ;;  %v1699_v42 = vld [vmem:[%s2388_s0 + $0x34] sm:$0xf] }
  0x1a   :  { %259 = vmatpush.bf16.msra.mxu0 %v1684_v31  ;;  %v1544_v31 = vld [vmem:[%s2388_s0 + $0x28] sm:$0xf0]  ;;  %v1552_v43 = vld [vmem:[%s2388_s0 + $0x38] sm:$0xf0]  ;;  %v1656_v53 = vld [vmem:[%s2388_s0 + $0x74] sm:$0xf0] }
  0x1b   :  { %503 = vmatpush.bf16.msra.mxu2 %v1658_v32  ;;  %v1542_v32 = vld [vmem:[%s2388_s0 + $0x20] sm:$0xf]  ;;  %v1701_v54 = vld [vmem:[%s2388_s0 + $0x44] sm:$0xf]  ;;  %v1560_v55 = vld [vmem:[%s2388_s0 + $0x58] sm:$0xf0] }
  0x1c   :  { %831 = vmatpush.bf16.msrb.mxu3 %v1718_v48  ;;  %v1555_v48 = vor.u32 %v1699_v42, %v1552_v43  ;;  %v1558_v56 = vld [vmem:[%s2388_s0 + $0x40] sm:$0xf]  ;;  %v1702_v57 = vld [vmem:[%s2388_s0 + $0x54] sm:$0xf0]  ;;  %v1563_v60 = vor.u32 %v1701_v54, %v1560_v55  ;;  %v1576_v18 = vld [vmem:[%s2388_s0 + $0x78] sm:$0xf0] }
  0x1d   :  { %783 = vmatpush.bf16.msrb.mxu1 %v1714_v30  ;;  %v1697_v30 = vld [vmem:[%s2388_s0 + $0x24] sm:$0xf]  ;;  %v1574_v19 = vld [vmem:[%s2388_s0 + $0x70] sm:$0xf]  ;;  %v1706_v20 = vld [vmem:[%s2388_s0 + $0x74] sm:$0xf0] }
  0x1e   :  { %260 = vmatpush.bf16.msra.mxu0 %v1683_v33  ;;  %v1698_v33 = vld [vmem:[%s2388_s0 + $0x24] sm:$0xf0]  ;;  %v1547_v36 = vor.u32 %v1697_v30, %v1544_v31 }
  0x1f   :  { %504 = vmatpush.bf16.msra.mxu2 %v1657_v34  ;;  %v1307_v34 = vor.u32 %v1678_v27, %v1306_v26  ;;  %v1543_v37 = vor.u32 %v1698_v33, %v1542_v32  ;;  %v1575_v26 = vor.u32 %v1706_v20, %v1574_v19  ;;  %v1673_v32 = vld [vmem:[%s2388_s0 + $0x2c] sm:$0xf]  ;;  %v1292_v33 = vld [vmem:[%s2388_s0 + $0x30] sm:$0xf0] }
  0x20   :  { %832 = vmatpush.bf16.msrb.mxu3 %v1717_v50  ;;  %v1322_v50 = vld [vmem:[%s2388_s0 + $0x78] sm:$0xf]  ;;  %v1295_v42 = vor.u32 %v1673_v32, %v1292_v33 }
  0x21   :  { %784 = vmatpush.bf16.msrb.mxu1 %v1713_v35  ;;  %261 = vmatmul.bf16.vlgmr.msra.gmra.mxu0 %v1275_v44  ;;  %v1418_v35 = vor.u32 %v1652_v29, %v1417_v28  ;;  %v1550_v44 = vld [vmem:[%s2388_s0 + $0x30] sm:$0xf] }
  0x22   :  { %301 = vmatpush.bf16.msrb.mxu0 %v1821_v5  ;;  %505 = vmatmul.bf16.vlgmr.msra.gmra.mxu2 %v1386_v45  ;;  %v1648_v5 = vld [vmem:[%s2388_s0 + $0x24] sm:$0xf0]  ;;  %v1700_v45 = vld [vmem:[%s2388_s0 + $0x34] sm:$0xf0] }
  0x23   :  { %545 = vmatpush.bf16.msrb.mxu2 %v1810_v2  ;;  %1491 = vmatmul.msk.bf16.gmra.mxu3 %vm231_vm0, %v1422_v46  ;;  %v1290_v2 = vld [vmem:[%s2388_s0 + $0x28] sm:$0xf]  ;;  %v1315_v46 = vor.u32 %v1680_v39, %v1314_v38  ;;  %v1582_v38 = vld [vmem:[%s2388_s0 + $0x80] sm:$0xf] }
  0x24   :  { %1380 = vmatmul.msk.bf16.gmra.mxu1 %vm231_vm0, %v1311_v47  ;;  %v1426_v47 = vor.u32 %v1654_v41, %v1425_v40  ;;  %v1708_v39 = vld [vmem:[%s2388_s0 + $0x84] sm:$0xf0] }
  0x25   :  { %785 = vmatpush.bf16.msrb.mxu1 %v1712_v49  ;;  %v1551_v49 = vor.u32 %v1700_v45, %v1550_v44 }
  0x26   :  { %302 = vmatpush.bf16.msrb.mxu0 %v1833_v7  ;;  %v1435_v7 = vld [vmem:[%s2388_s0 + $0x78] sm:$0xf0] }
  0x27   :  { %546 = vmatpush.bf16.msrb.mxu2 %v1827_v6  ;;  %v1655_v6 = vld [vmem:[%s2388_s0 + $0x74] sm:$0xf] }
  0x28   :  { %v1438_v12 = vor.u32 %v1655_v6, %v1435_v7 }
  0x29   :  { %786 = vmatpush.bf16.msrb.mxu1 %v1711_v51  ;;  %v1682_v51 = vld [vmem:[%s2388_s0 + $0x7c] sm:$0xf0] }
  0x2a   :  { %303 = vmatpush.bf16.msrb.mxu0 %v1851_v11  ;;  %v1402_v11 = vor.u32 %v1648_v5, %v1401_v4  ;;  %v1323_v58 = vor.u32 %v1682_v51, %v1322_v50  ;;  %v1566_v4 = vld [vmem:[%s2388_s0 + $0x60] sm:$0xf]  ;;  %v1704_v5 = vld [vmem:[%s2388_s0 + $0x64] sm:$0xf0] }
  0x2b   :  { %547 = vmatpush.bf16.msrb.mxu2 %v1845_v10  ;;  %v1291_v10 = vor.u32 %v1674_v3, %v1290_v2  ;;  %v1703_v2 = vld [vmem:[%s2388_s0 + $0x64] sm:$0xf]  ;;  %v1568_v3 = vld [vmem:[%s2388_s0 + $0x68] sm:$0xf0]  ;;  %v1567_v9 = vor.u32 %v1704_v5, %v1566_v4 }
  0x2c   :  { %v1571_v8 = vor.u32 %v1703_v2, %v1568_v3 }
  0x2d   :  { %787 = vmatpush.bf16.msrb.mxu1 %v1710_v52  ;;  %v1433_v52 = vld [vmem:[%s2388_s0 + $0x70] sm:$0xf] }
  0x2e   :  { %304 = vmatpush.bf16.msrb.mxu0 %v1874_v17  ;;  %v1650_v17 = vld [vmem:[%s2388_s0 + $0x44] sm:$0xf0]  ;;  %v1434_v59 = vor.u32 %v1656_v53, %v1433_v52 }
  0x2f   :  { %548 = vmatpush.bf16.msrb.mxu2 %v1862_v14  ;;  %v1298_v14 = vld [vmem:[%s2388_s0 + $0x38] sm:$0xf]  ;;  %v1410_v23 = vor.u32 %v1650_v17, %v1409_v16  ;;  %v1395_v16 = vld [vmem:[%s2388_s0 + $0x18] sm:$0xf0]  ;;  %v1705_v17 = vld [vmem:[%s2388_s0 + $0x74] sm:$0xf] }
  0x30   :  { %v1299_v22 = vor.u32 %v1676_v15, %v1298_v14  ;;  %v1284_v14 = vld [vmem:[%s2388_s0 + $0x20] sm:$0xf0]  ;;  %v1645_v15 = vld [vmem:[%s2388_s0 + $0x14] sm:$0xf] }
  0x31   :  { %266 = vmatmul.bf16.gmra.mxu0 %v1283_v61  ;;  %788 = vmatpush.bf16.msrb.mxu1 %v1709_v1  ;;  %v1559_v61 = vor.u32 %v1702_v57, %v1558_v56  ;;  %v1387_v1 = vld [vmem:[%s2388_s0 + $0x8] sm:$0xf0] }
  0x32   :  { %510 = vmatmul.bf16.gmra.mxu2 %v1394_v62  ;;  %v1669_v62 = vld [vmem:[%s2388_s0 + $0xc] sm:$0xf] }
  0x33   :  { %1492 = vmatmul.msk.bf16.gmra.mxu3 %vm231_vm0, %v1430_v63  ;;  %v1276_v63 = vld [vmem:[%s2388_s0 + $0x10] sm:$0xf0] }
  0x34   :  { %1381 = vmatmul.msk.bf16.gmra.mxu1 %vm231_vm0, %v1319_v0  ;;  %v1643_v0 = vld [vmem:[%s2388_s0 + $0x4] sm:$0xf]  ;;  %v1279_v6 = vor.u32 %v1669_v62, %v1276_v63 }
  0x35   :  { %v1390_v7 = vor.u32 %v1643_v0, %v1387_v1 }
  0x41   :  { %271 = vmatmul.bf16.gmra.mxu0 %v1291_v10 }
  0x42   :  { %515 = vmatmul.bf16.gmra.mxu2 %v1402_v11 }
  0x43   :  { %1493 = vmatmul.msk.bf16.gmra.mxu3 %vm231_vm0, %v1438_v12 }
  0x44   :  { %1382 = vmatmul.msk.bf16.gmra.mxu1 %vm231_vm0, %v1327_v13  ;;  %v1671_v13 = vld [vmem:[%s2388_s0 + $0x1c] sm:$0xf] }
  0x51   :  { %276 = vmatmul.bf16.gmra.mxu0 %v1299_v22  ;;  %v1287_v22 = vor.u32 %v1671_v13, %v1284_v14 }
  0x52   :  { %520 = vmatmul.bf16.gmra.mxu2 %v1410_v23 }
  0x53   :  { %1636 = vmatmul.msk.bf16.vlgmr.msrb.gmra.mxu3 %vm231_vm0, %v1539_v24  ;;  %v1398_v24 = vor.u32 %v1645_v15, %v1395_v16 }
  0x54   :  { %789 = vmatmul.bf16.vlgmr.msrb.gmra.mxu1 %v1535_v25  ;;  %v1579_v25 = vor.u32 %v1705_v17, %v1576_v18 }
  0x61   :  { %281 = vmatmul.bf16.gmra.mxu0 %v1307_v34  ;;  %v1647_v34 = vld [vmem:[%s2388_s0 + $0x24] sm:$0xf] }
  0x62   :  { %525 = vmatmul.bf16.gmra.mxu2 %v1418_v35  ;;  %v1403_v35 = vld [vmem:[%s2388_s0 + $0x28] sm:$0xf0] }
  0x63   :  { %1637 = vmatmul.msk.bf16.gmra.mxu3 %vm231_vm0, %v1547_v36  ;;  %v1707_v36 = vld [vmem:[%s2388_s0 + $0x84] sm:$0xf]  ;;  %v1406_v44 = vor.u32 %v1647_v34, %v1403_v35 }
  0x64   :  { %794 = vmatmul.bf16.gmra.mxu1 %v1543_v37  ;;  %v1584_v37 = vld [vmem:[%s2388_s0 + $0x88] sm:$0xf0] }
  0x65   :  { %v1587_v45 = vor.u32 %v1707_v36, %v1584_v37 }
  0x71   :  { %286 = vmatmul.bf16.gmra.mxu0 %v1315_v46  ;;  %v1583_v46 = vor.u32 %v1708_v39, %v1582_v38 }
  0x72   :  { %530 = vmatmul.bf16.gmra.mxu2 %v1426_v47 }
  0x73   :  { %1638 = vmatmul.msk.bf16.gmra.mxu3 %vm231_vm0, %v1555_v48 }
  0x74   :  { %799 = vmatmul.bf16.gmra.mxu1 %v1551_v49 }
  0x81   :  { %291 = vmatmul.bf16.gmra.mxu0 %v1323_v58 }
  0x82   :  { %535 = vmatmul.bf16.gmra.mxu2 %v1434_v59 }
  0x83   :  { %1639 = vmatmul.msk.bf16.gmra.mxu3 %vm231_vm0, %v1563_v60 }
  0x84   :  { %804 = vmatmul.bf16.gmra.mxu1 %v1559_v61 }
  0x91   :  { %v2157_v10 = vpop.f32.mrf.mxu1  ;;  %1376 = vmatmul.msk.bf16.vlgmr.msrb.gmra.mxu0 %vm231_vm0, %v1279_v6 }
  0x92   :  { %1487 = vmatmul.msk.bf16.vlgmr.msrb.gmra.mxu2 %vm231_vm0, %v1390_v7 }
  0x93   :  { %1640 = vmatmul.msk.bf16.gmra.mxu3 %vm231_vm0, %v1571_v8 }
  0x94   :  { %809 = vmatmul.bf16.gmra.mxu1 %v1567_v9 }
  0x96   :  { %v2162_v11 = vpop.f32.mrf.mxu3 }
  0x99   :  { %v2164_v12 = vpop.f32.mrf.mxu1 }
  0x9e   :  { %v2190_v21 = vpop.f32.mrf.mxu3  ;;  %v2192_v23 = vpop.f32.mrf.mxu0 }
  0xa1   :  { %v326_v27 = vpop.f32.mrf.mxu1  ;;  %1377 = vmatmul.msk.bf16.gmra.mxu0 %vm231_vm0, %v1287_v22 }
  0xa2   :  { %1488 = vmatmul.msk.bf16.gmra.mxu2 %vm231_vm0, %v1398_v24 }
  0xa3   :  { %1641 = vmatmul.msk.bf16.gmra.mxu3 %vm231_vm0, %v1579_v25 }
  0xa4   :  { %814 = vmatmul.bf16.gmra.mxu1 %v1575_v26 }
  0xa5   :  { %v2197_v28 = vpop.f32.mrf.mxu2 }
  0xa6   :  { %v570_v29 = vpop.f32.mrf.mxu3  ;;  %v2199_v30 = vpop.f32.mrf.mxu0 }
  0xa9   :  { %v328_v31 = vpop.f32.mrf.mxu1 }
  0xad   :  { %v2225_v40 = vpop.f32.mrf.mxu2 }
  0xae   :  { %v572_v41 = vpop.f32.mrf.mxu3  ;;  %v2227_v43 = vpop.f32.mrf.mxu0 }
  0xb1   :  { %v331_v47 = vpop.f32.mrf.mxu1  ;;  %1378 = vmatmul.msk.bf16.gmra.mxu0 %vm231_vm0, %v1295_v42 }
  0xb2   :  { %1489 = vmatmul.msk.bf16.gmra.mxu2 %vm231_vm0, %v1406_v44 }
  0xb3   :  { %1642 = vmatmul.msk.bf16.gmra.mxu3 %vm231_vm0, %v1587_v45 }
  0xb4   :  { %819 = vmatmul.bf16.gmra.mxu1 %v1583_v46 }
  0xb5   :  { %v2232_v48 = vpop.f32.mrf.mxu2 }
  0xb6   :  { %v575_v49 = vpop.f32.mrf.mxu3  ;;  %v2234_v50 = vpop.f32.mrf.mxu0 }
  0xb9   :  { %v333_v51 = vpop.f32.mrf.mxu1 }
  0xbd   :  { %v2236_v52 = vpop.f32.mrf.mxu2 }
  0xbe   :  { %v577_v53 = vpop.f32.mrf.mxu3  ;;  %v2238_v54 = vpop.f32.mrf.mxu0 }
  0xc1   :  { %v336_v55 = vpop.f32.mrf.mxu1 }
  0xc5   :  { %v2240_v56 = vpop.f32.mrf.mxu2 }
  0xc6   :  { %v580_v57 = vpop.f32.mrf.mxu3  ;;  %v2242_v58 = vpop.f32.mrf.mxu0 }
  0xc9   :  { %v338_v59 = vpop.f32.mrf.mxu1 }
  0xcd   :  { %v2244_v60 = vpop.f32.mrf.mxu2 }
  0xce   :  { %v2246_v61 = vpop.f32.mrf.mxu3  ;;  %v277_v62 = vpop.f32.mrf.mxu0 }
  0xcf   :  { %v322_v0 = vadd.f32 %v2157_v10, %v277_v62 }
  0xd1   :  { %v790_v63 = vpop.f32.mrf.mxu1 }
  0xd5   :  { %v521_v1 = vpop.f32.mrf.mxu2 }
  0xd6   :  { %v834_v2 = vpop.f32.mrf.mxu3  ;;  %v522_v3 = vadd.f32 %v521_v1, %v322_v0  ;;  %v279_v5 = vpop.f32.mrf.mxu0 }
  0xd7   :  { %v2249_v4 = vadd.f32 %v834_v2, %v790_v63  ;;  %v324_v8 = vadd.f32 %v2164_v12, %v279_v5 }
  0xd8   :  { %v566_v6 = vadd.f32 %v2162_v11, %v522_v3 }
  0xd9   :  { %v792_v7 = vpop.f32.mrf.mxu1 }
  0xdd   :  { %v523_v9 = vpop.f32.mrf.mxu2 }
  0xde   :  { %v836_v13 = vpop.f32.mrf.mxu3  ;;  %v524_v14 = vadd.f32 %v523_v9, %v324_v8  ;;  %v282_v16 = vpop.f32.mrf.mxu0 }
  0xdf   :  { %v2253_v15 = vadd.f32 %v836_v13, %v792_v7  ;;  %v327_v18 = vadd.f32 %v326_v27, %v282_v16 }
  0xe0   :  { %v568_v17 = vadd.f32 %v2190_v21, %v524_v14 }
  0xe1   :  { %v795_v10 = vpop.f32.mrf.mxu1 }
  0xe5   :  { %v526_v19 = vpop.f32.mrf.mxu2 }
  0xe6   :  { %v839_v20 = vpop.f32.mrf.mxu3  ;;  %v527_v22 = vadd.f32 %v526_v19, %v327_v18  ;;  %v284_v25 = vpop.f32.mrf.mxu0  ;;  %v2277_v19 = vld [vmem:[%s2389_s2] ss:$0 sm:$0xff] }
  0xe7   :  { %v2256_v24 = vadd.f32 %v839_v20, %v795_v10  ;;  %v329_v12 = vadd.f32 %v328_v31, %v284_v25 }
  0xe8   :  { %v2258_v11 = vadd.f32 %v570_v29, %v527_v22 }
  0xe9   :  { %v797_v26 = vpop.f32.mrf.mxu1 }
  0xed   :  { %v528_v32 = vpop.f32.mrf.mxu2 }
  0xee   :  { %v841_v33 = vpop.f32.mrf.mxu3  ;;  %v529_v34 = vadd.f32 %v528_v32, %v329_v12  ;;  %v287_v36 = vpop.f32.mrf.mxu0  ;;  %v901_v12 = vlaneseq }
  0xef   :  { %v2260_v35 = vadd.f32 %v841_v33, %v797_v26  ;;  %v332_v27 = vadd.f32 %v331_v47, %v287_v36 }
  0xf0   :  { %v2262_v37 = vadd.f32 %v572_v41, %v529_v34 }
  0xf1   :  { %v800_v21 = vpop.f32.mrf.mxu1 }
  0xf5   :  { %v531_v38 = vpop.f32.mrf.mxu2 }
  0xf6   :  { %v844_v39 = vpop.f32.mrf.mxu3  ;;  %v532_v42 = vadd.f32 %v531_v38, %v332_v27  ;;  %v289_v45 = vpop.f32.mrf.mxu0 }
  0xf7   :  { %v2264_v44 = vadd.f32 %v844_v39, %v800_v21  ;;  %v334_v31 = vadd.f32 %v333_v51, %v289_v45 }
  0xf8   :  { %v2266_v29 = vadd.f32 %v575_v49, %v532_v42 }
  0xf9   :  { %v802_v46 = vpop.f32.mrf.mxu1 }
  0xfd   :  { %v533_v62 = vpop.f32.mrf.mxu2 }
  0xfe   :  { %v846_v63 = vpop.f32.mrf.mxu3  ;;  %v534_v0 = vadd.f32 %v533_v62, %v334_v31  ;;  %v292_v2 = vpop.f32.mrf.mxu0 }
  0xff   :  { %v2268_v1 = vadd.f32 %v846_v63, %v802_v46  ;;  %v337_v47 = vadd.f32 %v336_v55, %v292_v2 }
 0x100   :  { %v2270_v41 = vadd.f32 %v577_v53, %v534_v0 }
 0x101   :  { %v805_v3 = vpop.f32.mrf.mxu1 }
 0x105   :  { %v536_v5 = vpop.f32.mrf.mxu2 }
 0x106   :  { %v849_v7 = vpop.f32.mrf.mxu3  ;;  %v537_v8 = vadd.f32 %v536_v5, %v337_v47  ;;  %v294_v9 = vpop.f32.mrf.mxu0 }
 0x107   :  { %v850_v14 = vadd.f32 %v849_v7, %v805_v3  ;;  %v339_v16 = vadd.f32 %v338_v59, %v294_v9 }
 0x108   :  { %v2272_v13 = vadd.f32 %v580_v57, %v537_v8 }
 0x109   :  { %v807_v49 = vpop.f32.mrf.mxu1  ;;  %v875_v18 = vadd.f32 %v850_v14, %v566_v6 }
 0x10b   :  { %v2284_v59 = vadd.f32 %v2277_v19, %v875_v18 }
 0x10d   :  { %v538_v51 = vpop.f32.mrf.mxu2 }
 0x10e   :  { %v851_v10 = vpop.f32.mrf.mxu3  ;;  %v539_v53 = vadd.f32 %v538_v51, %v339_v16  ;;  %v306_v55 = vpop.f32.mrf.mxu0 }
 0x10f   :  { %v852_v20 = vadd.f32 %v851_v10, %v807_v49  ;;  %v307_v57 = vadd.f32 %v306_v55, %v2192_v23 }
 0x110   :  { %v2280_v22 = vadd.f32 %v2246_v61, %v539_v53 }
 0x111   :  { %v876_v25 = vadd.f32 %v852_v20, %v568_v17  ;;  %v810_v26 = vpop.f32.mrf.mxu1  ;;  %v507_v33 = vadd.f32 %v2197_v28, %v307_v57  ;;  %v2295_v17 = vshrl.u32 %v901_v12, 7 }
 0x113   :  { %v2287_v6 = vadd.f32 %v2277_v19, %v876_v25  ;;  %v903_v38 = vadd.s32 8, %v2295_v17  ;;  %v920_v28 = vand.u32 7, %v2295_v17 }
 0x115   :  { %v1739_v32 = vpack.c.bf16 %v2287_v6, %v2284_v59  ;;  %v550_v34 = vpop.f32.mrf.mxu2  ;;  %v927_v31 = vand.u32 7, %v903_v38  ;;  %vm1084_vm1 = vcmp.lt.s32.totalorder %v920_v28, 7 }
 0x116   :  { %v854_v36 = vpop.f32.mrf.mxu3  ;;  %v551_v23 = vadd.f32 %v550_v34, %v507_v33  ;;  %v308_v61 = vpop.f32.mrf.mxu0 }
 0x117   :  { %1758 = vst [vmem:[%s2390_s3 + $0x18] sm:$0xff] %v1739_v32   ;;  %v309_v21 = vadd.f32 %v308_v61, %v2199_v30  ;;  %v855_v42 = vadd.f32 %v854_v36, %v810_v26  ;;  %vm1085_vm2 = vcmp.lt.s32.totalorder %v927_v31, 7  ;;  %v905_v32 = vadd.s32 24, %v2295_v17 }
 0x118   :  { %v869_v39 = vadd.f32 %v2249_v4, %v551_v23 }
 0x119   :  { %v812_v27 = vpop.f32.mrf.mxu1  ;;  %v509_v45 = vadd.f32 %v2225_v40, %v309_v21  ;;  %v877_v0 = vadd.f32 %v855_v42, %v2258_v11  ;;  %v904_v40 = vadd.s32 16, %v2295_v17  ;;  %v941_v38 = vand.u32 7, %v905_v32 }
 0x11a   :  { %v887_v63 = vadd.f32 %v2277_v19, %v869_v39 }
 0x11b   :  { %v2309_v9 = vadd.f32 %v2277_v19, %v877_v0  ;;  %v934_v53 = vand.u32 7, %v904_v40  ;;  %vm1087_vm4 = vcmp.lt.s32.totalorder %v941_v38, 7  ;;  %v913_v38 = vadd.s32 88, %v2295_v17 }
 0x11c   :  { %v1126_v8 = vsel %vm1084_vm1, %v887_v63, 0.0 }
 0x11d   :  { %v552_v46 = vpop.f32.mrf.mxu2  ;;  %vm1086_vm3 = vcmp.lt.s32.totalorder %v934_v53, 7  ;;  %v910_v53 = vadd.s32 64, %v2295_v17 }
 0x11e   :  { %v856_v62 = vpop.f32.mrf.mxu3  ;;  %v553_v2 = vadd.f32 %v552_v46, %v509_v45  ;;  %v311_v30 = vpop.f32.mrf.mxu0 }
 0x11f   :  { %v857_v3 = vadd.f32 %v856_v62, %v812_v27  ;;  %v312_v5 = vadd.f32 %v311_v30, %v2227_v43 }
 0x120   :  { %v870_v47 = vadd.f32 %v2253_v15, %v553_v2 }
 0x121   :  { %v878_v4 = vadd.f32 %v857_v3, %v2262_v37  ;;  %v815_v7 = vpop.f32.mrf.mxu1  ;;  %v512_v43 = vadd.f32 %v2232_v48, %v312_v5  ;;  %v1160_v37 = vmul.f32 %v1126_v8, %v1126_v8 }
 0x122   :  { %v888_v11 = vadd.f32 %v2277_v19, %v870_v47 }
 0x123   :  { %v2313_v49 = vadd.f32 %v2277_v19, %v878_v4 }
 0x124   :  { %v1127_v14 = vsel %vm1085_vm2, %v888_v11, 0.0  ;;  %v1724_v16 = vpack.c.bf16 %v888_v11, %v887_v63 }
 0x125   :  { %v1744_v15 = vpack.c.bf16 %v2313_v49, %v2309_v9  ;;  %v1140_v51 = vadd.f32 %v1127_v14, %v1126_v8  ;;  %v1161_v10 = vmul.f32 %v1127_v14, %v1127_v14  ;;  %v555_v18 = vpop.f32.mrf.mxu2  ;;  %v908_v14 = vadd.s32 48, %v2295_v17 }
 0x126   :  { %v859_v20 = vpop.f32.mrf.mxu3  ;;  %1725 = vst [vmem:[%s2390_s3] sm:$0xff] %v1724_v16   ;;  %v556_v55 = vadd.f32 %v555_v18, %v512_v43  ;;  %v313_v25 = vpop.f32.mrf.mxu0 }
 0x127   :  { %v1174_v57 = vadd.f32 %v1161_v10, %v1160_v37  ;;  %1759 = vst [vmem:[%s2390_s3 + $0x20] sm:$0xff] %v1744_v15   ;;  %v314_v48 = vadd.f32 %v313_v25, %v2234_v50  ;;  %v860_v34 = vadd.f32 %v859_v20, %v815_v7  ;;  %v907_v15 = vadd.s32 40, %v2295_v17 }
 0x128   :  { %v871_v26 = vadd.f32 %v2256_v24, %v556_v55  ;;  %v962_v18 = vand.u32 7, %v908_v14  ;;  %v911_v25 = vadd.s32 72, %v2295_v17 }
 0x129   :  { %v817_v12 = vpop.f32.mrf.mxu1  ;;  %v514_v23 = vadd.f32 %v2236_v52, %v314_v48  ;;  %v879_v42 = vadd.f32 %v860_v34, %v2266_v29  ;;  %v906_v52 = vadd.s32 32, %v2295_v17 }
 0x12a   :  { %v889_v33 = vadd.f32 %v2277_v19, %v871_v26  ;;  %v955_v26 = vand.u32 7, %v907_v15  ;;  %vm1090_vm6 = vcmp.lt.s32.totalorder %v962_v18, 7 }
 0x12b   :  { %v2335_v0 = vadd.f32 %v2277_v19, %v879_v42  ;;  %v948_v5 = vand.u32 7, %v906_v52  ;;  %v997_v52 = vand.u32 7, %v913_v38 }
 0x12c   :  { %v1128_v36 = vsel %vm1086_vm3, %v889_v33, 0.0  ;;  %vm1089_vm7 = vcmp.lt.s32.totalorder %v955_v26, 7 }
 0x12d   :  { %v1141_v61 = vadd.f32 %v1140_v51, %v1128_v36  ;;  %v1162_v21 = vmul.f32 %v1128_v36, %v1128_v36  ;;  %v557_v27 = vpop.f32.mrf.mxu2  ;;  %vm1088_vm5 = vcmp.lt.s32.totalorder %v948_v5, 7  ;;  %v909_v51 = vadd.s32 56, %v2295_v17 }
 0x12e   :  { %v861_v39 = vpop.f32.mrf.mxu3  ;;  %v558_v24 = vadd.f32 %v557_v27, %v514_v23  ;;  %v316_v50 = vpop.f32.mrf.mxu0  ;;  %v912_v36 = vadd.s32 80, %v2295_v17  ;;  %v983_v27 = vand.u32 7, %v911_v25  ;;  %vm1095_vm12 = vcmp.lt.s32.totalorder %v997_v52, 7 }
 0x12f   :  { %v862_v28 = vadd.f32 %v861_v39, %v817_v12  ;;  %v1175_v45 = vadd.f32 %v1174_v57, %v1162_v21  ;;  %v317_v62 = vadd.f32 %v316_v50, %v2238_v54  ;;  %v969_v34 = vand.u32 7, %v909_v51 }
 0x130   :  { %v872_v46 = vadd.f32 %v2260_v35, %v558_v24  ;;  %v990_v24 = vand.u32 7, %v912_v36  ;;  %vm1093_vm10 = vcmp.lt.s32.totalorder %v983_v27, 7 }
 0x131   :  { %v880_v31 = vadd.f32 %v862_v28, %v2270_v41  ;;  %v820_v63 = vpop.f32.mrf.mxu1  ;;  %v517_v41 = vadd.f32 %v2240_v56, %v317_v62  ;;  %vm1091_vm8 = vcmp.lt.s32.totalorder %v969_v34, 7  ;;  %v1132_v28 = vsel %vm1090_vm6, %v2284_v59, 0.0 }
 0x132   :  { %v890_v2 = vadd.f32 %v2277_v19, %v872_v46  ;;  %v1133_v62 = vsel %vm1091_vm8, %v2287_v6, 0.0  ;;  %v915_v59 = vadd.s32 104, %v2295_v17  ;;  %vm1094_vm11 = vcmp.lt.s32.totalorder %v990_v24, 7 }
 0x133   :  { %v2339_v29 = vadd.f32 %v2277_v19, %v880_v31 }
 0x134   :  { %v1129_v3 = vsel %vm1087_vm4, %v890_v2, 0.0  ;;  %v1729_v30 = vpack.c.bf16 %v890_v2, %v889_v33 }
 0x135   :  { %v1749_v35 = vpack.c.bf16 %v2339_v29, %v2335_v0  ;;  %v1142_v54 = vadd.f32 %v1141_v61, %v1129_v3  ;;  %v1163_v47 = vmul.f32 %v1129_v3, %v1129_v3  ;;  %v560_v4 = vpop.f32.mrf.mxu2 }
 0x136   :  { %v864_v7 = vpop.f32.mrf.mxu3  ;;  %1756 = vst [vmem:[%s2390_s3 + $0x8] sm:$0xff] %v1729_v30   ;;  %v561_v40 = vadd.f32 %v560_v4, %v517_v41  ;;  %v318_v8 = vpop.f32.mrf.mxu0  ;;  %v1167_v30 = vmul.f32 %v1133_v62, %v1133_v62 }
 0x137   :  { %v1176_v11 = vadd.f32 %v1175_v45, %v1163_v47  ;;  %1760 = vst [vmem:[%s2390_s3 + $0x28] sm:$0xff] %v1749_v35   ;;  %v319_v16 = vadd.f32 %v318_v8, %v2242_v58  ;;  %v865_v37 = vadd.f32 %v864_v7, %v820_v63  ;;  %v1011_v7 = vand.u32 7, %v915_v59 }
 0x138   :  { %v873_v56 = vadd.f32 %v2264_v44, %v561_v40 }
 0x139   :  { %v822_v10 = vpop.f32.mrf.mxu1  ;;  %v519_v55 = vadd.f32 %v2244_v60, %v319_v16  ;;  %v881_v12 = vadd.f32 %v865_v37, %v2272_v13  ;;  %v976_v60 = vand.u32 7, %v910_v53  ;;  %vm1097_vm14 = vcmp.lt.s32.totalorder %v1011_v7, 7 }
 0x13a   :  { %v891_v43 = vadd.f32 %v2277_v19, %v873_v56 }
 0x13b   :  { %v899_v39 = vadd.f32 %v2277_v19, %v881_v12  ;;  %vm1092_vm9 = vcmp.lt.s32.totalorder %v976_v60, 7 }
 0x13c   :  { %v1130_v20 = vsel %vm1088_vm5, %v891_v43, 0.0  ;;  %v1134_v3 = vsel %vm1092_vm9, %v2309_v9, 0.0  ;;  %v1137_v9 = vsel %vm1095_vm12, %v2339_v29, 0.0 }
 0x13d   :  { %v1143_v44 = vadd.f32 %v1142_v54, %v1130_v20  ;;  %v1164_v57 = vmul.f32 %v1130_v20, %v1130_v20  ;;  %v562_v58 = vpop.f32.mrf.mxu2  ;;  %v1135_v54 = vsel %vm1093_vm10, %v2313_v49, 0.0  ;;  %v1168_v47 = vmul.f32 %v1134_v3, %v1134_v3 }
 0x13e   :  { %v866_v48 = vpop.f32.mrf.mxu3  ;;  %v563_v32 = vadd.f32 %v562_v58, %v519_v55  ;;  %v1169_v40 = vmul.f32 %v1135_v54, %v1135_v54 }
 0x13f   :  { %v867_v33 = vadd.f32 %v866_v48, %v822_v10  ;;  %v1177_v23 = vadd.f32 %v1176_v11, %v1164_v57 }
 0x140   :  { %v874_v61 = vadd.f32 %v2268_v1, %v563_v32 }
 0x141   :  { %v882_v21 = vadd.f32 %v867_v33, %v2280_v22  ;;  %v914_v22 = vadd.s32 96, %v2295_v17  ;;  %v1136_v17 = vsel %vm1094_vm11, %v2335_v0, 0.0 }
 0x142   :  { %v892_v13 = vadd.f32 %v2277_v19, %v874_v61  ;;  %v1170_v14 = vmul.f32 %v1136_v17, %v1136_v17 }
 0x143   :  { %v900_v42 = vadd.f32 %v2277_v19, %v882_v21  ;;  %v1166_v19 = vmul.f32 %v1132_v28, %v1132_v28  ;;  %v1004_v6 = vand.u32 7, %v914_v22 }
 0x144   :  { %v1131_v50 = vsel %vm1089_vm7, %v892_v13, 0.0  ;;  %v1734_v1 = vpack.c.bf16 %v892_v13, %v891_v43  ;;  %v1171_v43 = vmul.f32 %v1137_v9, %v1137_v9 }
 0x145   :  { %v1754_v45 = vpack.c.bf16 %v900_v42, %v899_v39  ;;  %v1144_v46 = vadd.f32 %v1143_v44, %v1131_v50  ;;  %v1165_v31 = vmul.f32 %v1131_v50, %v1131_v50  ;;  %vm1096_vm13 = vcmp.lt.s32.totalorder %v1004_v6, 7 }
 0x146   :  { %1757 = vst [vmem:[%s2390_s3 + $0x10] sm:$0xff] %v1734_v1   ;;  %v1138_v15 = vsel %vm1096_vm13, %v899_v39, 0.0  ;;  %v1139_v51 = vsel %vm1097_vm14, %v900_v42, 0.0 }
 0x147   :  { %v1145_v63 = vadd.f32 %v1144_v46, %v1132_v28  ;;  %v1178_v2 = vadd.f32 %v1177_v23, %v1165_v31  ;;  %1761 = vst [vmem:[%s2390_s3 + $0x30] sm:$0xff] %v1754_v45   ;;  %v1172_v10 = vmul.f32 %v1138_v15, %v1138_v15  ;;  %v1173_v0 = vmul.f32 %v1139_v51, %v1139_v51 }
 0x149   :  { %v1146_v35 = vadd.f32 %v1145_v63, %v1133_v62  ;;  %v1179_v41 = vadd.f32 %v1178_v2, %v1166_v19 }
 0x14b   :  { %v1147_v4 = vadd.f32 %v1146_v35, %v1134_v3  ;;  %v1180_v5 = vadd.f32 %v1179_v41, %v1167_v30 }
 0x14d   :  { %v1181_v8 = vadd.f32 %v1180_v5, %v1168_v47  ;;  %v1148_v11 = vadd.f32 %v1147_v4, %v1135_v54 }
 0x14f   :  { %v1149_v56 = vadd.f32 %v1148_v11, %v1136_v17  ;;  %v1182_v16 = vadd.f32 %v1181_v8, %v1169_v40 }
 0x151   :  { %v1150_v49 = vadd.f32 %v1149_v56, %v1137_v9  ;;  %v1183_v37 = vadd.f32 %v1182_v16, %v1170_v14 }
 0x153   :  { %v1151_v18 = vadd.f32 %v1150_v49, %v1138_v15  ;;  %v1184_v53 = vadd.f32 %v1183_v37, %v1171_v43 }
 0x155   :  { %v1152_v20 = vadd.f32 %v1151_v18, %v1139_v51  ;;  %v1185_v55 = vadd.f32 %v1184_v53, %v1172_v10 }
 0x157   :  { %v1153_v25 = vrot.slane %v1152_v20, 4  ;;  %v1186_v44 = vadd.f32 %v1185_v55, %v1173_v0 }
 0x159   :  { %v1154_v57 = vadd.f32 %v1153_v25, %v1152_v20  ;;  %v1187_v58 = vrot.slane %v1186_v44, 4 }
 0x15b   :  { %v1155_v29 = vrot.slane %v1154_v57, 2  ;;  %v1188_v26 = vadd.f32 %v1187_v58, %v1186_v44 }
 0x15d   :  { %v1156_v48 = vadd.f32 %v1155_v29, %v1154_v57  ;;  %v1189_v12 = vrot.slane %v1188_v26, 2 }
 0x15f   :  { %v1157_v32 = vrot.slane %v1156_v48, 1  ;;  %v1190_v33 = vadd.f32 %v1189_v12, %v1188_v26 }
 0x161   :  { %v1158_v34 = vadd.f32 %v1157_v32, %v1156_v48  ;;  %v1191_v36 = vrot.slane %v1190_v33, 1 }
 0x163   :  { %1159 = vst [vmem:[%s2391_s4] sm:$0x1] %v1158_v34  ;;  %v1192_v23 = vadd.f32 %v1191_v36, %v1190_v33 }
 0x165   :  { %1193 = vst [vmem:[%s2392_s5] sm:$0x1] %v1192_v23 }

// kernel: clinical_image_encoder.9
= control target key start
LH: loop header
LB: loop body
LE: loop exit
PB: predicated region body
PF: predicated region fallthrough
CT: control target
= control target key end

     0   :  { %s664_s12 = smov 0   ;;  %s851_s0 = inlined_call_operand.vmem [shape: bf16[8,4,4,128], index: 0, kind: input, shape index: {}]   ;;  %s852_s1 = inlined_call_operand.vmem [shape: f32[1,128], index: 1, kind: input, shape index: {}]   ;;  %s853_s2 = inlined_call_operand.vmem [shape: f32[1,128], index: 2, kind: input, shape index: {}]   ;;  %s854_s3 = inlined_call_operand.vmem [shape: bf16[2,3,3,128], index: 3, kind: output, shape index: {}]  }
   0x1 LB: > { %s670_s13 = sadd.s32 4294967295, %s642_s12   ;;  %p557_p0 = scmp.ge.s32.totalorder %s642_s12, 1  ;;  %s642_s12 = sphi %s664_s12, %s13_s12  }
   0x2   : > { %p139_p1 = scmp.lt.s32.totalorder %s642_s12, 3 }
   0x4   : > { %p140_p2 = pnand %p557_p0, %p139_p1 }
   0x5   : > { %s558_s14 = sshll.u32 (!%p140_p2), %s670_s13, 2  ;;  %p171_p4 = scmp.lt.s32.totalorder (!%p140_p2), %s670_s13, 1 }
   0x6   : > { %143 = sbr.rel (%p140_p2) target bundleno = 91 (0x5b), region = 32  ;;  %p165_p3 = scmp.lt.s32.totalorder (!%p140_p2), %s558_s14, 7 }
   0xb   : > { %s856_s14 = smov (!%p165_p3, %s558_s14), 7  ;;  %v683_v0 = vld [vmem:[%s852_s1] ss:$0 sm:$0xff]  ;;  %s858_s13 = smov (!%p171_p4, %s670_s13), 1  ;;  %vm486_vm0 = vcmask 1041408  }
   0xc   : > { %s588_s15 = sshll.u32 %s856_s14, 3  ;;  %v688_v1 = vld [vmem:[%s853_s2] ss:$0 sm:$0xff]  ;;  %s589_s23 = smul.u32 6, %s858_s13  ;;  %vm487_vm1 = vsmask.f32 1280 }
   0xd   : > { %s678_s18 = scalar_lea.vmem %s851_s0, %s588_s15  ;;  %vm488_vm2 = vmand %vm486_vm0, %vm487_vm1 }
   0xe   : > { %v178_v2 = vld [vmem:[%s678_s18] sm:$0x3]  ;;  %v179_v3 = vld [vmem:[%s678_s18 + $0x2] sm:$0x3]  ;;  %v180_v4 = vld [vmem:[%s678_s18 + $0x4] sm:$0x3]  ;;  %s175_s26 = scalar_lea.vmem %s854_s3, %s589_s23 }
   0xf   : > { %v181_v5 = vunpack.c.l.bf16 %v178_v2  ;;  %v182_v6 = vunpack.c.l.bf16 %v179_v3  ;;  %v183_v7 = vunpack.c.l.bf16 %v180_v4  ;;  %v562_v8 = vld [vmem:[%s678_s18 + $0x8] sm:$0x3]  ;;  %v563_v9 = vld [vmem:[%s678_s18 + $0xa] sm:$0x3]  ;;  %v564_v10 = vld [vmem:[%s678_s18 + $0xc] sm:$0x3] }
  0x10   : > { %v227_v11 = vunpack.c.l.bf16 %v562_v8  ;;  %v228_v12 = vunpack.c.l.bf16 %v563_v9  ;;  %v229_v13 = vunpack.c.l.bf16 %v564_v10  ;;  %v568_v20 = vld [vmem:[%s678_s18 + $0x10] sm:$0x3]  ;;  %v569_v24 = vld [vmem:[%s678_s18 + $0x12] sm:$0x3]  ;;  %v570_v27 = vld [vmem:[%s678_s18 + $0x14] sm:$0x3] }
  0x11   : > { %v187_v14 = vmul.f32 %v683_v0, %v181_v5  ;;  %v188_v15 = vmul.f32 %v683_v0, %v182_v6  ;;  %v189_v16 = vmul.f32 %v683_v0, %v183_v7  ;;  %v285_v30 = vunpack.c.l.bf16 %v568_v20  ;;  %v571_v53 = vld [vmem:[%s678_s18 + $0x18] sm:$0x3]  ;;  %v572_v54 = vld [vmem:[%s678_s18 + $0x1a] sm:$0x3]  ;;  %v573_v58 = vld [vmem:[%s678_s18 + $0x1c] sm:$0x3] }
  0x12   : > { %v230_v17 = vmul.f32 %v683_v0, %v227_v11  ;;  %v231_v18 = vmul.f32 %v683_v0, %v228_v12  ;;  %v232_v19 = vmul.f32 %v683_v0, %v229_v13  ;;  %v286_v33 = vunpack.c.l.bf16 %v569_v24 }
  0x13   : > { %v193_v21 = vadd.f32 %v688_v1, %v187_v14  ;;  %v194_v22 = vadd.f32 %v688_v1, %v188_v15  ;;  %v195_v23 = vadd.f32 %v688_v1, %v189_v16  ;;  %v287_v36 = vunpack.c.l.bf16 %v570_v27 }
  0x14   : > { %v233_v25 = vadd.f32 %v688_v1, %v230_v17  ;;  %v709_v26 = vadd.f32 %v688_v1, %v231_v18  ;;  %v713_v29 = vadd.f32 %v688_v1, %v232_v19  ;;  %v288_v40 = vmul.f32 %v683_v0, %v285_v30 }
  0x15   : > { %v199_v28 = vmul.f32 0.044715, %v193_v21  ;;  %v200_v31 = vmul.f32 0.044715, %v194_v22  ;;  %v201_v32 = vmul.f32 0.044715, %v195_v23  ;;  %v289_v43 = vmul.f32 %v683_v0, %v286_v33 }
  0x16   : > { %v239_v35 = vmul.f32 0.044715, %v233_v25  ;;  %v240_v38 = vmul.f32 0.044715, %v709_v26  ;;  %v241_v39 = vmul.f32 0.044715, %v713_v29  ;;  %v290_v46 = vmul.f32 %v683_v0, %v287_v36 }
  0x17   : > { %v202_v34 = vmul.f32 %v199_v28, %v193_v21  ;;  %v203_v37 = vmul.f32 %v200_v31, %v194_v22  ;;  %v204_v41 = vmul.f32 %v201_v32, %v195_v23  ;;  %v291_v49 = vadd.f32 %v688_v1, %v288_v40 }
  0x18   : > { %v242_v45 = vmul.f32 %v239_v35, %v233_v25  ;;  %v243_v47 = vmul.f32 %v240_v38, %v709_v26  ;;  %v244_v48 = vmul.f32 %v241_v39, %v713_v29  ;;  %v292_v52 = vadd.f32 %v688_v1, %v289_v43  ;;  %v578_v38 = vld [vmem:[%s678_s18 + $0x4] sm:$0x3]  ;;  %v579_v39 = vld [vmem:[%s678_s18 + $0x6] sm:$0x3] }
  0x19   : > { %v205_v42 = vmul.f32 %v202_v34, %v193_v21  ;;  %v206_v44 = vmul.f32 %v203_v37, %v194_v22  ;;  %v207_v50 = vmul.f32 %v204_v41, %v195_v23  ;;  %v293_v57 = vadd.f32 %v688_v1, %v290_v46 }
  0x1a   : > { %v245_v56 = vmul.f32 %v242_v45, %v233_v25  ;;  %v246_v59 = vmul.f32 %v243_v47, %v709_v26  ;;  %v247_v60 = vmul.f32 %v244_v48, %v713_v29  ;;  %v297_v61 = vmul.f32 0.044715, %v291_v49 }
  0x1b   : > { %v208_v51 = vadd.f32 %v205_v42, %v193_v21  ;;  %v209_v55 = vadd.f32 %v206_v44, %v194_v22  ;;  %v328_v62 = vunpack.c.l.bf16 %v571_v53  ;;  %v329_v63 = vunpack.c.l.bf16 %v572_v54 }
  0x1c   : > { %v210_v2 = vadd.f32 %v207_v50, %v195_v23  ;;  %v298_v4 = vmul.f32 0.044715, %v292_v52  ;;  %v330_v5 = vunpack.c.l.bf16 %v573_v58  ;;  %v248_v7 = vadd.f32 %v245_v56, %v233_v25 }
  0x1d   : > { %v211_v3 = vmul.f32 0.7978846, %v208_v51  ;;  %v212_v6 = vmul.f32 0.7978846, %v209_v55  ;;  %v299_v8 = vmul.f32 0.044715, %v293_v57  ;;  %v249_v9 = vadd.f32 %v246_v59, %v709_v26 }
  0x1e   : > { %v331_v10 = vmul.f32 %v683_v0, %v328_v62  ;;  %v250_v11 = vadd.f32 %v247_v60, %v713_v29  ;;  %v300_v12 = vmul.f32 %v297_v61, %v291_v49  ;;  %v332_v13 = vmul.f32 %v683_v0, %v329_v63 }
  0x1f   : > { %v333_v14 = vmul.f32 %v683_v0, %v330_v5  ;;  %v196_v15 = vmul.f32 0.5, %v193_v21  ;;  %v213_v16 = vmul.f32 0.7978846, %v210_v2  ;;  %600 = vtanh.f32 %v211_v3 }
  0x20   : > { %v301_v17 = vmul.f32 %v298_v4, %v292_v52  ;;  %v735_v18 = vmul.f32 0.5, %v194_v22  ;;  %602 = vtanh.f32 %v212_v6  ;;  %v251_v19 = vmul.f32 0.7978846, %v248_v7  ;;  %v577_v22 = vld [vmem:[%s678_s18 + $0x2] sm:$0x3] }
  0x21   : > { %v302_v20 = vmul.f32 %v299_v8, %v293_v57  ;;  %v737_v24 = vmul.f32 0.5, %v195_v23  ;;  %v739_v27 = vmul.f32 0.5, %v233_v25  ;;  %v252_v28 = vmul.f32 0.7978846, %v249_v9 }
  0x22   : > { %v334_v30 = vadd.f32 %v688_v1, %v331_v10  ;;  %v253_v31 = vmul.f32 0.7978846, %v250_v11  ;;  %v303_v21 = vmul.f32 %v300_v12, %v291_v49  ;;  %v335_v32 = vadd.f32 %v688_v1, %v332_v13 }
  0x23   : > { %v336_v33 = vadd.f32 %v688_v1, %v333_v14  ;;  %604 = vtanh.f32 %v213_v16  ;;  %v746_v34 = vmul.f32 0.5, %v709_v26  ;;  %v749_v23 = vmul.f32 0.5, %v713_v29 }
  0x24   : > { %v304_v25 = vmul.f32 %v301_v17, %v292_v52  ;;  %606 = vtanh.f32 %v251_v19  ;;  %v751_v35 = vmul.f32 0.5, %v291_v49  ;;  %v753_v36 = vmul.f32 0.5, %v292_v52 }
  0x25   : > { %v305_v37 = vmul.f32 %v302_v20, %v293_v57  ;;  %v601_v40 = vpop.eup %600  ;;  %608 = vtanh.f32 %v252_v28  ;;  %v757_v41 = vmul.f32 0.5, %v293_v57  ;;  %v340_v42 = vmul.f32 0.044715, %v334_v30 }
  0x26   : > { %v386_v43 = vunpack.c.l.bf16 %v577_v22  ;;  %v603_v26 = vpop.eup %602  ;;  %610 = vtanh.f32 %v253_v31  ;;  %v306_v44 = vadd.f32 %v303_v21, %v291_v49  ;;  %v341_v29 = vmul.f32 0.044715, %v335_v32  ;;  %v581_v21 = vld [vmem:[%s678_s18 + $0xc] sm:$0x3] }
  0x27   : > { %v342_v45 = vmul.f32 0.044715, %v336_v33  ;;  %v307_v46 = vadd.f32 %v304_v25, %v292_v52  ;;  %v343_v47 = vmul.f32 %v340_v42, %v334_v30  ;;  %v387_v48 = vunpack.c.l.bf16 %v578_v38  ;;  %v582_v25 = vld [vmem:[%s678_s18 + $0xe] sm:$0x3] }
  0x28   : > { %v388_v50 = vunpack.c.l.bf16 %v579_v39  ;;  %v217_v51 = vadd.f32 1.0, %v601_v40  ;;  %v308_v53 = vadd.f32 %v305_v37, %v293_v57  ;;  %v344_v54 = vmul.f32 %v341_v29, %v335_v32 }
  0x29   : > { %v345_v55 = vmul.f32 %v342_v45, %v336_v33  ;;  %v605_v56 = vpop.eup %604  ;;  %v218_v58 = vadd.f32 1.0, %v603_v26  ;;  %v759_v59 = vmul.f32 0.5, %v334_v30  ;;  %v346_v60 = vmul.f32 %v343_v47, %v334_v30 }
  0x2a   : > { %v389_v61 = vmul.f32 %v683_v0, %v386_v43  ;;  %v607_v62 = vpop.eup %606  ;;  %v309_v63 = vmul.f32 0.7978846, %v306_v44  ;;  %v347_v49 = vmul.f32 %v344_v54, %v335_v32  ;;  %v390_v52 = vmul.f32 %v683_v0, %v387_v48 }
  0x2b   : > { %v348_v2 = vmul.f32 %v345_v55, %v336_v33  ;;  %v609_v3 = vpop.eup %608  ;;  %v310_v4 = vmul.f32 0.7978846, %v307_v46  ;;  %v763_v5 = vmul.f32 0.5, %v335_v32  ;;  %v349_v57 = vadd.f32 %v346_v60, %v334_v30 }
  0x2c   : > { %v391_v6 = vmul.f32 %v683_v0, %v388_v50  ;;  %v611_v7 = vpop.eup %610  ;;  %v219_v8 = vadd.f32 1.0, %v605_v56  ;;  %v766_v9 = vmul.f32 %v217_v51, %v196_v15  ;;  %v311_v10 = vmul.f32 0.7978846, %v308_v53  ;;  %v580_v15 = vld [vmem:[%s678_s18 + $0xa] sm:$0x3] }
  0x2d   : > { %v350_v11 = vadd.f32 %v347_v49, %v335_v32  ;;  %v257_v12 = vadd.f32 1.0, %v607_v62  ;;  %v351_v13 = vadd.f32 %v348_v2, %v336_v33  ;;  %v352_v14 = vmul.f32 0.7978846, %v349_v57 }
  0x2e   : > { %v769_v16 = vadd.f32 %v688_v1, %v389_v61  ;;  %v221_v17 = vmul.f32 %v218_v58, %v735_v18  ;;  %612 = vtanh.f32 %v309_v63  ;;  %v773_v19 = vadd.f32 %v688_v1, %v390_v52 }
  0x2f   : > { %v776_v20 = vadd.f32 %v688_v1, %v391_v6  ;;  %v258_v28 = vadd.f32 1.0, %v609_v3  ;;  %614 = vtanh.f32 %v310_v4  ;;  %v779_v30 = vmul.f32 0.5, %v336_v33 }
  0x30   : > { %v353_v31 = vmul.f32 0.7978846, %v350_v11  ;;  %v783_v32 = vmul.f32 %v219_v8, %v737_v24  ;;  %v259_v22 = vadd.f32 1.0, %v611_v7  ;;  %v565_v18 = vrot.slane %v766_v9, 9 }
  0x31   : > { %616 = vtanh.f32 %v311_v10  ;;  %v260_v37 = vmul.f32 %v257_v12, %v739_v27  ;;  %v354_v38 = vmul.f32 0.7978846, %v351_v13  ;;  %v398_v39 = vmul.f32 0.044715, %v769_v16 }
  0x32   : > { %618 = vtanh.f32 %v352_v14  ;;  %v399_v40 = vmul.f32 0.044715, %v773_v19  ;;  %v400_v33 = vmul.f32 0.044715, %v776_v20  ;;  %v429_v42 = vunpack.c.l.bf16 %v580_v15 }
  0x33   : > { %v430_v43 = vunpack.c.l.bf16 %v581_v21  ;;  %v261_v24 = vmul.f32 %v258_v28, %v746_v34  ;;  %620 = vtanh.f32 %v353_v31  ;;  %v401_v26 = vmul.f32 %v398_v39, %v769_v16 }
  0x34   : > { %v431_v44 = vunpack.c.l.bf16 %v582_v25  ;;  %v613_v29 = vpop.eup %612  ;;  %v402_v45 = vmul.f32 %v399_v40, %v773_v19  ;;  %v403_v27 = vmul.f32 %v400_v33, %v776_v20  ;;  %v432_v46 = vmul.f32 %v683_v0, %v429_v42 }
  0x35   : > { %v433_v47 = vmul.f32 %v683_v0, %v430_v43  ;;  %v615_v48 = vpop.eup %614  ;;  %v262_v50 = vmul.f32 %v259_v22, %v749_v23  ;;  %622 = vtanh.f32 %v354_v38  ;;  %v404_v51 = vmul.f32 %v401_v26, %v769_v16 }
  0x36   : > { %v434_v34 = vmul.f32 %v683_v0, %v431_v44  ;;  %v263_v54 = vmax.f32 %v766_v9, %v260_v37  ;;  %v566_v55 = vrot.slane %v221_v17, 9  ;;  %v405_v56 = vmul.f32 %v402_v45, %v773_v19 }
  0x37   : > { %v617_v53 = vpop.eup %616  ;;  %v406_v58 = vmul.f32 %v403_v27, %v776_v20  ;;  %v264_v61 = vmax.f32 %v221_v17, %v261_v24  ;;  %v315_v62 = vadd.f32 1.0, %v613_v29  ;;  %v407_v63 = vadd.f32 %v404_v51, %v769_v16 }
  0x38   : > { %v619_v60 = vpop.eup %618  ;;  %v805_v23 = vadd.f32 %v688_v1, %v432_v46  ;;  %v316_v49 = vadd.f32 1.0, %v615_v48  ;;  %v408_v2 = vadd.f32 %v405_v56, %v773_v19  ;;  %v810_v52 = vadd.f32 %v688_v1, %v433_v47 }
  0x39   : > { %v409_v0 = vadd.f32 %v406_v58, %v776_v20  ;;  %v621_v3 = vpop.eup %620  ;;  %v265_v4 = vmax.f32 %v783_v32, %v262_v50  ;;  %v567_v57 = vrot.slane %v783_v32, 9  ;;  %v410_v6 = vmul.f32 0.7978846, %v407_v63 }
  0x3a   : > { %v815_v7 = vadd.f32 %v688_v1, %v434_v34  ;;  %v278_v8 = vmax.f32 %v263_v54, %v565_v18  ;;  %v317_v9 = vadd.f32 1.0, %v617_v53  ;;  %v411_v10 = vmul.f32 0.7978846, %v408_v2 }
  0x3b   : > { %v412_v11 = vmul.f32 0.7978846, %v409_v0  ;;  %v623_v12 = vpop.eup %622  ;;  %v279_v13 = vmax.f32 %v264_v61, %v566_v55  ;;  %v318_v14 = vmul.f32 %v315_v62, %v751_v35  ;;  %624 = vtanh.f32 %v410_v6 }
  0x3c   : > { %v441_v17 = vmul.f32 0.044715, %v805_v23  ;;  %v319_v15 = vmul.f32 %v316_v49, %v753_v36  ;;  %v358_v28 = vadd.f32 1.0, %v619_v60  ;;  %626 = vtanh.f32 %v411_v10 }
  0x3d   : > { %v442_v31 = vmul.f32 0.044715, %v810_v52  ;;  %v359_v21 = vadd.f32 1.0, %v621_v3  ;;  %628 = vtanh.f32 %v412_v11  ;;  %v443_v1 = vmul.f32 0.044715, %v815_v7 }
  0x3e   : > { %v444_v32 = vmul.f32 %v441_v17, %v805_v23  ;;  %v280_v22 = vmax.f32 %v265_v4, %v567_v57  ;;  %v320_v18 = vmul.f32 %v317_v9, %v757_v41  ;;  %v360_v25 = vadd.f32 1.0, %v623_v12 }
  0x3f   : > { %v445_v35 = vmul.f32 %v442_v31, %v810_v52  ;;  %v446_v37 = vmul.f32 %v443_v1, %v815_v7  ;;  %v321_v38 = vmax.f32 %v278_v8, %v318_v14  ;;  %v322_v39 = vmax.f32 %v279_v13, %v319_v15 }
  0x40   : > { %v447_v36 = vmul.f32 %v444_v32, %v805_v23  ;;  %v361_v40 = vmul.f32 %v358_v28, %v759_v59  ;;  %v362_v43 = vmul.f32 %v359_v21, %v763_v5  ;;  %v574_v24 = vrot.slane %v318_v14, 9 }
  0x41   : > { %v448_v33 = vmul.f32 %v445_v35, %v810_v52  ;;  %v625_v42 = vpop.eup %624  ;;  %v449_v41 = vmul.f32 %v446_v37, %v815_v7  ;;  %v323_v29 = vmax.f32 %v280_v22, %v320_v18  ;;  %v363_v45 = vmul.f32 %v360_v25, %v779_v30  ;;  %v489_v22 = vld [vmem:[%s175_s26] sm:$0x3]  ;;  %v492_v35 = vld [vmem:[%s175_s26 + $0x2] sm:$0x3] }
  0x42   : > { %v450_v26 = vadd.f32 %v447_v36, %v805_v23  ;;  %v627_v44 = vpop.eup %626  ;;  %v575_v27 = vrot.slane %v319_v15, 9  ;;  %v576_v59 = vrot.slane %v320_v18, 9  ;;  %v395_v48 = vmul.f32 0.5, %v769_v16  ;;  %v495_v36 = vld [vmem:[%s175_s26 + $0x4] sm:$0x3] }
  0x43   : > { %v451_v46 = vadd.f32 %v448_v33, %v810_v52  ;;  %v629_v47 = vpop.eup %628  ;;  %v452_v50 = vadd.f32 %v449_v41, %v815_v7  ;;  %v364_v51 = vmax.f32 %v321_v38, %v361_v40  ;;  %v396_v34 = vmul.f32 0.5, %v773_v19 }
  0x44   : > { %v453_v5 = vmul.f32 0.7978846, %v450_v26  ;;  %v416_v53 = vadd.f32 1.0, %v625_v42  ;;  %v365_v55 = vmax.f32 %v322_v39, %v362_v43  ;;  %v417_v30 = vadd.f32 1.0, %v627_v44 }
  0x45   : > { %v454_v54 = vmul.f32 0.7978846, %v451_v46  ;;  %v455_v56 = vmul.f32 0.7978846, %v452_v50  ;;  %v366_v58 = vmax.f32 %v323_v29, %v363_v45  ;;  %v397_v60 = vmul.f32 0.5, %v776_v20 }
  0x46   : > { %630 = vtanh.f32 %v453_v5  ;;  %v418_v61 = vadd.f32 1.0, %v629_v47  ;;  %v379_v16 = vmax.f32 %v364_v51, %v574_v24  ;;  %v419_v62 = vmul.f32 %v416_v53, %v395_v48 }
  0x47   : > { %632 = vtanh.f32 %v454_v54  ;;  %v380_v63 = vmax.f32 %v365_v55, %v575_v27  ;;  %v420_v49 = vmul.f32 %v417_v30, %v396_v34  ;;  %v381_v2 = vmax.f32 %v366_v58, %v576_v59 }
  0x48   : > { %634 = vtanh.f32 %v455_v56  ;;  %v421_v19 = vmul.f32 %v418_v61, %v397_v60  ;;  %v438_v0 = vmul.f32 0.5, %v805_v23  ;;  %v439_v4 = vmul.f32 0.5, %v810_v52 }
  0x49   : > { %v422_v6 = vmax.f32 %v379_v16, %v419_v62  ;;  %v440_v20 = vmul.f32 0.5, %v815_v7  ;;  %v423_v10 = vmax.f32 %v380_v63, %v420_v49  ;;  %v583_v17 = vrot.slane %v419_v62, 9 }
  0x4a   : > { %v424_v12 = vmax.f32 %v381_v2, %v421_v19  ;;  %v584_v28 = vrot.slane %v420_v49, 9  ;;  %v585_v31 = vrot.slane %v421_v19, 9 }
  0x4c   : > { %v631_v3 = vpop.eup %630 }
  0x4d   : > { %v633_v57 = vpop.eup %632  ;;  %v459_v8 = vadd.f32 1.0, %v631_v3 }
  0x4e   : > { %v635_v9 = vpop.eup %634  ;;  %v460_v11 = vadd.f32 1.0, %v633_v57 }
  0x4f   : > { %v461_v13 = vadd.f32 1.0, %v635_v9  ;;  %v462_v14 = vmul.f32 %v459_v8, %v438_v0 }
  0x50   : > { %v463_v15 = vmul.f32 %v460_v11, %v439_v4 }
  0x51   : > { %v464_v23 = vmul.f32 %v461_v13, %v440_v20  ;;  %v465_v52 = vmax.f32 %v422_v6, %v462_v14 }
  0x52   : > { %v466_v7 = vmax.f32 %v423_v10, %v463_v15 }
  0x53   : > { %v467_v21 = vmax.f32 %v424_v12, %v464_v23  ;;  %v480_v1 = vmax.f32 %v465_v52, %v583_v17 }
  0x54   : > { %v481_v32 = vmax.f32 %v466_v7, %v584_v28 }
  0x55   : > { %v482_v18 = vmax.f32 %v467_v21, %v585_v31  ;;  %v483_v25 = vpack.c.bf16 %v480_v1, %v480_v1 }
  0x56   : > { %v484_v37 = vpack.c.bf16 %v481_v32, %v481_v32 }
  0x57   : > { %v485_v38 = vpack.c.bf16 %v482_v18, %v482_v18  ;;  %v490_v39 = vsel %vm488_vm2, %v483_v25, %v489_v22 }
  0x58   : > { %491 = vst [vmem:[%s175_s26] sm:$0x3] %v490_v39  ;;  %v493_v40 = vsel %vm488_vm2, %v484_v37, %v492_v35 }
  0x59   : > { %494 = vst [vmem:[%s175_s26 + $0x2] sm:$0x3] %v493_v40  ;;  %v496_v33 = vsel %vm488_vm2, %v485_v38, %v495_v36 }
  0x5a   : > { %497 = vst [vmem:[%s175_s26 + $0x4] sm:$0x3] %v496_v33 }
  0x5b PF: > { %s13_s12 = sadd.s32 1, %s642_s12  }
  0x5c   : > { %p10_p5 = scmp.ge.s32.totalorder %s13_s12, 4  }
  0x5e   :  { %12 = sbr.rel (!%p10_p5) target bundleno = 1 (0x1), region = 67 }

// kernel: clinical_image_encoder.11
= control target key start
LH: loop header
LB: loop body
LE: loop exit
PB: predicated region body
PF: predicated region fallthrough
CT: control target
= control target key end

     0   :  { %s724_s0 = inlined_call_operand.vmem [shape: bf16[2,9,256], index: 0, kind: input, shape index: {}]   ;;  %s725_s1 = inlined_call_operand.vmem [shape: f32[1,256], index: 1, kind: input, shape index: {}]   ;;  %s726_s2 = inlined_call_operand.vmem [shape: f32[1,256], index: 2, kind: input, shape index: {}]   ;;  %s727_s3 = inlined_call_operand.vmem [shape: bf16[256,32], index: 3, kind: input, shape index: {}]   ;;  %s728_s4 = inlined_call_operand.vmem [shape: f32[1,32], index: 4, kind: input, shape index: {}]   ;;  %s729_s5 = inlined_call_operand.vmem [shape: f32[1,32], index: 5, kind: input, shape index: {}]   ;;  %s730_s6 = inlined_call_operand.vmem [shape: f32[1,32], index: 6, kind: input, shape index: {}]   ;;  %s731_s7 = inlined_call_operand.hbm [shape: f32[2,32], index: 7, kind: output, shape index: {}]  }
   0x1   :  { %v481_v0 = vld [vmem:[%s727_s3 + $0x38] sm:$0xff]  ;;  %v480_v2 = vld [vmem:[%s727_s3 + $0x30] sm:$0xff]  ;;  %v479_v4 = vld [vmem:[%s727_s3 + $0x28] sm:$0xff] }
   0x2   :  { %v489_v1 = vld [vmem:[%s727_s3 + $0x78] sm:$0xff]  ;;  %327 = vmatpush.bf16.msra.mxu0 %v481_v0  ;;  %v488_v3 = vld [vmem:[%s727_s3 + $0x70] sm:$0xff]  ;;  %v487_v5 = vld [vmem:[%s727_s3 + $0x68] sm:$0xff] }
   0x3   :  { %340 = vmatpush.bf16.msra.mxu1 %v489_v1  ;;  %v27_v6 = vld [vmem:[%s724_s0] sm:$0xff]  ;;  %v28_v7 = vld [vmem:[%s724_s0 + $0x8] sm:$0x11]  ;;  %v29_v8 = vld [vmem:[%s724_s0 + $0x10] sm:$0xff] }
   0x4   :  { %v30_v9 = vld [vmem:[%s724_s0 + $0x18] sm:$0x11]  ;;  %v31_v10 = vunpack.c.l.bf16 %v27_v6  ;;  %v33_v11 = vunpack.c.l.bf16 %v28_v7  ;;  %v39_v12 = vld [vmem:[%s725_s1] sm:$0x3]  ;;  %v32_v13 = vunpack.c.h.bf16 %v27_v6  ;;  %v34_v14 = vunpack.c.h.bf16 %v28_v7 }
   0x5   :  { %v35_v15 = vunpack.c.l.bf16 %v29_v8  ;;  %v37_v16 = vunpack.c.l.bf16 %v30_v9  ;;  %v41_v17 = vperm.slane %v39_v12, 0  ;;  %v53_v18 = vld [vmem:[%s726_s2] sm:$0x3]  ;;  %v36_v19 = vunpack.c.h.bf16 %v29_v8 }
   0x6   :  { %328 = vmatpush.bf16.msra.mxu0 %v480_v2  ;;  %v55_v20 = vperm.slane %v53_v18, 0  ;;  %v38_v21 = vunpack.c.h.bf16 %v30_v9  ;;  %v42_v22 = vperm.slane %v39_v12, 1  ;;  %v56_v23 = vperm.slane %v53_v18, 1 }
   0x7   :  { %341 = vmatpush.bf16.msra.mxu1 %v488_v3 }
   0x8   :  { %12 = vsyncpa [#allocation3], 0  ;;  %v45_v24 = vmul.f32 %v41_v17, %v31_v10  ;;  %v47_v25 = vmul.f32 %v41_v17, %v33_v11  ;;  %v49_v26 = vmul.f32 %v41_v17, %v35_v15  ;;  %v51_v27 = vmul.f32 %v41_v17, %v37_v16  ;;  %v478_v28 = vld [vmem:[%s727_s3 + $0x20] sm:$0xff]  ;;  %v477_v38 = vld [vmem:[%s727_s3 + $0x18] sm:$0xff]  ;;  %s542_s23 = smov [#allocation2]   ;;  %s401_s25 = sshll.u32 %s731_s7, 4  ;;  %s402_s25 = int_to_ptr.hbm [resolvable:$true] %s401_s25 }
   0x9   :  { %v486_v29 = vld [vmem:[%s727_s3 + $0x60] sm:$0xff]  ;;  %v46_v30 = vmul.f32 %v42_v22, %v32_v13  ;;  %v48_v31 = vmul.f32 %v42_v22, %v34_v14  ;;  %v50_v32 = vmul.f32 %v42_v22, %v36_v19  ;;  %v52_v37 = vmul.f32 %v42_v22, %v38_v21  ;;  %v485_v39 = vld [vmem:[%s727_s3 + $0x58] sm:$0xff]  ;;  %v476_v55 = vld [vmem:[%s727_s3 + $0x10] sm:$0xff]  ;;  %s399_s24 = sshll.u32 %s542_s23, 4  ;;  %s400_s24 = int_to_ptr.vmem [resolvable:$true] %s399_s24 }
   0xa   :  { %329 = vmatpush.bf16.msra.mxu0 %v479_v4  ;;  %v625_v33 = vadd.f32 %v55_v20, %v45_v24  ;;  %v627_v34 = vadd.f32 %v55_v20, %v47_v25  ;;  %v629_v35 = vadd.f32 %v55_v20, %v49_v26  ;;  %v631_v36 = vadd.f32 %v55_v20, %v51_v27  ;;  %v484_v56 = vld [vmem:[%s727_s3 + $0x50] sm:$0xff]  ;;  %v483_v6 = vld [vmem:[%s727_s3 + $0x48] sm:$0xff]  ;;  %v474_v22 = vld [vmem:[%s727_s3] sm:$0xff] }
   0xb   :  { %342 = vmatpush.bf16.msra.mxu1 %v487_v5  ;;  %v639_v40 = vadd.f32 %v56_v23, %v46_v30  ;;  %v641_v41 = vadd.f32 %v56_v23, %v48_v31  ;;  %v643_v42 = vadd.f32 %v56_v23, %v50_v32  ;;  %v648_v46 = vadd.f32 %v56_v23, %v52_v37  ;;  %v475_v5 = vld [vmem:[%s727_s3 + $0x8] sm:$0xff]  ;;  %v482_v23 = vld [vmem:[%s727_s3 + $0x40] sm:$0xff] }
   0xc   :  { %v75_v43 = vmul.f32 0.044715, %v625_v33  ;;  %v77_v44 = vmul.f32 0.044715, %v627_v34  ;;  %v79_v45 = vmul.f32 0.044715, %v629_v35 }
   0xd   :  { %v81_v47 = vmul.f32 0.044715, %v631_v36  ;;  %v76_v52 = vmul.f32 0.044715, %v639_v40  ;;  %v78_v53 = vmul.f32 0.044715, %v641_v41 }
   0xe   :  { %330 = vmatpush.bf16.msra.mxu0 %v478_v28  ;;  %v83_v48 = vmul.f32 %v75_v43, %v625_v33  ;;  %v85_v49 = vmul.f32 %v77_v44, %v627_v34  ;;  %v87_v50 = vmul.f32 %v79_v45, %v629_v35  ;;  %v80_v54 = vmul.f32 0.044715, %v643_v42 }
   0xf   :  { %343 = vmatpush.bf16.msra.mxu1 %v486_v29  ;;  %v89_v51 = vmul.f32 %v81_v47, %v631_v36  ;;  %v82_v60 = vmul.f32 0.044715, %v648_v46  ;;  %v84_v62 = vmul.f32 %v76_v52, %v639_v40  ;;  %v86_v63 = vmul.f32 %v78_v53, %v641_v41 }
  0x10   :  { %v91_v57 = vmul.f32 %v83_v48, %v625_v33  ;;  %v93_v58 = vmul.f32 %v85_v49, %v627_v34  ;;  %v95_v59 = vmul.f32 %v87_v50, %v629_v35  ;;  %v88_v0 = vmul.f32 %v80_v54, %v643_v42 }
  0x11   :  { %v97_v61 = vmul.f32 %v89_v51, %v631_v36  ;;  %v90_v4 = vmul.f32 %v82_v60, %v648_v46  ;;  %v92_v8 = vmul.f32 %v84_v62, %v639_v40  ;;  %v94_v9 = vmul.f32 %v86_v63, %v641_v41 }
  0x12   :  { %331 = vmatpush.bf16.msra.mxu0 %v477_v38  ;;  %v99_v1 = vadd.f32 %v91_v57, %v625_v33  ;;  %v101_v2 = vadd.f32 %v93_v58, %v627_v34  ;;  %v103_v3 = vadd.f32 %v95_v59, %v629_v35  ;;  %v96_v10 = vmul.f32 %v88_v0, %v643_v42 }
  0x13   :  { %344 = vmatpush.bf16.msra.mxu1 %v485_v39  ;;  %v105_v7 = vadd.f32 %v97_v61, %v631_v36  ;;  %v98_v14 = vmul.f32 %v90_v4, %v648_v46  ;;  %v100_v16 = vadd.f32 %v92_v8, %v639_v40  ;;  %v102_v17 = vadd.f32 %v94_v9, %v641_v41 }
  0x14   :  { %v107_v11 = vmul.f32 0.7978846, %v99_v1  ;;  %v109_v12 = vmul.f32 0.7978846, %v101_v2  ;;  %v111_v13 = vmul.f32 0.7978846, %v103_v3  ;;  %v104_v18 = vadd.f32 %v96_v10, %v643_v42 }
  0x15   :  { %v113_v15 = vmul.f32 0.7978846, %v105_v7  ;;  %v106_v19 = vadd.f32 %v98_v14, %v648_v46  ;;  %v108_v20 = vmul.f32 0.7978846, %v100_v16  ;;  %v110_v21 = vmul.f32 0.7978846, %v102_v17 }
  0x16   :  { %332 = vmatpush.bf16.msra.mxu0 %v476_v55  ;;  %495 = vtanh.f32 %v107_v11  ;;  %v112_v24 = vmul.f32 0.7978846, %v104_v18  ;;  %v67_v26 = vmul.f32 0.5, %v625_v33  ;;  %v69_v28 = vmul.f32 0.5, %v627_v34 }
  0x17   :  { %345 = vmatpush.bf16.msra.mxu1 %v484_v56  ;;  %497 = vtanh.f32 %v109_v12  ;;  %v114_v25 = vmul.f32 0.7978846, %v106_v19  ;;  %v71_v30 = vmul.f32 0.5, %v629_v35  ;;  %v73_v37 = vmul.f32 0.5, %v631_v36 }
  0x18   :  { %499 = vtanh.f32 %v111_v13  ;;  %vm139_vm0 = vcmask 1040384   ;;  %v68_v33 = vmul.f32 0.5, %v639_v40  ;;  %v70_v34 = vmul.f32 0.5, %v641_v41 }
  0x19   :  { %501 = vtanh.f32 %v113_v15  ;;  %v72_v35 = vmul.f32 0.5, %v643_v42  ;;  %v74_v54 = vmul.f32 0.5, %v648_v46  ;;  %vm224_vm1 = vcmask 1041409  }
  0x1a   :  { %333 = vmatpush.bf16.msra.mxu0 %v475_v5  ;;  %503 = vtanh.f32 %v108_v20  ;;  %vm353_vm2 = vcmask 254976  }
  0x1b   :  { %346 = vmatpush.bf16.msra.mxu1 %v483_v6  ;;  %505 = vtanh.f32 %v110_v21 }
  0x1c   :  { %v496_v27 = vpop.eup %495  ;;  %507 = vtanh.f32 %v112_v24 }
  0x1d   :  { %v498_v29 = vpop.eup %497  ;;  %v123_v31 = vadd.f32 1.0, %v496_v27  ;;  %509 = vtanh.f32 %v114_v25 }
  0x1e   :  { %334 = vmatpush.bf16.msra.mxu0 %v474_v22  ;;  %v500_v32 = vpop.eup %499  ;;  %v125_v38 = vadd.f32 1.0, %v498_v29 }
  0x1f   :  { %347 = vmatpush.bf16.msra.mxu1 %v482_v23  ;;  %v502_v39 = vpop.eup %501  ;;  %v127_v43 = vadd.f32 1.0, %v500_v32  ;;  %v131_v44 = vmul.f32 %v123_v31, %v67_v26 }
  0x20   :  { %v504_v45 = vpop.eup %503  ;;  %v129_v47 = vadd.f32 1.0, %v502_v39  ;;  %v133_v48 = vmul.f32 %v125_v38, %v69_v28 }
  0x21   :  { %v506_v49 = vpop.eup %505  ;;  %v135_v50 = vmul.f32 %v127_v43, %v71_v30  ;;  %v124_v51 = vadd.f32 1.0, %v504_v45 }
  0x22   :  { %v508_v52 = vpop.eup %507  ;;  %v137_v53 = vmul.f32 %v129_v47, %v73_v37  ;;  %v140_v36 = vsel %vm139_vm0, %v133_v48, 0.0  ;;  %v126_v55 = vadd.f32 1.0, %v506_v49 }
  0x23   :  { %v510_v56 = vpop.eup %509  ;;  %v141_v57 = vadd.f32 %v140_v36, %v131_v44  ;;  %v128_v40 = vadd.f32 1.0, %v508_v52  ;;  %v132_v58 = vmul.f32 %v124_v51, %v68_v33 }
  0x24   :  { %v156_v59 = vsel %vm139_vm0, %v137_v53, 0.0  ;;  %v130_v60 = vadd.f32 1.0, %v510_v56  ;;  %v134_v41 = vmul.f32 %v126_v55, %v70_v34  ;;  %v492_v34 = vld [vmem:[%s728_s4] ss:$0 sm:$0xff] }
  0x25   :  { %v142_v61 = vrot.slane %v141_v57, 4  ;;  %v157_v62 = vadd.f32 %v156_v59, %v135_v50  ;;  %v136_v63 = vmul.f32 %v128_v40, %v72_v35 }
  0x26   :  { %v138_v42 = vmul.f32 %v130_v60, %v74_v54  ;;  %v148_v0 = vsel %vm139_vm0, %v134_v41, 0.0  ;;  %v541_v54 = vmov 32.0  }
  0x27   :  { %v143_v1 = vadd.f32 %v142_v61, %v141_v57  ;;  %v158_v2 = vrot.slane %v157_v62, 4  ;;  %v149_v3 = vadd.f32 %v148_v0, %v132_v58  ;;  %511 = vrcp.f32 %v541_v54 }
  0x28   :  { %v164_v46 = vsel %vm139_vm0, %v138_v42, 0.0 }
  0x29   :  { %v144_v4 = vrot.slane %v143_v1, 2  ;;  %v159_v5 = vadd.f32 %v158_v2, %v157_v62  ;;  %v150_v6 = vrot.slane %v149_v3, 4  ;;  %v165_v7 = vadd.f32 %v164_v46, %v136_v63 }
  0x2b   :  { %v145_v8 = vadd.f32 %v144_v4, %v143_v1  ;;  %v160_v9 = vrot.slane %v159_v5, 2  ;;  %v151_v10 = vadd.f32 %v150_v6, %v149_v3  ;;  %v166_v11 = vrot.slane %v165_v7, 4 }
  0x2d   :  { %v146_v12 = vrot.slane %v145_v8, 1  ;;  %v161_v13 = vadd.f32 %v160_v9, %v159_v5  ;;  %v152_v14 = vrot.slane %v151_v10, 2  ;;  %v167_v15 = vadd.f32 %v166_v11, %v165_v7  ;;  %v512_v55 = vpop.eup %511  ;;  %v493_v7 = vld [vmem:[%s729_s5] ss:$0 sm:$0xff] }
  0x2e   :  { %v358_v56 = vmul.f32 32.0, %v512_v55  ;;  %vm362_vm3 = vweird.f32 %v512_v55 }
  0x2f   :  { %v147_v16 = vadd.f32 %v146_v12, %v145_v8  ;;  %v162_v17 = vrot.slane %v161_v13, 1  ;;  %v153_v18 = vadd.f32 %v152_v14, %v151_v10  ;;  %v168_v19 = vrot.slane %v167_v15, 2  ;;  %v494_v10 = vld [vmem:[%s730_s6] ss:$0 sm:$0xff] }
  0x30   :  { %v359_v57 = vsub.f32 1.0, %v358_v56 }
  0x31   :  { %v163_v20 = vadd.f32 %v162_v17, %v161_v13  ;;  %v172_v21 = vmul.f32 0.11111111, %v147_v16  ;;  %v154_v22 = vrot.slane %v153_v18, 1  ;;  %v169_v23 = vadd.f32 %v168_v19, %v167_v15 }
  0x32   :  { %v360_v40 = vmul.f32 %v512_v55, %v359_v57 }
  0x33   :  { %v174_v24 = vmul.f32 0.11111111, %v163_v20  ;;  %v176_v25 = vpack.c.bf16 %v172_v21, %v172_v21  ;;  %v155_v26 = vadd.f32 %v154_v22, %v153_v18  ;;  %v170_v27 = vrot.slane %v169_v23, 1 }
  0x34   :  { %v361_v58 = vadd.f32 %v512_v55, %v360_v40 }
  0x35   :  { %v178_v28 = vpack.c.bf16 %v174_v24, %v174_v24  ;;  %v220_v29 = vunpack.c.l.b16 %v176_v25  ;;  %v171_v30 = vadd.f32 %v170_v27, %v169_v23  ;;  %v173_v31 = vmul.f32 0.11111111, %v155_v26 }
  0x36   :  { %v363_v59 = vsel %vm362_vm3, %v512_v55, %v361_v58 }
  0x37   :  { %v222_v32 = vunpack.c.l.b16 %v178_v28  ;;  %v175_v37 = vmul.f32 0.11111111, %v171_v30  ;;  %v177_v38 = vpack.c.bf16 %v173_v31, %v173_v31 }
  0x39   :  { %v225_v39 = vsel %vm224_vm1, %v222_v32, %v220_v29  ;;  %v179_v43 = vpack.c.bf16 %v175_v37, %v175_v37  ;;  %v221_v44 = vunpack.c.l.b16 %v177_v38 }
  0x3a   :  { %v227_v33 = vpack.c.b16 %v225_v39, %v225_v39 }
  0x3b   :  { %v223_v45 = vunpack.c.l.b16 %v179_v43 }
  0x3c   :  { %335 = vmatmul.bf16.vlgmr.msra.gmra.mxu0 %v227_v33 }
  0x3d   :  { %v226_v47 = vsel %vm224_vm1, %v223_v45, %v221_v44 }
  0x3e   :  { %v228_v48 = vpack.c.b16 %v226_v47, %v226_v47 }
  0x40   :  { %348 = vmatmul.bf16.vlgmr.msra.gmra.mxu1 %v228_v48 }
  0xb9   :  { %v336_v49 = vpop.f32.mrf.mxu0 }
  0xba   :  { %v337_v50 = vadd.f32 %v492_v34, %v336_v49 }
  0xbd   :  { %v349_v35 = vpop.f32.mrf.mxu1 }
  0xbe   :  { %v350_v51 = vadd.f32 %v349_v35, %v337_v50 }
  0xc0   :  { %v354_v52 = vsel %vm353_vm2, %v350_v51, 0.0 }
  0xc1   :  { %355 = vadd.xlane.f32.xlu0 %v354_v52  ;;  %v338_v53 = vpop.f32.mrf.mxu0 }
  0xc5   :  { %v351_v36 = vpop.f32.mrf.mxu1 }
 0x134   :  { %v356_v60 = vpop.xlane.xlu0 %355 }
 0x135   :  { %v364_v41 = vmul.f32 %v363_v59, %v356_v60 }
 0x137   :  { %v365_v61 = vsub.f32 %v350_v51, %v364_v41 }
 0x139   :  { %v366_v62 = vmul.f32 %v365_v61, %v365_v61 }
 0x13b   :  { %v367_v63 = vsel %vm353_vm2, %v366_v62, 0.0 }
 0x13c   :  { %368 = vadd.xlane.f32.xlu0 %v367_v63 }
 0x1af   :  { %v369_v42 = vpop.xlane.xlu0 %368 }
 0x1b0   :  { %v370_v0 = vmul.f32 %v369_v42, %v363_v59 }
 0x1b2   :  { %v371_v1 = vadd.f32 1e-05, %v370_v0 }
 0x1b4   :  { %513 = vrsqrt.f32 %v371_v1  ;;  %vm378_vm5 = vweird.f32 %v371_v1 }
 0x1ba   :  { %v514_v2 = vpop.eup %513 }
 0x1bb   :  { %v373_v3 = vmul.f32 %v514_v2, %v371_v1  ;;  %vm379_vm4 = vweird.f32 %v514_v2 }
 0x1bc   :  { %vm380_vm6 = vmor %vm378_vm5, %vm379_vm4 }
 0x1bd   :  { %v374_v46 = vmul.f32 %v514_v2, %v373_v3 }
 0x1bf   :  { %v375_v4 = vmul.f32 0.5, %v374_v46 }
 0x1c1   :  { %v376_v5 = vsub.f32 1.5, %v375_v4 }
 0x1c3   :  { %v377_v6 = vmul.f32 %v514_v2, %v376_v5 }
 0x1c5   :  { %v381_v8 = vsel %vm380_vm6, %v514_v2, %v377_v6 }
 0x1c6   :  { %v382_v9 = vmul.f32 %v381_v8, %v365_v61 }
 0x1c8   :  { %v387_v11 = vmul.f32 %v493_v7, %v382_v9 }
 0x1ca   :  { %v392_v12 = vadd.f32 %v494_v10, %v387_v11 }
 0x1cc   :  { %393 = vst.msk [vmem:[#allocation2] sm:$0x3] %vm353_vm2, %v392_v12 }
 0x1cd   :  { %404 = dma.vmem_to_hbm [thread:$0]  %s400_s24, 32, %s402_s25, [#allocation3]  }
 0x1ce   :  { %539 = dma.done.wait [#allocation3], 32  }
 0x1cf   :  { %540 = vsyncadd [#allocation3], 4294967264 }
 0x1d0   :  { %409 = vsyncpa [#allocation3], 1 }

// kernel: clinical_image_encoder.10
= control target key start
LH: loop header
LB: loop body
LE: loop exit
PB: predicated region body
PF: predicated region fallthrough
CT: control target
= control target key end

     0   :  { %vm1661_vm6 = vcmask 1040384   ;;  %s4006_s1 = inlined_call_operand.vmem [shape: bf16[3,384,256], index: 1, kind: input, shape index: {}]   ;;  %s4007_s0 = inlined_call_operand.vmem [shape: bf16[2,5,8,384], index: 0, kind: input, shape index: {}]   ;;  %s4008_s2 = inlined_call_operand.vmem [shape: f32[1,256], index: 2, kind: input, shape index: {}]   ;;  %s4009_s3 = inlined_call_operand.vmem [shape: bf16[2,3,8,256], index: 3, kind: output, shape index: {0}]   ;;  %s4010_s4 = inlined_call_operand.vmem [shape: f32[1,1,256], index: 4, kind: output, shape index: {1}]   ;;  %s4011_s5 = inlined_call_operand.vmem [shape: f32[1,1,256], index: 5, kind: output, shape index: {2}]  }
   0x1   :  { %v1887_v0 = vld [vmem:[%s4006_s1 + $0x1f0] sm:$0xf]  ;;  %v2618_v1 = vld [vmem:[%s4006_s1 + $0x1f4] sm:$0xf0]  ;;  %v1879_v5 = vld [vmem:[%s4006_s1 + $0x1e0] sm:$0xf] }
   0x2   :  { %v1951_v2 = vld [vmem:[%s4006_s1 + $0x270] sm:$0xf]  ;;  %v1888_v3 = vor.u32 %v2618_v1, %v1887_v0  ;;  %v2634_v4 = vld [vmem:[%s4006_s1 + $0x274] sm:$0xf0]  ;;  %v2616_v6 = vld [vmem:[%s4006_s1 + $0x1e4] sm:$0xf0] }
   0x3   :  { %v1952_v7 = vor.u32 %v2634_v4, %v1951_v2  ;;  %v1943_v8 = vld [vmem:[%s4006_s1 + $0x260] sm:$0xf]  ;;  %v2632_v9 = vld [vmem:[%s4006_s1 + $0x264] sm:$0xf0]  ;;  %v1880_v10 = vor.u32 %v2616_v6, %v1879_v5  ;;  %v1871_v12 = vld [vmem:[%s4006_s1 + $0x1d0] sm:$0xf] }
   0x4   :  { %427 = vmatpush.bf16.msra.mxu0 %v1888_v3  ;;  %2708 = vmatpush.bf16.msra.mxu2 %v1888_v3  ;;  %v1944_v11 = vor.u32 %v2632_v9, %v1943_v8  ;;  %v2614_v13 = vld [vmem:[%s4006_s1 + $0x1d4] sm:$0xf0]  ;;  %v1935_v14 = vld [vmem:[%s4006_s1 + $0x250] sm:$0xf]  ;;  %v1863_v18 = vld [vmem:[%s4006_s1 + $0x1c0] sm:$0xf] }
   0x5   :  { %451 = vmatpush.bf16.msra.mxu1 %v1952_v7  ;;  %2716 = vmatpush.bf16.msra.mxu3 %v1952_v7  ;;  %v2630_v15 = vld [vmem:[%s4006_s1 + $0x254] sm:$0xf0]  ;;  %v1872_v16 = vor.u32 %v2614_v13, %v1871_v12  ;;  %v2612_v19 = vld [vmem:[%s4006_s1 + $0x1c4] sm:$0xf0]  ;;  %v1927_v20 = vld [vmem:[%s4006_s1 + $0x240] sm:$0xf] }
   0x6   :  { %v1936_v17 = vor.u32 %v2630_v15, %v1935_v14  ;;  %v2628_v21 = vld [vmem:[%s4006_s1 + $0x244] sm:$0xf0]  ;;  %v1864_v22 = vor.u32 %v2612_v19, %v1863_v18  ;;  %v1855_v24 = vld [vmem:[%s4006_s1 + $0x1b0] sm:$0xf]  ;;  %v2610_v25 = vld [vmem:[%s4006_s1 + $0x1b4] sm:$0xf0] }
   0x7   :  { %v1928_v23 = vor.u32 %v2628_v21, %v1927_v20  ;;  %v1919_v26 = vld [vmem:[%s4006_s1 + $0x230] sm:$0xf]  ;;  %v2626_v27 = vld [vmem:[%s4006_s1 + $0x234] sm:$0xf0]  ;;  %v1856_v28 = vor.u32 %v2610_v25, %v1855_v24  ;;  %v1847_v30 = vld [vmem:[%s4006_s1 + $0x1a0] sm:$0xf] }
   0x8   :  { %428 = vmatpush.bf16.msra.mxu0 %v1880_v10  ;;  %2709 = vmatpush.bf16.msra.mxu2 %v1880_v10  ;;  %v1920_v29 = vor.u32 %v2626_v27, %v1919_v26  ;;  %v2608_v31 = vld [vmem:[%s4006_s1 + $0x1a4] sm:$0xf0]  ;;  %v1911_v32 = vld [vmem:[%s4006_s1 + $0x220] sm:$0xf]  ;;  %v1839_v36 = vld [vmem:[%s4006_s1 + $0x190] sm:$0xf] }
   0x9   :  { %452 = vmatpush.bf16.msra.mxu1 %v1944_v11  ;;  %2717 = vmatpush.bf16.msra.mxu3 %v1944_v11  ;;  %v2624_v33 = vld [vmem:[%s4006_s1 + $0x224] sm:$0xf0]  ;;  %v1848_v34 = vor.u32 %v2608_v31, %v1847_v30  ;;  %v2606_v37 = vld [vmem:[%s4006_s1 + $0x194] sm:$0xf0]  ;;  %v1903_v38 = vld [vmem:[%s4006_s1 + $0x210] sm:$0xf] }
   0xa   :  { %v1912_v35 = vor.u32 %v2624_v33, %v1911_v32  ;;  %v2622_v39 = vld [vmem:[%s4006_s1 + $0x214] sm:$0xf0]  ;;  %v1840_v40 = vor.u32 %v2606_v37, %v1839_v36  ;;  %v1831_v41 = vld [vmem:[%s4006_s1 + $0x180] sm:$0xf]  ;;  %v2604_v42 = vld [vmem:[%s4006_s1 + $0x184] sm:$0xf0] }
   0xb   :  { %v1895_v43 = vld [vmem:[%s4006_s1 + $0x200] sm:$0xf]  ;;  %v1904_v44 = vor.u32 %v2622_v39, %v1903_v38  ;;  %v2620_v45 = vld [vmem:[%s4006_s1 + $0x204] sm:$0xf0]  ;;  %v2015_v46 = vld [vmem:[%s4006_s1 + $0x2f0] sm:$0xf]  ;;  %v1832_v54 = vor.u32 %v2604_v42, %v1831_v41 }
   0xc   :  { %429 = vmatpush.bf16.msra.mxu0 %v1872_v16  ;;  %2710 = vmatpush.bf16.msra.mxu2 %v1872_v16  ;;  %v2650_v47 = vld [vmem:[%s4006_s1 + $0x2f4] sm:$0xf0]  ;;  %v2617_v48 = vld [vmem:[%s4006_s1 + $0x1f4] sm:$0xf]  ;;  %v1889_v49 = vld [vmem:[%s4006_s1 + $0x1f8] sm:$0xf0]  ;;  %v1896_v58 = vor.u32 %v2620_v45, %v1895_v43 }
   0xd   :  { %453 = vmatpush.bf16.msra.mxu1 %v1936_v17  ;;  %2718 = vmatpush.bf16.msra.mxu3 %v1936_v17  ;;  %v1795_v50 = vld [vmem:[%s4007_s0 + $0xc] sm:$0xf]  ;;  %v2595_v51 = vld [vmem:[%s4007_s0 + $0x14] sm:$0xf0]  ;;  %v2594_v52 = vld [vmem:[%s4007_s0 + $0x10] sm:$0xf]  ;;  %v2016_v62 = vor.u32 %v2650_v47, %v2015_v46  ;;  %v1892_v63 = vor.u32 %v2617_v48, %v1889_v49 }
   0xe   :  { %v1797_v53 = vld [vmem:[%s4007_s0 + $0x18] sm:$0xf0]  ;;  %v2633_v55 = vld [vmem:[%s4006_s1 + $0x274] sm:$0xf]  ;;  %v2007_v60 = vld [vmem:[%s4006_s1 + $0x2e0] sm:$0xf]  ;;  %v2901_v3 = vor.u32 %v2595_v51, %v1795_v50 }
   0xf   :  { %v2649_v56 = vld [vmem:[%s4006_s1 + $0x2f4] sm:$0xf]  ;;  %v2017_v57 = vld [vmem:[%s4006_s1 + $0x2f8] sm:$0xf0]  ;;  %v2601_v0 = vld [vmem:[%s4007_s0 + $0x5c] sm:$0xf0]  ;;  %v2912_v8 = vor.u32 %v2594_v52, %v1797_v53 }
  0x10   :  { %430 = vmatpush.bf16.msra.mxu0 %v1864_v22  ;;  %2711 = vmatpush.bf16.msra.mxu2 %v1864_v22  ;;  %v1953_v59 = vld [vmem:[%s4006_s1 + $0x278] sm:$0xf0]  ;;  %v1819_v61 = vld [vmem:[%s4007_s0 + $0x54] sm:$0xf]  ;;  %v2600_v1 = vld [vmem:[%s4007_s0 + $0x58] sm:$0xf]  ;;  %v2020_v4 = vor.u32 %v2649_v56, %v2017_v57 }
  0x11   :  { %454 = vmatpush.bf16.msra.mxu1 %v1928_v23  ;;  %2719 = vmatpush.bf16.msra.mxu3 %v1928_v23  ;;  %v1821_v2 = vld [vmem:[%s4007_s0 + $0x60] sm:$0xf0]  ;;  %v2648_v5 = vld [vmem:[%s4006_s1 + $0x2e4] sm:$0xf0]  ;;  %v1881_v7 = vld [vmem:[%s4006_s1 + $0x1e8] sm:$0xf0]  ;;  %v1956_v9 = vor.u32 %v2633_v55, %v1953_v59  ;;  %v2920_v12 = vor.u32 %v2601_v0, %v1819_v61 }
  0x12   :  { %v2615_v6 = vld [vmem:[%s4006_s1 + $0x1e4] sm:$0xf]  ;;  %v2009_v11 = vld [vmem:[%s4006_s1 + $0x2e8] sm:$0xf0]  ;;  %v2922_v13 = vor.u32 %v2600_v1, %v1821_v2  ;;  %v2008_v16 = vor.u32 %v2648_v5, %v2007_v60  ;;  %v1999_v18 = vld [vmem:[%s4006_s1 + $0x2d0] sm:$0xf] }
  0x13   :  { %v2647_v10 = vld [vmem:[%s4006_s1 + $0x2e4] sm:$0xf]  ;;  %v1945_v15 = vld [vmem:[%s4006_s1 + $0x268] sm:$0xf0]  ;;  %v1884_v17 = vor.u32 %v2615_v6, %v1881_v7  ;;  %v2646_v20 = vld [vmem:[%s4006_s1 + $0x2d4] sm:$0xf0] }
  0x14   :  { %431 = vmatpush.bf16.msra.mxu0 %v1856_v28  ;;  %2712 = vmatpush.bf16.msra.mxu2 %v1856_v28  ;;  %v2631_v14 = vld [vmem:[%s4006_s1 + $0x264] sm:$0xf]  ;;  %v2012_v19 = vor.u32 %v2647_v10, %v2009_v11  ;;  %v2613_v21 = vld [vmem:[%s4006_s1 + $0x1d4] sm:$0xf]  ;;  %v1873_v22 = vld [vmem:[%s4006_s1 + $0x1d8] sm:$0xf0]  ;;  %v2000_v28 = vor.u32 %v2646_v20, %v1999_v18 }
  0x15   :  { %455 = vmatpush.bf16.msra.mxu1 %v1920_v29  ;;  %2720 = vmatpush.bf16.msra.mxu3 %v1920_v29  ;;  %v1948_v23 = vor.u32 %v2631_v14, %v1945_v15  ;;  %v2645_v24 = vld [vmem:[%s4006_s1 + $0x2d4] sm:$0xf]  ;;  %v2001_v25 = vld [vmem:[%s4006_s1 + $0x2d8] sm:$0xf0]  ;;  %v1876_v29 = vor.u32 %v2613_v21, %v1873_v22  ;;  %v1991_v30 = vld [vmem:[%s4006_s1 + $0x2c0] sm:$0xf] }
  0x16   :  { %v2629_v26 = vld [vmem:[%s4006_s1 + $0x254] sm:$0xf]  ;;  %v1937_v27 = vld [vmem:[%s4006_s1 + $0x258] sm:$0xf0]  ;;  %v2004_v31 = vor.u32 %v2645_v24, %v2001_v25  ;;  %v2644_v32 = vld [vmem:[%s4006_s1 + $0x2c4] sm:$0xf0] }
  0x17   :  { %v2611_v33 = vld [vmem:[%s4006_s1 + $0x1c4] sm:$0xf]  ;;  %v1993_v37 = vld [vmem:[%s4006_s1 + $0x2c8] sm:$0xf0]  ;;  %v1983_v42 = vld [vmem:[%s4006_s1 + $0x2b0] sm:$0xf] }
  0x18   :  { %432 = vmatpush.bf16.msra.mxu0 %v1848_v34  ;;  %2713 = vmatpush.bf16.msra.mxu2 %v1848_v34  ;;  %v1865_v34 = vld [vmem:[%s4006_s1 + $0x1c8] sm:$0xf0]  ;;  %v2643_v36 = vld [vmem:[%s4006_s1 + $0x2c4] sm:$0xf]  ;;  %v2642_v43 = vld [vmem:[%s4006_s1 + $0x2b4] sm:$0xf0] }
  0x19   :  { %456 = vmatpush.bf16.msra.mxu1 %v1912_v35  ;;  %2721 = vmatpush.bf16.msra.mxu3 %v1912_v35  ;;  %v1940_v35 = vor.u32 %v2629_v26, %v1937_v27  ;;  %v2627_v38 = vld [vmem:[%s4006_s1 + $0x244] sm:$0xf]  ;;  %v1929_v39 = vld [vmem:[%s4006_s1 + $0x248] sm:$0xf0]  ;;  %v1868_v41 = vor.u32 %v2611_v33, %v1865_v34  ;;  %v1996_v45 = vor.u32 %v2643_v36, %v1993_v37  ;;  %v1857_v46 = vld [vmem:[%s4006_s1 + $0x1b8] sm:$0xf0] }
  0x1a   :  { %v1807_v47 = vld [vmem:[%s4007_s0 + $0x24] sm:$0xf]  ;;  %v2598_v48 = vld [vmem:[%s4007_s0 + $0x44] sm:$0xf0]  ;;  %v1932_v49 = vor.u32 %v2627_v38, %v1929_v39  ;;  %v2641_v51 = vld [vmem:[%s4006_s1 + $0x2b4] sm:$0xf]  ;;  %v1984_v56 = vor.u32 %v2642_v43, %v1983_v42 }
  0x1b   :  { %v2597_v50 = vld [vmem:[%s4007_s0 + $0x28] sm:$0xf]  ;;  %v1985_v52 = vld [vmem:[%s4006_s1 + $0x2b8] sm:$0xf0]  ;;  %v1809_v53 = vld [vmem:[%s4007_s0 + $0x48] sm:$0xf0]  ;;  %v3021_v59 = vor.u32 %v2598_v48, %v1807_v47 }
  0x1c   :  { %433 = vmatpush.bf16.msra.mxu0 %v1840_v40  ;;  %2714 = vmatpush.bf16.msra.mxu2 %v1840_v40  ;;  %v1992_v40 = vor.u32 %v2644_v32, %v1991_v30  ;;  %v1921_v55 = vld [vmem:[%s4006_s1 + $0x238] sm:$0xf0]  ;;  %v1988_v60 = vor.u32 %v2641_v51, %v1985_v52  ;;  %v2640_v61 = vld [vmem:[%s4006_s1 + $0x2a4] sm:$0xf0]  ;;  %v3032_v0 = vor.u32 %v2597_v50, %v1809_v53  ;;  %v2639_v2 = vld [vmem:[%s4006_s1 + $0x2a4] sm:$0xf] }
  0x1d   :  { %457 = vmatpush.bf16.msra.mxu1 %v1904_v44  ;;  %2722 = vmatpush.bf16.msra.mxu3 %v1904_v44  ;;  %v2609_v44 = vld [vmem:[%s4006_s1 + $0x1b4] sm:$0xf]  ;;  %v2623_v5 = vld [vmem:[%s4006_s1 + $0x224] sm:$0xf]  ;;  %v1913_v6 = vld [vmem:[%s4006_s1 + $0x228] sm:$0xf0] }
  0x1e   :  { %v1860_v57 = vor.u32 %v2609_v44, %v1857_v46  ;;  %v1967_v10 = vld [vmem:[%s4006_s1 + $0x290] sm:$0xf]  ;;  %v2638_v14 = vld [vmem:[%s4006_s1 + $0x294] sm:$0xf0]  ;;  %v2605_v15 = vld [vmem:[%s4006_s1 + $0x194] sm:$0xf] }
  0x1f   :  { %v2637_v18 = vld [vmem:[%s4006_s1 + $0x294] sm:$0xf]  ;;  %v1905_v21 = vld [vmem:[%s4006_s1 + $0x218] sm:$0xf0]  ;;  %v1968_v22 = vor.u32 %v2638_v14, %v1967_v10  ;;  %v1959_v24 = vld [vmem:[%s4006_s1 + $0x280] sm:$0xf] }
  0x20   :  { %434 = vmatpush.bf16.msra.mxu0 %v1832_v54  ;;  %2715 = vmatpush.bf16.msra.mxu2 %v1832_v54  ;;  %v2625_v54 = vld [vmem:[%s4006_s1 + $0x234] sm:$0xf]  ;;  %v2636_v25 = vld [vmem:[%s4006_s1 + $0x284] sm:$0xf0]  ;;  %v2603_v26 = vld [vmem:[%s4006_s1 + $0x184] sm:$0xf] }
  0x21   :  { %458 = vmatpush.bf16.msra.mxu1 %v1896_v58  ;;  %2723 = vmatpush.bf16.msra.mxu3 %v1896_v58  ;;  %v1975_v58 = vld [vmem:[%s4006_s1 + $0x2a0] sm:$0xf]  ;;  %v1924_v1 = vor.u32 %v2625_v54, %v1921_v55  ;;  %v2621_v20 = vld [vmem:[%s4006_s1 + $0x214] sm:$0xf]  ;;  %v2635_v30 = vld [vmem:[%s4006_s1 + $0x284] sm:$0xf]  ;;  %v1960_v38 = vor.u32 %v2636_v25, %v1959_v24 }
  0x22   :  { %v1976_v7 = vor.u32 %v2640_v61, %v1975_v58  ;;  %v1961_v32 = vld [vmem:[%s4006_s1 + $0x288] sm:$0xf0]  ;;  %v2179_v33 = vld [vmem:[%s4006_s1 + $0xf0] sm:$0xf]  ;;  %v2577_v34 = vld [vmem:[%s4006_s1 + $0xf4] sm:$0xf0] }
  0x23   :  { %435 = vmatmul.bf16.vlgmr.msra.gmra.mxu0 %v2901_v3  ;;  %445 = vmatmul.bf16.vlgmr.msra.gmra.mxu2 %v2920_v12  ;;  %v2115_v36 = vld [vmem:[%s4006_s1 + $0x70] sm:$0xf]  ;;  %v2561_v37 = vld [vmem:[%s4006_s1 + $0x74] sm:$0xf0]  ;;  %v1964_v43 = vor.u32 %v2635_v30, %v1961_v32  ;;  %v2180_v44 = vor.u32 %v2577_v34, %v2179_v33  ;;  %v2560_v46 = vld [vmem:[%s4006_s1 + $0x74] sm:$0xf] }
  0x24   :  { %475 = vmatpush.bf16.msrb.mxu2 %v2016_v62  ;;  %459 = vmatmul.bf16.vlgmr.msra.gmra.mxu1 %v2912_v8  ;;  %v2607_v62 = vld [vmem:[%s4006_s1 + $0x1a4] sm:$0xf]  ;;  %v2243_v42 = vld [vmem:[%s4006_s1 + $0x170] sm:$0xf]  ;;  %v2117_v47 = vld [vmem:[%s4006_s1 + $0x78] sm:$0xf0] }
  0x25   :  { %499 = vmatpush.bf16.msrb.mxu3 %v1892_v63  ;;  %547 = vmatpush.bf16.msrb.mxu1 %v2020_v4  ;;  %v1849_v63 = vld [vmem:[%s4006_s1 + $0x1a8] sm:$0xf0]  ;;  %v2171_v50 = vld [vmem:[%s4006_s1 + $0xe0] sm:$0xf]  ;;  %v2575_v51 = vld [vmem:[%s4006_s1 + $0xe4] sm:$0xf0] }
  0x26   :  { %523 = vmatpush.bf16.msrb.mxu0 %v1956_v9  ;;  %469 = vmatmul.bf16.vlgmr.msra.gmra.mxu3 %v2922_v13  ;;  %v1977_v4 = vld [vmem:[%s4006_s1 + $0x2a8] sm:$0xf0]  ;;  %v1852_v9 = vor.u32 %v2607_v62, %v1849_v63  ;;  %v2107_v53 = vld [vmem:[%s4006_s1 + $0x60] sm:$0xf]  ;;  %v2559_v54 = vld [vmem:[%s4006_s1 + $0x64] sm:$0xf0]  ;;  %v2172_v58 = vor.u32 %v2575_v51, %v2171_v50 }
  0x27   :  { %v1980_v11 = vor.u32 %v2639_v2, %v1977_v4  ;;  %v2558_v61 = vld [vmem:[%s4006_s1 + $0x64] sm:$0xf]  ;;  %v2109_v62 = vld [vmem:[%s4006_s1 + $0x68] sm:$0xf0]  ;;  %v2108_v63 = vor.u32 %v2559_v54, %v2107_v53  ;;  %v2573_v2 = vld [vmem:[%s4006_s1 + $0xd4] sm:$0xf0] }
  0x28   :  { %476 = vmatpush.bf16.msrb.mxu2 %v2008_v16  ;;  %v1841_v16 = vld [vmem:[%s4006_s1 + $0x198] sm:$0xf0]  ;;  %v2099_v4 = vld [vmem:[%s4006_s1 + $0x50] sm:$0xf]  ;;  %v2589_v10 = vld [vmem:[%s4006_s1 + $0x154] sm:$0xf0] }
  0x29   :  { %500 = vmatpush.bf16.msrb.mxu3 %v1884_v17  ;;  %548 = vmatpush.bf16.msrb.mxu1 %v2012_v19  ;;  %v1916_v17 = vor.u32 %v2623_v5, %v1913_v6  ;;  %v1969_v19 = vld [vmem:[%s4006_s1 + $0x298] sm:$0xf0]  ;;  %v2557_v5 = vld [vmem:[%s4006_s1 + $0x54] sm:$0xf0]  ;;  %v2554_v24 = vld [vmem:[%s4006_s1 + $0x44] sm:$0xf] }
  0x2a   :  { %524 = vmatpush.bf16.msrb.mxu0 %v1948_v23  ;;  %v1844_v23 = vor.u32 %v2605_v15, %v1841_v16  ;;  %v1972_v27 = vor.u32 %v2637_v18, %v1969_v19  ;;  %v2101_v14 = vld [vmem:[%s4006_s1 + $0x58] sm:$0xf0]  ;;  %v2100_v15 = vor.u32 %v2557_v5, %v2099_v4  ;;  %v2571_v16 = vld [vmem:[%s4006_s1 + $0xc4] sm:$0xf0]  ;;  %v2093_v25 = vld [vmem:[%s4006_s1 + $0x48] sm:$0xf0] }
  0x2b   :  { %v2555_v18 = vld [vmem:[%s4006_s1 + $0x44] sm:$0xf0]  ;;  %v2553_v30 = vld [vmem:[%s4006_s1 + $0x34] sm:$0xf0]  ;;  %v2599_v32 = vld [vmem:[%s4007_s0 + $0x4c] sm:$0xf0]  ;;  %v2096_v34 = vor.u32 %v2554_v24, %v2093_v25 }
  0x2c   :  { %477 = vmatpush.bf16.msrb.mxu2 %v2000_v28  ;;  %v1833_v28 = vld [vmem:[%s4006_s1 + $0x188] sm:$0xf0]  ;;  %v2583_v50 = vld [vmem:[%s4006_s1 + $0x124] sm:$0xf0]  ;;  %v2550_v51 = vld [vmem:[%s4006_s1 + $0x24] sm:$0xf] }
  0x2d   :  { %501 = vmatpush.bf16.msrb.mxu3 %v1876_v29  ;;  %549 = vmatpush.bf16.msrb.mxu1 %v2004_v31  ;;  %v2619_v29 = vld [vmem:[%s4006_s1 + $0x204] sm:$0xf]  ;;  %v1908_v31 = vor.u32 %v2621_v20, %v1905_v21  ;;  %v1836_v39 = vor.u32 %v2603_v26, %v1833_v28  ;;  %v2219_v21 = vld [vmem:[%s4006_s1 + $0x140] sm:$0xf]  ;;  %v2569_v28 = vld [vmem:[%s4006_s1 + $0xb4] sm:$0xf0] }
  0x2e   :  { %525 = vmatpush.bf16.msrb.mxu0 %v1940_v35  ;;  %v1897_v35 = vld [vmem:[%s4006_s1 + $0x208] sm:$0xf0]  ;;  %v2131_v54 = vld [vmem:[%s4006_s1 + $0x90] sm:$0xf]  ;;  %v2059_v5 = vld [vmem:[%s4006_s1] sm:$0xf] }
  0x2f   :  { %v1900_v48 = vor.u32 %v2619_v29, %v1897_v35  ;;  %v2083_v29 = vld [vmem:[%s4006_s1 + $0x30] sm:$0xf]  ;;  %v2691_v24 = vld [vmem:[%s4006_s1 + $0x3f4] sm:$0xf0] }
  0x30   :  { %478 = vmatpush.bf16.msrb.mxu2 %v1992_v40  ;;  %v1803_v40 = vld [vmem:[%s4007_s0 + $0x14] sm:$0xf]  ;;  %v2211_v35 = vld [vmem:[%s4006_s1 + $0x130] sm:$0xf] }
  0x31   :  { %502 = vmatpush.bf16.msrb.mxu3 %v1868_v41  ;;  %550 = vmatpush.bf16.msrb.mxu1 %v1996_v45  ;;  %v2596_v41 = vld [vmem:[%s4007_s0 + $0x1c] sm:$0xf0]  ;;  %v2593_v45 = vld [vmem:[%s4006_s1 + $0x174] sm:$0xf0] }
  0x32   :  { %526 = vmatpush.bf16.msrb.mxu0 %v1932_v49  ;;  %v2116_v49 = vor.u32 %v2561_v37, %v2115_v36  ;;  %v1804_v52 = vor.u32 %v2596_v41, %v1803_v40  ;;  %v2244_v55 = vor.u32 %v2593_v45, %v2243_v42  ;;  %v2585_v37 = vld [vmem:[%s4006_s1 + $0x134] sm:$0xf0]  ;;  %v2084_v40 = vor.u32 %v2553_v30, %v2083_v29  ;;  %v2139_v41 = vld [vmem:[%s4006_s1 + $0xa0] sm:$0xf]  ;;  %v2567_v42 = vld [vmem:[%s4006_s1 + $0xa4] sm:$0xf0] }
  0x33   :  { %440 = vmatmul.bf16.gmra.mxu0 %v3021_v59  ;;  %v2551_v45 = vld [vmem:[%s4006_s1 + $0x24] sm:$0xf0] }
  0x34   :  { %479 = vmatpush.bf16.msrb.mxu2 %v1984_v56  ;;  %464 = vmatmul.bf16.gmra.mxu1 %v3032_v0  ;;  %v2120_v56 = vor.u32 %v2560_v46, %v2117_v47  ;;  %v2212_v46 = vor.u32 %v2585_v37, %v2211_v35  ;;  %v2602_v29 = vld [vmem:[%s4007_s0 + $0x64] sm:$0xf0]  ;;  %v2173_v35 = vld [vmem:[%s4006_s1 + $0xe8] sm:$0xf0]  ;;  %v2459_v37 = vld [vmem:[%s4006_s1 + $0x3e0] sm:$0xf] }
  0x35   :  { %503 = vmatpush.bf16.msrb.mxu3 %v1860_v57  ;;  %551 = vmatpush.bf16.msrb.mxu1 %v1988_v60  ;;  %v2235_v57 = vld [vmem:[%s4006_s1 + $0x160] sm:$0xf]  ;;  %v2591_v60 = vld [vmem:[%s4006_s1 + $0x164] sm:$0xf0] }
  0x36   :  { %527 = vmatpush.bf16.msrb.mxu0 %v1924_v1  ;;  %v2163_v1 = vld [vmem:[%s4006_s1 + $0xd0] sm:$0xf]  ;;  %v2236_v6 = vor.u32 %v2591_v60, %v2235_v57  ;;  %v2549_v57 = vld [vmem:[%s4006_s1 + $0x14] sm:$0xf0] }
  0x38   :  { %480 = vmatpush.bf16.msrb.mxu2 %v1976_v7  ;;  %v2112_v7 = vor.u32 %v2558_v61, %v2109_v62  ;;  %v2123_v61 = vld [vmem:[%s4006_s1 + $0x80] sm:$0xf] }
  0x39   :  { %504 = vmatpush.bf16.msrb.mxu3 %v1852_v9  ;;  %552 = vmatpush.bf16.msrb.mxu1 %v1980_v11  ;;  %v2227_v9 = vld [vmem:[%s4006_s1 + $0x150] sm:$0xf]  ;;  %v2556_v11 = vld [vmem:[%s4006_s1 + $0x54] sm:$0xf] }
  0x3a   :  { %528 = vmatpush.bf16.msrb.mxu0 %v1916_v17  ;;  %v2091_v17 = vld [vmem:[%s4006_s1 + $0x40] sm:$0xf]  ;;  %v2228_v19 = vor.u32 %v2589_v10, %v2227_v9  ;;  %v2104_v20 = vor.u32 %v2556_v11, %v2101_v14  ;;  %v2592_v9 = vld [vmem:[%s4006_s1 + $0x174] sm:$0xf]  ;;  %v2579_v14 = vld [vmem:[%s4006_s1 + $0x104] sm:$0xf0] }
  0x3b   :  { %v2092_v26 = vor.u32 %v2555_v18, %v2091_v17  ;;  %v2546_v17 = vld [vmem:[%s4006_s1 + $0x4] sm:$0xf]  ;;  %v2061_v18 = vld [vmem:[%s4006_s1 + $0x8] sm:$0xf0] }
  0x3c   :  { %481 = vmatpush.bf16.msrb.mxu2 %v1968_v22 }
  0x3d   :  { %505 = vmatpush.bf16.msrb.mxu3 %v1844_v23  ;;  %553 = vmatpush.bf16.msrb.mxu1 %v1972_v27  ;;  %v2587_v23 = vld [vmem:[%s4006_s1 + $0x144] sm:$0xf0]  ;;  %v2147_v27 = vld [vmem:[%s4006_s1 + $0xb0] sm:$0xf] }
  0x3e   :  { %529 = vmatpush.bf16.msrb.mxu0 %v1908_v31  ;;  %v1815_v31 = vld [vmem:[%s4007_s0 + $0x2c] sm:$0xf]  ;;  %v2220_v33 = vor.u32 %v2587_v23, %v2219_v21  ;;  %v2148_v36 = vor.u32 %v2569_v28, %v2147_v27  ;;  %v2467_v23 = vld [vmem:[%s4006_s1 + $0x3f0] sm:$0xf]  ;;  %v1827_v28 = vld [vmem:[%s4007_s0 + $0x5c] sm:$0xf] }
  0x3f   :  { %v2237_v27 = vld [vmem:[%s4006_s1 + $0x168] sm:$0xf0] }
  0x40   :  { %482 = vmatpush.bf16.msrb.mxu2 %v1960_v38  ;;  %v2552_v38 = vld [vmem:[%s4006_s1 + $0x34] sm:$0xf] }
  0x41   :  { %506 = vmatpush.bf16.msrb.mxu3 %v1836_v39  ;;  %554 = vmatpush.bf16.msrb.mxu1 %v1964_v43  ;;  %v2085_v39 = vld [vmem:[%s4006_s1 + $0x38] sm:$0xf0]  ;;  %v1816_v43 = vor.u32 %v2599_v32, %v1815_v31  ;;  %v2064_v31 = vor.u32 %v2546_v17, %v2061_v18  ;;  %v2371_v17 = vld [vmem:[%s4006_s1 + $0x330] sm:$0xf]  ;;  %v2667_v18 = vld [vmem:[%s4006_s1 + $0x334] sm:$0xf0] }
  0x42   :  { %530 = vmatpush.bf16.msrb.mxu0 %v1900_v48  ;;  %v2088_v47 = vor.u32 %v2552_v38, %v2085_v39  ;;  %v2203_v48 = vld [vmem:[%s4006_s1 + $0x120] sm:$0xf]  ;;  %v2689_v38 = vld [vmem:[%s4006_s1 + $0x3e4] sm:$0xf0]  ;;  %v1828_v39 = vor.u32 %v2602_v29, %v1827_v28  ;;  %v2566_v28 = vld [vmem:[%s4006_s1 + $0xa4] sm:$0xf] }
  0x43   :  { %483 = vmatmul.bf16.vlgmr.msrb.gmra.mxu2 %v1804_v52 }
  0x44   :  { %859 = vmatpush.bf16.msra.mxu2 %v2116_v49  ;;  %507 = vmatmul.bf16.vlgmr.msrb.gmra.mxu3 %v2901_v3  ;;  %v2164_v3 = vor.u32 %v2573_v2, %v2163_v1  ;;  %v2140_v49 = vor.u32 %v2567_v42, %v2139_v41  ;;  %v2548_v1 = vld [vmem:[%s4006_s1 + $0x14] sm:$0xf]  ;;  %v2069_v2 = vld [vmem:[%s4006_s1 + $0x18] sm:$0xf0] }
  0x45   :  { %883 = vmatpush.bf16.msra.mxu3 %v2180_v44  ;;  %931 = vmatpush.bf16.msra.mxu1 %v2120_v56  ;;  %v2075_v44 = vld [vmem:[%s4006_s1 + $0x20] sm:$0xf]  ;;  %v2067_v56 = vld [vmem:[%s4006_s1 + $0x10] sm:$0xf]  ;;  %v2072_v11 = vor.u32 %v2548_v1, %v2069_v2  ;;  %v2229_v41 = vld [vmem:[%s4006_s1 + $0x158] sm:$0xf0] }
  0x46   :  { %907 = vmatpush.bf16.msra.mxu0 %v2244_v55  ;;  %555 = vmatmul.bf16.vlgmr.msrb.gmra.mxu1 %v1804_v52  ;;  %v2077_v52 = vld [vmem:[%s4006_s1 + $0x28] sm:$0xf0]  ;;  %v2076_v53 = vor.u32 %v2551_v45, %v2075_v44  ;;  %v2565_v55 = vld [vmem:[%s4006_s1 + $0x94] sm:$0xf0]  ;;  %v2068_v4 = vor.u32 %v2549_v57, %v2067_v56  ;;  %v2673_v44 = vld [vmem:[%s4006_s1 + $0x364] sm:$0xf0]  ;;  %v2460_v45 = vor.u32 %v2689_v38, %v2459_v37 }
  0x47   :  { %531 = vmatmul.bf16.vlgmr.msrb.gmra.mxu0 %v2912_v8  ;;  %v2155_v8 = vld [vmem:[%s4006_s1 + $0xc0] sm:$0xf]  ;;  %v2080_v60 = vor.u32 %v2550_v51, %v2077_v52  ;;  %v2132_v62 = vor.u32 %v2565_v55, %v2131_v54  ;;  %v2221_v52 = vld [vmem:[%s4006_s1 + $0x148] sm:$0xf0]  ;;  %v2451_v55 = vld [vmem:[%s4006_s1 + $0x3d0] sm:$0xf] }
  0x48   :  { %860 = vmatpush.bf16.msra.mxu2 %v2108_v63  ;;  %v2156_v22 = vor.u32 %v2571_v16, %v2155_v8  ;;  %v2581_v63 = vld [vmem:[%s4006_s1 + $0x114] sm:$0xf0]  ;;  %v2181_v8 = vld [vmem:[%s4006_s1 + $0xf8] sm:$0xf0]  ;;  %v2570_v57 = vld [vmem:[%s4006_s1 + $0xc4] sm:$0xf] }
  0x49   :  { %884 = vmatpush.bf16.msra.mxu3 %v2172_v58  ;;  %932 = vmatpush.bf16.msra.mxu1 %v2112_v7  ;;  %v2204_v58 = vor.u32 %v2583_v50, %v2203_v48  ;;  %v2187_v7 = vld [vmem:[%s4006_s1 + $0x100] sm:$0xf]  ;;  %v2572_v48 = vld [vmem:[%s4006_s1 + $0xd4] sm:$0xf]  ;;  %v2586_v50 = vld [vmem:[%s4006_s1 + $0x144] sm:$0xf] }
  0x4a   :  { %908 = vmatpush.bf16.msra.mxu0 %v2236_v6  ;;  %v2547_v6 = vld [vmem:[%s4006_s1 + $0x4] sm:$0xf0]  ;;  %v2188_v30 = vor.u32 %v2579_v14, %v2187_v7  ;;  %v2224_v54 = vor.u32 %v2586_v50, %v2221_v52  ;;  %v2687_v56 = vld [vmem:[%s4006_s1 + $0x3d4] sm:$0xf0]  ;;  %v2443_v2 = vld [vmem:[%s4006_s1 + $0x3c0] sm:$0xf] }
  0x4b   :  { %v2669_v1 = vld [vmem:[%s4006_s1 + $0x344] sm:$0xf0]  ;;  %v2538_v14 = vld [vmem:[%s4007_s0 + $0x8] sm:$0xf0]  ;;  %v2427_v37 = vld [vmem:[%s4006_s1 + $0x3a0] sm:$0xf] }
  0x4c   :  { %861 = vmatpush.bf16.msra.mxu2 %v2100_v15  ;;  %v2576_v15 = vld [vmem:[%s4006_s1 + $0xf4] sm:$0xf]  ;;  %v2681_v38 = vld [vmem:[%s4006_s1 + $0x3a4] sm:$0xf0]  ;;  %v2419_v50 = vld [vmem:[%s4006_s1 + $0x390] sm:$0xf] }
  0x4d   :  { %885 = vmatpush.bf16.msra.mxu3 %v2164_v3  ;;  %933 = vmatpush.bf16.msra.mxu1 %v2104_v20  ;;  %v2245_v3 = vld [vmem:[%s4006_s1 + $0x178] sm:$0xf0]  ;;  %v2060_v20 = vor.u32 %v2547_v6, %v2059_v5  ;;  %v2184_v25 = vor.u32 %v2576_v15, %v2181_v8  ;;  %v2537_v15 = vld [vmem:[%s4007_s0 + $0x4] sm:$0xf]  ;;  %v2025_v8 = vld [vmem:[%s4007_s0 + $0xc] sm:$0xf0] }
  0x4e   :  { %909 = vmatpush.bf16.msra.mxu0 %v2228_v19  ;;  %v2403_v19 = vld [vmem:[%s4006_s1 + $0x370] sm:$0xf]  ;;  %v2248_v21 = vor.u32 %v2592_v9, %v2245_v3  ;;  %v2149_v5 = vld [vmem:[%s4006_s1 + $0xb8] sm:$0xf0]  ;;  %v2023_v9 = vld [vmem:[%s4007_s0] sm:$0xf] }
  0x4f   :  { %v2562_v52 = vld [vmem:[%s4006_s1 + $0x84] sm:$0xf] }
  0x50   :  { %862 = vmatpush.bf16.msra.mxu2 %v2092_v26  ;;  %v2590_v26 = vld [vmem:[%s4006_s1 + $0x164] sm:$0xf] }
  0x51   :  { %886 = vmatpush.bf16.msra.mxu3 %v2156_v22  ;;  %934 = vmatpush.bf16.msra.mxu1 %v2096_v34  ;;  %v2675_v22 = vld [vmem:[%s4006_s1 + $0x374] sm:$0xf0]  ;;  %v2574_v34 = vld [vmem:[%s4006_s1 + $0xe4] sm:$0xf] }
  0x52   :  { %910 = vmatpush.bf16.msra.mxu0 %v2220_v33  ;;  %v2404_v32 = vor.u32 %v2675_v22, %v2403_v19  ;;  %v2468_v33 = vor.u32 %v2691_v24, %v2467_v23  ;;  %v2176_v42 = vor.u32 %v2574_v34, %v2173_v35  ;;  %v2031_v19 = vld [vmem:[%s4007_s0 + $0x8] sm:$0xf]  ;;  %v2024_v22 = vor.u32 %v2538_v14, %v2023_v9  ;;  %v2363_v34 = vld [vmem:[%s4006_s1 + $0x320] sm:$0xf] }
  0x53   :  { %488 = vmatmul.bf16.gmra.mxu2 %v1816_v43  ;;  %v3450_v23 = vor.u32 %v2537_v15, %v2025_v8  ;;  %v2372_v24 = vor.u32 %v2667_v18, %v2371_v17  ;;  %v2397_v15 = vld [vmem:[%s4006_s1 + $0x368] sm:$0xf0]  ;;  %v2690_v8 = vld [vmem:[%s4006_s1 + $0x3f4] sm:$0xf] }
  0x54   :  { %863 = vmatpush.bf16.msra.mxu2 %v2084_v40  ;;  %512 = vmatmul.bf16.gmra.mxu3 %v3021_v59  ;;  %v2195_v59 = vld [vmem:[%s4006_s1 + $0x110] sm:$0xf]  ;;  %v2588_v40 = vld [vmem:[%s4006_s1 + $0x154] sm:$0xf] }
  0x55   :  { %887 = vmatpush.bf16.msra.mxu3 %v2148_v36  ;;  %935 = vmatpush.bf16.msra.mxu1 %v2088_v47  ;;  %v2196_v10 = vor.u32 %v2581_v63, %v2195_v59  ;;  %v2240_v36 = vor.u32 %v2590_v26, %v2237_v27  ;;  %v2213_v59 = vld [vmem:[%s4006_s1 + $0x138] sm:$0xf0]  ;;  %v2379_v63 = vld [vmem:[%s4006_s1 + $0x340] sm:$0xf]  ;;  %v2435_v26 = vld [vmem:[%s4006_s1 + $0x3b0] sm:$0xf] }
  0x56   :  { %911 = vmatpush.bf16.msra.mxu0 %v2212_v46  ;;  %560 = vmatmul.bf16.gmra.mxu1 %v1816_v43  ;;  %v2395_v43 = vld [vmem:[%s4006_s1 + $0x360] sm:$0xf]  ;;  %v2232_v46 = vor.u32 %v2588_v40, %v2229_v41  ;;  %v2380_v3 = vor.u32 %v2669_v1, %v2379_v63  ;;  %v2683_v27 = vld [vmem:[%s4006_s1 + $0x3b4] sm:$0xf0]  ;;  %v2428_v40 = vor.u32 %v2681_v38, %v2427_v37  ;;  %v2564_v41 = vld [vmem:[%s4006_s1 + $0x94] sm:$0xf] }
  0x57   :  { %536 = vmatmul.bf16.gmra.mxu0 %v3032_v0  ;;  %v2563_v0 = vld [vmem:[%s4006_s1 + $0x84] sm:$0xf0]  ;;  %v2396_v47 = vor.u32 %v2673_v44, %v2395_v43  ;;  %v2436_v29 = vor.u32 %v2683_v27, %v2435_v26  ;;  %v2578_v43 = vld [vmem:[%s4006_s1 + $0x104] sm:$0xf]  ;;  %v2411_v1 = vld [vmem:[%s4006_s1 + $0x380] sm:$0xf] }
  0x58   :  { %864 = vmatpush.bf16.msra.mxu2 %v2076_v53  ;;  %v2124_v16 = vor.u32 %v2563_v0, %v2123_v61  ;;  %v2671_v53 = vld [vmem:[%s4006_s1 + $0x354] sm:$0xf0]  ;;  %v2584_v61 = vld [vmem:[%s4006_s1 + $0x134] sm:$0xf]  ;;  %v2661_v63 = vld [vmem:[%s4006_s1 + $0x304] sm:$0xf0] }
  0x59   :  { %888 = vmatpush.bf16.msra.mxu3 %v2140_v49  ;;  %936 = vmatpush.bf16.msra.mxu1 %v2080_v60  ;;  %v2165_v49 = vld [vmem:[%s4006_s1 + $0xd8] sm:$0xf0]  ;;  %v2452_v60 = vor.u32 %v2687_v56, %v2451_v55  ;;  %v2568_v0 = vld [vmem:[%s4006_s1 + $0xb4] sm:$0xf]  ;;  %v2216_v6 = vor.u32 %v2584_v61, %v2213_v59  ;;  %v2461_v37 = vld [vmem:[%s4006_s1 + $0x3e8] sm:$0xf0] }
  0x5a   :  { %912 = vmatpush.bf16.msra.mxu0 %v2204_v58  ;;  %v2168_v51 = vor.u32 %v2572_v48, %v2165_v49  ;;  %v2541_v55 = vld [vmem:[%s4007_s0 + $0x38] sm:$0xf0]  ;;  %v2706_v27 = vld [vmem:[%s4006_s1 + $0x474] sm:$0xf]  ;;  %v2704_v38 = vld [vmem:[%s4006_s1 + $0x464] sm:$0xf] }
  0x5b   :  { %v2540_v56 = vld [vmem:[%s4007_s0 + $0x1c] sm:$0xf] }
  0x5c   :  { %865 = vmatpush.bf16.msra.mxu2 %v2068_v4  ;;  %v2685_v4 = vld [vmem:[%s4006_s1 + $0x3c4] sm:$0xf0]  ;;  %v2545_v26 = vld [vmem:[%s4007_s0 + $0x58] sm:$0xf0] }
  0x5d   :  { %889 = vmatpush.bf16.msra.mxu3 %v2132_v62  ;;  %937 = vmatpush.bf16.msra.mxu1 %v2072_v11  ;;  %v2444_v7 = vor.u32 %v2685_v4, %v2443_v2  ;;  %v2205_v11 = vld [vmem:[%s4006_s1 + $0x128] sm:$0xf0] }
  0x5e   :  { %913 = vmatpush.bf16.msra.mxu0 %v2196_v10  ;;  %v2582_v10 = vld [vmem:[%s4006_s1 + $0x124] sm:$0xf] }
  0x60   :  { %866 = vmatpush.bf16.msra.mxu2 %v2060_v20  ;;  %v2539_v20 = vld [vmem:[%s4007_s0 + $0x10] sm:$0xf0] }
  0x61   :  { %890 = vmatpush.bf16.msra.mxu3 %v2124_v16  ;;  %938 = vmatpush.bf16.msra.mxu1 %v2064_v31  ;;  %v2152_v16 = vor.u32 %v2568_v0, %v2149_v5  ;;  %v2677_v0 = vld [vmem:[%s4006_s1 + $0x384] sm:$0xf0] }
  0x62   :  { %914 = vmatpush.bf16.msra.mxu0 %v2188_v30  ;;  %v2141_v30 = vld [vmem:[%s4006_s1 + $0xa8] sm:$0xf0]  ;;  %v2412_v5 = vor.u32 %v2677_v0, %v2411_v1  ;;  %v2651_v1 = vld [vmem:[%s4007_s0 + $0x1c] sm:$0xf] }
  0x63   :  { %493 = vmatmul.bf16.gmra.mxu2 %v1828_v39  ;;  %v2144_v31 = vor.u32 %v2566_v28, %v2141_v30  ;;  %v2533_v28 = vld [vmem:[%s4006_s1 + $0x478] sm:$0xf0] }
  0x64   :  { %955 = vmatpush.bf16.msrb.mxu2 %v2184_v25  ;;  %517 = vmatmul.bf16.gmra.mxu3 %v2920_v12  ;;  %v2387_v12 = vld [vmem:[%s4006_s1 + $0x350] sm:$0xf]  ;;  %v3452_v25 = vor.u32 %v2539_v20, %v2031_v19  ;;  %v2047_v19 = vld [vmem:[%s4007_s0 + $0x48] sm:$0xf]  ;;  %v2544_v20 = vld [vmem:[%s4007_s0 + $0x50] sm:$0xf0]  ;;  %v2536_v30 = vor.u32 %v2706_v27, %v2533_v28 }
  0x65   :  { %979 = vmatpush.bf16.msrb.mxu3 %v2248_v21  ;;  %1377 = vmatpush.bf16.msrb.mxu1 %v2468_v33  ;;  %v2388_v58 = vor.u32 %v2671_v53, %v2387_v12  ;;  %v2208_v21 = vor.u32 %v2582_v10, %v2205_v11  ;;  %v2197_v33 = vld [vmem:[%s4006_s1 + $0x118] sm:$0xf0]  ;;  %v2035_v12 = vld [vmem:[%s4007_s0 + $0x18] sm:$0xf]  ;;  %v2672_v11 = vld [vmem:[%s4006_s1 + $0x364] sm:$0xf] }
  0x66   :  { %1353 = vmatpush.bf16.msrb.mxu0 %v2404_v32  ;;  %565 = vmatmul.bf16.gmra.mxu1 %v1828_v39  ;;  %v2580_v32 = vld [vmem:[%s4006_s1 + $0x114] sm:$0xf]  ;;  %v2036_v61 = vor.u32 %v2541_v55, %v2035_v12  ;;  %v2707_v10 = vld [vmem:[%s4006_s1 + $0x474] sm:$0xf0]  ;;  %v2400_v17 = vor.u32 %v2672_v11, %v2397_v15  ;;  %v2501_v27 = vld [vmem:[%s4006_s1 + $0x438] sm:$0xf0] }
  0x67   :  { %541 = vmatmul.bf16.gmra.mxu0 %v2922_v13  ;;  %v2157_v13 = vld [vmem:[%s4006_s1 + $0xc8] sm:$0xf0]  ;;  %v2200_v35 = vor.u32 %v2580_v32, %v2197_v33  ;;  %v2670_v32 = vld [vmem:[%s4006_s1 + $0x354] sm:$0xf]  ;;  %v2389_v33 = vld [vmem:[%s4006_s1 + $0x358] sm:$0xf0] }
  0x68   :  { %956 = vmatpush.bf16.msrb.mxu2 %v2176_v42  ;;  %v2160_v62 = vor.u32 %v2570_v57, %v2157_v13  ;;  %v2133_v42 = vld [vmem:[%s4006_s1 + $0x98] sm:$0xf0]  ;;  %v2037_v57 = vld [vmem:[%s4007_s0 + $0x3c] sm:$0xf0]  ;;  %v2542_v13 = vld [vmem:[%s4007_s0 + $0x40] sm:$0xf0] }
  0x69   :  { %980 = vmatpush.bf16.msrb.mxu3 %v2240_v36  ;;  %1378 = vmatpush.bf16.msrb.mxu1 %v2460_v45  ;;  %v2665_v36 = vld [vmem:[%s4006_s1 + $0x324] sm:$0xf0]  ;;  %v2136_v44 = vor.u32 %v2564_v41, %v2133_v42  ;;  %v2189_v45 = vld [vmem:[%s4006_s1 + $0x108] sm:$0xf0]  ;;  %v3534_v59 = vor.u32 %v2540_v56, %v2037_v57  ;;  %v2507_v56 = vld [vmem:[%s4006_s1 + $0x440] sm:$0xf] }
  0x6a   :  { %1354 = vmatpush.bf16.msrb.mxu0 %v2396_v47  ;;  %v2364_v39 = vor.u32 %v2665_v36, %v2363_v34  ;;  %v2663_v47 = vld [vmem:[%s4006_s1 + $0x314] sm:$0xf0]  ;;  %v2192_v48 = vor.u32 %v2578_v43, %v2189_v45  ;;  %v2688_v36 = vld [vmem:[%s4006_s1 + $0x3e4] sm:$0xf]  ;;  %v2525_v42 = vld [vmem:[%s4006_s1 + $0x468] sm:$0xf0] }
  0x6b   :  { %v2464_v41 = vor.u32 %v2688_v36, %v2461_v37  ;;  %v2528_v43 = vor.u32 %v2704_v38, %v2525_v42  ;;  %v2515_v45 = vld [vmem:[%s4006_s1 + $0x450] sm:$0xf]  ;;  %v2701_v57 = vld [vmem:[%s4006_s1 + $0x444] sm:$0xf0]  ;;  %v2699_v11 = vld [vmem:[%s4006_s1 + $0x434] sm:$0xf0] }
  0x6c   :  { %957 = vmatpush.bf16.msrb.mxu2 %v2168_v51  ;;  %v2679_v51 = vld [vmem:[%s4006_s1 + $0x394] sm:$0xf0]  ;;  %v2491_v28 = vld [vmem:[%s4006_s1 + $0x420] sm:$0xf]  ;;  %v2696_v36 = vld [vmem:[%s4006_s1 + $0x424] sm:$0xf] }
  0x6d   :  { %981 = vmatpush.bf16.msrb.mxu3 %v2232_v46  ;;  %1379 = vmatpush.bf16.msrb.mxu1 %v2452_v60  ;;  %v2355_v46 = vld [vmem:[%s4006_s1 + $0x310] sm:$0xf]  ;;  %v2420_v53 = vor.u32 %v2679_v51, %v2419_v50  ;;  %v2043_v60 = vld [vmem:[%s4007_s0 + $0x20] sm:$0xf]  ;;  %v2686_v50 = vld [vmem:[%s4006_s1 + $0x3d4] sm:$0xf] }
  0x6e   :  { %1355 = vmatpush.bf16.msrb.mxu0 %v2388_v58  ;;  %v2356_v49 = vor.u32 %v2663_v47, %v2355_v46  ;;  %v3545_v2 = vor.u32 %v2542_v13, %v2043_v60  ;;  %v2703_v46 = vld [vmem:[%s4006_s1 + $0x454] sm:$0xf0]  ;;  %v2668_v47 = vld [vmem:[%s4006_s1 + $0x344] sm:$0xf]  ;;  %v2453_v51 = vld [vmem:[%s4006_s1 + $0x3d8] sm:$0xf0] }
  0x6f   :  { %v2456_v12 = vor.u32 %v2686_v50, %v2453_v51  ;;  %v2311_v60 = vld [vmem:[%s4007_s0 + $0x18] sm:$0xf]  ;;  %v2652_v13 = vld [vmem:[%s4007_s0 + $0x20] sm:$0xf0]  ;;  %v2493_v37 = vld [vmem:[%s4006_s1 + $0x428] sm:$0xf0] }
  0x70   :  { %958 = vmatpush.bf16.msrb.mxu2 %v2160_v62  ;;  %v2347_v62 = vld [vmem:[%s4006_s1 + $0x300] sm:$0xf]  ;;  %v2695_v42 = vld [vmem:[%s4006_s1 + $0x414] sm:$0xf0]  ;;  %v2349_v50 = vld [vmem:[%s4006_s1 + $0x308] sm:$0xf0] }
  0x71   :  { %982 = vmatpush.bf16.msrb.mxu3 %v2224_v54  ;;  %1380 = vmatpush.bf16.msrb.mxu1 %v2444_v7  ;;  %v2125_v54 = vld [vmem:[%s4006_s1 + $0x88] sm:$0xf0]  ;;  %v2348_v4 = vor.u32 %v2661_v63, %v2347_v62  ;;  %v2405_v7 = vld [vmem:[%s4006_s1 + $0x378] sm:$0xf0]  ;;  %v2684_v63 = vld [vmem:[%s4006_s1 + $0x3c4] sm:$0xf] }
  0x72   :  { %1356 = vmatpush.bf16.msrb.mxu0 %v2380_v3  ;;  %v2128_v58 = vor.u32 %v2562_v52, %v2125_v54  ;;  %v2531_v3 = vld [vmem:[%s4006_s1 + $0x470] sm:$0xf]  ;;  %v2517_v54 = vld [vmem:[%s4006_s1 + $0x458] sm:$0xf0]  ;;  %v2678_v51 = vld [vmem:[%s4006_s1 + $0x394] sm:$0xf] }
  0x73   :  { %867 = vmatmul.bf16.vlgmr.msra.gmra.mxu2 %v2024_v22  ;;  %v2532_v14 = vor.u32 %v2707_v10, %v2531_v3  ;;  %v2373_v62 = vld [vmem:[%s4006_s1 + $0x338] sm:$0xf0]  ;;  %v2499_v10 = vld [vmem:[%s4006_s1 + $0x430] sm:$0xf] }
  0x74   :  { %959 = vmatpush.bf16.msrb.mxu2 %v2152_v16  ;;  %891 = vmatmul.bf16.vlgmr.msra.gmra.mxu3 %v3450_v23  ;;  %v2469_v16 = vld [vmem:[%s4006_s1 + $0x3f8] sm:$0xf0]  ;;  %v2500_v15 = vor.u32 %v2699_v11, %v2499_v10 }
  0x75   :  { %983 = vmatpush.bf16.msrb.mxu3 %v2216_v6  ;;  %1381 = vmatpush.bf16.msrb.mxu1 %v2436_v29  ;;  %v2674_v6 = vld [vmem:[%s4006_s1 + $0x374] sm:$0xf]  ;;  %v2472_v18 = vor.u32 %v2690_v8, %v2469_v16  ;;  %v2523_v29 = vld [vmem:[%s4006_s1 + $0x460] sm:$0xf]  ;;  %v2365_v8 = vld [vmem:[%s4006_s1 + $0x328] sm:$0xf0] }
  0x76   :  { %1357 = vmatpush.bf16.msrb.mxu0 %v2372_v24  ;;  %939 = vmatmul.bf16.vlgmr.msra.gmra.mxu1 %v2024_v22  ;;  %v2408_v9 = vor.u32 %v2674_v6, %v2405_v7  ;;  %v2049_v22 = vld [vmem:[%s4007_s0 + $0x54] sm:$0xf0]  ;;  %v2055_v24 = vld [vmem:[%s4007_s0 + $0x50] sm:$0xf]  ;;  %v2700_v6 = vld [vmem:[%s4006_s1 + $0x444] sm:$0xf] }
  0x77   :  { %915 = vmatmul.bf16.vlgmr.msra.gmra.mxu0 %v3452_v25  ;;  %v2509_v7 = vld [vmem:[%s4006_s1 + $0x448] sm:$0xf0]  ;;  %v2682_v16 = vld [vmem:[%s4006_s1 + $0x3b4] sm:$0xf] }
  0x78   :  { %960 = vmatpush.bf16.msrb.mxu2 %v2144_v31  ;;  %v2705_v31 = vld [vmem:[%s4006_s1 + $0x464] sm:$0xf0]  ;;  %v2512_v3 = vor.u32 %v2700_v6, %v2509_v7  ;;  %v2413_v6 = vld [vmem:[%s4006_s1 + $0x388] sm:$0xf0]  ;;  %v2692_v7 = vld [vmem:[%s4006_s1 + $0x404] sm:$0xf] }
  0x79   :  { %984 = vmatpush.bf16.msrb.mxu3 %v2208_v21  ;;  %1382 = vmatpush.bf16.msrb.mxu1 %v2428_v40  ;;  %v2543_v21 = vld [vmem:[%s4007_s0 + $0x4c] sm:$0xf]  ;;  %v2524_v34 = vor.u32 %v2705_v31, %v2523_v29  ;;  %v2662_v31 = vld [vmem:[%s4006_s1 + $0x314] sm:$0xf] }
  0x7a   :  { %1358 = vmatpush.bf16.msrb.mxu0 %v2364_v39  ;;  %v2048_v39 = vor.u32 %v2544_v20, %v2047_v19  ;;  %v3621_v40 = vor.u32 %v2543_v21, %v2049_v22  ;;  %v3708_v20 = vor.u32 %v2652_v13, %v2311_v60  ;;  %v2475_v60 = vld [vmem:[%s4006_s1 + $0x400] sm:$0xf]  ;;  %v2693_v13 = vld [vmem:[%s4006_s1 + $0x404] sm:$0xf0] }
  0x7c   :  { %961 = vmatpush.bf16.msrb.mxu2 %v2136_v44  ;;  %v3626_v44 = vor.u32 %v2545_v26, %v2055_v24  ;;  %v2698_v26 = vld [vmem:[%s4006_s1 + $0x434] sm:$0xf] }
  0x7d   :  { %985 = vmatpush.bf16.msrb.mxu3 %v2200_v35  ;;  %1383 = vmatpush.bf16.msrb.mxu1 %v2420_v53  ;;  %v2392_v35 = vor.u32 %v2670_v32, %v2389_v33  ;;  %v2702_v53 = vld [vmem:[%s4006_s1 + $0x454] sm:$0xf]  ;;  %v2357_v32 = vld [vmem:[%s4006_s1 + $0x318] sm:$0xf0]  ;;  %v2680_v33 = vld [vmem:[%s4006_s1 + $0x3a4] sm:$0xf] }
  0x7e   :  { %1359 = vmatpush.bf16.msrb.mxu0 %v2356_v49  ;;  %v2381_v49 = vld [vmem:[%s4006_s1 + $0x348] sm:$0xf0]  ;;  %v2520_v55 = vor.u32 %v2702_v53, %v2517_v54  ;;  %v2421_v54 = vld [vmem:[%s4006_s1 + $0x398] sm:$0xf0] }
  0x7f   :  { %v2384_v52 = vor.u32 %v2668_v47, %v2381_v49  ;;  %v2660_v49 = vld [vmem:[%s4006_s1 + $0x304] sm:$0xf] }
  0x80   :  { %962 = vmatpush.bf16.msrb.mxu2 %v2128_v58  ;;  %v2508_v58 = vor.u32 %v2701_v57, %v2507_v56  ;;  %v2352_v53 = vor.u32 %v2660_v49, %v2349_v50  ;;  %v2485_v56 = vld [vmem:[%s4006_s1 + $0x418] sm:$0xf0]  ;;  %v2424_v57 = vor.u32 %v2678_v51, %v2421_v54 }
  0x81   :  { %986 = vmatpush.bf16.msrb.mxu3 %v2192_v48  ;;  %1384 = vmatpush.bf16.msrb.mxu1 %v2412_v5  ;;  %v2516_v48 = vor.u32 %v2703_v46, %v2515_v45  ;;  %v2445_v5 = vld [vmem:[%s4006_s1 + $0x3c8] sm:$0xf0] }
  0x82   :  { %1360 = vmatpush.bf16.msrb.mxu0 %v2348_v4  ;;  %v2313_v4 = vld [vmem:[%s4007_s0 + $0x24] sm:$0xf0] }
  0x83   :  { %872 = vmatmul.bf16.gmra.mxu2 %v2036_v61  ;;  %v3710_v22 = vor.u32 %v2651_v1, %v2313_v4  ;;  %v2654_v1 = vld [vmem:[%s4007_s0 + $0x34] sm:$0xf]  ;;  %v2325_v4 = vld [vmem:[%s4007_s0 + $0x54] sm:$0xf0] }
  0x84   :  { %896 = vmatmul.bf16.gmra.mxu3 %v3534_v59  ;;  %1401 = vmatpush.bf16.msra.mxu2 %v2532_v14  ;;  %v2664_v14 = vld [vmem:[%s4006_s1 + $0x324] sm:$0xf]  ;;  %v3808_v11 = vor.u32 %v2654_v1, %v2325_v4 }
  0x85   :  { %1425 = vmatpush.bf16.msra.mxu3 %v2408_v9  ;;  %1473 = vmatpush.bf16.msra.mxu1 %v2536_v30  ;;  %v2448_v9 = vor.u32 %v2684_v63, %v2445_v5  ;;  %v2504_v30 = vor.u32 %v2698_v26, %v2501_v27  ;;  %v2476_v63 = vor.u32 %v2693_v13, %v2475_v60  ;;  %v2335_v26 = vld [vmem:[%s4007_s0 + $0x60] sm:$0xf]  ;;  %v2337_v27 = vld [vmem:[%s4007_s0 + $0x6c] sm:$0xf0] }
  0x86   :  { %944 = vmatmul.bf16.gmra.mxu1 %v2036_v61  ;;  %1449 = vmatpush.bf16.msra.mxu0 %v2472_v18  ;;  %v2666_v61 = vld [vmem:[%s4006_s1 + $0x334] sm:$0xf]  ;;  %v2368_v18 = vor.u32 %v2664_v14, %v2365_v8 }
  0x87   :  { %920 = vmatmul.bf16.gmra.mxu0 %v3545_v2  ;;  %v2376_v0 = vor.u32 %v2666_v61, %v2373_v62  ;;  %v2323_v61 = vld [vmem:[%s4007_s0 + $0x30] sm:$0xf]  ;;  %v2655_v62 = vld [vmem:[%s4007_s0 + $0x50] sm:$0xf0] }
  0x88   :  { %1402 = vmatpush.bf16.msra.mxu2 %v2524_v34  ;;  %v2360_v34 = vor.u32 %v2662_v31, %v2357_v32  ;;  %v3797_v5 = vor.u32 %v2655_v62, %v2323_v61 }
  0x89   :  { %1426 = vmatpush.bf16.msra.mxu3 %v2400_v17  ;;  %1474 = vmatpush.bf16.msra.mxu1 %v2528_v43  ;;  %v2437_v17 = vld [vmem:[%s4006_s1 + $0x3b8] sm:$0xf0] }
  0x8a   :  { %1450 = vmatpush.bf16.msra.mxu0 %v2464_v41  ;;  %v2440_v19 = vor.u32 %v2682_v16, %v2437_v17  ;;  %v2483_v41 = vld [vmem:[%s4006_s1 + $0x410] sm:$0xf] }
  0x8b   :  { %v2484_v46 = vor.u32 %v2695_v42, %v2483_v41 }
  0x8c   :  { %1403 = vmatpush.bf16.msra.mxu2 %v2516_v48 }
  0x8d   :  { %1427 = vmatpush.bf16.msra.mxu3 %v2392_v35  ;;  %1475 = vmatpush.bf16.msra.mxu1 %v2520_v55  ;;  %v2429_v35 = vld [vmem:[%s4006_s1 + $0x3a8] sm:$0xf0]  ;;  %v2694_v55 = vld [vmem:[%s4006_s1 + $0x414] sm:$0xf] }
  0x8e   :  { %1451 = vmatpush.bf16.msra.mxu0 %v2456_v12  ;;  %v2432_v38 = vor.u32 %v2680_v33, %v2429_v35 }
  0x90   :  { %1404 = vmatpush.bf16.msra.mxu2 %v2508_v58  ;;  %v2488_v58 = vor.u32 %v2694_v55, %v2485_v56  ;;  %v2656_v55 = vld [vmem:[%s4007_s0 + $0x58] sm:$0xf0] }
  0x91   :  { %1428 = vmatpush.bf16.msra.mxu3 %v2384_v52  ;;  %1476 = vmatpush.bf16.msra.mxu1 %v2512_v3 }
  0x92   :  { %1452 = vmatpush.bf16.msra.mxu0 %v2448_v9  ;;  %v2477_v9 = vld [vmem:[%s4006_s1 + $0x408] sm:$0xf0] }
  0x93   :  { %877 = vmatmul.bf16.gmra.mxu2 %v2048_v39 }
  0x94   :  { %901 = vmatmul.bf16.gmra.mxu3 %v3621_v40  ;;  %1405 = vmatpush.bf16.msra.mxu2 %v2500_v15  ;;  %v2480_v15 = vor.u32 %v2692_v7, %v2477_v9  ;;  %v2343_v9 = vld [vmem:[%s4007_s0 + $0x68] sm:$0xf] }
  0x95   :  { %1429 = vmatpush.bf16.msra.mxu3 %v2376_v0  ;;  %1477 = vmatpush.bf16.msra.mxu1 %v2504_v30  ;;  %v2676_v0 = vld [vmem:[%s4006_s1 + $0x384] sm:$0xf] }
  0x96   :  { %949 = vmatmul.bf16.gmra.mxu1 %v2048_v39  ;;  %1453 = vmatpush.bf16.msra.mxu0 %v2440_v19  ;;  %v2496_v39 = vor.u32 %v2696_v36, %v2493_v37  ;;  %v2416_v14 = vor.u32 %v2676_v0, %v2413_v6 }
  0x97   :  { %925 = vmatmul.bf16.gmra.mxu0 %v3626_v44 }
  0x99   :  { %1430 = vmatpush.bf16.msra.mxu3 %v2368_v18  ;;  %1478 = vmatpush.bf16.msra.mxu1 %v2496_v39 }
  0x9a   :  { %1454 = vmatpush.bf16.msra.mxu0 %v2432_v38  ;;  %v2319_v38 = vld [vmem:[%s4007_s0 + $0x20] sm:$0xf] }
  0x9d   :  { %1431 = vmatpush.bf16.msra.mxu3 %v2360_v34  ;;  %1479 = vmatpush.bf16.msra.mxu1 %v2488_v58 }
  0x9e   :  { %1455 = vmatpush.bf16.msra.mxu0 %v2424_v57 }
  0xa0   :  { %v436_v21 = vpop.f32.mrf.mxu0 }
  0xa1   :  { %v460_v24 = vpop.f32.mrf.mxu1  ;;  %1432 = vmatpush.bf16.msra.mxu3 %v2352_v53  ;;  %1480 = vmatpush.bf16.msra.mxu1 %v2480_v15 }
  0xa2   :  { %v3723_v29 = vadd.f32 %v460_v24, %v436_v21  ;;  %1456 = vmatpush.bf16.msra.mxu0 %v2416_v14 }
  0xa3   :  { %963 = vmatmul.bf16.vlgmr.msrb.gmra.mxu2 %v3450_v23  ;;  %v2697_v23 = vld [vmem:[%s4006_s1 + $0x424] sm:$0xf0] }
  0xa4   :  { %987 = vmatmul.bf16.vlgmr.msrb.gmra.mxu3 %v3452_v25  ;;  %v2492_v25 = vor.u32 %v2697_v23, %v2491_v28 }
  0xa6   :  { %1385 = vmatmul.bf16.vlgmr.msrb.gmra.mxu1 %v3710_v22  ;;  %1406 = vmatpush.bf16.msra.mxu2 %v2492_v25  ;;  %v446_v45 = vpop.f32.mrf.mxu2 }
  0xa7   :  { %1361 = vmatmul.bf16.vlgmr.msrb.gmra.mxu0 %v3708_v20 }
  0xa8   :  { %v438_v43 = vpop.f32.mrf.mxu0 }
  0xa9   :  { %v462_v47 = vpop.f32.mrf.mxu1  ;;  %v470_v48 = vpop.f32.mrf.mxu3 }
  0xaa   :  { %v3763_v52 = vadd.f32 %v462_v47, %v438_v43  ;;  %v3765_v12 = vadd.f32 %v470_v48, %v446_v45  ;;  %1407 = vmatpush.bf16.msra.mxu2 %v2484_v46 }
  0xae   :  { %1408 = vmatpush.bf16.msra.mxu2 %v2476_v63  ;;  %v448_v10 = vpop.f32.mrf.mxu2 }
  0xb0   :  { %v441_v3 = vpop.f32.mrf.mxu0 }
  0xb1   :  { %v465_v8 = vpop.f32.mrf.mxu1  ;;  %v472_v16 = vpop.f32.mrf.mxu3 }
  0xb2   :  { %v466_v17 = vadd.f32 %v465_v8, %v441_v3  ;;  %v3812_v18 = vadd.f32 %v472_v16, %v448_v10  ;;  %v2659_v3 = vld [vmem:[%s4007_s0 + $0x70] sm:$0xf0] }
  0xb3   :  { %968 = vmatmul.bf16.gmra.mxu2 %v3534_v59  ;;  %v2658_v59 = vld [vmem:[%s4007_s0 + $0x68] sm:$0xf0]  ;;  %v2344_v15 = vor.u32 %v2659_v3, %v2343_v9 }
  0xb4   :  { %992 = vmatmul.bf16.gmra.mxu3 %v3545_v2  ;;  %v2657_v2 = vld [vmem:[%s4007_s0 + $0x64] sm:$0xf]  ;;  %v3828_v28 = vor.u32 %v2658_v59, %v2335_v26 }
  0xb5   :  { %v3830_v23 = vor.u32 %v2657_v2, %v2337_v27 }
  0xb6   :  { %1390 = vmatmul.bf16.gmra.mxu1 %v3808_v11 }
  0xb7   :  { %1366 = vmatmul.bf16.gmra.mxu0 %v3797_v5 }
  0xb8   :  { %v443_v19 = vpop.f32.mrf.mxu0 }
  0xb9   :  { %v467_v21 = vpop.f32.mrf.mxu1 }
  0xba   :  { %v468_v24 = vadd.f32 %v467_v21, %v443_v19 }
  0xc3   :  { %v556_v25 = vpop.f32.mrf.mxu1  ;;  %973 = vmatmul.bf16.gmra.mxu2 %v3621_v40  ;;  %v2653_v40 = vld [vmem:[%s4007_s0 + $0x28] sm:$0xf0] }
  0xc4   :  { %v532_v30 = vpop.f32.mrf.mxu0  ;;  %997 = vmatmul.bf16.gmra.mxu3 %v3626_v44 }
  0xc6   :  { %v484_v31 = vpop.f32.mrf.mxu2  ;;  %1395 = vmatmul.bf16.gmra.mxu1 %v3830_v23 }
  0xc7   :  { %1371 = vmatmul.bf16.gmra.mxu0 %v3828_v28  ;;  %v508_v32 = vpop.f32.mrf.mxu3  ;;  %v3837_v33 = vadd.f32 %v484_v31, %v3723_v29  ;;  %v2320_v29 = vor.u32 %v2653_v40, %v2319_v38 }
  0xc8   :  { %v533_v34 = vadd.f32 %v532_v30, %v508_v32 }
  0xca   :  { %v557_v35 = vadd.f32 %v556_v25, %v533_v34 }
  0xcb   :  { %v558_v37 = vpop.f32.mrf.mxu1 }
  0xcc   :  { %v534_v36 = vpop.f32.mrf.mxu0 }
  0xce   :  { %v486_v44 = vpop.f32.mrf.mxu2 }
  0xcf   :  { %v510_v39 = vpop.f32.mrf.mxu3  ;;  %v3846_v41 = vadd.f32 %v486_v44, %v3763_v52  ;;  %v2331_v52 = vld [vmem:[%s4007_s0 + $0x38] sm:$0xf] }
  0xd0   :  { %v535_v42 = vadd.f32 %v534_v36, %v510_v39  ;;  %v2332_v58 = vor.u32 %v2656_v55, %v2331_v52 }
  0xd2   :  { %v559_v43 = vadd.f32 %v558_v37, %v535_v42 }
  0xd3   :  { %v561_v46 = vpop.f32.mrf.mxu1  ;;  %1409 = vmatmul.bf16.vlgmr.msra.gmra.mxu2 %v2320_v29 }
  0xd4   :  { %v537_v45 = vpop.f32.mrf.mxu0  ;;  %1433 = vmatmul.bf16.vlgmr.msra.gmra.mxu3 %v3708_v20 }
  0xd6   :  { %v489_v47 = vpop.f32.mrf.mxu2  ;;  %1481 = vmatmul.bf16.vlgmr.msra.gmra.mxu1 %v2320_v29 }
  0xd7   :  { %1457 = vmatmul.bf16.vlgmr.msra.gmra.mxu0 %v3710_v22  ;;  %v513_v48 = vpop.f32.mrf.mxu3  ;;  %v490_v49 = vadd.f32 %v489_v47, %v466_v17 }
  0xd8   :  { %v538_v50 = vadd.f32 %v537_v45, %v513_v48 }
  0xda   :  { %v562_v51 = vadd.f32 %v561_v46, %v538_v50 }
  0xdb   :  { %v563_v54 = vpop.f32.mrf.mxu1 }
  0xdc   :  { %v539_v53 = vpop.f32.mrf.mxu0 }
  0xde   :  { %v491_v56 = vpop.f32.mrf.mxu2 }
  0xdf   :  { %v515_v20 = vpop.f32.mrf.mxu3  ;;  %v492_v57 = vadd.f32 %v491_v56, %v468_v24 }
  0xe0   :  { %v540_v22 = vadd.f32 %v539_v53, %v515_v20 }
  0xe2   :  { %v564_v60 = vadd.f32 %v563_v54, %v540_v22 }
  0xe3   :  { %v566_v61 = vpop.f32.mrf.mxu1  ;;  %1414 = vmatmul.bf16.gmra.mxu2 %v2332_v58 }
  0xe4   :  { %v542_v13 = vpop.f32.mrf.mxu0  ;;  %1438 = vmatmul.bf16.gmra.mxu3 %v3797_v5 }
  0xe6   :  { %v494_v62 = vpop.f32.mrf.mxu2  ;;  %1486 = vmatmul.bf16.gmra.mxu1 %v2332_v58 }
  0xe7   :  { %1462 = vmatmul.bf16.gmra.mxu0 %v3808_v11  ;;  %v518_v63 = vpop.f32.mrf.mxu3  ;;  %v495_v1 = vadd.f32 %v494_v62, %v3765_v12 }
  0xe8   :  { %v543_v4 = vadd.f32 %v542_v13, %v518_v63 }
  0xea   :  { %v567_v0 = vadd.f32 %v566_v61, %v543_v4 }
  0xeb   :  { %v568_v7 = vpop.f32.mrf.mxu1 }
  0xec   :  { %v544_v6 = vpop.f32.mrf.mxu0 }
  0xee   :  { %v496_v5 = vpop.f32.mrf.mxu2 }
  0xef   :  { %v520_v10 = vpop.f32.mrf.mxu3  ;;  %v497_v11 = vadd.f32 %v496_v5, %v3812_v18 }
  0xf0   :  { %v545_v14 = vadd.f32 %v544_v6, %v520_v10 }
  0xf2   :  { %v569_v8 = vadd.f32 %v568_v7, %v545_v14 }
  0xf3   :  { %v940_v16 = vpop.f32.mrf.mxu1  ;;  %1419 = vmatmul.bf16.gmra.mxu2 %v2344_v15 }
  0xf4   :  { %v916_v12 = vpop.f32.mrf.mxu0  ;;  %1443 = vmatmul.bf16.gmra.mxu3 %v3828_v28  ;;  %v3867_v17 = vadd.f32 %v940_v16, %v557_v35 }
  0xf6   :  { %v868_v19 = vpop.f32.mrf.mxu2  ;;  %1491 = vmatmul.bf16.gmra.mxu1 %v2344_v15 }
  0xf7   :  { %1467 = vmatmul.bf16.gmra.mxu0 %v3830_v23  ;;  %v892_v21 = vpop.f32.mrf.mxu3  ;;  %v869_v24 = vadd.f32 %v868_v19, %v3837_v33 }
  0xf9   :  { %v893_v26 = vadd.f32 %v892_v21, %v869_v24 }
  0xfb   :  { %v3871_v18 = vadd.f32 %v916_v12, %v893_v26  ;;  %v942_v2 = vpop.f32.mrf.mxu1 }
  0xfc   :  { %v918_v59 = vpop.f32.mrf.mxu0  ;;  %v3873_v27 = vadd.f32 %v942_v2, %v559_v43 }
  0xfe   :  { %v870_v30 = vpop.f32.mrf.mxu2 }
  0xff   :  { %v894_v25 = vpop.f32.mrf.mxu3  ;;  %v871_v28 = vadd.f32 %v870_v30, %v3846_v41 }
 0x101   :  { %v895_v31 = vadd.f32 %v894_v25, %v871_v28 }
 0x103   :  { %v3876_v34 = vadd.f32 %v918_v59, %v895_v31  ;;  %v945_v23 = vpop.f32.mrf.mxu1  ;;  %v1527_v31 = vlaneseq }
 0x104   :  { %v921_v32 = vpop.f32.mrf.mxu0  ;;  %v3878_v35 = vadd.f32 %v945_v23, %v562_v51 }
 0x105   :  { %vm1666_vm7 = vcmp.lt.s32.totalorder %v1527_v31, 256 }
 0x106   :  { %v873_v36 = vpop.f32.mrf.mxu2 }
 0x107   :  { %v897_v33 = vpop.f32.mrf.mxu3  ;;  %v874_v37 = vadd.f32 %v873_v36, %v490_v49  ;;  %v1509_v36 = vld [vmem:[%s4008_s2] sm:$0x3] }
 0x109   :  { %v898_v38 = vadd.f32 %v897_v33, %v874_v37 }
 0x10b   :  { %v3880_v44 = vadd.f32 %v921_v32, %v898_v38  ;;  %v947_v39 = vpop.f32.mrf.mxu1 }
 0x10c   :  { %v923_v40 = vpop.f32.mrf.mxu0  ;;  %v3882_v42 = vadd.f32 %v947_v39, %v564_v60  ;;  %v3925_v39 = vshrl.u32 %v1527_v31, 7 }
 0x10e   :  { %v875_v29 = vpop.f32.mrf.mxu2 }
 0x10f   :  { %v899_v43 = vpop.f32.mrf.mxu3  ;;  %v876_v41 = vadd.f32 %v875_v29, %v492_v57 }
 0x111   :  { %v900_v45 = vadd.f32 %v899_v43, %v876_v41  ;;  %v3928_v43 = vperm.slane %v1509_v36, 0 }
 0x113   :  { %v3884_v47 = vadd.f32 %v923_v40, %v900_v45  ;;  %v950_v48 = vpop.f32.mrf.mxu1 }
 0x114   :  { %v926_v46 = vpop.f32.mrf.mxu0  ;;  %v3886_v50 = vadd.f32 %v950_v48, %v567_v0 }
 0x116   :  { %v878_v51 = vpop.f32.mrf.mxu2 }
 0x117   :  { %v902_v53 = vpop.f32.mrf.mxu3  ;;  %v879_v49 = vadd.f32 %v878_v51, %v495_v1 }
 0x119   :  { %v903_v54 = vadd.f32 %v902_v53, %v879_v49  ;;  %v1538_v53 = vand.u32 7, %v3925_v39 }
 0x11b   :  { %v3888_v55 = vadd.f32 %v926_v46, %v903_v54  ;;  %v952_v56 = vpop.f32.mrf.mxu1  ;;  %v1529_v46 = vadd.s32 8, %v3925_v39  ;;  %vm1606_vm0 = vcmp.lt.s32.totalorder %v1538_v53, 3 }
 0x11c   :  { %v928_v52 = vpop.f32.mrf.mxu0  ;;  %v3890_v20 = vadd.f32 %v952_v56, %v569_v8 }
 0x11e   :  { %v880_v22 = vpop.f32.mrf.mxu2 }
 0x11f   :  { %v904_v58 = vpop.f32.mrf.mxu3  ;;  %v881_v57 = vadd.f32 %v880_v22, %v497_v11  ;;  %v1545_v22 = vand.u32 7, %v1529_v46 }
 0x121   :  { %v905_v60 = vadd.f32 %v904_v58, %v881_v57  ;;  %vm3941_vm1 = vcmp.lt.s32.totalorder %v1545_v22, 3 }
 0x123   :  { %v3892_v61 = vadd.f32 %v928_v52, %v905_v60  ;;  %v1386_v62 = vpop.f32.mrf.mxu1 }
 0x124   :  { %v1362_v13 = vpop.f32.mrf.mxu0 }
 0x125   :  { %v1387_v32 = vadd.f32 %v1386_v62, %v1362_v13 }
 0x126   :  { %v964_v63 = vpop.f32.mrf.mxu2 }
 0x127   :  { %v988_v4 = vpop.f32.mrf.mxu3  ;;  %v965_v28 = vadd.f32 %v964_v63, %v3867_v17  ;;  %v3930_v17 = vperm.slane %v1509_v36, 1 }
 0x129   :  { %v989_v40 = vadd.f32 %v988_v4, %v965_v28 }
 0x12b   :  { %v1388_v6 = vpop.f32.mrf.mxu1 }
 0x12c   :  { %v1364_v0 = vpop.f32.mrf.mxu0 }
 0x12d   :  { %v1389_v49 = vadd.f32 %v1388_v6, %v1364_v0  ;;  %v1530_v6 = vadd.s32 16, %v3925_v39 }
 0x12e   :  { %v966_v1 = vpop.f32.mrf.mxu2 }
 0x12f   :  { %v990_v7 = vpop.f32.mrf.mxu3  ;;  %v967_v54 = vadd.f32 %v966_v1, %v3873_v27 }
 0x131   :  { %v991_v62 = vadd.f32 %v990_v7, %v967_v54 }
 0x133   :  { %v1391_v3 = vpop.f32.mrf.mxu1 }
 0x134   :  { %v1367_v9 = vpop.f32.mrf.mxu0 }
 0x135   :  { %v1392_v7 = vadd.f32 %v1391_v3, %v1367_v9 }
 0x136   :  { %v969_v5 = vpop.f32.mrf.mxu2 }
 0x137   :  { %v3894_v10 = vpop.f32.mrf.mxu3 }
 0x13b   :  { %v3898_v15 = vpop.f32.mrf.mxu1 }
 0x13c   :  { %v3896_v14 = vpop.f32.mrf.mxu0 }
 0x13e   :  { %v3900_v11 = vpop.f32.mrf.mxu2 }
 0x13f   :  { %v3902_v8 = vpop.f32.mrf.mxu3 }
 0x143   :  { %v3906_v16 = vpop.f32.mrf.mxu1 }
 0x144   :  { %v3904_v12 = vpop.f32.mrf.mxu0 }
 0x146   :  { %v3908_v19 = vpop.f32.mrf.mxu2 }
 0x147   :  { %v3910_v21 = vpop.f32.mrf.mxu3 }
 0x14b   :  { %v3914_v26 = vpop.f32.mrf.mxu1 }
 0x14c   :  { %v3912_v24 = vpop.f32.mrf.mxu0 }
 0x14e   :  { %v3916_v59 = vpop.f32.mrf.mxu2 }
 0x14f   :  { %v3918_v2 = vpop.f32.mrf.mxu3 }
 0x153   :  { %v1482_v25 = vpop.f32.mrf.mxu1 }
 0x154   :  { %v1458_v30 = vpop.f32.mrf.mxu0 }
 0x156   :  { %v1410_v23 = vpop.f32.mrf.mxu2 }
 0x157   :  { %v1434_v33 = vpop.f32.mrf.mxu3  ;;  %v1411_v37 = vadd.f32 %v1410_v23, %v1387_v32  ;;  %v970_v32 = vadd.f32 %v969_v5, %v3878_v35 }
 0x158   :  { %v1459_v38 = vadd.f32 %v1458_v30, %v1434_v33 }
 0x159   :  { %v1497_v29 = vadd.f32 %v1411_v37, %v3871_v18  ;;  %v994_v53 = vadd.f32 %v3894_v10, %v970_v32  ;;  %v972_v10 = vadd.f32 %v3900_v11, %v3882_v42 }
 0x15a   :  { %v1483_v41 = vadd.f32 %v1482_v25, %v1459_v38 }
 0x15b   :  { %v1484_v51 = vpop.f32.mrf.mxu1  ;;  %v1515_v52 = vadd.f32 %v3928_v43, %v1497_v29  ;;  %v1552_v29 = vand.u32 7, %v1530_v6 }
 0x15c   :  { %v1460_v45 = vpop.f32.mrf.mxu0  ;;  %v1498_v48 = vadd.f32 %v1483_v41, %v989_v40 }
 0x15d   :  { %v1624_v1 = vsel %vm1606_vm0, %v1515_v52, 0.0  ;;  %vm1608_vm2 = vcmp.lt.s32.totalorder %v1552_v29, 3 }
 0x15e   :  { %v1516_v56 = vadd.f32 %v3930_v17, %v1498_v48  ;;  %v1412_v18 = vpop.f32.mrf.mxu2  ;;  %v1669_v33 = vmul.f32 %v1624_v1, %v1624_v1 }
 0x15f   :  { %v1436_v58 = vpop.f32.mrf.mxu3  ;;  %v1413_v60 = vadd.f32 %v1412_v18, %v1389_v49  ;;  %v1531_v18 = vadd.s32 24, %v3925_v39 }
 0x160   :  { %v1709_v57 = vpack.c.bf16 %v1516_v56, %v1515_v52  ;;  %v1461_v13 = vadd.f32 %v1460_v45, %v1436_v58  ;;  %v1625_v23 = vsel %vm1606_vm0, %v1516_v56, 0.0 }
 0x161   :  { %v1499_v63 = vadd.f32 %v1413_v60, %v3876_v34  ;;  %v1670_v3 = vmul.f32 %v1625_v23, %v1625_v23  ;;  %v1394_v60 = vadd.f32 %v3898_v15, %v3896_v14  ;;  %v1559_v27 = vand.u32 7, %v1531_v18 }
 0x162   :  { %1715 = vst [vmem:[%s4009_s3] sm:$0xff] %v1709_v57  ;;  %v1485_v4 = vadd.f32 %v1484_v51, %v1461_v13  ;;  %v996_v14 = vadd.f32 %v3902_v8, %v972_v10  ;;  %v975_v8 = vadd.f32 %v3908_v19, %v3886_v50  ;;  %v1399_v18 = vadd.f32 %v3914_v26, %v3912_v24 }
 0x163   :  { %v1517_v30 = vadd.f32 %v3928_v43, %v1499_v63  ;;  %v1487_v28 = vpop.f32.mrf.mxu1  ;;  %vm1609_vm3 = vcmp.lt.s32.totalorder %v1559_v27, 3 }
 0x164   :  { %v1463_v0 = vpop.f32.mrf.mxu0  ;;  %v1500_v25 = vadd.f32 %v1485_v4, %v991_v62 }
 0x165   :  { %v1626_v34 = vsel %vm3941_vm1, %v1517_v30, 0.0 }
 0x166   :  { %v1518_v36 = vadd.f32 %v3930_v17, %v1500_v25  ;;  %v1636_v37 = vadd.f32 %v1626_v34, %v1624_v1  ;;  %v1671_v38 = vmul.f32 %v1626_v34, %v1626_v34  ;;  %v1415_v40 = vpop.f32.mrf.mxu2 }
 0x167   :  { %v1439_v41 = vpop.f32.mrf.mxu3  ;;  %v1416_v48 = vadd.f32 %v1415_v40, %v1392_v7 }
 0x168   :  { %v1627_v45 = vsel %vm3941_vm1, %v1518_v36, 0.0  ;;  %v1710_v46 = vpack.c.bf16 %v1518_v36, %v1517_v30  ;;  %v1464_v9 = vadd.f32 %v1463_v0, %v1439_v41  ;;  %v1681_v35 = vadd.f32 %v1671_v38, %v1669_v33 }
 0x169   :  { %v1647_v5 = vadd.f32 %v1627_v45, %v1625_v23  ;;  %v1672_v51 = vmul.f32 %v1627_v45, %v1627_v45  ;;  %v1501_v49 = vadd.f32 %v1416_v48, %v3880_v44  ;;  %v1532_v23 = vadd.s32 32, %v3925_v39 }
 0x16a   :  { %1716 = vst [vmem:[%s4009_s3 + $0x8] sm:$0xff] %v1710_v46  ;;  %v1488_v54 = vadd.f32 %v1487_v28, %v1464_v9 }
 0x16b   :  { %v1692_v52 = vadd.f32 %v1672_v51, %v1670_v3  ;;  %v1519_v22 = vadd.f32 %v3928_v43, %v1501_v49  ;;  %v1489_v57 = vpop.f32.mrf.mxu1  ;;  %v1566_v46 = vand.u32 7, %v1532_v23 }
 0x16c   :  { %v1465_v56 = vpop.f32.mrf.mxu0  ;;  %v1502_v58 = vadd.f32 %v1488_v54, %v994_v53  ;;  %v1533_v54 = vadd.s32 40, %v3925_v39 }
 0x16d   :  { %v1628_v13 = vsel %vm1608_vm2, %v1519_v22, 0.0  ;;  %vm1610_vm4 = vcmp.lt.s32.totalorder %v1566_v46, 3 }
 0x16e   :  { %v1520_v62 = vadd.f32 %v3930_v17, %v1502_v58  ;;  %v1637_v44 = vadd.f32 %v1636_v37, %v1628_v13  ;;  %v1673_v63 = vmul.f32 %v1628_v13, %v1628_v13  ;;  %v1417_v4 = vpop.f32.mrf.mxu2  ;;  %v1397_v37 = vadd.f32 %v3906_v16, %v3904_v12 }
 0x16f   :  { %v1441_v0 = vpop.f32.mrf.mxu3  ;;  %v1418_v30 = vadd.f32 %v1417_v4, %v1394_v60  ;;  %v999_v12 = vadd.f32 %v3910_v21, %v975_v8  ;;  %v977_v21 = vadd.f32 %v3916_v59, %v3890_v20  ;;  %v1573_v13 = vand.u32 7, %v1533_v54 }
 0x170   :  { %v1629_v6 = vsel %vm1608_vm2, %v1520_v62, 0.0  ;;  %v1711_v1 = vpack.c.bf16 %v1520_v62, %v1519_v22  ;;  %v1466_v25 = vadd.f32 %v1465_v56, %v1441_v0  ;;  %v1682_v28 = vadd.f32 %v1681_v35, %v1673_v63 }
 0x171   :  { %v1648_v7 = vadd.f32 %v1647_v5, %v1629_v6  ;;  %v1674_v32 = vmul.f32 %v1629_v6, %v1629_v6  ;;  %v1503_v42 = vadd.f32 %v1418_v30, %v3884_v47  ;;  %v1001_v26 = vadd.f32 %v3918_v2, %v977_v21 }
 0x172   :  { %1717 = vst [vmem:[%s4009_s3 + $0x10] sm:$0xff] %v1711_v1  ;;  %v1490_v15 = vadd.f32 %v1489_v57, %v1466_v25  ;;  %vm1611_vm5 = vcmp.lt.s32.totalorder %v1573_v13, 3 }
 0x173   :  { %v1693_v11 = vadd.f32 %v1692_v52, %v1674_v32  ;;  %v1521_v34 = vadd.f32 %v3928_v43, %v1503_v42  ;;  %v1492_v29 = vpop.f32.mrf.mxu1 }
 0x174   :  { %v1504_v36 = vadd.f32 %v1490_v15, %v996_v14  ;;  %v1468_v33 = vpop.f32.mrf.mxu0 }
 0x175   :  { %v1630_v38 = vsel %vm1609_vm3, %v1521_v34, 0.0 }
 0x176   :  { %v1522_v40 = vadd.f32 %v3930_v17, %v1504_v36  ;;  %v1638_v47 = vadd.f32 %v1637_v44, %v1630_v38  ;;  %v1675_v41 = vmul.f32 %v1630_v38, %v1630_v38  ;;  %v1420_v45 = vpop.f32.mrf.mxu2 }
 0x177   :  { %v1444_v48 = vpop.f32.mrf.mxu3  ;;  %v1421_v35 = vadd.f32 %v1420_v45, %v1397_v37 }
 0x178   :  { %v1631_v9 = vsel %vm1609_vm3, %v1522_v40, 0.0  ;;  %v1712_v3 = vpack.c.bf16 %v1522_v40, %v1521_v34  ;;  %v1469_v5 = vadd.f32 %v1468_v33, %v1444_v48  ;;  %v1683_v51 = vadd.f32 %v1682_v28, %v1675_v41 }
 0x179   :  { %v1649_v53 = vadd.f32 %v1648_v7, %v1631_v9  ;;  %v1676_v49 = vmul.f32 %v1631_v9, %v1631_v9  ;;  %v1505_v50 = vadd.f32 %v1421_v35, %v3888_v55 }
 0x17a   :  { %1718 = vst [vmem:[%s4009_s3 + $0x18] sm:$0xff] %v1712_v3  ;;  %v1493_v16 = vadd.f32 %v1492_v29, %v1469_v5 }
 0x17b   :  { %v1694_v19 = vadd.f32 %v1693_v11, %v1676_v49  ;;  %v1523_v52 = vadd.f32 %v3928_v43, %v1505_v50  ;;  %v1494_v24 = vpop.f32.mrf.mxu1 }
 0x17c   :  { %v1506_v56 = vadd.f32 %v1493_v16, %v999_v12  ;;  %v1470_v57 = vpop.f32.mrf.mxu0 }
 0x17d   :  { %v1632_v22 = vsel %vm1610_vm4, %v1523_v52, 0.0 }
 0x17e   :  { %v1524_v58 = vadd.f32 %v3930_v17, %v1506_v56  ;;  %v1639_v60 = vadd.f32 %v1638_v47, %v1632_v22  ;;  %v1677_v55 = vmul.f32 %v1632_v22, %v1632_v22  ;;  %v1422_v10 = vpop.f32.mrf.mxu2 }
 0x17f   :  { %v1446_v62 = vpop.f32.mrf.mxu3  ;;  %v1423_v63 = vadd.f32 %v1422_v10, %v1399_v18 }
 0x180   :  { %v1633_v44 = vsel %vm1610_vm4, %v1524_v58, 0.0  ;;  %v1713_v39 = vpack.c.bf16 %v1524_v58, %v1523_v52  ;;  %v1471_v4 = vadd.f32 %v1470_v57, %v1446_v62  ;;  %v1684_v27 = vadd.f32 %v1683_v51, %v1677_v55 }
 0x181   :  { %v1650_v0 = vadd.f32 %v1649_v53, %v1633_v44  ;;  %v1678_v6 = vmul.f32 %v1633_v44, %v1633_v44  ;;  %v1507_v20 = vadd.f32 %v1423_v63, %v3892_v61 }
 0x182   :  { %1719 = vst [vmem:[%s4009_s3 + $0x20] sm:$0xff] %v1713_v39  ;;  %v1495_v59 = vadd.f32 %v1494_v24, %v1471_v4 }
 0x183   :  { %v1695_v1 = vadd.f32 %v1694_v19, %v1678_v6  ;;  %v1525_v30 = vadd.f32 %v3928_v43, %v1507_v20 }
 0x184   :  { %v1508_v25 = vadd.f32 %v1495_v59, %v1001_v26 }
 0x185   :  { %v1634_v28 = vsel %vm1611_vm5, %v1525_v30, 0.0 }
 0x186   :  { %v1526_v7 = vadd.f32 %v3930_v17, %v1508_v25  ;;  %v1640_v32 = vadd.f32 %v1639_v60, %v1634_v28  ;;  %v1679_v14 = vmul.f32 %v1634_v28, %v1634_v28 }
 0x188   :  { %v1635_v42 = vsel %vm1611_vm5, %v1526_v7, 0.0  ;;  %v1714_v15 = vpack.c.bf16 %v1526_v7, %v1525_v30  ;;  %v1641_v2 = vrot.slane %v1640_v32, 4  ;;  %v1685_v11 = vadd.f32 %v1684_v27, %v1679_v14 }
 0x189   :  { %v1651_v23 = vadd.f32 %v1650_v0, %v1635_v42  ;;  %v1680_v34 = vmul.f32 %v1635_v42, %v1635_v42 }
 0x18a   :  { %1720 = vst [vmem:[%s4009_s3 + $0x28] sm:$0xff] %v1714_v15  ;;  %v1642_v61 = vadd.f32 %v1641_v2, %v1640_v32  ;;  %v1686_v36 = vrot.slane %v1685_v11, 4 }
 0x18b   :  { %v1652_v33 = vrot.slane %v1651_v23, 4  ;;  %v1696_v43 = vadd.f32 %v1695_v1, %v1680_v34 }
 0x18c   :  { %v1643_v37 = vrot.slane %v1642_v61, 2  ;;  %v1687_v8 = vadd.f32 %v1686_v36, %v1685_v11 }
 0x18d   :  { %v1653_v38 = vadd.f32 %v1652_v33, %v1651_v23  ;;  %v1697_v17 = vrot.slane %v1696_v43, 4 }
 0x18e   :  { %v1644_v40 = vadd.f32 %v1643_v37, %v1642_v61  ;;  %v1688_v29 = vrot.slane %v1687_v8, 2 }
 0x18f   :  { %v1654_v47 = vrot.slane %v1653_v38, 2  ;;  %v1698_v41 = vadd.f32 %v1697_v17, %v1696_v43 }
 0x190   :  { %v1689_v45 = vadd.f32 %v1688_v29, %v1687_v8  ;;  %v1645_v9 = vrot.slane %v1644_v40, 1 }
 0x191   :  { %v1655_v46 = vadd.f32 %v1654_v47, %v1653_v38  ;;  %v1699_v48 = vrot.slane %v1698_v41, 2 }
 0x192   :  { %v1690_v5 = vrot.slane %v1689_v45, 1  ;;  %v1646_v49 = vadd.f32 %v1645_v9, %v1644_v40 }
 0x193   :  { %v1656_v3 = vrot.slane %v1655_v46, 1  ;;  %v1700_v35 = vadd.f32 %v1699_v48, %v1698_v41 }
 0x194   :  { %v1691_v16 = vadd.f32 %v1690_v5, %v1689_v45 }
 0x195   :  { %v1657_v51 = vadd.f32 %v1656_v3, %v1655_v46  ;;  %v1701_v53 = vrot.slane %v1700_v35, 1 }
 0x197   :  { %v1660_v12 = vrot.slane %v1657_v51, 7  ;;  %v1702_v50 = vadd.f32 %v1701_v53, %v1700_v35 }
 0x199   :  { %v1662_v19 = vsel %vm1661_vm6, %v1646_v49, %v1660_v12  ;;  %v1705_v54 = vrot.slane %v1702_v50, 7 }
 0x19a   :  { %1668 = vst.msk [vmem:[%s4010_s4] sm:$0x3] %vm1666_vm7, %v1662_v19 }
 0x19b   :  { %v1706_v52 = vsel %vm1661_vm6, %v1691_v16, %v1705_v54 }
 0x19c   :  { %1708 = vst.msk [vmem:[%s4011_s5] sm:$0x3] %vm1666_vm7, %v1706_v52 }

</bundles_post_ra>
